<compile_context>
chip_gen: v5e
topology: v5e:2x2
jax: 0.10.0
libtpu: 0.0.40
codegen_flags: <defaults>
</compile_context>

<pallas_src>
import functools

import jax
import jax.numpy as jnp
from jax.experimental import pallas as pl
from jax.experimental.pallas import tpu as pltpu


F1, F2, F3, HIDDEN = 40, 80, 80, 200
_TN = 128          # lane-dense output tile; gives fc1 a 2-wide parallel j axis
_MAX_TK = 8192     # keep B double-buffer well under v5e's 16 MiB scoped VMEM


def _round_up(x, m):
    return ((x + m - 1) // m) * m


def _pick_m_tiles(M):
    """Mp = round_up(M, 16); tm = largest multiple of 16 (<=512) dividing Mp."""
    Mp = _round_up(M, 16)
    tm, t = 16, 16
    while t <= min(Mp, 512):
        if Mp % t == 0:
            tm = t
        t += 16
    return tm, Mp


def _pick_k_tiles(K):
    """Kp multiple of 128; tk | Kp, tk <= _MAX_TK, minimizing k-steps."""
    Kp = _round_up(K, 128)
    if Kp <= _MAX_TK:
        return Kp, Kp                       # single k-step
    nblk = Kp // 128
    max_blk = _MAX_TK // 128
    for steps in range(2, nblk + 1):
        if nblk % steps == 0 and nblk // steps <= max_blk:
            return (nblk // steps) * 128, Kp
    # Fallback (never hit for ModelD shapes): fixed tk, round Kp up.
    return 2048, _round_up(Kp, 2048)


# ---------------------------------------------------------------------------
# Pallas matmul kernel:  O = relu?(A @ B + bias).  A/B bf16, f32 accumulation.
# The output block's index_map ignores k, so the block stays resident in VMEM
# across the k axis and doubles as the accumulator.  Exactly one store per step.
# ---------------------------------------------------------------------------
def _matmul_kernel(a_ref, b_ref, bias_ref, o_ref, *, apply_relu, nk):
    part = jnp.dot(a_ref[...], b_ref[...], preferred_element_type=jnp.float32)

    if nk == 1:                                   # static: single k-step
        out = part + bias_ref[...]
        if apply_relu:
            out = jnp.maximum(out, 0.0)
        o_ref[...] = out.astype(o_ref.dtype)
    else:
        k = pl.program_id(2)

        @pl.when(k == 0)
        def _():                                   # bias folded into first write
            o_ref[...] = part + bias_ref[...]

        @pl.when(jnp.logical_and(k > 0, k < nk - 1))
        def _():
            o_ref[...] = o_ref[...] + part

        @pl.when(k == nk - 1)
        def _():
            out = o_ref[...] + part
            if apply_relu:
                out = jnp.maximum(out, 0.0)
            o_ref[...] = out.astype(o_ref.dtype)


def pallas_linear(a, prep, n_out, *, relu=False, out_dtype=jnp.float32):
    """a: [M, K];  prep = {'w': [Kp, Np] bf16, 'b': [1, Np] f32}."""
    M, K = a.shape
    tm, Mp = _pick_m_tiles(M)
    tk, Kp = _pick_k_tiles(K)
    Np = _round_up(n_out, _TN)
    w_p, bias_p = prep["w"], prep["b"]
    assert w_p.shape == (Kp, Np), (w_p.shape, Kp, Np)

    nk = Kp // tk
    if nk > 1:
        out_dtype = jnp.float32                   # o_ref is the f32 accumulator

    # Only the (small) activation matrix is touched per call: bf16 cast + one pad op.
    a = a.astype(jnp.bfloat16)
    if (Mp, Kp) != (M, K):
        a = jnp.pad(a, ((0, Mp - M), (0, Kp - K)))

    grid = (Mp // tm, Np // _TN, nk)
    out = pl.pallas_call(
        functools.partial(_matmul_kernel, apply_relu=relu, nk=nk),
        out_shape=jax.ShapeDtypeStruct((Mp, Np), out_dtype),
        grid_spec=pltpu.PrefetchScalarGridSpec(
            num_scalar_prefetch=0,
            grid=grid,
            in_specs=[
                pl.BlockSpec((tm, tk), lambda i, j, k: (i, k)),
                pl.BlockSpec((tk, _TN), lambda i, j, k: (k, j)),
                pl.BlockSpec((1, _TN), lambda i, j, k: (0, j)),
            ],
            out_specs=pl.BlockSpec((tm, _TN), lambda i, j, k: (i, j)),
        ),
        compiler_params=pltpu.CompilerParams(
            dimension_semantics=("parallel", "parallel", "arbitrary")),
    )(a, w_p, bias_p)
    return out[:M, :n_out]


# ---------------------------------------------------------------------------
# Glue (plain JAX): patch extraction, maxpool, flatten — memory shuffles only.
# TODO(synk): im2col / 2x2 maxpool kept in plain XLA; a Pallas launch per shuffle
# would cost more than the copy itself at this model size.
# ---------------------------------------------------------------------------
def _extract_patches(x_nhwc, kh, kw):
    """x: [N,H,W,C] -> ([N*OH*OW, C*kh*kw], (N,OH,OW)); feature order (c, fh, fw)."""
    N, H, W, C = x_nhwc.shape
    OH, OW = H - kh + 1, W - kw + 1
    patches = jax.lax.conv_general_dilated_patches(
        x_nhwc, filter_shape=(kh, kw), window_strides=(1, 1), padding="VALID",
        dimension_numbers=("NHWC", "HWIO", "NHWC"))
    return patches.reshape(N * OH * OW, C * kh * kw), (N, OH, OW)


def _maxpool2(x_nhwc):
    N, H, W, C = x_nhwc.shape
    return x_nhwc.reshape(N, H // 2, 2, W // 2, 2, C).max(axis=(2, 4))


def _conv_weight_to_mat(w_oihw):
    """PyTorch [Cout,Cin,kh,kw] -> matmul weight [Cin*kh*kw, Cout], matching the
    channel-major (c, fh, fw) feature order of conv_general_dilated_patches."""
    cout, cin, kh, kw = w_oihw.shape
    return jnp.transpose(w_oihw, (1, 2, 3, 0)).reshape(cin * kh * kw, cout)


def _fc1_weight_nhwc(fc1_w):
    """Permute fc1's K columns from PyTorch NCHW .view() order to NHWC flatten order
    (one-time), so the runtime flatten is a plain contiguous reshape, no transposes."""
    seg1 = fc1_w[:, : 6 * 6 * F3].reshape(HIDDEN, F3, 6, 6)
    seg1 = jnp.transpose(seg1, (0, 2, 3, 1)).reshape(HIDDEN, 6 * 6 * F3)
    seg2 = fc1_w[:, 6 * 6 * F3:].reshape(HIDDEN, F2, 16, 16)
    seg2 = jnp.transpose(seg2, (0, 2, 3, 1)).reshape(HIDDEN, 16 * 16 * F2)
    return jnp.concatenate([seg1, seg2], axis=1).T      # [K, HIDDEN]


# ---------------------------------------------------------------------------
# Params
# ---------------------------------------------------------------------------
def init_params(key):
    def uniform(k, shape, fan_in):
        bound = 1.0 / jnp.sqrt(fan_in)
        return jax.random.uniform(k, shape, jnp.float32, -bound, bound)

    ks = jax.random.split(key, 10)
    fc1_in = 6 * 6 * F3 + 16 * 16 * F2
    return {
        "w1": uniform(ks[0], (F1, 3, 9, 9), 3 * 9 * 9),
        "b1": uniform(ks[1], (F1,), 3 * 9 * 9),
        "w2": uniform(ks[2], (F2, F1, 5, 5), F1 * 5 * 5),
        "b2": uniform(ks[3], (F2,), F1 * 5 * 5),
        "w3": uniform(ks[4], (F3, F2, 3, 3), F2 * 3 * 3),
        "b3": uniform(ks[5], (F3,), F2 * 3 * 3),
        "fc1_w": uniform(ks[6], (HIDDEN, fc1_in), fc1_in),
        "fc1_b": uniform(ks[7], (HIDDEN,), fc1_in),
        "fc2_w": uniform(ks[8], (24, HIDDEN), HIDDEN),
        "fc2_b": uniform(ks[9], (24,), HIDDEN),
    }


def _prep_matmul(w_mat, bias):
    """One-time: pad to the kernel's (Kp, Np) tiles and cast the weight to bf16."""
    K, N = w_mat.shape
    _, Kp = _pick_k_tiles(K)
    Np = _round_up(N, _TN)
    w_p = jnp.zeros((Kp, Np), jnp.bfloat16).at[:K, :N].set(w_mat.astype(jnp.bfloat16))
    b_p = jnp.zeros((1, Np), jnp.float32).at[0, :N].set(bias.astype(jnp.float32))
    return {"w": w_p, "b": b_p}


def prepare_params(params):
    """Run ONCE: all weight reshapes / permutations / padding / bf16 casts."""
    return {
        "conv1": _prep_matmul(_conv_weight_to_mat(params["w1"]), params["b1"]),
        "conv2": _prep_matmul(_conv_weight_to_mat(params["w2"]), params["b2"]),
        "conv3": _prep_matmul(_conv_weight_to_mat(params["w3"]), params["b3"]),
        "fc1":   _prep_matmul(_fc1_weight_nhwc(params["fc1_w"]), params["fc1_b"]),
        # fc2 is tiny -> plain XLA dot; just pre-transpose once.
        "fc2_w": params["fc2_w"].T.astype(jnp.float32),
        "fc2_b": params["fc2_b"].astype(jnp.float32),
    }


# ---------------------------------------------------------------------------
# ModelD forward
# ---------------------------------------------------------------------------
@jax.jit
def model_d_forward(x_nchw, prepared):
    # NCHW -> NHWC, cast activations to bf16 once (matmul operand dtype).
    x = jnp.transpose(x_nchw, (0, 2, 3, 1)).astype(jnp.bfloat16)     # [N,48,48,3]

    # conv1 (9x9) + relu -> [N,40,40,F1], pool -> [N,20,20,F1]
    a1, (N, oh1, ow1) = _extract_patches(x, 9, 9)
    y1 = pallas_linear(a1, prepared["conv1"], F1, relu=True,
                       out_dtype=jnp.bfloat16).reshape(N, oh1, ow1, F1)
    y1 = _maxpool2(y1)

    # conv2 (5x5) + relu -> temp [N,16,16,F2], pool -> [N,8,8,F2]
    a2, (_, oh2, ow2) = _extract_patches(y1, 5, 5)
    temp = pallas_linear(a2, prepared["conv2"], F2, relu=True,
                         out_dtype=jnp.bfloat16).reshape(N, oh2, ow2, F2)
    y2 = _maxpool2(temp)

    # conv3 (3x3) + relu -> [N,6,6,F3]
    a3, (_, oh3, ow3) = _extract_patches(y2, 3, 3)
    y3 = pallas_linear(a3, prepared["conv3"], F3, relu=True,
                       out_dtype=jnp.bfloat16).reshape(N, oh3, ow3, F3)

    # fc1 weight columns are pre-permuted to NHWC flatten order -> plain reshape+concat.
    h = jnp.concatenate([y3.reshape(N, -1), temp.reshape(N, -1)], axis=1)  # [N, 23360]
    h = pallas_linear(h, prepared["fc1"], HIDDEN, relu=True, out_dtype=jnp.float32)

    # fc2: [N,200] @ [200,24] (tiny -> plain dot)
    out = jnp.dot(h, prepared["fc2_w"], preferred_element_type=jnp.float32) \
          + prepared["fc2_b"]
    return out                                                        # [N, 24]


if __name__ == "__main__":
    key = jax.random.PRNGKey(0)
    k_x, k_p = jax.random.split(key)
    # Input spatial size 48x48 is dictated by ModelD's fc1 in-features.
    x = jax.random.normal(k_x, (2, 3, 48, 48), jnp.float32)
    params = init_params(k_p)
    prepared = prepare_params(params)      # one-time weight prep (permute/pad/cast)

    out = model_d_forward(x, prepared)
    out = jax.block_until_ready(out)
    assert out.shape == (2, 24), out.shape
    print("KERNEL_OK")
</pallas_src>

<mosaic_0001>
module attributes {stable_mosaic.version = 11 : i64} {
  func.func @_matmul_kernel(%arg0: i32, %arg1: i32, %arg2: i32, %arg3: memref<400x256xbf16, #tpu.memory_space<vmem>>, %arg4: memref<256x128xbf16, #tpu.memory_space<vmem>>, %arg5: memref<1x128xf32, #tpu.memory_space<vmem>>, %arg6: memref<400x128xbf16, #tpu.memory_space<vmem>>) attributes {dimension_semantics = [#tpu.dimension_semantics<parallel>, #tpu.dimension_semantics<parallel>, #tpu.dimension_semantics<arbitrary>], iteration_bounds = array<i64: 8, 1, 1>, scalar_prefetch = 0 : i64, scratch_operands = 0 : i64, tpu.core_type = #tpu.core_type<tc>, window_params = [{transform_indices = @transform_0, window_bounds = array<i64: 400, 256>}, {transform_indices = @transform_1, window_bounds = array<i64: 256, 128>}, {transform_indices = @transform_2, window_bounds = array<i64: 1, 128>}, {transform_indices = @transform_3, window_bounds = array<i64: 400, 128>}]} {
    %c0 = arith.constant 0 : index
    %c0_0 = arith.constant 0 : index
    %0 = vector.load %arg3[%c0, %c0_0] : memref<400x256xbf16, #tpu.memory_space<vmem>>, vector<400x256xbf16>
    %c0_1 = arith.constant 0 : index
    %c0_2 = arith.constant 0 : index
    %1 = vector.load %arg4[%c0_1, %c0_2] : memref<256x128xbf16, #tpu.memory_space<vmem>>, vector<256x128xbf16>
    %cst = arith.constant dense<0.000000e+00> : vector<400x128xf32>
    %2 = tpu.matmul %0, %1, %cst {dimension_numbers = #tpu.dot_dimension_numbers<[1], [0], [0], [1], [0, 0, 1, 1], [], []>} : vector<400x256xbf16>, vector<256x128xbf16>, vector<400x128xf32> -> vector<400x128xf32>
    %c0_3 = arith.constant 0 : index
    %c0_4 = arith.constant 0 : index
    %3 = vector.load %arg5[%c0_3, %c0_4] : memref<1x128xf32, #tpu.memory_space<vmem>>, vector<1x128xf32>
    %4 = vector.broadcast %3 : vector<1x128xf32> to vector<400x128xf32>
    %5 = arith.addf %2, %4 : vector<400x128xf32>
    %cst_5 = arith.constant 0.000000e+00 : f32
    %6 = vector.broadcast %cst_5 : f32 to vector<400x128xf32>
    %7 = arith.maximumf %5, %6 : vector<400x128xf32>
    %8 = arith.truncf %7 : vector<400x128xf32> to vector<400x128xbf16>
    %c0_6 = arith.constant 0 : index
    %c0_7 = arith.constant 0 : index
    %9 = vector.load %arg6[%c0_6, %c0_7] : memref<400x128xbf16, #tpu.memory_space<vmem>>, vector<400x128xbf16>
    tpu.vector_store %arg6[%c0_6, %c0_7], %8 {strides = array<i32>} : memref<400x128xbf16, #tpu.memory_space<vmem>>, vector<400x128xbf16>,
    return
  }
  func.func @transform_0(%arg0: i32, %arg1: i32, %arg2: i32) -> (i32, i32) {
    %c0_i32 = arith.constant 0 : i32
    return %arg0, %arg2 : i32, i32
  }
  func.func @transform_1(%arg0: i32, %arg1: i32, %arg2: i32) -> (i32, i32) {
    %c0_i32 = arith.constant 0 : i32
    return %arg2, %arg1 : i32, i32
  }
  func.func @transform_2(%arg0: i32, %arg1: i32, %arg2: i32) -> (i32, i32) {
    %c0_i32 = arith.constant 0 : i32
    %c0_i32_0 = arith.constant 0 : i32
    return %c0_i32, %arg1 : i32, i32
  }
  func.func @transform_3(%arg0: i32, %arg1: i32, %arg2: i32) -> (i32, i32) {
    %c0_i32 = arith.constant 0 : i32
    return %arg0, %arg1 : i32, i32
  }
}

module attributes {stable_mosaic.version = 11 : i64} {
  func.func @_matmul_kernel(%arg0: i32, %arg1: i32, %arg2: i32, %arg3: memref<512x1024xbf16, #tpu.memory_space<vmem>>, %arg4: memref<1024x128xbf16, #tpu.memory_space<vmem>>, %arg5: memref<1x128xf32, #tpu.memory_space<vmem>>, %arg6: memref<512x128xbf16, #tpu.memory_space<vmem>>) attributes {dimension_semantics = [#tpu.dimension_semantics<parallel>, #tpu.dimension_semantics<parallel>, #tpu.dimension_semantics<arbitrary>], iteration_bounds = array<i64: 1, 1, 1>, scalar_prefetch = 0 : i64, scratch_operands = 0 : i64, tpu.core_type = #tpu.core_type<tc>, window_params = [{transform_indices = @transform_0, window_bounds = array<i64: 512, 1024>}, {transform_indices = @transform_1, window_bounds = array<i64: 1024, 128>}, {transform_indices = @transform_2, window_bounds = array<i64: 1, 128>}, {transform_indices = @transform_3, window_bounds = array<i64: 512, 128>}]} {
    %c0 = arith.constant 0 : index
    %c0_0 = arith.constant 0 : index
    %0 = vector.load %arg3[%c0, %c0_0] : memref<512x1024xbf16, #tpu.memory_space<vmem>>, vector<512x1024xbf16>
    %c0_1 = arith.constant 0 : index
    %c0_2 = arith.constant 0 : index
    %1 = vector.load %arg4[%c0_1, %c0_2] : memref<1024x128xbf16, #tpu.memory_space<vmem>>, vector<1024x128xbf16>
    %cst = arith.constant dense<0.000000e+00> : vector<512x128xf32>
    %2 = tpu.matmul %0, %1, %cst {dimension_numbers = #tpu.dot_dimension_numbers<[1], [0], [0], [1], [0, 0, 1, 1], [], []>} : vector<512x1024xbf16>, vector<1024x128xbf16>, vector<512x128xf32> -> vector<512x128xf32>
    %c0_3 = arith.constant 0 : index
    %c0_4 = arith.constant 0 : index
    %3 = vector.load %arg5[%c0_3, %c0_4] : memref<1x128xf32, #tpu.memory_space<vmem>>, vector<1x128xf32>
    %4 = vector.broadcast %3 : vector<1x128xf32> to vector<512x128xf32>
    %5 = arith.addf %2, %4 : vector<512x128xf32>
    %cst_5 = arith.constant 0.000000e+00 : f32
    %6 = vector.broadcast %cst_5 : f32 to vector<512x128xf32>
    %7 = arith.maximumf %5, %6 : vector<512x128xf32>
    %8 = arith.truncf %7 : vector<512x128xf32> to vector<512x128xbf16>
    %c0_6 = arith.constant 0 : index
    %c0_7 = arith.constant 0 : index
    %9 = vector.load %arg6[%c0_6, %c0_7] : memref<512x128xbf16, #tpu.memory_space<vmem>>, vector<512x128xbf16>
    tpu.vector_store %arg6[%c0_6, %c0_7], %8 {strides = array<i32>} : memref<512x128xbf16, #tpu.memory_space<vmem>>, vector<512x128xbf16>,
    return
  }
  func.func @transform_0(%arg0: i32, %arg1: i32, %arg2: i32) -> (i32, i32) {
    %c0_i32 = arith.constant 0 : i32
    return %arg0, %arg2 : i32, i32
  }
  func.func @transform_1(%arg0: i32, %arg1: i32, %arg2: i32) -> (i32, i32) {
    %c0_i32 = arith.constant 0 : i32
    return %arg2, %arg1 : i32, i32
  }
  func.func @transform_2(%arg0: i32, %arg1: i32, %arg2: i32) -> (i32, i32) {
    %c0_i32 = arith.constant 0 : i32
    %c0_i32_0 = arith.constant 0 : i32
    return %c0_i32, %arg1 : i32, i32
  }
  func.func @transform_3(%arg0: i32, %arg1: i32, %arg2: i32) -> (i32, i32) {
    %c0_i32 = arith.constant 0 : i32
    return %arg0, %arg1 : i32, i32
  }
}

module attributes {stable_mosaic.version = 11 : i64} {
  func.func @_matmul_kernel(%arg0: i32, %arg1: i32, %arg2: i32, %arg3: memref<80x768xbf16, #tpu.memory_space<vmem>>, %arg4: memref<768x128xbf16, #tpu.memory_space<vmem>>, %arg5: memref<1x128xf32, #tpu.memory_space<vmem>>, %arg6: memref<80x128xbf16, #tpu.memory_space<vmem>>) attributes {dimension_semantics = [#tpu.dimension_semantics<parallel>, #tpu.dimension_semantics<parallel>, #tpu.dimension_semantics<arbitrary>], iteration_bounds = array<i64: 1, 1, 1>, scalar_prefetch = 0 : i64, scratch_operands = 0 : i64, tpu.core_type = #tpu.core_type<tc>, window_params = [{transform_indices = @transform_0, window_bounds = array<i64: 80, 768>}, {transform_indices = @transform_1, window_bounds = array<i64: 768, 128>}, {transform_indices = @transform_2, window_bounds = array<i64: 1, 128>}, {transform_indices = @transform_3, window_bounds = array<i64: 80, 128>}]} {
    %c0 = arith.constant 0 : index
    %c0_0 = arith.constant 0 : index
    %0 = vector.load %arg3[%c0, %c0_0] : memref<80x768xbf16, #tpu.memory_space<vmem>>, vector<80x768xbf16>
    %c0_1 = arith.constant 0 : index
    %c0_2 = arith.constant 0 : index
    %1 = vector.load %arg4[%c0_1, %c0_2] : memref<768x128xbf16, #tpu.memory_space<vmem>>, vector<768x128xbf16>
    %cst = arith.constant dense<0.000000e+00> : vector<80x128xf32>
    %2 = tpu.matmul %0, %1, %cst {dimension_numbers = #tpu.dot_dimension_numbers<[1], [0], [0], [1], [0, 0, 1, 1], [], []>} : vector<80x768xbf16>, vector<768x128xbf16>, vector<80x128xf32> -> vector<80x128xf32>
    %c0_3 = arith.constant 0 : index
    %c0_4 = arith.constant 0 : index
    %3 = vector.load %arg5[%c0_3, %c0_4] : memref<1x128xf32, #tpu.memory_space<vmem>>, vector<1x128xf32>
    %4 = vector.broadcast %3 : vector<1x128xf32> to vector<80x128xf32>
    %5 = arith.addf %2, %4 : vector<80x128xf32>
    %cst_5 = arith.constant 0.000000e+00 : f32
    %6 = vector.broadcast %cst_5 : f32 to vector<80x128xf32>
    %7 = arith.maximumf %5, %6 : vector<80x128xf32>
    %8 = arith.truncf %7 : vector<80x128xf32> to vector<80x128xbf16>
    %c0_6 = arith.constant 0 : index
    %c0_7 = arith.constant 0 : index
    %9 = vector.load %arg6[%c0_6, %c0_7] : memref<80x128xbf16, #tpu.memory_space<vmem>>, vector<80x128xbf16>
    tpu.vector_store %arg6[%c0_6, %c0_7], %8 {strides = array<i32>} : memref<80x128xbf16, #tpu.memory_space<vmem>>, vector<80x128xbf16>,
    return
  }
  func.func @transform_0(%arg0: i32, %arg1: i32, %arg2: i32) -> (i32, i32) {
    %c0_i32 = arith.constant 0 : i32
    return %arg0, %arg2 : i32, i32
  }
  func.func @transform_1(%arg0: i32, %arg1: i32, %arg2: i32) -> (i32, i32) {
    %c0_i32 = arith.constant 0 : i32
    return %arg2, %arg1 : i32, i32
  }
  func.func @transform_2(%arg0: i32, %arg1: i32, %arg2: i32) -> (i32, i32) {
    %c0_i32 = arith.constant 0 : i32
    %c0_i32_0 = arith.constant 0 : i32
    return %c0_i32, %arg1 : i32, i32
  }
  func.func @transform_3(%arg0: i32, %arg1: i32, %arg2: i32) -> (i32, i32) {
    %c0_i32 = arith.constant 0 : i32
    return %arg0, %arg1 : i32, i32
  }
}

module attributes {stable_mosaic.version = 11 : i64} {
  func.func @_matmul_kernel(%arg0: i32, %arg1: i32, %arg2: i32, %arg3: memref<16x7808xbf16, #tpu.memory_space<vmem>>, %arg4: memref<7808x128xbf16, #tpu.memory_space<vmem>>, %arg5: memref<1x128xf32, #tpu.memory_space<vmem>>, %arg6: memref<16x128xf32, #tpu.memory_space<vmem>>) attributes {dimension_semantics = [#tpu.dimension_semantics<parallel>, #tpu.dimension_semantics<parallel>, #tpu.dimension_semantics<arbitrary>], iteration_bounds = array<i64: 1, 2, 3>, scalar_prefetch = 0 : i64, scratch_operands = 0 : i64, tpu.core_type = #tpu.core_type<tc>, window_params = [{transform_indices = @transform_0, window_bounds = array<i64: 16, 7808>}, {transform_indices = @transform_1, window_bounds = array<i64: 7808, 128>}, {transform_indices = @transform_2, window_bounds = array<i64: 1, 128>}, {transform_indices = @transform_3, window_bounds = array<i64: 16, 128>}]} {
    %c0 = arith.constant 0 : index
    %c0_0 = arith.constant 0 : index
    %0 = vector.load %arg3[%c0, %c0_0] : memref<16x7808xbf16, #tpu.memory_space<vmem>>, vector<16x7808xbf16>
    %c0_1 = arith.constant 0 : index
    %c0_2 = arith.constant 0 : index
    %1 = vector.load %arg4[%c0_1, %c0_2] : memref<7808x128xbf16, #tpu.memory_space<vmem>>, vector<7808x128xbf16>
    %cst = arith.constant dense<0.000000e+00> : vector<16x128xf32>
    %2 = tpu.matmul %0, %1, %cst {dimension_numbers = #tpu.dot_dimension_numbers<[1], [0], [0], [1], [0, 0, 1, 1], [], []>} : vector<16x7808xbf16>, vector<7808x128xbf16>, vector<16x128xf32> -> vector<16x128xf32>
    %c0_i32 = arith.constant 0 : i32
    %3 = arith.cmpi eq, %arg2, %c0_i32 : i32
    %4 = arith.extui %3 : i1 to i32
    %c0_i32_3 = arith.constant 0 : i32
    %5 = arith.cmpi ne, %4, %c0_i32_3 : i32
    scf.if %5 {
      %c0_8 = arith.constant 0 : index
      %c0_9 = arith.constant 0 : index
      %14 = vector.load %arg5[%c0_8, %c0_9] : memref<1x128xf32, #tpu.memory_space<vmem>>, vector<1x128xf32>
      %15 = vector.broadcast %14 : vector<1x128xf32> to vector<16x128xf32>
      %16 = arith.addf %2, %15 : vector<16x128xf32>
      %c0_10 = arith.constant 0 : index
      %c0_11 = arith.constant 0 : index
      %17 = vector.load %arg6[%c0_10, %c0_11] : memref<16x128xf32, #tpu.memory_space<vmem>>, vector<16x128xf32>
      tpu.vector_store %arg6[%c0_10, %c0_11], %16 {strides = array<i32>} : memref<16x128xf32, #tpu.memory_space<vmem>>, vector<16x128xf32>,
    } else {
    }
    %c0_i32_4 = arith.constant 0 : i32
    %6 = arith.cmpi sgt, %arg2, %c0_i32_4 : i32
    %c2_i32 = arith.constant 2 : i32
    %7 = arith.cmpi slt, %arg2, %c2_i32 : i32
    %8 = arith.andi %6, %7 : i1
    %9 = arith.extui %8 : i1 to i32
    %c0_i32_5 = arith.constant 0 : i32
    %10 = arith.cmpi ne, %9, %c0_i32_5 : i32
    scf.if %10 {
      %c0_8 = arith.constant 0 : index
      %c0_9 = arith.constant 0 : index
      %14 = vector.load %arg6[%c0_8, %c0_9] : memref<16x128xf32, #tpu.memory_space<vmem>>, vector<16x128xf32>
      %15 = arith.addf %14, %2 : vector<16x128xf32>
      %c0_10 = arith.constant 0 : index
      %c0_11 = arith.constant 0 : index
      %16 = vector.load %arg6[%c0_10, %c0_11] : memref<16x128xf32, #tpu.memory_space<vmem>>, vector<16x128xf32>
      tpu.vector_store %arg6[%c0_10, %c0_11], %15 {strides = array<i32>} : memref<16x128xf32, #tpu.memory_space<vmem>>, vector<16x128xf32>,
    } else {
    }
    %c2_i32_6 = arith.constant 2 : i32
    %11 = arith.cmpi eq, %arg2, %c2_i32_6 : i32
    %12 = arith.extui %11 : i1 to i32
    %c0_i32_7 = arith.constant 0 : i32
    %13 = arith.cmpi ne, %12, %c0_i32_7 : i32
    scf.if %13 {
      %c0_8 = arith.constant 0 : index
      %c0_9 = arith.constant 0 : index
      %14 = vector.load %arg6[%c0_8, %c0_9] : memref<16x128xf32, #tpu.memory_space<vmem>>, vector<16x128xf32>
      %15 = arith.addf %14, %2 : vector<16x128xf32>
      %cst_10 = arith.constant 0.000000e+00 : f32
      %16 = vector.broadcast %cst_10 : f32 to vector<16x128xf32>
      %17 = arith.maximumf %15, %16 : vector<16x128xf32>
      %c0_11 = arith.constant 0 : index
      %c0_12 = arith.constant 0 : index
      %18 = vector.load %arg6[%c0_11, %c0_12] : memref<16x128xf32, #tpu.memory_space<vmem>>, vector<16x128xf32>
      tpu.vector_store %arg6[%c0_11, %c0_12], %17 {strides = array<i32>} : memref<16x128xf32, #tpu.memory_space<vmem>>, vector<16x128xf32>,
    } else {
    }
    return
  }
  func.func @transform_0(%arg0: i32, %arg1: i32, %arg2: i32) -> (i32, i32) {
    %c0_i32 = arith.constant 0 : i32
    return %arg0, %arg2 : i32, i32
  }
  func.func @transform_1(%arg0: i32, %arg1: i32, %arg2: i32) -> (i32, i32) {
    %c0_i32 = arith.constant 0 : i32
    return %arg2, %arg1 : i32, i32
  }
  func.func @transform_2(%arg0: i32, %arg1: i32, %arg2: i32) -> (i32, i32) {
    %c0_i32 = arith.constant 0 : i32
    %c0_i32_0 = arith.constant 0 : i32
    return %c0_i32, %arg1 : i32, i32
  }
  func.func @transform_3(%arg0: i32, %arg1: i32, %arg2: i32) -> (i32, i32) {
    %c0_i32 = arith.constant 0 : i32
    return %arg0, %arg1 : i32, i32
  }
}

</mosaic_0001>

<bundles_post_ra>
// kernel: model_d_forward.4
= control target key start
LH: loop header
LB: loop body
LE: loop exit
PB: predicated region body
PF: predicated region fallthrough
CT: control target
= control target key end

     0   :  { %s1808_s12 = smov 0   ;;  %s1810_s13 = smov 0   ;;  %s2086_s0 = inlined_call_operand.vmem [shape: bf16[3200,256], index: 0, kind: input, shape index: {}]   ;;  %s2087_s1 = inlined_call_operand.vmem [shape: bf16[256,128], index: 1, kind: input, shape index: {}]   ;;  %s2088_s2 = inlined_call_operand.vmem [shape: f32[1,128], index: 2, kind: input, shape index: {}]   ;;  %s2089_s3 = inlined_call_operand.vmem [shape: bf16[3200,128], index: 3, kind: output, shape index: {}]  }
   0x1   :  { %s1812_s14 = smov 0  }
   0x2 LB: > { %s32_s15 = sadd.s32 1, %s1782_s13  ;;  %p1237_p0 = scmp.ge.s32.totalorder %s1786_s14, 1  ;;  %s1786_s14 = sphi %s1812_s14, %s13_s14   ;;  %s1782_s13 = sphi %s1810_s13, %s2091_s13   ;;  %s1778_s12 = sphi %s1808_s12, %s2090_s12  }
   0x3   : > { %p34_p1 = scmp.ge.s32.totalorder %s32_s15, 8  ;;  %p191_p2 = scmp.lt.s32.totalorder %s1786_s14, 9 }
   0x5   : > { %s2093_s15 = smov (%p34_p1, %s32_s15), 0  ;;  %p192_p3 = pnand %p1237_p0, %p191_p2 }
   0x6   : > { %s234_s28 = smul.u32 (!%p192_p3), 50, %s1778_s12 }
   0x7   : > { %195 = sbr.rel (%p192_p3) target bundleno = 385 (0x181), region = 32 }
   0x8   : > { %p236_p4 = scmp.lt.s32.totalorder (!%p192_p3), %s234_s28, 399 }
   0xc   : > { %v1565_v0 = vld [vmem:[%s2087_s1 + $0x38] sm:$0xff]  ;;  %v1564_v2 = vld [vmem:[%s2087_s1 + $0x30] sm:$0xff]  ;;  %v1563_v4 = vld [vmem:[%s2087_s1 + $0x28] sm:$0xff]  ;;  %s2095_s28 = smov (!%p236_p4, %s234_s28), 399 }
   0xd   : > { %v1573_v1 = vld [vmem:[%s2087_s1 + $0x78] sm:$0xff]  ;;  %699 = vmatpush.bf16.msra.mxu0 %v1565_v0  ;;  %1723 = vmatpush.bf16.msra.mxu2 %v1565_v0  ;;  %v1572_v3 = vld [vmem:[%s2087_s1 + $0x70] sm:$0xff]  ;;  %v1571_v5 = vld [vmem:[%s2087_s1 + $0x68] sm:$0xff]  ;;  %s1507_s17 = sshll.u32 %s2095_s28, 3  ;;  %s1240_s5 = sshll.u32 %s2095_s28, 2 }
   0xe   : > { %833 = vmatpush.bf16.msra.mxu1 %v1573_v1  ;;  %1731 = vmatpush.bf16.msra.mxu3 %v1573_v1  ;;  %v1562_v6 = vld [vmem:[%s2087_s1 + $0x20] sm:$0xff]  ;;  %v1561_v8 = vld [vmem:[%s2087_s1 + $0x18] sm:$0xff]  ;;  %v1560_v10 = vld [vmem:[%s2087_s1 + $0x10] sm:$0xff]  ;;  %s1874_s22 = scalar_lea.vmem %s2086_s0, %s1507_s17  ;;  %s1978_s8 = scalar_lea.vmem %s2089_s3, %s1240_s5 }
   0xf   : > { %v1570_v7 = vld [vmem:[%s2087_s1 + $0x60] sm:$0xff]  ;;  %v1569_v9 = vld [vmem:[%s2087_s1 + $0x58] sm:$0xff]  ;;  %v1568_v11 = vld [vmem:[%s2087_s1 + $0x50] sm:$0xff] }
  0x10   : > { %v1559_v12 = vld [vmem:[%s2087_s1 + $0x8] sm:$0xff]  ;;  %v1558_v14 = vld [vmem:[%s2087_s1] sm:$0xff]  ;;  %v1534_v22 = vld [vmem:[%s1874_s22 + $0xd4] sm:$0xf] }
  0x11   : > { %700 = vmatpush.bf16.msra.mxu0 %v1564_v2  ;;  %1724 = vmatpush.bf16.msra.mxu2 %v1564_v2  ;;  %v1567_v13 = vld [vmem:[%s2087_s1 + $0x48] sm:$0xff]  ;;  %v1566_v15 = vld [vmem:[%s2087_s1 + $0x40] sm:$0xff]  ;;  %v1349_v23 = vld [vmem:[%s1874_s22 + $0xd8] sm:$0xf0] }
  0x12   : > { %834 = vmatpush.bf16.msra.mxu1 %v1572_v3  ;;  %1732 = vmatpush.bf16.msra.mxu3 %v1572_v3  ;;  %v1243_v16 = vld [vmem:[%s1874_s22] sm:$0xf]  ;;  %v1509_v17 = vld [vmem:[%s1874_s22 + $0x4] sm:$0xf0]  ;;  %v1508_v20 = vld [vmem:[%s1874_s22 + $0x4] sm:$0xf]  ;;  %v1352_v27 = vor.u32 %v1534_v22, %v1349_v23 }
  0x13   : > { %v1339_v18 = vld [vmem:[%s1874_s22 + $0xc0] sm:$0xf]  ;;  %v1533_v19 = vld [vmem:[%s1874_s22 + $0xc4] sm:$0xf0]  ;;  %v1245_v21 = vld [vmem:[%s1874_s22 + $0x8] sm:$0xf0]  ;;  %v1244_v24 = vor.u32 %v1509_v17, %v1243_v16 }
  0x14   : > { %v1340_v25 = vor.u32 %v1533_v19, %v1339_v18  ;;  %v1248_v26 = vor.u32 %v1508_v20, %v1245_v21  ;;  %v1251_v28 = vld [vmem:[%s1874_s22 + $0x10] sm:$0xf]  ;;  %v1511_v29 = vld [vmem:[%s1874_s22 + $0x14] sm:$0xf0]  ;;  %v1510_v32 = vld [vmem:[%s1874_s22 + $0x14] sm:$0xf] }
  0x15   : > { %701 = vmatpush.bf16.msra.mxu0 %v1563_v4  ;;  %1725 = vmatpush.bf16.msra.mxu2 %v1563_v4  ;;  %v1347_v30 = vld [vmem:[%s1874_s22 + $0xd0] sm:$0xf]  ;;  %v1535_v31 = vld [vmem:[%s1874_s22 + $0xd4] sm:$0xf0]  ;;  %v1253_v33 = vld [vmem:[%s1874_s22 + $0x18] sm:$0xf0]  ;;  %v1252_v36 = vor.u32 %v1511_v29, %v1251_v28 }
  0x16   : > { %835 = vmatpush.bf16.msra.mxu1 %v1571_v5  ;;  %1733 = vmatpush.bf16.msra.mxu3 %v1571_v5  ;;  %v1536_v34 = vld [vmem:[%s1874_s22 + $0xe4] sm:$0xf]  ;;  %v1357_v35 = vld [vmem:[%s1874_s22 + $0xe8] sm:$0xf0]  ;;  %v1348_v37 = vor.u32 %v1535_v31, %v1347_v30  ;;  %v1256_v38 = vor.u32 %v1510_v32, %v1253_v33  ;;  %v1259_v40 = vld [vmem:[%s1874_s22 + $0x20] sm:$0xf] }
  0x17   : > { %v1360_v39 = vor.u32 %v1536_v34, %v1357_v35  ;;  %v1513_v41 = vld [vmem:[%s1874_s22 + $0x24] sm:$0xf0]  ;;  %v1355_v42 = vld [vmem:[%s1874_s22 + $0xe0] sm:$0xf]  ;;  %v1512_v44 = vld [vmem:[%s1874_s22 + $0x24] sm:$0xf] }
  0x18   : > { %v1537_v43 = vld [vmem:[%s1874_s22 + $0xe4] sm:$0xf0]  ;;  %v1261_v45 = vld [vmem:[%s1874_s22 + $0x28] sm:$0xf0]  ;;  %v1538_v46 = vld [vmem:[%s1874_s22 + $0xf4] sm:$0xf]  ;;  %v1260_v48 = vor.u32 %v1513_v41, %v1259_v40 }
  0x19   : > { %702 = vmatpush.bf16.msra.mxu0 %v1562_v6  ;;  %1726 = vmatpush.bf16.msra.mxu2 %v1562_v6  ;;  %v1365_v47 = vld [vmem:[%s1874_s22 + $0xf8] sm:$0xf0]  ;;  %v1356_v49 = vor.u32 %v1537_v43, %v1355_v42  ;;  %v1264_v50 = vor.u32 %v1512_v44, %v1261_v45  ;;  %v1267_v52 = vld [vmem:[%s1874_s22 + $0x30] sm:$0xf]  ;;  %v1515_v53 = vld [vmem:[%s1874_s22 + $0x34] sm:$0xf0] }
  0x1a   : > { %836 = vmatpush.bf16.msra.mxu1 %v1570_v7  ;;  %1734 = vmatpush.bf16.msra.mxu3 %v1570_v7  ;;  %v1368_v51 = vor.u32 %v1538_v46, %v1365_v47  ;;  %v1363_v54 = vld [vmem:[%s1874_s22 + $0xf0] sm:$0xf]  ;;  %v1539_v55 = vld [vmem:[%s1874_s22 + $0xf4] sm:$0xf0]  ;;  %v1514_v56 = vld [vmem:[%s1874_s22 + $0x34] sm:$0xf]  ;;  %v1268_v60 = vor.u32 %v1515_v53, %v1267_v52 }
  0x1b   : > { %v1269_v57 = vld [vmem:[%s1874_s22 + $0x38] sm:$0xf0]  ;;  %v1540_v58 = vld [vmem:[%s1874_s22 + $0x104] sm:$0xf]  ;;  %v1373_v59 = vld [vmem:[%s1874_s22 + $0x108] sm:$0xf0]  ;;  %v1364_v61 = vor.u32 %v1539_v55, %v1363_v54 }
  0x1c   : > { %v1272_v62 = vor.u32 %v1514_v56, %v1269_v57  ;;  %v1376_v63 = vor.u32 %v1540_v58, %v1373_v59  ;;  %v1275_v0 = vld [vmem:[%s1874_s22 + $0x40] sm:$0xf]  ;;  %v1517_v1 = vld [vmem:[%s1874_s22 + $0x44] sm:$0xf0]  ;;  %v1516_v4 = vld [vmem:[%s1874_s22 + $0x44] sm:$0xf] }
  0x1d   : > { %703 = vmatpush.bf16.msra.mxu0 %v1561_v8  ;;  %1727 = vmatpush.bf16.msra.mxu2 %v1561_v8  ;;  %v1371_v2 = vld [vmem:[%s1874_s22 + $0x100] sm:$0xf]  ;;  %v1541_v3 = vld [vmem:[%s1874_s22 + $0x104] sm:$0xf0]  ;;  %v1277_v5 = vld [vmem:[%s1874_s22 + $0x48] sm:$0xf0]  ;;  %v1276_v8 = vor.u32 %v1517_v1, %v1275_v0 }
  0x1e   : > { %837 = vmatpush.bf16.msra.mxu1 %v1569_v9  ;;  %1735 = vmatpush.bf16.msra.mxu3 %v1569_v9  ;;  %v1542_v6 = vld [vmem:[%s1874_s22 + $0x114] sm:$0xf]  ;;  %v1381_v7 = vld [vmem:[%s1874_s22 + $0x118] sm:$0xf0]  ;;  %v1372_v9 = vor.u32 %v1541_v3, %v1371_v2  ;;  %v1544_v18 = vld [vmem:[%s1874_s22 + $0x124] sm:$0xf] }
  0x1f   : > { %v1518_v16 = vld [vmem:[%s1874_s22 + $0x54] sm:$0xf]  ;;  %v1285_v17 = vld [vmem:[%s1874_s22 + $0x58] sm:$0xf0]  ;;  %v1389_v19 = vld [vmem:[%s1874_s22 + $0x128] sm:$0xf0] }
  0x20   : > { %v1288_v22 = vor.u32 %v1518_v16, %v1285_v17  ;;  %v1392_v23 = vor.u32 %v1544_v18, %v1389_v19  ;;  %v1520_v28 = vld [vmem:[%s1874_s22 + $0x64] sm:$0xf]  ;;  %v1293_v29 = vld [vmem:[%s1874_s22 + $0x68] sm:$0xf0]  ;;  %v1546_v30 = vld [vmem:[%s1874_s22 + $0x134] sm:$0xf] }
  0x21   : > { %704 = vmatpush.bf16.msra.mxu0 %v1560_v10  ;;  %1728 = vmatpush.bf16.msra.mxu2 %v1560_v10  ;;  %v1280_v10 = vor.u32 %v1516_v4, %v1277_v5  ;;  %v1397_v31 = vld [vmem:[%s1874_s22 + $0x138] sm:$0xf0]  ;;  %v1296_v34 = vor.u32 %v1520_v28, %v1293_v29  ;;  %v1522_v40 = vld [vmem:[%s1874_s22 + $0x74] sm:$0xf]  ;;  %v1548_v42 = vld [vmem:[%s1874_s22 + $0x144] sm:$0xf] }
  0x22   : > { %838 = vmatpush.bf16.msra.mxu1 %v1568_v11  ;;  %1736 = vmatpush.bf16.msra.mxu3 %v1568_v11  ;;  %v1384_v11 = vor.u32 %v1542_v6, %v1381_v7  ;;  %v1400_v35 = vor.u32 %v1546_v30, %v1397_v31  ;;  %v1301_v41 = vld [vmem:[%s1874_s22 + $0x78] sm:$0xf0]  ;;  %v1405_v43 = vld [vmem:[%s1874_s22 + $0x148] sm:$0xf0]  ;;  %v1524_v52 = vld [vmem:[%s1874_s22 + $0x84] sm:$0xf] }
  0x23   : > { %v1304_v46 = vor.u32 %v1522_v40, %v1301_v41  ;;  %v1408_v47 = vor.u32 %v1548_v42, %v1405_v43  ;;  %v1309_v53 = vld [vmem:[%s1874_s22 + $0x88] sm:$0xf0]  ;;  %v1550_v54 = vld [vmem:[%s1874_s22 + $0x154] sm:$0xf]  ;;  %v1413_v55 = vld [vmem:[%s1874_s22 + $0x158] sm:$0xf0] }
  0x24   : > { %v1312_v59 = vor.u32 %v1524_v52, %v1309_v53  ;;  %v1315_v7 = vld [vmem:[%s1874_s22 + $0x90] sm:$0xf]  ;;  %v1421_v16 = vld [vmem:[%s1874_s22 + $0x168] sm:$0xf0]  ;;  %v1554_v43 = vld [vmem:[%s1874_s22 + $0x174] sm:$0xf] }
  0x25   : > { %705 = vmatpush.bf16.msra.mxu0 %v1559_v12  ;;  %1729 = vmatpush.bf16.msra.mxu2 %v1559_v12  ;;  %v1283_v12 = vld [vmem:[%s1874_s22 + $0x50] sm:$0xf]  ;;  %v1325_v40 = vld [vmem:[%s1874_s22 + $0xa8] sm:$0xf0] }
  0x26   : > { %839 = vmatpush.bf16.msra.mxu1 %v1567_v13  ;;  %1737 = vmatpush.bf16.msra.mxu3 %v1567_v13  ;;  %v1519_v13 = vld [vmem:[%s1874_s22 + $0x54] sm:$0xf0] }
  0x27   : > { %v1284_v20 = vor.u32 %v1519_v13, %v1283_v12  ;;  %v1317_v12 = vld [vmem:[%s1874_s22 + $0x98] sm:$0xf0] }
  0x29   : > { %706 = vmatpush.bf16.msra.mxu0 %v1558_v14  ;;  %1730 = vmatpush.bf16.msra.mxu2 %v1558_v14  ;;  %v1379_v14 = vld [vmem:[%s1874_s22 + $0x110] sm:$0xf] }
  0x2a   : > { %840 = vmatpush.bf16.msra.mxu1 %v1566_v15  ;;  %1738 = vmatpush.bf16.msra.mxu3 %v1566_v15  ;;  %v1543_v15 = vld [vmem:[%s1874_s22 + $0x114] sm:$0xf0] }
  0x2b   : > { %v1380_v21 = vor.u32 %v1543_v15, %v1379_v14  ;;  %v1552_v15 = vld [vmem:[%s1874_s22 + $0x164] sm:$0xf] }
  0x2c   : > { %707 = vmatmul.bf16.vlgmr.msra.gmra.mxu0 %v1244_v24  ;;  %767 = vmatmul.bf16.vlgmr.msra.gmra.mxu2 %v1340_v25  ;;  %v1291_v24 = vld [vmem:[%s1874_s22 + $0x60] sm:$0xf]  ;;  %v1521_v25 = vld [vmem:[%s1874_s22 + $0x64] sm:$0xf0] }
  0x2d   : > { %841 = vmatmul.bf16.vlgmr.msra.gmra.mxu1 %v1248_v26  ;;  %906 = vmatmul.bf16.vlgmr.msra.gmra.mxu3 %v1352_v27  ;;  %v1387_v26 = vld [vmem:[%s1874_s22 + $0x120] sm:$0xf]  ;;  %v1545_v27 = vld [vmem:[%s1874_s22 + $0x124] sm:$0xf0]  ;;  %v1292_v32 = vor.u32 %v1521_v25, %v1291_v24  ;;  %v1424_v24 = vor.u32 %v1552_v15, %v1421_v16  ;;  %v1556_v15 = vld [vmem:[%s1874_s22 + $0x184] sm:$0xf] }
  0x2e   : > { %v1388_v33 = vor.u32 %v1545_v27, %v1387_v26  ;;  %v1437_v16 = vld [vmem:[%s1874_s22 + $0x188] sm:$0xf0] }
  0x3c   : > { %712 = vmatmul.bf16.gmra.mxu0 %v1252_v36  ;;  %772 = vmatmul.bf16.gmra.mxu2 %v1348_v37  ;;  %v1299_v36 = vld [vmem:[%s1874_s22 + $0x70] sm:$0xf]  ;;  %v1523_v37 = vld [vmem:[%s1874_s22 + $0x74] sm:$0xf0] }
  0x3d   : > { %846 = vmatmul.bf16.gmra.mxu1 %v1256_v38  ;;  %911 = vmatmul.bf16.gmra.mxu3 %v1360_v39  ;;  %v1395_v38 = vld [vmem:[%s1874_s22 + $0x130] sm:$0xf]  ;;  %v1547_v39 = vld [vmem:[%s1874_s22 + $0x134] sm:$0xf0]  ;;  %v1300_v44 = vor.u32 %v1523_v37, %v1299_v36  ;;  %v1529_v36 = vld [vmem:[%s1874_s22 + $0xa4] sm:$0xf0] }
  0x3e   : > { %v1396_v45 = vor.u32 %v1547_v39, %v1395_v38  ;;  %v1419_v37 = vld [vmem:[%s1874_s22 + $0x160] sm:$0xf]  ;;  %v1553_v38 = vld [vmem:[%s1874_s22 + $0x164] sm:$0xf0]  ;;  %v1528_v39 = vld [vmem:[%s1874_s22 + $0xa4] sm:$0xf] }
  0x3f   : > { %v1328_v53 = vor.u32 %v1528_v39, %v1325_v40 }
  0x4c   : > { %717 = vmatmul.bf16.gmra.mxu0 %v1260_v48  ;;  %777 = vmatmul.bf16.gmra.mxu2 %v1356_v49  ;;  %v1307_v48 = vld [vmem:[%s1874_s22 + $0x80] sm:$0xf]  ;;  %v1525_v49 = vld [vmem:[%s1874_s22 + $0x84] sm:$0xf0] }
  0x4d   : > { %851 = vmatmul.bf16.gmra.mxu1 %v1264_v50  ;;  %916 = vmatmul.bf16.gmra.mxu3 %v1368_v51  ;;  %v1403_v50 = vld [vmem:[%s1874_s22 + $0x140] sm:$0xf]  ;;  %v1549_v51 = vld [vmem:[%s1874_s22 + $0x144] sm:$0xf0]  ;;  %v1308_v56 = vor.u32 %v1525_v49, %v1307_v48 }
  0x4e   : > { %v1404_v57 = vor.u32 %v1549_v51, %v1403_v50  ;;  %v1420_v50 = vor.u32 %v1553_v38, %v1419_v37 }
  0x5c   : > { %722 = vmatmul.bf16.gmra.mxu0 %v1268_v60  ;;  %782 = vmatmul.bf16.gmra.mxu2 %v1364_v61  ;;  %v1416_v60 = vor.u32 %v1550_v54, %v1413_v55  ;;  %v1960_v61 = vld [vmem:[%s2088_s2] ss:$0 sm:$0xff] }
  0x5d   : > { %856 = vmatmul.bf16.gmra.mxu1 %v1272_v62  ;;  %921 = vmatmul.bf16.gmra.mxu3 %v1376_v63 }
  0x6c   : > { %727 = vmatmul.bf16.gmra.mxu0 %v1276_v8  ;;  %787 = vmatmul.bf16.gmra.mxu2 %v1372_v9  ;;  %v1527_v8 = vld [vmem:[%s1874_s22 + $0x94] sm:$0xf0]  ;;  %v1411_v9 = vld [vmem:[%s1874_s22 + $0x150] sm:$0xf] }
  0x6d   : > { %861 = vmatmul.bf16.gmra.mxu1 %v1280_v10  ;;  %926 = vmatmul.bf16.gmra.mxu3 %v1384_v11  ;;  %v1551_v10 = vld [vmem:[%s1874_s22 + $0x154] sm:$0xf0]  ;;  %v1526_v11 = vld [vmem:[%s1874_s22 + $0x94] sm:$0xf]  ;;  %v1316_v19 = vor.u32 %v1527_v8, %v1315_v7  ;;  %v1331_v7 = vld [vmem:[%s1874_s22 + $0xb0] sm:$0xf] }
  0x6e   : > { %v1531_v8 = vld [vmem:[%s1874_s22 + $0xb4] sm:$0xf0] }
  0x7c   : > { %732 = vmatmul.bf16.gmra.mxu0 %v1284_v20  ;;  %792 = vmatmul.bf16.gmra.mxu2 %v1380_v21  ;;  %v1412_v20 = vor.u32 %v1551_v10, %v1411_v9  ;;  %v1427_v9 = vld [vmem:[%s1874_s22 + $0x170] sm:$0xf]  ;;  %v1555_v10 = vld [vmem:[%s1874_s22 + $0x174] sm:$0xf0] }
  0x7d   : > { %866 = vmatmul.bf16.gmra.mxu1 %v1288_v22  ;;  %931 = vmatmul.bf16.gmra.mxu3 %v1392_v23  ;;  %v1320_v23 = vor.u32 %v1526_v11, %v1317_v12  ;;  %v1530_v11 = vld [vmem:[%s1874_s22 + $0xb4] sm:$0xf]  ;;  %v1333_v12 = vld [vmem:[%s1874_s22 + $0xb8] sm:$0xf0] }
  0x8c   : > { %737 = vmatmul.bf16.gmra.mxu0 %v1292_v32  ;;  %797 = vmatmul.bf16.gmra.mxu2 %v1388_v33 }
  0x8d   : > { %871 = vmatmul.bf16.gmra.mxu1 %v1296_v34  ;;  %936 = vmatmul.bf16.gmra.mxu3 %v1400_v35  ;;  %v1323_v35 = vld [vmem:[%s1874_s22 + $0xa0] sm:$0xf] }
  0x9c   : > { %742 = vmatmul.bf16.gmra.mxu0 %v1300_v44  ;;  %802 = vmatmul.bf16.gmra.mxu2 %v1396_v45  ;;  %v1429_v44 = vld [vmem:[%s1874_s22 + $0x178] sm:$0xf0] }
  0x9d   : > { %876 = vmatmul.bf16.gmra.mxu1 %v1304_v46  ;;  %941 = vmatmul.bf16.gmra.mxu3 %v1408_v47  ;;  %v1324_v46 = vor.u32 %v1529_v36, %v1323_v35  ;;  %v1432_v54 = vor.u32 %v1554_v43, %v1429_v44  ;;  %v1557_v43 = vld [vmem:[%s1874_s22 + $0x184] sm:$0xf0] }
  0xa9   : > { %v708_v58 = vpop.f32.mrf.mxu0 }
  0xaa   : > { %v842_v62 = vpop.f32.mrf.mxu1  ;;  %v709_v63 = vadd.f32 %v1960_v61, %v708_v58 }
  0xac   : > { %747 = vmatmul.bf16.gmra.mxu0 %v1308_v56  ;;  %807 = vmatmul.bf16.gmra.mxu2 %v1404_v57  ;;  %v843_v3 = vadd.f32 %v842_v62, %v709_v63 }
  0xad   : > { %881 = vmatmul.bf16.gmra.mxu1 %v1312_v59  ;;  %946 = vmatmul.bf16.gmra.mxu3 %v1416_v60 }
  0xae   : > { %v967_v13 = vmax.f32 %v843_v3, 0.0 }
  0xaf   : > { %v1963_v0 = vpop.f32.mrf.mxu2 }
  0xb0   : > { %v907_v1 = vpop.f32.mrf.mxu3 }
  0xb1   : > { %v710_v2 = vpop.f32.mrf.mxu0 }
  0xb2   : > { %v711_v4 = vadd.f32 %v1960_v61, %v710_v2  ;;  %v844_v5 = vpop.f32.mrf.mxu1 }
  0xb4   : > { %v845_v6 = vadd.f32 %v844_v5, %v711_v4 }
  0xb6   : > { %v968_v14 = vmax.f32 %v845_v6, 0.0 }
  0xb7   : > { %v1980_v17 = vpop.f32.mrf.mxu2 }
  0xb8   : > { %v1577_v18 = vpack.c.bf16 %v968_v14, %v967_v13  ;;  %v909_v21 = vpop.f32.mrf.mxu3 }
  0xb9   : > { %v713_v22 = vpop.f32.mrf.mxu0 }
  0xba   : > { %1578 = vst [vmem:[%s1978_s8] sm:$0xff] %v1577_v18   ;;  %v847_v25 = vpop.f32.mrf.mxu1  ;;  %v714_v26 = vadd.f32 %v1960_v61, %v713_v22 }
  0xbc   : > { %752 = vmatmul.bf16.gmra.mxu0 %v1316_v19  ;;  %812 = vmatmul.bf16.gmra.mxu2 %v1412_v20  ;;  %v848_v30 = vadd.f32 %v847_v25, %v714_v26  ;;  %v1332_v19 = vor.u32 %v1531_v8, %v1331_v7  ;;  %v1336_v26 = vor.u32 %v1530_v11, %v1333_v12 }
  0xbd   : > { %886 = vmatmul.bf16.gmra.mxu1 %v1320_v23  ;;  %951 = vmatmul.bf16.gmra.mxu3 %v1424_v24  ;;  %v1428_v23 = vor.u32 %v1555_v10, %v1427_v9 }
  0xbe   : > { %v969_v41 = vmax.f32 %v848_v30, 0.0 }
  0xbf   : > { %v773_v27 = vpop.f32.mrf.mxu2 }
  0xc0   : > { %v912_v28 = vpop.f32.mrf.mxu3  ;;  %v774_v33 = vadd.f32 %v1960_v61, %v773_v27  ;;  %v1440_v27 = vor.u32 %v1556_v15, %v1437_v16 }
  0xc1   : > { %v715_v29 = vpop.f32.mrf.mxu0 }
  0xc2   : > { %v716_v31 = vadd.f32 %v1960_v61, %v715_v29  ;;  %v849_v32 = vpop.f32.mrf.mxu1  ;;  %v908_v47 = vadd.f32 %v907_v1, %v774_v33 }
  0xc4   : > { %v850_v34 = vadd.f32 %v849_v32, %v716_v31  ;;  %v993_v57 = vmax.f32 %v908_v47, 0.0  ;;  %v1341_v47 = vld [vmem:[%s1874_s22 + $0xc8] sm:$0xf0] }
  0xc6   : > { %v970_v42 = vmax.f32 %v850_v34, 0.0 }
  0xc7   : > { %v775_v45 = vpop.f32.mrf.mxu2 }
  0xc8   : > { %v1582_v48 = vpack.c.bf16 %v970_v42, %v969_v41  ;;  %v776_v49 = vadd.f32 %v1960_v61, %v775_v45  ;;  %v914_v51 = vpop.f32.mrf.mxu3  ;;  %v1435_v42 = vld [vmem:[%s1874_s22 + $0x180] sm:$0xf] }
  0xc9   : > { %v718_v52 = vpop.f32.mrf.mxu0 }
  0xca   : > { %1699 = vst [vmem:[%s1978_s8 + $0x8] sm:$0xff] %v1582_v48   ;;  %v910_v55 = vadd.f32 %v909_v21, %v776_v49  ;;  %v852_v56 = vpop.f32.mrf.mxu1  ;;  %v719_v60 = vadd.f32 %v1960_v61, %v718_v52  ;;  %v1436_v52 = vor.u32 %v1557_v43, %v1435_v42 }
  0xcc   : > { %v994_v58 = vmax.f32 %v910_v55, 0.0  ;;  %757 = vmatmul.bf16.gmra.mxu0 %v1324_v46  ;;  %817 = vmatmul.bf16.gmra.mxu2 %v1420_v50  ;;  %v853_v2 = vadd.f32 %v852_v56, %v719_v60  ;;  %v1532_v46 = vld [vmem:[%s1874_s22 + $0xc4] sm:$0xf] }
  0xcd   : > { %891 = vmatmul.bf16.gmra.mxu1 %v1328_v53  ;;  %956 = vmatmul.bf16.gmra.mxu3 %v1432_v54  ;;  %v1344_v55 = vor.u32 %v1532_v46, %v1341_v47 }
  0xce   : > { %v1642_v59 = vpack.c.bf16 %v994_v58, %v993_v57  ;;  %v971_v13 = vmax.f32 %v853_v2, 0.0 }
  0xcf   : > { %v778_v62 = vpop.f32.mrf.mxu2 }
  0xd0   : > { %1711 = vst [vmem:[%s1978_s8 + $0x68] sm:$0xff] %v1642_v59   ;;  %v917_v63 = vpop.f32.mrf.mxu3  ;;  %v779_v5 = vadd.f32 %v1960_v61, %v778_v62 }
  0xd1   : > { %v720_v1 = vpop.f32.mrf.mxu0 }
  0xd2   : > { %v721_v3 = vadd.f32 %v1960_v61, %v720_v1  ;;  %v854_v4 = vpop.f32.mrf.mxu1  ;;  %v913_v20 = vadd.f32 %v912_v28, %v779_v5 }
  0xd4   : > { %v855_v6 = vadd.f32 %v854_v4, %v721_v3  ;;  %v995_v31 = vmax.f32 %v913_v20, 0.0 }
  0xd6   : > { %v972_v14 = vmax.f32 %v855_v6, 0.0 }
  0xd7   : > { %v780_v18 = vpop.f32.mrf.mxu2 }
  0xd8   : > { %v1587_v21 = vpack.c.bf16 %v972_v14, %v971_v13  ;;  %v781_v22 = vadd.f32 %v1960_v61, %v780_v18  ;;  %v919_v24 = vpop.f32.mrf.mxu3 }
  0xd9   : > { %v723_v25 = vpop.f32.mrf.mxu0 }
  0xda   : > { %1700 = vst [vmem:[%s1978_s8 + $0x10] sm:$0xff] %v1587_v21   ;;  %v915_v29 = vadd.f32 %v914_v51, %v781_v22  ;;  %v857_v30 = vpop.f32.mrf.mxu1  ;;  %v724_v33 = vadd.f32 %v1960_v61, %v723_v25 }
  0xdc   : > { %v996_v32 = vmax.f32 %v915_v29, 0.0  ;;  %762 = vmatmul.bf16.gmra.mxu0 %v1332_v19  ;;  %822 = vmatmul.bf16.gmra.mxu2 %v1428_v23  ;;  %v858_v37 = vadd.f32 %v857_v30, %v724_v33 }
  0xdd   : > { %896 = vmatmul.bf16.gmra.mxu1 %v1336_v26  ;;  %961 = vmatmul.bf16.gmra.mxu3 %v1440_v27 }
  0xde   : > { %v1647_v28 = vpack.c.bf16 %v996_v32, %v995_v31  ;;  %v973_v44 = vmax.f32 %v858_v37, 0.0 }
  0xdf   : > { %v783_v34 = vpop.f32.mrf.mxu2 }
  0xe0   : > { %1712 = vst [vmem:[%s1978_s8 + $0x70] sm:$0xff] %v1647_v28   ;;  %v922_v35 = vpop.f32.mrf.mxu3  ;;  %v784_v40 = vadd.f32 %v1960_v61, %v783_v34 }
  0xe1   : > { %v725_v36 = vpop.f32.mrf.mxu0 }
  0xe2   : > { %v726_v38 = vadd.f32 %v1960_v61, %v725_v36  ;;  %v859_v39 = vpop.f32.mrf.mxu1  ;;  %v918_v49 = vadd.f32 %v917_v63, %v784_v40 }
  0xe4   : > { %v860_v41 = vadd.f32 %v859_v39, %v726_v38  ;;  %v997_v58 = vmax.f32 %v918_v49, 0.0 }
  0xe6   : > { %v974_v45 = vmax.f32 %v860_v41, 0.0 }
  0xe7   : > { %v785_v48 = vpop.f32.mrf.mxu2 }
  0xe8   : > { %v1592_v50 = vpack.c.bf16 %v974_v45, %v973_v44  ;;  %v786_v51 = vadd.f32 %v1960_v61, %v785_v48  ;;  %v924_v53 = vpop.f32.mrf.mxu3 }
  0xe9   : > { %v728_v54 = vpop.f32.mrf.mxu0 }
  0xea   : > { %1701 = vst [vmem:[%s1978_s8 + $0x18] sm:$0xff] %v1592_v50   ;;  %v920_v56 = vadd.f32 %v919_v24, %v786_v51  ;;  %v862_v57 = vpop.f32.mrf.mxu1  ;;  %v729_v62 = vadd.f32 %v1960_v61, %v728_v54 }
  0xec   : > { %v998_v59 = vmax.f32 %v920_v56, 0.0  ;;  %827 = vmatmul.bf16.gmra.mxu2 %v1436_v52  ;;  %v863_v3 = vadd.f32 %v862_v57, %v729_v62 }
  0xed   : > { %901 = vmatmul.bf16.gmra.mxu1 %v1344_v55 }
  0xee   : > { %v1652_v60 = vpack.c.bf16 %v998_v59, %v997_v58  ;;  %v975_v8 = vmax.f32 %v863_v3, 0.0 }
  0xef   : > { %v788_v1 = vpop.f32.mrf.mxu2 }
  0xf0   : > { %1713 = vst [vmem:[%s1978_s8 + $0x78] sm:$0xff] %v1652_v60   ;;  %v927_v63 = vpop.f32.mrf.mxu3  ;;  %v789_v6 = vadd.f32 %v1960_v61, %v788_v1 }
  0xf1   : > { %v730_v2 = vpop.f32.mrf.mxu0 }
  0xf2   : > { %v731_v4 = vadd.f32 %v1960_v61, %v730_v2  ;;  %v864_v5 = vpop.f32.mrf.mxu1  ;;  %v923_v11 = vadd.f32 %v922_v35, %v789_v6 }
  0xf4   : > { %v865_v7 = vadd.f32 %v864_v5, %v731_v4  ;;  %v999_v19 = vmax.f32 %v923_v11, 0.0 }
  0xf6   : > { %v976_v9 = vmax.f32 %v865_v7, 0.0 }
  0xf7   : > { %v790_v10 = vpop.f32.mrf.mxu2 }
  0xf8   : > { %v1597_v12 = vpack.c.bf16 %v976_v9, %v975_v8  ;;  %v791_v13 = vadd.f32 %v1960_v61, %v790_v10  ;;  %v929_v14 = vpop.f32.mrf.mxu3 }
  0xf9   : > { %v733_v15 = vpop.f32.mrf.mxu0 }
  0xfa   : > { %1702 = vst [vmem:[%s1978_s8 + $0x20] sm:$0xff] %v1597_v12   ;;  %v925_v16 = vadd.f32 %v924_v53, %v791_v13  ;;  %v867_v18 = vpop.f32.mrf.mxu1  ;;  %v734_v22 = vadd.f32 %v1960_v61, %v733_v15 }
  0xfc   : > { %v1000_v20 = vmax.f32 %v925_v16, 0.0  ;;  %v868_v26 = vadd.f32 %v867_v18, %v734_v22 }
  0xfe   : > { %v1657_v21 = vpack.c.bf16 %v1000_v20, %v999_v19  ;;  %v977_v32 = vmax.f32 %v868_v26, 0.0 }
  0xff   : > { %v793_v23 = vpop.f32.mrf.mxu2 }
 0x100   : > { %1714 = vst [vmem:[%s1978_s8 + $0x80] sm:$0xff] %v1657_v21   ;;  %v932_v24 = vpop.f32.mrf.mxu3  ;;  %v794_v30 = vadd.f32 %v1960_v61, %v793_v23 }
 0x101   : > { %v735_v25 = vpop.f32.mrf.mxu0 }
 0x102   : > { %v736_v27 = vadd.f32 %v1960_v61, %v735_v25  ;;  %v869_v29 = vpop.f32.mrf.mxu1  ;;  %v928_v34 = vadd.f32 %v927_v63, %v794_v30 }
 0x104   : > { %v870_v31 = vadd.f32 %v869_v29, %v736_v27  ;;  %v1001_v41 = vmax.f32 %v928_v34, 0.0 }
 0x106   : > { %v978_v28 = vmax.f32 %v870_v31, 0.0 }
 0x107   : > { %v795_v33 = vpop.f32.mrf.mxu2 }
 0x108   : > { %v1602_v35 = vpack.c.bf16 %v978_v28, %v977_v32  ;;  %v796_v36 = vadd.f32 %v1960_v61, %v795_v33  ;;  %v934_v37 = vpop.f32.mrf.mxu3 }
 0x109   : > { %v738_v38 = vpop.f32.mrf.mxu0 }
 0x10a   : > { %1703 = vst [vmem:[%s1978_s8 + $0x28] sm:$0xff] %v1602_v35   ;;  %v930_v39 = vadd.f32 %v929_v14, %v796_v36  ;;  %v872_v40 = vpop.f32.mrf.mxu1  ;;  %v739_v44 = vadd.f32 %v1960_v61, %v738_v38 }
 0x10c   : > { %v1002_v42 = vmax.f32 %v930_v39, 0.0  ;;  %v873_v48 = vadd.f32 %v872_v40, %v739_v44 }
 0x10e   : > { %v1662_v43 = vpack.c.bf16 %v1002_v42, %v1001_v41  ;;  %v979_v53 = vmax.f32 %v873_v48, 0.0 }
 0x10f   : > { %v798_v45 = vpop.f32.mrf.mxu2 }
 0x110   : > { %1715 = vst [vmem:[%s1978_s8 + $0x88] sm:$0xff] %v1662_v43   ;;  %v937_v46 = vpop.f32.mrf.mxu3  ;;  %v799_v51 = vadd.f32 %v1960_v61, %v798_v45 }
 0x111   : > { %v740_v47 = vpop.f32.mrf.mxu0 }
 0x112   : > { %v741_v49 = vadd.f32 %v1960_v61, %v740_v47  ;;  %v874_v50 = vpop.f32.mrf.mxu1  ;;  %v933_v56 = vadd.f32 %v932_v24, %v799_v51 }
 0x114   : > { %v875_v52 = vadd.f32 %v874_v50, %v741_v49  ;;  %v1003_v63 = vmax.f32 %v933_v56, 0.0 }
 0x116   : > { %v980_v54 = vmax.f32 %v875_v52, 0.0 }
 0x117   : > { %v800_v55 = vpop.f32.mrf.mxu2 }
 0x118   : > { %v1607_v57 = vpack.c.bf16 %v980_v54, %v979_v53  ;;  %v801_v58 = vadd.f32 %v1960_v61, %v800_v55  ;;  %v939_v59 = vpop.f32.mrf.mxu3 }
 0x119   : > { %v743_v60 = vpop.f32.mrf.mxu0 }
 0x11a   : > { %1704 = vst [vmem:[%s1978_s8 + $0x30] sm:$0xff] %v1607_v57   ;;  %v935_v62 = vadd.f32 %v934_v37, %v801_v58  ;;  %v877_v1 = vpop.f32.mrf.mxu1  ;;  %v744_v4 = vadd.f32 %v1960_v61, %v743_v60 }
 0x11c   : > { %v1004_v2 = vmax.f32 %v935_v62, 0.0  ;;  %v878_v8 = vadd.f32 %v877_v1, %v744_v4 }
 0x11e   : > { %v1667_v3 = vpack.c.bf16 %v1004_v2, %v1003_v63  ;;  %v981_v13 = vmax.f32 %v878_v8, 0.0 }
 0x11f   : > { %v803_v5 = vpop.f32.mrf.mxu2 }
 0x120   : > { %1716 = vst [vmem:[%s1978_s8 + $0x90] sm:$0xff] %v1667_v3   ;;  %v942_v6 = vpop.f32.mrf.mxu3  ;;  %v804_v11 = vadd.f32 %v1960_v61, %v803_v5 }
 0x121   : > { %v745_v7 = vpop.f32.mrf.mxu0 }
 0x122   : > { %v746_v9 = vadd.f32 %v1960_v61, %v745_v7  ;;  %v879_v10 = vpop.f32.mrf.mxu1  ;;  %v938_v16 = vadd.f32 %v937_v46, %v804_v11 }
 0x124   : > { %v880_v12 = vadd.f32 %v879_v10, %v746_v9  ;;  %v1005_v24 = vmax.f32 %v938_v16, 0.0 }
 0x126   : > { %v982_v14 = vmax.f32 %v880_v12, 0.0 }
 0x127   : > { %v805_v15 = vpop.f32.mrf.mxu2 }
 0x128   : > { %v1612_v18 = vpack.c.bf16 %v982_v14, %v981_v13  ;;  %v806_v19 = vadd.f32 %v1960_v61, %v805_v15  ;;  %v944_v21 = vpop.f32.mrf.mxu3 }
 0x129   : > { %v748_v20 = vpop.f32.mrf.mxu0 }
 0x12a   : > { %1705 = vst [vmem:[%s1978_s8 + $0x38] sm:$0xff] %v1612_v18   ;;  %v940_v22 = vadd.f32 %v939_v59, %v806_v19  ;;  %v882_v23 = vpop.f32.mrf.mxu1  ;;  %v749_v27 = vadd.f32 %v1960_v61, %v748_v20 }
 0x12c   : > { %v1006_v25 = vmax.f32 %v940_v22, 0.0  ;;  %v883_v31 = vadd.f32 %v882_v23, %v749_v27 }
 0x12e   : > { %v1672_v26 = vpack.c.bf16 %v1006_v25, %v1005_v24  ;;  %v983_v36 = vmax.f32 %v883_v31, 0.0 }
 0x12f   : > { %v808_v29 = vpop.f32.mrf.mxu2 }
 0x130   : > { %1717 = vst [vmem:[%s1978_s8 + $0x98] sm:$0xff] %v1672_v26   ;;  %v947_v33 = vpop.f32.mrf.mxu3  ;;  %v809_v34 = vadd.f32 %v1960_v61, %v808_v29 }
 0x131   : > { %v750_v30 = vpop.f32.mrf.mxu0 }
 0x132   : > { %v751_v32 = vadd.f32 %v1960_v61, %v750_v30  ;;  %v884_v28 = vpop.f32.mrf.mxu1  ;;  %v943_v39 = vadd.f32 %v942_v6, %v809_v34 }
 0x134   : > { %v885_v35 = vadd.f32 %v884_v28, %v751_v32  ;;  %v1007_v45 = vmax.f32 %v943_v39, 0.0 }
 0x136   : > { %v984_v37 = vmax.f32 %v885_v35, 0.0 }
 0x137   : > { %v810_v38 = vpop.f32.mrf.mxu2 }
 0x138   : > { %v1617_v40 = vpack.c.bf16 %v984_v37, %v983_v36  ;;  %v811_v41 = vadd.f32 %v1960_v61, %v810_v38  ;;  %v949_v47 = vpop.f32.mrf.mxu3 }
 0x139   : > { %v753_v42 = vpop.f32.mrf.mxu0 }
 0x13a   : > { %1706 = vst [vmem:[%s1978_s8 + $0x40] sm:$0xff] %v1617_v40   ;;  %v945_v43 = vadd.f32 %v944_v21, %v811_v41  ;;  %v887_v44 = vpop.f32.mrf.mxu1  ;;  %v754_v49 = vadd.f32 %v1960_v61, %v753_v42 }
 0x13c   : > { %v1008_v46 = vmax.f32 %v945_v43, 0.0  ;;  %v888_v52 = vadd.f32 %v887_v44, %v754_v49 }
 0x13e   : > { %v1677_v48 = vpack.c.bf16 %v1008_v46, %v1007_v45  ;;  %v985_v57 = vmax.f32 %v888_v52, 0.0 }
 0x13f   : > { %v813_v50 = vpop.f32.mrf.mxu2 }
 0x140   : > { %1718 = vst [vmem:[%s1978_s8 + $0xa0] sm:$0xff] %v1677_v48   ;;  %v814_v55 = vadd.f32 %v1960_v61, %v813_v50  ;;  %v952_v60 = vpop.f32.mrf.mxu3 }
 0x141   : > { %v755_v51 = vpop.f32.mrf.mxu0 }
 0x142   : > { %v756_v53 = vadd.f32 %v1960_v61, %v755_v51  ;;  %v889_v54 = vpop.f32.mrf.mxu1  ;;  %v948_v62 = vadd.f32 %v947_v33, %v814_v55  ;;  %v769_v51 = vadd.f32 %v1960_v61, %v1963_v0 }
 0x144   : > { %v890_v56 = vadd.f32 %v889_v54, %v756_v53  ;;  %v1009_v5 = vmax.f32 %v948_v62, 0.0  ;;  %v771_v54 = vadd.f32 %v1960_v61, %v1980_v17 }
 0x146   : > { %v986_v58 = vmax.f32 %v890_v56, 0.0 }
 0x147   : > { %v815_v59 = vpop.f32.mrf.mxu2 }
 0x148   : > { %v1622_v1 = vpack.c.bf16 %v986_v58, %v985_v57  ;;  %v816_v63 = vadd.f32 %v1960_v61, %v815_v59  ;;  %v954_v11 = vpop.f32.mrf.mxu3 }
 0x149   : > { %v758_v2 = vpop.f32.mrf.mxu0 }
 0x14a   : > { %1707 = vst [vmem:[%s1978_s8 + $0x48] sm:$0xff] %v1622_v1   ;;  %v950_v3 = vadd.f32 %v949_v47, %v816_v63  ;;  %v892_v4 = vpop.f32.mrf.mxu1  ;;  %v759_v8 = vadd.f32 %v1960_v61, %v758_v2 }
 0x14c   : > { %v1010_v6 = vmax.f32 %v950_v3, 0.0  ;;  %v893_v12 = vadd.f32 %v892_v4, %v759_v8 }
 0x14e   : > { %v1682_v7 = vpack.c.bf16 %v1010_v6, %v1009_v5  ;;  %v987_v18 = vmax.f32 %v893_v12, 0.0 }
 0x14f   : > { %v818_v9 = vpop.f32.mrf.mxu2 }
 0x150   : > { %1719 = vst [vmem:[%s1978_s8 + $0xa8] sm:$0xff] %v1682_v7   ;;  %v819_v15 = vadd.f32 %v1960_v61, %v818_v9  ;;  %v957_v27 = vpop.f32.mrf.mxu3 }
 0x151   : > { %v760_v10 = vpop.f32.mrf.mxu0 }
 0x152   : > { %v761_v13 = vadd.f32 %v1960_v61, %v760_v10  ;;  %v894_v14 = vpop.f32.mrf.mxu1  ;;  %v953_v21 = vadd.f32 %v952_v60, %v819_v15 }
 0x154   : > { %v895_v16 = vadd.f32 %v894_v14, %v761_v13  ;;  %v1011_v29 = vmax.f32 %v953_v21, 0.0 }
 0x156   : > { %v988_v19 = vmax.f32 %v895_v16, 0.0 }
 0x157   : > { %v820_v20 = vpop.f32.mrf.mxu2 }
 0x158   : > { %v1627_v22 = vpack.c.bf16 %v988_v19, %v987_v18  ;;  %v821_v23 = vadd.f32 %v1960_v61, %v820_v20  ;;  %v959_v39 = vpop.f32.mrf.mxu3 }
 0x159   : > { %v763_v24 = vpop.f32.mrf.mxu0 }
 0x15a   : > { %1708 = vst [vmem:[%s1978_s8 + $0x50] sm:$0xff] %v1627_v22   ;;  %v955_v25 = vadd.f32 %v954_v11, %v821_v23  ;;  %v897_v26 = vpop.f32.mrf.mxu1  ;;  %v764_v32 = vadd.f32 %v1960_v61, %v763_v24 }
 0x15c   : > { %v1012_v30 = vmax.f32 %v955_v25, 0.0  ;;  %v898_v34 = vadd.f32 %v897_v26, %v764_v32 }
 0x15e   : > { %v1687_v31 = vpack.c.bf16 %v1012_v30, %v1011_v29  ;;  %v989_v40 = vmax.f32 %v898_v34, 0.0 }
 0x15f   : > { %v823_v28 = vpop.f32.mrf.mxu2 }
 0x160   : > { %1720 = vst [vmem:[%s1978_s8 + $0xb0] sm:$0xff] %v1687_v31   ;;  %v824_v37 = vadd.f32 %v1960_v61, %v823_v28  ;;  %v962_v52 = vpop.f32.mrf.mxu3 }
 0x161   : > { %v765_v33 = vpop.f32.mrf.mxu0 }
 0x162   : > { %v766_v35 = vadd.f32 %v1960_v61, %v765_v33  ;;  %v899_v36 = vpop.f32.mrf.mxu1  ;;  %v958_v43 = vadd.f32 %v957_v27, %v824_v37 }
 0x164   : > { %v900_v38 = vadd.f32 %v899_v36, %v766_v35  ;;  %v1013_v48 = vmax.f32 %v958_v43, 0.0 }
 0x166   : > { %v990_v41 = vmax.f32 %v900_v38, 0.0 }
 0x167   : > { %v825_v42 = vpop.f32.mrf.mxu2 }
 0x168   : > { %v1632_v44 = vpack.c.bf16 %v990_v41, %v989_v40  ;;  %v826_v45 = vadd.f32 %v1960_v61, %v825_v42  ;;  %v964_v0 = vpop.f32.mrf.mxu3 }
 0x16a   : > { %1709 = vst [vmem:[%s1978_s8 + $0x58] sm:$0xff] %v1632_v44   ;;  %v960_v46 = vadd.f32 %v959_v39, %v826_v45  ;;  %v902_v47 = vpop.f32.mrf.mxu1 }
 0x16b   : > { %v903_v55 = vadd.f32 %v902_v47, %v769_v51 }
 0x16c   : > { %v1014_v49 = vmax.f32 %v960_v46, 0.0 }
 0x16d   : > { %v991_v59 = vmax.f32 %v903_v55, 0.0 }
 0x16e   : > { %v1692_v50 = vpack.c.bf16 %v1014_v49, %v1013_v48 }
 0x16f   : > { %v828_v53 = vpop.f32.mrf.mxu2 }
 0x170   : > { %1721 = vst [vmem:[%s1978_s8 + $0xb8] sm:$0xff] %v1692_v50   ;;  %v829_v58 = vadd.f32 %v1960_v61, %v828_v53 }
 0x172   : > { %v904_v56 = vpop.f32.mrf.mxu1  ;;  %v963_v63 = vadd.f32 %v962_v52, %v829_v58 }
 0x173   : > { %v905_v57 = vadd.f32 %v904_v56, %v771_v54 }
 0x174   : > { %v1015_v4 = vmax.f32 %v963_v63, 0.0 }
 0x175   : > { %v992_v60 = vmax.f32 %v905_v57, 0.0 }
 0x177   : > { %v1637_v62 = vpack.c.bf16 %v992_v60, %v991_v59  ;;  %v830_v1 = vpop.f32.mrf.mxu2 }
 0x178   : > { %v831_v2 = vadd.f32 %v1960_v61, %v830_v1 }
 0x179   : > { %1710 = vst [vmem:[%s1978_s8 + $0x60] sm:$0xff] %v1637_v62  }
 0x17a   : > { %v965_v3 = vadd.f32 %v964_v0, %v831_v2 }
 0x17c   : > { %v1016_v5 = vmax.f32 %v965_v3, 0.0 }
 0x17e   : > { %v1697_v6 = vpack.c.bf16 %v1016_v5, %v1015_v4 }
 0x180   : > { %1722 = vst [vmem:[%s1978_s8 + $0xc0] sm:$0xff] %v1697_v6  }
 0x181 PF: > { %s13_s14 = sadd.s32 1, %s1786_s14   ;;  %s2090_s12 = smov %s1782_s13 }
 0x182   : > { %p10_p5 = scmp.ge.s32.totalorder %s13_s14, 10   ;;  %s2091_s13 = smov %s2093_s15 }
 0x184   :  { %12 = sbr.rel (!%p10_p5) target bundleno = 2 (0x2), region = 68 }

// kernel: model_d_forward.5
= control target key start
LH: loop header
LB: loop body
LE: loop exit
PB: predicated region body
PF: predicated region fallthrough
CT: control target
= control target key end

     0   :  { %s7519_s1 = inlined_call_operand.vmem [shape: bf16[1024,128], index: 1, kind: input, shape index: {}]   ;;  %s7520_s2 = inlined_call_operand.vmem [shape: f32[1,128], index: 2, kind: input, shape index: {}]   ;;  %s7521_s0 = inlined_call_operand.vmem [shape: bf16[512,1024], index: 0, kind: input, shape index: {}]   ;;  %s7522_s3 = inlined_call_operand.vmem [shape: bf16[512,128], index: 3, kind: output, shape index: {}]  }
   0x1   :  { %v5157_v0 = vld [vmem:[%s7519_s1 + $0x38] sm:$0xff]  ;;  %v5156_v4 = vld [vmem:[%s7519_s1 + $0x30] sm:$0xff]  ;;  %v5155_v8 = vld [vmem:[%s7519_s1 + $0x28] sm:$0xff] }
   0x2   :  { %v5165_v1 = vld [vmem:[%s7519_s1 + $0x78] sm:$0xff]  ;;  %2066 = vmatpush.bf16.msra.mxu0 %v5157_v0  ;;  %v5164_v5 = vld [vmem:[%s7519_s1 + $0x70] sm:$0xff]  ;;  %v5163_v9 = vld [vmem:[%s7519_s1 + $0x68] sm:$0xff] }
   0x3   :  { %v5173_v2 = vld [vmem:[%s7519_s1 + $0xb8] sm:$0xff]  ;;  %2235 = vmatpush.bf16.msra.mxu1 %v5165_v1  ;;  %v5172_v6 = vld [vmem:[%s7519_s1 + $0xb0] sm:$0xff]  ;;  %v5171_v10 = vld [vmem:[%s7519_s1 + $0xa8] sm:$0xff] }
   0x4   :  { %v5181_v3 = vld [vmem:[%s7519_s1 + $0xf8] sm:$0xff]  ;;  %2404 = vmatpush.bf16.msra.mxu2 %v5173_v2  ;;  %v5180_v7 = vld [vmem:[%s7519_s1 + $0xf0] sm:$0xff]  ;;  %v5179_v11 = vld [vmem:[%s7519_s1 + $0xe8] sm:$0xff] }
   0x5   :  { %2573 = vmatpush.bf16.msra.mxu3 %v5181_v3  ;;  %v5154_v12 = vld [vmem:[%s7519_s1 + $0x20] sm:$0xff]  ;;  %v5153_v16 = vld [vmem:[%s7519_s1 + $0x18] sm:$0xff]  ;;  %v5152_v20 = vld [vmem:[%s7519_s1 + $0x10] sm:$0xff] }
   0x6   :  { %2067 = vmatpush.bf16.msra.mxu0 %v5156_v4  ;;  %v5162_v13 = vld [vmem:[%s7519_s1 + $0x60] sm:$0xff]  ;;  %v5161_v17 = vld [vmem:[%s7519_s1 + $0x58] sm:$0xff]  ;;  %v5160_v21 = vld [vmem:[%s7519_s1 + $0x50] sm:$0xff] }
   0x7   :  { %2236 = vmatpush.bf16.msra.mxu1 %v5164_v5  ;;  %v5170_v14 = vld [vmem:[%s7519_s1 + $0xa0] sm:$0xff]  ;;  %v5169_v18 = vld [vmem:[%s7519_s1 + $0x98] sm:$0xff]  ;;  %v5168_v22 = vld [vmem:[%s7519_s1 + $0x90] sm:$0xff] }
   0x8   :  { %2405 = vmatpush.bf16.msra.mxu2 %v5172_v6  ;;  %v5178_v15 = vld [vmem:[%s7519_s1 + $0xe0] sm:$0xff]  ;;  %v5177_v19 = vld [vmem:[%s7519_s1 + $0xd8] sm:$0xff]  ;;  %v5176_v23 = vld [vmem:[%s7519_s1 + $0xd0] sm:$0xff] }
   0x9   :  { %2574 = vmatpush.bf16.msra.mxu3 %v5180_v7  ;;  %v5151_v24 = vld [vmem:[%s7519_s1 + $0x8] sm:$0xff]  ;;  %v5150_v28 = vld [vmem:[%s7519_s1] sm:$0xff]  ;;  %v5205_v40 = vld [vmem:[%s7519_s1 + $0x1b8] sm:$0xff] }
   0xa   :  { %2068 = vmatpush.bf16.msra.mxu0 %v5155_v8  ;;  %v5159_v25 = vld [vmem:[%s7519_s1 + $0x48] sm:$0xff]  ;;  %v5158_v29 = vld [vmem:[%s7519_s1 + $0x40] sm:$0xff]  ;;  %v5189_v41 = vld [vmem:[%s7519_s1 + $0x138] sm:$0xff] }
   0xb   :  { %2237 = vmatpush.bf16.msra.mxu1 %v5163_v9  ;;  %v5167_v26 = vld [vmem:[%s7519_s1 + $0x88] sm:$0xff]  ;;  %v5166_v30 = vld [vmem:[%s7519_s1 + $0x80] sm:$0xff]  ;;  %v5213_v46 = vld [vmem:[%s7519_s1 + $0x1f8] sm:$0xff] }
   0xc   :  { %2406 = vmatpush.bf16.msra.mxu2 %v5171_v10  ;;  %v5175_v27 = vld [vmem:[%s7519_s1 + $0xc8] sm:$0xff]  ;;  %v5174_v31 = vld [vmem:[%s7519_s1 + $0xc0] sm:$0xff]  ;;  %v5197_v47 = vld [vmem:[%s7519_s1 + $0x178] sm:$0xff] }
   0xd   :  { %2575 = vmatpush.bf16.msra.mxu3 %v5179_v11  ;;  %v3616_v32 = vld [vmem:[%s7521_s0] sm:$0xf]  ;;  %v4894_v34 = vld [vmem:[%s7521_s0 + $0x4] sm:$0xf]  ;;  %v3624_v36 = vld [vmem:[%s7521_s0 + $0x8] sm:$0xf] }
   0xe   :  { %2069 = vmatpush.bf16.msra.mxu0 %v5154_v12  ;;  %v4898_v33 = vld [vmem:[%s7521_s0 + $0x1c] sm:$0xf0]  ;;  %v3618_v35 = vld [vmem:[%s7521_s0 + $0x20] sm:$0xf0]  ;;  %v4899_v37 = vld [vmem:[%s7521_s0 + $0x24] sm:$0xf0] }
   0xf   :  { %2238 = vmatpush.bf16.msra.mxu1 %v5162_v13  ;;  %v4895_v38 = vld [vmem:[%s7521_s0 + $0xc] sm:$0xf]  ;;  %v3617_v42 = vor.u32 %v4898_v33, %v3616_v32  ;;  %v3621_v43 = vor.u32 %v4894_v34, %v3618_v35  ;;  %v3625_v44 = vor.u32 %v4899_v37, %v3624_v36  ;;  %v3648_v48 = vld [vmem:[%s7521_s0 + $0x40] sm:$0xf]  ;;  %v4902_v50 = vld [vmem:[%s7521_s0 + $0x44] sm:$0xf] }
  0x10   :  { %2407 = vmatpush.bf16.msra.mxu2 %v5170_v14  ;;  %v3626_v39 = vld [vmem:[%s7521_s0 + $0x28] sm:$0xf0]  ;;  %v4906_v49 = vld [vmem:[%s7521_s0 + $0x5c] sm:$0xf0]  ;;  %v3650_v51 = vld [vmem:[%s7521_s0 + $0x60] sm:$0xf0] }
  0x11   :  { %2576 = vmatpush.bf16.msra.mxu3 %v5178_v15  ;;  %v3629_v45 = vor.u32 %v4895_v38, %v3626_v39  ;;  %v3656_v52 = vld [vmem:[%s7521_s0 + $0x48] sm:$0xf]  ;;  %v4903_v54 = vld [vmem:[%s7521_s0 + $0x4c] sm:$0xf]  ;;  %v3649_v56 = vor.u32 %v4906_v49, %v3648_v48  ;;  %v3653_v57 = vor.u32 %v4902_v50, %v3650_v51  ;;  %v3680_v60 = vld [vmem:[%s7521_s0 + $0x80] sm:$0xf] }
  0x12   :  { %2070 = vmatpush.bf16.msra.mxu0 %v5153_v16  ;;  %v4907_v53 = vld [vmem:[%s7521_s0 + $0x64] sm:$0xf0]  ;;  %v3658_v55 = vld [vmem:[%s7521_s0 + $0x68] sm:$0xf0]  ;;  %v4914_v61 = vld [vmem:[%s7521_s0 + $0x9c] sm:$0xf0] }
  0x13   :  { %2239 = vmatpush.bf16.msra.mxu1 %v5161_v17  ;;  %v3657_v58 = vor.u32 %v4907_v53, %v3656_v52  ;;  %v3661_v59 = vor.u32 %v4903_v54, %v3658_v55  ;;  %v4910_v62 = vld [vmem:[%s7521_s0 + $0x84] sm:$0xf]  ;;  %v3688_v0 = vld [vmem:[%s7521_s0 + $0x88] sm:$0xf]  ;;  %v4911_v2 = vld [vmem:[%s7521_s0 + $0x8c] sm:$0xf]  ;;  %v3681_v4 = vor.u32 %v4914_v61, %v3680_v60 }
  0x14   :  { %2408 = vmatpush.bf16.msra.mxu2 %v5169_v18  ;;  %v3682_v63 = vld [vmem:[%s7521_s0 + $0xa0] sm:$0xf0]  ;;  %v4915_v1 = vld [vmem:[%s7521_s0 + $0xa4] sm:$0xf0]  ;;  %v3690_v3 = vld [vmem:[%s7521_s0 + $0xa8] sm:$0xf0] }
  0x15   :  { %2577 = vmatpush.bf16.msra.mxu3 %v5177_v19  ;;  %v3685_v5 = vor.u32 %v4910_v62, %v3682_v63  ;;  %v3689_v6 = vor.u32 %v4915_v1, %v3688_v0  ;;  %v3693_v7 = vor.u32 %v4911_v2, %v3690_v3  ;;  %v5204_v8 = vld [vmem:[%s7519_s1 + $0x1b0] sm:$0xff]  ;;  %v3712_v12 = vld [vmem:[%s7521_s0 + $0xc0] sm:$0xf]  ;;  %v4918_v14 = vld [vmem:[%s7521_s0 + $0xc4] sm:$0xf] }
  0x16   :  { %2071 = vmatpush.bf16.msra.mxu0 %v5152_v20  ;;  %v5188_v9 = vld [vmem:[%s7519_s1 + $0x130] sm:$0xff]  ;;  %v4922_v13 = vld [vmem:[%s7521_s0 + $0xdc] sm:$0xf0]  ;;  %v3714_v15 = vld [vmem:[%s7521_s0 + $0xe0] sm:$0xf0] }
  0x17   :  { %2240 = vmatpush.bf16.msra.mxu1 %v5160_v21  ;;  %v5212_v10 = vld [vmem:[%s7519_s1 + $0x1f0] sm:$0xff]  ;;  %v3720_v16 = vld [vmem:[%s7521_s0 + $0xc8] sm:$0xf]  ;;  %v4919_v18 = vld [vmem:[%s7521_s0 + $0xcc] sm:$0xf]  ;;  %v3713_v20 = vor.u32 %v4922_v13, %v3712_v12  ;;  %v3717_v21 = vor.u32 %v4918_v14, %v3714_v15 }
  0x18   :  { %2409 = vmatpush.bf16.msra.mxu2 %v5168_v22  ;;  %v5196_v11 = vld [vmem:[%s7519_s1 + $0x170] sm:$0xff]  ;;  %v4923_v17 = vld [vmem:[%s7521_s0 + $0xe4] sm:$0xf0]  ;;  %v3722_v19 = vld [vmem:[%s7521_s0 + $0xe8] sm:$0xf0] }
  0x19   :  { %2578 = vmatpush.bf16.msra.mxu3 %v5176_v23  ;;  %v3721_v22 = vor.u32 %v4923_v17, %v3720_v16  ;;  %v3725_v23 = vor.u32 %v4919_v18, %v3722_v19  ;;  %v3776_v36 = vld [vmem:[%s7521_s0 + $0x140] sm:$0xf]  ;;  %v4934_v38 = vld [vmem:[%s7521_s0 + $0x144] sm:$0xf]  ;;  %v3816_v52 = vld [vmem:[%s7521_s0 + $0x188] sm:$0xf] }
  0x1a   :  { %2072 = vmatpush.bf16.msra.mxu0 %v5151_v24  ;;  %v3744_v24 = vld [vmem:[%s7521_s0 + $0x100] sm:$0xf]  ;;  %v3778_v39 = vld [vmem:[%s7521_s0 + $0x160] sm:$0xf0]  ;;  %v4947_v53 = vld [vmem:[%s7521_s0 + $0x1a4] sm:$0xf0] }
  0x1b   :  { %2241 = vmatpush.bf16.msra.mxu1 %v5159_v25  ;;  %v4930_v25 = vld [vmem:[%s7521_s0 + $0x11c] sm:$0xf0]  ;;  %v4942_v50 = vld [vmem:[%s7521_s0 + $0x184] sm:$0xf]  ;;  %v4943_v54 = vld [vmem:[%s7521_s0 + $0x18c] sm:$0xf] }
  0x1c   :  { %2410 = vmatpush.bf16.msra.mxu2 %v5167_v26  ;;  %v4926_v26 = vld [vmem:[%s7521_s0 + $0x104] sm:$0xf]  ;;  %v3745_v32 = vor.u32 %v4930_v25, %v3744_v24  ;;  %v4938_v37 = vld [vmem:[%s7521_s0 + $0x15c] sm:$0xf0]  ;;  %v3818_v55 = vld [vmem:[%s7521_s0 + $0x1a8] sm:$0xf0] }
  0x1d   :  { %2579 = vmatpush.bf16.msra.mxu3 %v5175_v27  ;;  %v3746_v27 = vld [vmem:[%s7521_s0 + $0x120] sm:$0xf0]  ;;  %v3808_v48 = vld [vmem:[%s7521_s0 + $0x180] sm:$0xf]  ;;  %v5203_v60 = vld [vmem:[%s7519_s1 + $0x1a8] sm:$0xff] }
  0x1e   :  { %2073 = vmatpush.bf16.msra.mxu0 %v5150_v28  ;;  %v3752_v28 = vld [vmem:[%s7521_s0 + $0x108] sm:$0xf]  ;;  %v3749_v33 = vor.u32 %v4926_v26, %v3746_v27  ;;  %v4946_v49 = vld [vmem:[%s7521_s0 + $0x19c] sm:$0xf0]  ;;  %v3810_v51 = vld [vmem:[%s7521_s0 + $0x1a0] sm:$0xf0] }
  0x1f   :  { %2242 = vmatpush.bf16.msra.mxu1 %v5158_v29  ;;  %v4931_v29 = vld [vmem:[%s7521_s0 + $0x124] sm:$0xf0]  ;;  %v3840_v0 = vld [vmem:[%s7521_s0 + $0x1c0] sm:$0xf]  ;;  %v4950_v2 = vld [vmem:[%s7521_s0 + $0x1c4] sm:$0xf] }
  0x20   :  { %2411 = vmatpush.bf16.msra.mxu2 %v5166_v30  ;;  %v4927_v30 = vld [vmem:[%s7521_s0 + $0x10c] sm:$0xf]  ;;  %v3753_v34 = vor.u32 %v4931_v29, %v3752_v28  ;;  %v4954_v1 = vld [vmem:[%s7521_s0 + $0x1dc] sm:$0xf0]  ;;  %v3842_v3 = vld [vmem:[%s7521_s0 + $0x1e0] sm:$0xf0] }
  0x21   :  { %2580 = vmatpush.bf16.msra.mxu3 %v5174_v31  ;;  %2074 = vmatmul.bf16.vlgmr.msra.gmra.mxu0 %v3617_v42  ;;  %v3754_v31 = vld [vmem:[%s7521_s0 + $0x128] sm:$0xf0]  ;;  %v5755_v12 = vld [vmem:[%s7520_s2] ss:$0 sm:$0xff]  ;;  %v4958_v15 = vld [vmem:[%s7521_s0 + $0x204] sm:$0xf] }
  0x22   :  { %2742 = vmatpush.bf16.msrb.mxu0 %v5189_v41  ;;  %2243 = vmatmul.bf16.vlgmr.msra.gmra.mxu1 %v3621_v43  ;;  %v3757_v35 = vor.u32 %v4927_v30, %v3754_v31  ;;  %v4939_v41 = vld [vmem:[%s7521_s0 + $0x164] sm:$0xf0]  ;;  %v4935_v42 = vld [vmem:[%s7521_s0 + $0x14c] sm:$0xf]  ;;  %v3872_v13 = vld [vmem:[%s7521_s0 + $0x200] sm:$0xf] }
  0x23   :  { %2412 = vmatmul.bf16.vlgmr.msra.gmra.mxu2 %v3625_v44  ;;  %2911 = vmatpush.bf16.msrb.mxu1 %v5197_v47  ;;  %v3786_v43 = vld [vmem:[%s7521_s0 + $0x168] sm:$0xf0]  ;;  %v3777_v44 = vor.u32 %v4938_v37, %v3776_v36  ;;  %v4962_v14 = vld [vmem:[%s7521_s0 + $0x21c] sm:$0xf0]  ;;  %v3874_v16 = vld [vmem:[%s7521_s0 + $0x220] sm:$0xf0] }
  0x24   :  { %3080 = vmatpush.bf16.msrb.mxu2 %v5205_v40  ;;  %2581 = vmatmul.bf16.vlgmr.msra.gmra.mxu3 %v3629_v45  ;;  %v3784_v40 = vld [vmem:[%s7521_s0 + $0x148] sm:$0xf]  ;;  %v3781_v45 = vor.u32 %v4934_v38, %v3778_v39  ;;  %v3789_v47 = vor.u32 %v4935_v42, %v3786_v43  ;;  %v4959_v19 = vld [vmem:[%s7521_s0 + $0x20c] sm:$0xf]  ;;  %v3904_v37 = vld [vmem:[%s7521_s0 + $0x240] sm:$0xf] }
  0x25   :  { %3249 = vmatpush.bf16.msrb.mxu3 %v5213_v46  ;;  %v3785_v46 = vor.u32 %v4939_v41, %v3784_v40  ;;  %v5187_v61 = vld [vmem:[%s7519_s1 + $0x128] sm:$0xff]  ;;  %v4970_v38 = vld [vmem:[%s7521_s0 + $0x25c] sm:$0xf0]  ;;  %v4966_v39 = vld [vmem:[%s7521_s0 + $0x244] sm:$0xf] }
  0x26   :  { %2743 = vmatpush.bf16.msrb.mxu0 %v5188_v9  ;;  %v5211_v62 = vld [vmem:[%s7519_s1 + $0x1e8] sm:$0xff]  ;;  %v3845_v9 = vor.u32 %v4950_v2, %v3842_v3  ;;  %v3906_v40 = vld [vmem:[%s7521_s0 + $0x260] sm:$0xf0]  ;;  %v4978_v2 = vld [vmem:[%s7521_s0 + $0x29c] sm:$0xf0] }
  0x27   :  { %2912 = vmatpush.bf16.msrb.mxu1 %v5196_v11  ;;  %v5195_v63 = vld [vmem:[%s7519_s1 + $0x168] sm:$0xff]  ;;  %v4974_v3 = vld [vmem:[%s7521_s0 + $0x284] sm:$0xf] }
  0x28   :  { %3081 = vmatpush.bf16.msrb.mxu2 %v5204_v8  ;;  %v3841_v8 = vor.u32 %v4954_v1, %v3840_v0  ;;  %v3880_v17 = vld [vmem:[%s7521_s0 + $0x208] sm:$0xf]  ;;  %v4967_v43 = vld [vmem:[%s7521_s0 + $0x24c] sm:$0xf]  ;;  %v3936_v1 = vld [vmem:[%s7521_s0 + $0x280] sm:$0xf] }
  0x29   :  { %3250 = vmatpush.bf16.msrb.mxu3 %v5212_v10  ;;  %v4963_v18 = vld [vmem:[%s7521_s0 + $0x224] sm:$0xf0] }
  0x2a   :  { %2744 = vmatpush.bf16.msrb.mxu0 %v5187_v61  ;;  %v3881_v25 = vor.u32 %v4963_v18, %v3880_v17  ;;  %v3912_v41 = vld [vmem:[%s7521_s0 + $0x248] sm:$0xf] }
  0x2b   :  { %2913 = vmatpush.bf16.msrb.mxu1 %v5195_v63  ;;  %v4971_v42 = vld [vmem:[%s7521_s0 + $0x264] sm:$0xf0] }
  0x2c   :  { %3082 = vmatpush.bf16.msrb.mxu2 %v5203_v60 }
  0x2d   :  { %3251 = vmatpush.bf16.msrb.mxu3 %v5211_v62 }
  0x31   :  { %2079 = vmatmul.bf16.gmra.mxu0 %v3649_v56  ;;  %v3809_v56 = vor.u32 %v4946_v49, %v3808_v48  ;;  %v3909_v48 = vor.u32 %v4966_v39, %v3906_v40  ;;  %v3976_v39 = vld [vmem:[%s7521_s0 + $0x2c8] sm:$0xf] }
  0x32   :  { %2248 = vmatmul.bf16.gmra.mxu1 %v3653_v57  ;;  %v3813_v57 = vor.u32 %v4942_v50, %v3810_v51  ;;  %v4987_v40 = vld [vmem:[%s7521_s0 + $0x2e4] sm:$0xf0] }
  0x33   :  { %2417 = vmatmul.bf16.gmra.mxu2 %v3657_v58  ;;  %v3817_v58 = vor.u32 %v4947_v53, %v3816_v52  ;;  %v3913_v52 = vor.u32 %v4971_v42, %v3912_v41  ;;  %v4983_v41 = vld [vmem:[%s7521_s0 + $0x2cc] sm:$0xf] }
  0x34   :  { %2586 = vmatmul.bf16.gmra.mxu3 %v3661_v59  ;;  %v3821_v59 = vor.u32 %v4943_v54, %v3818_v55  ;;  %v3978_v42 = vld [vmem:[%s7521_s0 + $0x2e8] sm:$0xf0] }
  0x41   :  { %2084 = vmatmul.bf16.gmra.mxu0 %v3681_v4  ;;  %v3848_v4 = vld [vmem:[%s7521_s0 + $0x1c8] sm:$0xf] }
  0x42   :  { %2253 = vmatmul.bf16.gmra.mxu1 %v3685_v5  ;;  %v4955_v5 = vld [vmem:[%s7521_s0 + $0x1e4] sm:$0xf0] }
  0x43   :  { %2422 = vmatmul.bf16.gmra.mxu2 %v3689_v6  ;;  %v4951_v6 = vld [vmem:[%s7521_s0 + $0x1cc] sm:$0xf]  ;;  %v3849_v10 = vor.u32 %v4955_v5, %v3848_v4  ;;  %v3938_v4 = vld [vmem:[%s7521_s0 + $0x2a0] sm:$0xf0]  ;;  %v3944_v5 = vld [vmem:[%s7521_s0 + $0x288] sm:$0xf] }
  0x44   :  { %2591 = vmatmul.bf16.gmra.mxu3 %v3693_v7  ;;  %v3850_v7 = vld [vmem:[%s7521_s0 + $0x1e8] sm:$0xf0] }
  0x45   :  { %v3853_v11 = vor.u32 %v4951_v6, %v3850_v7  ;;  %v4979_v6 = vld [vmem:[%s7521_s0 + $0x2a4] sm:$0xf0]  ;;  %v4975_v7 = vld [vmem:[%s7521_s0 + $0x28c] sm:$0xf] }
  0x46   :  { %v3945_v17 = vor.u32 %v4979_v6, %v3944_v5  ;;  %v4008_v5 = vld [vmem:[%s7521_s0 + $0x308] sm:$0xf] }
  0x47   :  { %v4995_v6 = vld [vmem:[%s7521_s0 + $0x324] sm:$0xf0] }
  0x51   :  { %2089 = vmatmul.bf16.gmra.mxu0 %v3713_v20  ;;  %v3882_v20 = vld [vmem:[%s7521_s0 + $0x228] sm:$0xf0] }
  0x52   :  { %2258 = vmatmul.bf16.gmra.mxu1 %v3717_v21  ;;  %v3873_v21 = vor.u32 %v4962_v14, %v3872_v13  ;;  %v3885_v26 = vor.u32 %v4959_v19, %v3882_v20  ;;  %v3941_v13 = vor.u32 %v4974_v3, %v3938_v4  ;;  %v4990_v3 = vld [vmem:[%s7521_s0 + $0x304] sm:$0xf] }
  0x53   :  { %2427 = vmatmul.bf16.gmra.mxu2 %v3721_v22  ;;  %v3877_v22 = vor.u32 %v4958_v15, %v3874_v16  ;;  %v4002_v4 = vld [vmem:[%s7521_s0 + $0x320] sm:$0xf0] }
  0x54   :  { %2596 = vmatmul.bf16.gmra.mxu3 %v3725_v23 }
  0x61   :  { %2094 = vmatmul.bf16.gmra.mxu0 %v3745_v32 }
  0x62   :  { %2263 = vmatmul.bf16.gmra.mxu1 %v3749_v33 }
  0x63   :  { %2432 = vmatmul.bf16.gmra.mxu2 %v3753_v34 }
  0x64   :  { %2601 = vmatmul.bf16.gmra.mxu3 %v3757_v35 }
  0x71   :  { %2099 = vmatmul.bf16.gmra.mxu0 %v3777_v44  ;;  %v3914_v44 = vld [vmem:[%s7521_s0 + $0x268] sm:$0xf0] }
  0x72   :  { %2268 = vmatmul.bf16.gmra.mxu1 %v3781_v45  ;;  %v3917_v53 = vor.u32 %v4967_v43, %v3914_v44 }
  0x73   :  { %2437 = vmatmul.bf16.gmra.mxu2 %v3785_v46 }
  0x74   :  { %2606 = vmatmul.bf16.gmra.mxu3 %v3789_v47  ;;  %v3905_v47 = vor.u32 %v4970_v38, %v3904_v37  ;;  %v4982_v37 = vld [vmem:[%s7521_s0 + $0x2c4] sm:$0xf] }
  0x75   :  { %v3970_v38 = vld [vmem:[%s7521_s0 + $0x2e0] sm:$0xf0] }
  0x81   :  { %2104 = vmatmul.bf16.gmra.mxu0 %v3809_v56 }
  0x82   :  { %2273 = vmatmul.bf16.gmra.mxu1 %v3813_v57 }
  0x83   :  { %2442 = vmatmul.bf16.gmra.mxu2 %v3817_v58 }
  0x84   :  { %2611 = vmatmul.bf16.gmra.mxu3 %v3821_v59 }
  0x91   :  { %2109 = vmatmul.bf16.gmra.mxu0 %v3841_v8  ;;  %v3946_v8 = vld [vmem:[%s7521_s0 + $0x2a8] sm:$0xf0] }
  0x92   :  { %2278 = vmatmul.bf16.gmra.mxu1 %v3845_v9  ;;  %v3949_v18 = vor.u32 %v4975_v7, %v3946_v8  ;;  %v4991_v7 = vld [vmem:[%s7521_s0 + $0x30c] sm:$0xf] }
  0x93   :  { %2447 = vmatmul.bf16.gmra.mxu2 %v3849_v10  ;;  %v4010_v8 = vld [vmem:[%s7521_s0 + $0x328] sm:$0xf0] }
  0x94   :  { %2616 = vmatmul.bf16.gmra.mxu3 %v3853_v11  ;;  %v3937_v11 = vor.u32 %v4978_v2, %v3936_v1  ;;  %v4000_v1 = vld [vmem:[%s7521_s0 + $0x300] sm:$0xf] }
  0x95   :  { %v4994_v2 = vld [vmem:[%s7521_s0 + $0x31c] sm:$0xf0] }
  0x9e   :  { %v2075_v23 = vpop.f32.mrf.mxu0 }
  0x9f   :  { %v2244_v24 = vpop.f32.mrf.mxu1  ;;  %v2076_v27 = vadd.f32 %v5755_v12, %v2075_v23  ;;  %v5186_v23 = vld [vmem:[%s7519_s1 + $0x120] sm:$0xff] }
  0xa0   :  { %2745 = vmatpush.bf16.msrb.mxu0 %v5186_v23 }
  0xa1   :  { %v2245_v28 = vadd.f32 %v2244_v24, %v2076_v27  ;;  %2114 = vmatmul.bf16.gmra.mxu0 %v3873_v21  ;;  %v5210_v24 = vld [vmem:[%s7519_s1 + $0x1e0] sm:$0xff] }
  0xa2   :  { %2283 = vmatmul.bf16.gmra.mxu1 %v3877_v22  ;;  %v5202_v22 = vld [vmem:[%s7519_s1 + $0x1a0] sm:$0xff]  ;;  %3252 = vmatpush.bf16.msrb.mxu3 %v5210_v24 }
  0xa3   :  { %2452 = vmatmul.bf16.gmra.mxu2 %v3881_v25 }
  0xa4   :  { %2621 = vmatmul.bf16.gmra.mxu3 %v3885_v26  ;;  %3083 = vmatpush.bf16.msrb.mxu2 %v5202_v22 }
  0xa6   :  { %v2413_v29 = vpop.f32.mrf.mxu2  ;;  %v2077_v32 = vpop.f32.mrf.mxu0 }
  0xa7   :  { %v2582_v30 = vpop.f32.mrf.mxu3  ;;  %v2414_v31 = vadd.f32 %v2413_v29, %v2245_v28  ;;  %v2246_v33 = vpop.f32.mrf.mxu1  ;;  %v2078_v34 = vadd.f32 %v5755_v12, %v2077_v32  ;;  %v5194_v32 = vld [vmem:[%s7519_s1 + $0x160] sm:$0xff] }
  0xa8   :  { %2914 = vmatpush.bf16.msrb.mxu1 %v5194_v32  ;;  %v4032_v32 = vld [vmem:[%s7521_s0 + $0x340] sm:$0xf] }
  0xa9   :  { %v5783_v35 = vadd.f32 %v2582_v30, %v2414_v31  ;;  %v2247_v36 = vadd.f32 %v2246_v33, %v2078_v34  ;;  %v3968_v34 = vld [vmem:[%s7521_s0 + $0x2c0] sm:$0xf] }
  0xae   :  { %v2415_v45 = vpop.f32.mrf.mxu2  ;;  %v2080_v50 = vpop.f32.mrf.mxu0 }
  0xaf   :  { %v2584_v46 = vpop.f32.mrf.mxu3  ;;  %v2416_v49 = vadd.f32 %v2415_v45, %v2247_v36  ;;  %v2249_v51 = vpop.f32.mrf.mxu1  ;;  %v2081_v54 = vadd.f32 %v5755_v12, %v2080_v50  ;;  %v4986_v36 = vld [vmem:[%s7521_s0 + $0x2dc] sm:$0xf0]  ;;  %v3977_v50 = vor.u32 %v4987_v40, %v3976_v39  ;;  %v4999_v39 = vld [vmem:[%s7521_s0 + $0x34c] sm:$0xf] }
  0xb0   :  { %v3969_v45 = vor.u32 %v4986_v36, %v3968_v34  ;;  %v4998_v34 = vld [vmem:[%s7521_s0 + $0x344] sm:$0xf]  ;;  %v4042_v40 = vld [vmem:[%s7521_s0 + $0x368] sm:$0xf0] }
  0xb1   :  { %v5810_v55 = vadd.f32 %v2584_v46, %v2416_v49  ;;  %v2250_v56 = vadd.f32 %v2249_v51, %v2081_v54  ;;  %2119 = vmatmul.bf16.gmra.mxu0 %v3905_v47  ;;  %v3973_v46 = vor.u32 %v4982_v37, %v3970_v38  ;;  %v3981_v51 = vor.u32 %v4983_v41, %v3978_v42  ;;  %v4034_v36 = vld [vmem:[%s7521_s0 + $0x360] sm:$0xf0]  ;;  %v4040_v37 = vld [vmem:[%s7521_s0 + $0x348] sm:$0xf] }
  0xb2   :  { %2288 = vmatmul.bf16.gmra.mxu1 %v3909_v48  ;;  %v5003_v38 = vld [vmem:[%s7521_s0 + $0x364] sm:$0xf0] }
  0xb3   :  { %2457 = vmatmul.bf16.gmra.mxu2 %v3913_v52 }
  0xb4   :  { %2626 = vmatmul.bf16.gmra.mxu3 %v3917_v53 }
  0xb6   :  { %v2418_v57 = vpop.f32.mrf.mxu2  ;;  %v2082_v60 = vpop.f32.mrf.mxu0 }
  0xb7   :  { %v2587_v58 = vpop.f32.mrf.mxu3  ;;  %v2419_v59 = vadd.f32 %v2418_v57, %v2250_v56  ;;  %v2251_v61 = vpop.f32.mrf.mxu1  ;;  %v2083_v62 = vadd.f32 %v5755_v12, %v2082_v60 }
  0xb9   :  { %v5813_v63 = vadd.f32 %v2587_v58, %v2419_v59  ;;  %v2252_v0 = vadd.f32 %v2251_v61, %v2083_v62 }
  0xbe   :  { %v2420_v9 = vpop.f32.mrf.mxu2  ;;  %v2085_v15 = vpop.f32.mrf.mxu0 }
  0xbf   :  { %v2589_v10 = vpop.f32.mrf.mxu3  ;;  %v2421_v14 = vadd.f32 %v2420_v9, %v2252_v0  ;;  %v2254_v16 = vpop.f32.mrf.mxu1  ;;  %v2086_v19 = vadd.f32 %v5755_v12, %v2085_v15 }
  0xc1   :  { %v5840_v20 = vadd.f32 %v2589_v10, %v2421_v14  ;;  %v2255_v21 = vadd.f32 %v2254_v16, %v2086_v19  ;;  %2124 = vmatmul.bf16.gmra.mxu0 %v3937_v11  ;;  %v4001_v11 = vor.u32 %v4994_v2, %v4000_v1  ;;  %v4064_v1 = vld [vmem:[%s7521_s0 + $0x380] sm:$0xf] }
  0xc2   :  { %2293 = vmatmul.bf16.gmra.mxu1 %v3941_v13  ;;  %v4005_v13 = vor.u32 %v4990_v3, %v4002_v4  ;;  %v5010_v2 = vld [vmem:[%s7521_s0 + $0x39c] sm:$0xf0]  ;;  %v5006_v3 = vld [vmem:[%s7521_s0 + $0x384] sm:$0xf] }
  0xc3   :  { %2462 = vmatmul.bf16.gmra.mxu2 %v3945_v17  ;;  %v4009_v17 = vor.u32 %v4995_v6, %v4008_v5  ;;  %v4066_v4 = vld [vmem:[%s7521_s0 + $0x3a0] sm:$0xf0]  ;;  %v4072_v5 = vld [vmem:[%s7521_s0 + $0x388] sm:$0xf] }
  0xc4   :  { %2631 = vmatmul.bf16.gmra.mxu3 %v3949_v18  ;;  %v4013_v18 = vor.u32 %v4991_v7, %v4010_v8  ;;  %v5011_v6 = vld [vmem:[%s7521_s0 + $0x3a4] sm:$0xf0]  ;;  %v5007_v7 = vld [vmem:[%s7521_s0 + $0x38c] sm:$0xf] }
  0xc5   :  { %v4074_v8 = vld [vmem:[%s7521_s0 + $0x3a8] sm:$0xf0] }
  0xc6   :  { %v2423_v25 = vpop.f32.mrf.mxu2  ;;  %v2087_v28 = vpop.f32.mrf.mxu0 }
  0xc7   :  { %v2592_v26 = vpop.f32.mrf.mxu3  ;;  %v2424_v27 = vadd.f32 %v2423_v25, %v2255_v21  ;;  %v2256_v29 = vpop.f32.mrf.mxu1  ;;  %v2088_v30 = vadd.f32 %v5755_v12, %v2087_v28 }
  0xc9   :  { %v5852_v31 = vadd.f32 %v2592_v26, %v2424_v27  ;;  %v2257_v33 = vadd.f32 %v2256_v29, %v2088_v30 }
  0xce   :  { %v2425_v43 = vpop.f32.mrf.mxu2  ;;  %v2090_v48 = vpop.f32.mrf.mxu0 }
  0xcf   :  { %v2594_v44 = vpop.f32.mrf.mxu3  ;;  %v2426_v47 = vadd.f32 %v2425_v43, %v2257_v33  ;;  %v2259_v49 = vpop.f32.mrf.mxu1  ;;  %v2091_v52 = vadd.f32 %v5755_v12, %v2090_v48  ;;  %v5002_v33 = vld [vmem:[%s7521_s0 + $0x35c] sm:$0xf0]  ;;  %v4041_v48 = vor.u32 %v5003_v38, %v4040_v37  ;;  %v5193_v37 = vld [vmem:[%s7519_s1 + $0x158] sm:$0xff] }
  0xd0   :  { %v4033_v43 = vor.u32 %v5002_v33, %v4032_v32  ;;  %2915 = vmatpush.bf16.msrb.mxu1 %v5193_v37 }
  0xd1   :  { %v5882_v53 = vadd.f32 %v2594_v44, %v2426_v47  ;;  %v2260_v54 = vadd.f32 %v2259_v49, %v2091_v52  ;;  %2129 = vmatmul.bf16.gmra.mxu0 %v3969_v45  ;;  %v4037_v44 = vor.u32 %v4998_v34, %v4034_v36  ;;  %v4045_v49 = vor.u32 %v4999_v39, %v4042_v40  ;;  %v4096_v39 = vld [vmem:[%s7521_s0 + $0x3c0] sm:$0xf] }
  0xd2   :  { %2298 = vmatmul.bf16.gmra.mxu1 %v3973_v46  ;;  %v5018_v40 = vld [vmem:[%s7521_s0 + $0x3dc] sm:$0xf0] }
  0xd3   :  { %2467 = vmatmul.bf16.gmra.mxu2 %v3977_v50 }
  0xd4   :  { %2636 = vmatmul.bf16.gmra.mxu3 %v3981_v51 }
  0xd6   :  { %v2428_v56 = vpop.f32.mrf.mxu2  ;;  %v2092_v59 = vpop.f32.mrf.mxu0 }
  0xd7   :  { %v2597_v57 = vpop.f32.mrf.mxu3  ;;  %v2429_v58 = vadd.f32 %v2428_v56, %v2260_v54  ;;  %v2261_v60 = vpop.f32.mrf.mxu1  ;;  %v2093_v61 = vadd.f32 %v5755_v12, %v2092_v59 }
  0xd9   :  { %v5885_v62 = vadd.f32 %v2597_v57, %v2429_v58  ;;  %v2262_v0 = vadd.f32 %v2261_v60, %v2093_v61 }
  0xde   :  { %v2430_v9 = vpop.f32.mrf.mxu2  ;;  %v2095_v15 = vpop.f32.mrf.mxu0 }
  0xdf   :  { %v2599_v10 = vpop.f32.mrf.mxu3  ;;  %v2431_v14 = vadd.f32 %v2430_v9, %v2262_v0  ;;  %v2264_v16 = vpop.f32.mrf.mxu1  ;;  %v2096_v19 = vadd.f32 %v5755_v12, %v2095_v15 }
  0xe1   :  { %v5912_v21 = vadd.f32 %v2599_v10, %v2431_v14  ;;  %v2265_v22 = vadd.f32 %v2264_v16, %v2096_v19  ;;  %2134 = vmatmul.bf16.gmra.mxu0 %v4001_v11  ;;  %v4065_v11 = vor.u32 %v5010_v2, %v4064_v1 }
  0xe2   :  { %2303 = vmatmul.bf16.gmra.mxu1 %v4005_v13  ;;  %v4069_v13 = vor.u32 %v5006_v3, %v4066_v4 }
  0xe3   :  { %2472 = vmatmul.bf16.gmra.mxu2 %v4009_v17  ;;  %v4073_v17 = vor.u32 %v5011_v6, %v4072_v5 }
  0xe4   :  { %2641 = vmatmul.bf16.gmra.mxu3 %v4013_v18  ;;  %v4077_v18 = vor.u32 %v5007_v7, %v4074_v8 }
  0xe6   :  { %v2433_v23 = vpop.f32.mrf.mxu2  ;;  %v2097_v26 = vpop.f32.mrf.mxu0 }
  0xe7   :  { %v2602_v24 = vpop.f32.mrf.mxu3  ;;  %v2434_v25 = vadd.f32 %v2433_v23, %v2265_v22  ;;  %v2266_v27 = vpop.f32.mrf.mxu1  ;;  %v2098_v28 = vadd.f32 %v5755_v12, %v2097_v26  ;;  %v5209_v26 = vld [vmem:[%s7519_s1 + $0x1d8] sm:$0xff] }
  0xe8   :  { %3253 = vmatpush.bf16.msrb.mxu3 %v5209_v26 }
  0xe9   :  { %v5915_v29 = vadd.f32 %v2602_v24, %v2434_v25  ;;  %v2267_v30 = vadd.f32 %v2266_v27, %v2098_v28  ;;  %v5201_v24 = vld [vmem:[%s7519_s1 + $0x198] sm:$0xff] }
  0xea   :  { %v5185_v25 = vld [vmem:[%s7519_s1 + $0x118] sm:$0xff]  ;;  %3084 = vmatpush.bf16.msrb.mxu2 %v5201_v24 }
  0xeb   :  { %2746 = vmatpush.bf16.msrb.mxu0 %v5185_v25 }
  0xee   :  { %v2435_v41 = vpop.f32.mrf.mxu2  ;;  %v2100_v46 = vpop.f32.mrf.mxu0 }
  0xef   :  { %v2604_v42 = vpop.f32.mrf.mxu3  ;;  %v2436_v45 = vadd.f32 %v2435_v41, %v2267_v30  ;;  %v2269_v47 = vpop.f32.mrf.mxu1  ;;  %v2101_v50 = vadd.f32 %v5755_v12, %v2100_v46  ;;  %v5014_v41 = vld [vmem:[%s7521_s0 + $0x3c4] sm:$0xf]  ;;  %v4106_v46 = vld [vmem:[%s7521_s0 + $0x3e8] sm:$0xf0] }
  0xf1   :  { %v5942_v51 = vadd.f32 %v2604_v42, %v2436_v45  ;;  %v2270_v52 = vadd.f32 %v2269_v47, %v2101_v50  ;;  %2139 = vmatmul.bf16.gmra.mxu0 %v4033_v43  ;;  %v4098_v42 = vld [vmem:[%s7521_s0 + $0x3e0] sm:$0xf0]  ;;  %v4104_v43 = vld [vmem:[%s7521_s0 + $0x3c8] sm:$0xf]  ;;  %v5015_v45 = vld [vmem:[%s7521_s0 + $0x3cc] sm:$0xf] }
  0xf2   :  { %2308 = vmatmul.bf16.gmra.mxu1 %v4037_v44  ;;  %v5019_v44 = vld [vmem:[%s7521_s0 + $0x3e4] sm:$0xf0]  ;;  %v4101_v50 = vor.u32 %v5014_v41, %v4098_v42 }
  0xf3   :  { %2477 = vmatmul.bf16.gmra.mxu2 %v4041_v48 }
  0xf4   :  { %2646 = vmatmul.bf16.gmra.mxu3 %v4045_v49  ;;  %v4097_v49 = vor.u32 %v5018_v40, %v4096_v39 }
  0xf6   :  { %v2438_v54 = vpop.f32.mrf.mxu2  ;;  %v2102_v58 = vpop.f32.mrf.mxu0 }
  0xf7   :  { %v2607_v56 = vpop.f32.mrf.mxu3  ;;  %v2439_v57 = vadd.f32 %v2438_v54, %v2270_v52  ;;  %v2271_v59 = vpop.f32.mrf.mxu1  ;;  %v2103_v60 = vadd.f32 %v5755_v12, %v2102_v58  ;;  %v4109_v58 = vor.u32 %v5015_v45, %v4106_v46  ;;  %v4160_v45 = vld [vmem:[%s7521_s0 + $0x440] sm:$0xf] }
  0xf8   :  { %v5034_v46 = vld [vmem:[%s7521_s0 + $0x45c] sm:$0xf0] }
  0xf9   :  { %v5945_v61 = vadd.f32 %v2607_v56, %v2439_v57  ;;  %v2272_v0 = vadd.f32 %v2271_v59, %v2103_v60  ;;  %v4105_v57 = vor.u32 %v5019_v44, %v4104_v43 }
  0xfe   :  { %v2440_v9 = vpop.f32.mrf.mxu2  ;;  %v2105_v15 = vpop.f32.mrf.mxu0 }
  0xff   :  { %v2609_v10 = vpop.f32.mrf.mxu3  ;;  %v2441_v14 = vadd.f32 %v2440_v9, %v2272_v0  ;;  %v2274_v16 = vpop.f32.mrf.mxu1  ;;  %v2106_v19 = vadd.f32 %v5755_v12, %v2105_v15  ;;  %v4128_v9 = vld [vmem:[%s7521_s0 + $0x400] sm:$0xf]  ;;  %v5027_v15 = vld [vmem:[%s7521_s0 + $0x424] sm:$0xf0] }
 0x101   :  { %v5972_v22 = vadd.f32 %v2609_v10, %v2441_v14  ;;  %v2275_v23 = vadd.f32 %v2274_v16, %v2106_v19  ;;  %2144 = vmatmul.bf16.gmra.mxu0 %v4065_v11  ;;  %v5026_v10 = vld [vmem:[%s7521_s0 + $0x41c] sm:$0xf0]  ;;  %v5022_v11 = vld [vmem:[%s7521_s0 + $0x404] sm:$0xf]  ;;  %v4136_v14 = vld [vmem:[%s7521_s0 + $0x408] sm:$0xf] }
 0x102   :  { %2313 = vmatmul.bf16.gmra.mxu1 %v4069_v13  ;;  %v4130_v13 = vld [vmem:[%s7521_s0 + $0x420] sm:$0xf0]  ;;  %v5023_v16 = vld [vmem:[%s7521_s0 + $0x40c] sm:$0xf] }
 0x103   :  { %2482 = vmatmul.bf16.gmra.mxu2 %v4073_v17  ;;  %v4138_v17 = vld [vmem:[%s7521_s0 + $0x428] sm:$0xf0]  ;;  %v4133_v24 = vor.u32 %v5022_v11, %v4130_v13 }
 0x104   :  { %2651 = vmatmul.bf16.gmra.mxu3 %v4077_v18 }
 0x106   :  { %v2443_v27 = vpop.f32.mrf.mxu2  ;;  %v2107_v32 = vpop.f32.mrf.mxu0 }
 0x107   :  { %v2612_v28 = vpop.f32.mrf.mxu3  ;;  %v2444_v30 = vadd.f32 %v2443_v27, %v2275_v23  ;;  %v2276_v33 = vpop.f32.mrf.mxu1  ;;  %v2108_v34 = vadd.f32 %v5755_v12, %v2107_v32  ;;  %v4129_v23 = vor.u32 %v5026_v10, %v4128_v9 }
 0x109   :  { %v5984_v36 = vadd.f32 %v2612_v28, %v2444_v30  ;;  %v2277_v38 = vadd.f32 %v2276_v33, %v2108_v34  ;;  %v4137_v28 = vor.u32 %v5027_v15, %v4136_v14  ;;  %v4141_v30 = vor.u32 %v5023_v16, %v4138_v17 }
 0x10e   :  { %v2445_v47 = vpop.f32.mrf.mxu2  ;;  %v2110_v54 = vpop.f32.mrf.mxu0 }
 0x10f   :  { %v2614_v48 = vpop.f32.mrf.mxu3  ;;  %v2446_v52 = vadd.f32 %v2445_v47, %v2277_v38  ;;  %v2279_v56 = vpop.f32.mrf.mxu1  ;;  %v2111_v59 = vadd.f32 %v5755_v12, %v2110_v54  ;;  %v5030_v47 = vld [vmem:[%s7521_s0 + $0x444] sm:$0xf]  ;;  %v4170_v54 = vld [vmem:[%s7521_s0 + $0x468] sm:$0xf0] }
 0x111   :  { %v6014_v60 = vadd.f32 %v2614_v48, %v2446_v52  ;;  %v2280_v0 = vadd.f32 %v2279_v56, %v2111_v59  ;;  %2149 = vmatmul.bf16.gmra.mxu0 %v4097_v49  ;;  %v4162_v48 = vld [vmem:[%s7521_s0 + $0x460] sm:$0xf0]  ;;  %v4168_v49 = vld [vmem:[%s7521_s0 + $0x448] sm:$0xf]  ;;  %v5031_v52 = vld [vmem:[%s7521_s0 + $0x44c] sm:$0xf] }
 0x112   :  { %2318 = vmatmul.bf16.gmra.mxu1 %v4101_v50  ;;  %v5035_v50 = vld [vmem:[%s7521_s0 + $0x464] sm:$0xf0]  ;;  %v4165_v59 = vor.u32 %v5030_v47, %v4162_v48  ;;  %v5200_v47 = vld [vmem:[%s7519_s1 + $0x190] sm:$0xff] }
 0x113   :  { %2487 = vmatmul.bf16.gmra.mxu2 %v4105_v57  ;;  %v5184_v48 = vld [vmem:[%s7519_s1 + $0x110] sm:$0xff] }
 0x114   :  { %2656 = vmatmul.bf16.gmra.mxu3 %v4109_v58  ;;  %v4161_v58 = vor.u32 %v5034_v46, %v4160_v45  ;;  %3085 = vmatpush.bf16.msrb.mxu2 %v5200_v47  ;;  %v4258_v47 = vld [vmem:[%s7521_s0 + $0x520] sm:$0xf0] }
 0x115   :  { %2747 = vmatpush.bf16.msrb.mxu0 %v5184_v48  ;;  %v4264_v48 = vld [vmem:[%s7521_s0 + $0x508] sm:$0xf] }
 0x116   :  { %v2448_v1 = vpop.f32.mrf.mxu2  ;;  %v2112_v4 = vpop.f32.mrf.mxu0 }
 0x117   :  { %v2617_v2 = vpop.f32.mrf.mxu3  ;;  %v2449_v3 = vadd.f32 %v2448_v1, %v2280_v0  ;;  %v2281_v5 = vpop.f32.mrf.mxu1  ;;  %v2113_v6 = vadd.f32 %v5755_v12, %v2112_v4  ;;  %v4173_v4 = vor.u32 %v5031_v52, %v4170_v54 }
 0x119   :  { %v6017_v7 = vadd.f32 %v2617_v2, %v2449_v3  ;;  %v2282_v8 = vadd.f32 %v2281_v5, %v2113_v6  ;;  %v4169_v3 = vor.u32 %v5035_v50, %v4168_v49  ;;  %v5208_v49 = vld [vmem:[%s7519_s1 + $0x1d0] sm:$0xff] }
 0x11a   :  { %3254 = vmatpush.bf16.msrb.mxu3 %v5208_v49  ;;  %v5059_v49 = vld [vmem:[%s7521_s0 + $0x524] sm:$0xf0] }
 0x11e   :  { %v2450_v18 = vpop.f32.mrf.mxu2  ;;  %v2115_v26 = vpop.f32.mrf.mxu0 }
 0x11f   :  { %v2619_v19 = vpop.f32.mrf.mxu3  ;;  %v2451_v25 = vadd.f32 %v2450_v18, %v2282_v8  ;;  %v2284_v27 = vpop.f32.mrf.mxu1  ;;  %v2116_v32 = vadd.f32 %v5755_v12, %v2115_v26  ;;  %v4192_v18 = vld [vmem:[%s7521_s0 + $0x480] sm:$0xf]  ;;  %v5043_v26 = vld [vmem:[%s7521_s0 + $0x4a4] sm:$0xf0] }
 0x121   :  { %v6044_v33 = vadd.f32 %v2619_v19, %v2451_v25  ;;  %v2285_v34 = vadd.f32 %v2284_v27, %v2116_v32  ;;  %2154 = vmatmul.bf16.gmra.mxu0 %v4129_v23  ;;  %v5042_v19 = vld [vmem:[%s7521_s0 + $0x49c] sm:$0xf0]  ;;  %v5038_v23 = vld [vmem:[%s7521_s0 + $0x484] sm:$0xf]  ;;  %v4200_v25 = vld [vmem:[%s7521_s0 + $0x488] sm:$0xf] }
 0x122   :  { %2323 = vmatmul.bf16.gmra.mxu1 %v4133_v24  ;;  %v4194_v24 = vld [vmem:[%s7521_s0 + $0x4a0] sm:$0xf0]  ;;  %v5039_v27 = vld [vmem:[%s7521_s0 + $0x48c] sm:$0xf] }
 0x123   :  { %2492 = vmatmul.bf16.gmra.mxu2 %v4137_v28  ;;  %v4202_v28 = vld [vmem:[%s7521_s0 + $0x4a8] sm:$0xf0] }
 0x124   :  { %2661 = vmatmul.bf16.gmra.mxu3 %v4141_v30 }
 0x126   :  { %v2453_v37 = vpop.f32.mrf.mxu2  ;;  %v2117_v40 = vpop.f32.mrf.mxu0 }
 0x127   :  { %v2622_v38 = vpop.f32.mrf.mxu3  ;;  %v2454_v39 = vadd.f32 %v2453_v37, %v2285_v34  ;;  %v2286_v41 = vpop.f32.mrf.mxu1  ;;  %v2118_v42 = vadd.f32 %v5755_v12, %v2117_v40  ;;  %v4193_v34 = vor.u32 %v5042_v19, %v4192_v18  ;;  %v4197_v37 = vor.u32 %v5038_v23, %v4194_v24 }
 0x129   :  { %v6047_v43 = vadd.f32 %v2622_v38, %v2454_v39  ;;  %v2287_v44 = vadd.f32 %v2286_v41, %v2118_v42  ;;  %v4201_v41 = vor.u32 %v5043_v26, %v4200_v25  ;;  %v4205_v42 = vor.u32 %v5039_v27, %v4202_v28 }
 0x12e   :  { %v2455_v56 = vpop.f32.mrf.mxu2  ;;  %v2120_v1 = vpop.f32.mrf.mxu0 }
 0x12f   :  { %v2624_v57 = vpop.f32.mrf.mxu3  ;;  %v2456_v0 = vadd.f32 %v2455_v56, %v2287_v44  ;;  %v2289_v2 = vpop.f32.mrf.mxu1  ;;  %v2121_v5 = vadd.f32 %v5755_v12, %v2120_v1 }
 0x131   :  { %v6074_v6 = vadd.f32 %v2624_v57, %v2456_v0  ;;  %v2290_v8 = vadd.f32 %v2289_v2, %v2121_v5  ;;  %2159 = vmatmul.bf16.gmra.mxu0 %v4161_v58  ;;  %v5192_v0 = vld [vmem:[%s7519_s1 + $0x150] sm:$0xff]  ;;  %v4224_v2 = vld [vmem:[%s7521_s0 + $0x4c0] sm:$0xf]  ;;  %v4226_v5 = vld [vmem:[%s7521_s0 + $0x4e0] sm:$0xf0] }
 0x132   :  { %2328 = vmatmul.bf16.gmra.mxu1 %v4165_v59 }
 0x133   :  { %2497 = vmatmul.bf16.gmra.mxu2 %v4169_v3  ;;  %v5050_v3 = vld [vmem:[%s7521_s0 + $0x4dc] sm:$0xf0]  ;;  %2916 = vmatpush.bf16.msrb.mxu1 %v5192_v0 }
 0x134   :  { %2666 = vmatmul.bf16.gmra.mxu3 %v4173_v4  ;;  %v5046_v4 = vld [vmem:[%s7521_s0 + $0x4c4] sm:$0xf] }
 0x136   :  { %v2458_v9 = vpop.f32.mrf.mxu2  ;;  %v2122_v13 = vpop.f32.mrf.mxu0 }
 0x137   :  { %v2627_v10 = vpop.f32.mrf.mxu3  ;;  %v2459_v11 = vadd.f32 %v2458_v9, %v2290_v8  ;;  %v2291_v14 = vpop.f32.mrf.mxu1  ;;  %v2123_v15 = vadd.f32 %v5755_v12, %v2122_v13  ;;  %v4232_v8 = vld [vmem:[%s7521_s0 + $0x4c8] sm:$0xf] }
 0x138   :  { %v5051_v9 = vld [vmem:[%s7521_s0 + $0x4e4] sm:$0xf0] }
 0x139   :  { %v6077_v16 = vadd.f32 %v2627_v10, %v2459_v11  ;;  %v2292_v17 = vadd.f32 %v2291_v14, %v2123_v15  ;;  %v5047_v10 = vld [vmem:[%s7521_s0 + $0x4cc] sm:$0xf]  ;;  %v4225_v15 = vor.u32 %v5050_v3, %v4224_v2  ;;  %v4233_v24 = vor.u32 %v5051_v9, %v4232_v8 }
 0x13a   :  { %v4234_v11 = vld [vmem:[%s7521_s0 + $0x4e8] sm:$0xf0]  ;;  %v4265_v3 = vor.u32 %v5059_v49, %v4264_v48 }
 0x13b   :  { %v4237_v25 = vor.u32 %v5047_v10, %v4234_v11 }
 0x13e   :  { %v2460_v30 = vpop.f32.mrf.mxu2  ;;  %v2125_v39 = vpop.f32.mrf.mxu0 }
 0x13f   :  { %v2629_v32 = vpop.f32.mrf.mxu3  ;;  %v2461_v38 = vadd.f32 %v2460_v30, %v2292_v17  ;;  %v2294_v40 = vpop.f32.mrf.mxu1  ;;  %v2126_v44 = vadd.f32 %v5755_v12, %v2125_v39  ;;  %v4229_v17 = vor.u32 %v5046_v4, %v4226_v5 }
 0x141   :  { %v6104_v45 = vadd.f32 %v2629_v32, %v2461_v38  ;;  %v2295_v46 = vadd.f32 %v2294_v40, %v2126_v44  ;;  %2164 = vmatmul.bf16.gmra.mxu0 %v4193_v34  ;;  %v5058_v44 = vld [vmem:[%s7521_s0 + $0x51c] sm:$0xf0] }
 0x142   :  { %2333 = vmatmul.bf16.gmra.mxu1 %v4197_v37 }
 0x143   :  { %2502 = vmatmul.bf16.gmra.mxu2 %v4201_v41 }
 0x144   :  { %2671 = vmatmul.bf16.gmra.mxu3 %v4205_v42  ;;  %v4256_v42 = vld [vmem:[%s7521_s0 + $0x500] sm:$0xf] }
 0x146   :  { %v2463_v50 = vpop.f32.mrf.mxu2  ;;  %v2127_v56 = vpop.f32.mrf.mxu0 }
 0x147   :  { %v2632_v52 = vpop.f32.mrf.mxu3  ;;  %v2464_v54 = vadd.f32 %v2463_v50, %v2295_v46  ;;  %v2296_v57 = vpop.f32.mrf.mxu1  ;;  %v2128_v58 = vadd.f32 %v5755_v12, %v2127_v56  ;;  %v5054_v46 = vld [vmem:[%s7521_s0 + $0x504] sm:$0xf]  ;;  %v5055_v50 = vld [vmem:[%s7521_s0 + $0x50c] sm:$0xf] }
 0x149   :  { %v6116_v59 = vadd.f32 %v2632_v52, %v2464_v54  ;;  %v2297_v1 = vadd.f32 %v2296_v57, %v2128_v58  ;;  %v4266_v52 = vld [vmem:[%s7521_s0 + $0x528] sm:$0xf0]  ;;  %v4257_v57 = vor.u32 %v5058_v44, %v4256_v42  ;;  %v4261_v58 = vor.u32 %v5054_v46, %v4258_v47 }
 0x14a   :  { %v4269_v4 = vor.u32 %v5055_v50, %v4266_v52 }
 0x14e   :  { %v2465_v13 = vpop.f32.mrf.mxu2  ;;  %v2130_v19 = vpop.f32.mrf.mxu0 }
 0x14f   :  { %v2634_v14 = vpop.f32.mrf.mxu3  ;;  %v2466_v18 = vadd.f32 %v2465_v13, %v2297_v1  ;;  %v2299_v23 = vpop.f32.mrf.mxu1  ;;  %v2131_v26 = vadd.f32 %v5755_v12, %v2130_v19 }
 0x151   :  { %v6146_v27 = vadd.f32 %v2634_v14, %v2466_v18  ;;  %v2300_v28 = vadd.f32 %v2299_v23, %v2131_v26  ;;  %2169 = vmatmul.bf16.gmra.mxu0 %v4225_v15  ;;  %v4288_v23 = vld [vmem:[%s7521_s0 + $0x540] sm:$0xf]  ;;  %v4290_v26 = vld [vmem:[%s7521_s0 + $0x560] sm:$0xf0] }
 0x152   :  { %2338 = vmatmul.bf16.gmra.mxu1 %v4229_v17 }
 0x153   :  { %2507 = vmatmul.bf16.gmra.mxu2 %v4233_v24  ;;  %v5066_v24 = vld [vmem:[%s7521_s0 + $0x55c] sm:$0xf0] }
 0x154   :  { %2676 = vmatmul.bf16.gmra.mxu3 %v4237_v25  ;;  %v5062_v25 = vld [vmem:[%s7521_s0 + $0x544] sm:$0xf] }
 0x156   :  { %v2468_v30 = vpop.f32.mrf.mxu2  ;;  %v2132_v37 = vpop.f32.mrf.mxu0 }
 0x157   :  { %v2637_v32 = vpop.f32.mrf.mxu3  ;;  %v2469_v34 = vadd.f32 %v2468_v30, %v2300_v28  ;;  %v2301_v38 = vpop.f32.mrf.mxu1  ;;  %v2133_v39 = vadd.f32 %v5755_v12, %v2132_v37  ;;  %v4296_v28 = vld [vmem:[%s7521_s0 + $0x548] sm:$0xf] }
 0x158   :  { %v5067_v30 = vld [vmem:[%s7521_s0 + $0x564] sm:$0xf0] }
 0x159   :  { %v6149_v40 = vadd.f32 %v2637_v32, %v2469_v34  ;;  %v2302_v41 = vadd.f32 %v2301_v38, %v2133_v39  ;;  %v5063_v32 = vld [vmem:[%s7521_s0 + $0x54c] sm:$0xf]  ;;  %v4289_v39 = vor.u32 %v5066_v24, %v4288_v23  ;;  %v4297_v47 = vor.u32 %v5067_v30, %v4296_v28 }
 0x15a   :  { %v4298_v34 = vld [vmem:[%s7521_s0 + $0x568] sm:$0xf0] }
 0x15b   :  { %v4301_v48 = vor.u32 %v5063_v32, %v4298_v34 }
 0x15e   :  { %v2470_v54 = vpop.f32.mrf.mxu2  ;;  %v2135_v1 = vpop.f32.mrf.mxu0 }
 0x15f   :  { %v2639_v56 = vpop.f32.mrf.mxu3  ;;  %v2471_v0 = vadd.f32 %v2470_v54, %v2302_v41  ;;  %v2304_v2 = vpop.f32.mrf.mxu1  ;;  %v2136_v5 = vadd.f32 %v5755_v12, %v2135_v1  ;;  %v4293_v41 = vor.u32 %v5062_v25, %v4290_v26 }
 0x161   :  { %v6176_v8 = vadd.f32 %v2639_v56, %v2471_v0  ;;  %v2305_v9 = vadd.f32 %v2304_v2, %v2136_v5  ;;  %2174 = vmatmul.bf16.gmra.mxu0 %v4257_v57  ;;  %v5074_v5 = vld [vmem:[%s7521_s0 + $0x59c] sm:$0xf0] }
 0x162   :  { %2343 = vmatmul.bf16.gmra.mxu1 %v4261_v58 }
 0x163   :  { %2512 = vmatmul.bf16.gmra.mxu2 %v4265_v3 }
 0x164   :  { %2681 = vmatmul.bf16.gmra.mxu3 %v4269_v4  ;;  %v4320_v4 = vld [vmem:[%s7521_s0 + $0x580] sm:$0xf] }
 0x165   :  { %v4321_v23 = vor.u32 %v5074_v5, %v4320_v4  ;;  %v5083_v4 = vld [vmem:[%s7521_s0 + $0x5e4] sm:$0xf0]  ;;  %v5079_v5 = vld [vmem:[%s7521_s0 + $0x5cc] sm:$0xf] }
 0x166   :  { %v2473_v10 = vpop.f32.mrf.mxu2  ;;  %v2137_v14 = vpop.f32.mrf.mxu0 }
 0x167   :  { %v2642_v11 = vpop.f32.mrf.mxu3  ;;  %v2474_v13 = vadd.f32 %v2473_v10, %v2305_v9  ;;  %v2306_v15 = vpop.f32.mrf.mxu1  ;;  %v2138_v17 = vadd.f32 %v5755_v12, %v2137_v14  ;;  %v5070_v9 = vld [vmem:[%s7521_s0 + $0x584] sm:$0xf]  ;;  %v5071_v14 = vld [vmem:[%s7521_s0 + $0x58c] sm:$0xf] }
 0x168   :  { %v4322_v10 = vld [vmem:[%s7521_s0 + $0x5a0] sm:$0xf0] }
 0x169   :  { %v6179_v18 = vadd.f32 %v2642_v11, %v2474_v13  ;;  %v2307_v19 = vadd.f32 %v2306_v15, %v2138_v17  ;;  %v4328_v11 = vld [vmem:[%s7521_s0 + $0x588] sm:$0xf]  ;;  %v4330_v15 = vld [vmem:[%s7521_s0 + $0x5a8] sm:$0xf0]  ;;  %v4325_v24 = vor.u32 %v5070_v9, %v4322_v10 }
 0x16a   :  { %v5075_v13 = vld [vmem:[%s7521_s0 + $0x5a4] sm:$0xf0]  ;;  %v4333_v32 = vor.u32 %v5071_v14, %v4330_v15  ;;  %v4362_v9 = vld [vmem:[%s7521_s0 + $0x5e8] sm:$0xf0] }
 0x16b   :  { %v4329_v30 = vor.u32 %v5075_v13, %v4328_v11 }
 0x16e   :  { %v2475_v37 = vpop.f32.mrf.mxu2  ;;  %v2140_v44 = vpop.f32.mrf.mxu0 }
 0x16f   :  { %v2644_v38 = vpop.f32.mrf.mxu3  ;;  %v2476_v42 = vadd.f32 %v2475_v37, %v2307_v19  ;;  %v2309_v46 = vpop.f32.mrf.mxu1  ;;  %v2141_v49 = vadd.f32 %v5755_v12, %v2140_v44 }
 0x171   :  { %v6206_v50 = vadd.f32 %v2644_v38, %v2476_v42  ;;  %v2310_v52 = vadd.f32 %v2309_v46, %v2141_v49  ;;  %2179 = vmatmul.bf16.gmra.mxu0 %v4289_v39  ;;  %v5199_v39 = vld [vmem:[%s7519_s1 + $0x188] sm:$0xff] }
 0x172   :  { %2348 = vmatmul.bf16.gmra.mxu1 %v4293_v41  ;;  %v5183_v41 = vld [vmem:[%s7519_s1 + $0x108] sm:$0xff]  ;;  %3086 = vmatpush.bf16.msrb.mxu2 %v5199_v39 }
 0x173   :  { %2517 = vmatmul.bf16.gmra.mxu2 %v4297_v47  ;;  %v5207_v42 = vld [vmem:[%s7519_s1 + $0x1c8] sm:$0xff]  ;;  %2748 = vmatpush.bf16.msrb.mxu0 %v5183_v41 }
 0x174   :  { %2686 = vmatmul.bf16.gmra.mxu3 %v4301_v48 }
 0x175   :  { %3255 = vmatpush.bf16.msrb.mxu3 %v5207_v42 }
 0x176   :  { %v2478_v54 = vpop.f32.mrf.mxu2  ;;  %v2142_v58 = vpop.f32.mrf.mxu0 }
 0x177   :  { %v2647_v56 = vpop.f32.mrf.mxu3  ;;  %v2479_v57 = vadd.f32 %v2478_v54, %v2310_v52  ;;  %v2311_v0 = vpop.f32.mrf.mxu1  ;;  %v2143_v1 = vadd.f32 %v5755_v12, %v2142_v58  ;;  %v4352_v58 = vld [vmem:[%s7521_s0 + $0x5c0] sm:$0xf] }
 0x179   :  { %v6209_v2 = vadd.f32 %v2647_v56, %v2479_v57  ;;  %v2312_v3 = vadd.f32 %v2311_v0, %v2143_v1  ;;  %v5191_v56 = vld [vmem:[%s7519_s1 + $0x148] sm:$0xff]  ;;  %v5082_v0 = vld [vmem:[%s7521_s0 + $0x5dc] sm:$0xf0]  ;;  %v5078_v1 = vld [vmem:[%s7521_s0 + $0x5c4] sm:$0xf] }
 0x17a   :  { %2917 = vmatpush.bf16.msrb.mxu1 %v5191_v56  ;;  %v4353_v13 = vor.u32 %v5082_v0, %v4352_v58  ;;  %v4392_v56 = vld [vmem:[%s7521_s0 + $0x608] sm:$0xf]  ;;  %v5087_v58 = vld [vmem:[%s7521_s0 + $0x60c] sm:$0xf] }
 0x17b   :  { %v4394_v0 = vld [vmem:[%s7521_s0 + $0x628] sm:$0xf0] }
 0x17e   :  { %v2480_v17 = vpop.f32.mrf.mxu2  ;;  %v2145_v26 = vpop.f32.mrf.mxu0 }
 0x17f   :  { %v2649_v19 = vpop.f32.mrf.mxu3  ;;  %v2481_v25 = vadd.f32 %v2480_v17, %v2312_v3  ;;  %v2314_v28 = vpop.f32.mrf.mxu1  ;;  %v2146_v34 = vadd.f32 %v5755_v12, %v2145_v26  ;;  %v4360_v3 = vld [vmem:[%s7521_s0 + $0x5c8] sm:$0xf] }
 0x181   :  { %v6236_v37 = vadd.f32 %v2649_v19, %v2481_v25  ;;  %v2315_v38 = vadd.f32 %v2314_v28, %v2146_v34  ;;  %2184 = vmatmul.bf16.gmra.mxu0 %v4321_v23  ;;  %v4361_v23 = vor.u32 %v5083_v4, %v4360_v3  ;;  %v6280_v25 = vld [vmem:[%s7520_s2] ss:$0 sm:$0xff] }
 0x182   :  { %2353 = vmatmul.bf16.gmra.mxu1 %v4325_v24  ;;  %v4365_v24 = vor.u32 %v5079_v5, %v4362_v9 }
 0x183   :  { %2522 = vmatmul.bf16.gmra.mxu2 %v4329_v30 }
 0x184   :  { %2691 = vmatmul.bf16.gmra.mxu3 %v4333_v32 }
 0x186   :  { %v2483_v44 = vpop.f32.mrf.mxu2  ;;  %v2147_v48 = vpop.f32.mrf.mxu0 }
 0x187   :  { %v2652_v46 = vpop.f32.mrf.mxu3  ;;  %v2484_v47 = vadd.f32 %v2483_v44, %v2315_v38  ;;  %v2316_v49 = vpop.f32.mrf.mxu1  ;;  %v2148_v52 = vadd.f32 %v5755_v12, %v2147_v48  ;;  %v4354_v12 = vld [vmem:[%s7521_s0 + $0x5e0] sm:$0xf0]  ;;  %v5090_v48 = vld [vmem:[%s7521_s0 + $0x61c] sm:$0xf0] }
 0x188   :  { %v4357_v14 = vor.u32 %v5078_v1, %v4354_v12 }
 0x189   :  { %v6248_v54 = vadd.f32 %v2652_v46, %v2484_v47  ;;  %v2317_v57 = vadd.f32 %v2316_v49, %v2148_v52  ;;  %v4384_v47 = vld [vmem:[%s7521_s0 + $0x600] sm:$0xf]  ;;  %v5086_v49 = vld [vmem:[%s7521_s0 + $0x604] sm:$0xf] }
 0x18a   :  { %v4386_v52 = vld [vmem:[%s7521_s0 + $0x620] sm:$0xf0]  ;;  %v4385_v3 = vor.u32 %v5090_v48, %v4384_v47  ;;  %v4424_v47 = vld [vmem:[%s7521_s0 + $0x648] sm:$0xf] }
 0x18b   :  { %v4389_v4 = vor.u32 %v5086_v49, %v4386_v52  ;;  %v5099_v48 = vld [vmem:[%s7521_s0 + $0x664] sm:$0xf0]  ;;  %v5095_v49 = vld [vmem:[%s7521_s0 + $0x64c] sm:$0xf] }
 0x18c   :  { %v4426_v52 = vld [vmem:[%s7521_s0 + $0x668] sm:$0xf0] }
 0x18e   :  { %v2485_v10 = vpop.f32.mrf.mxu2  ;;  %v2150_v17 = vpop.f32.mrf.mxu0 }
 0x18f   :  { %v2654_v11 = vpop.f32.mrf.mxu3  ;;  %v2486_v15 = vadd.f32 %v2485_v10, %v2317_v57  ;;  %v2319_v19 = vpop.f32.mrf.mxu1  ;;  %v2151_v26 = vadd.f32 %v6280_v25, %v2150_v17  ;;  %v5091_v57 = vld [vmem:[%s7521_s0 + $0x624] sm:$0xf0] }
 0x191   :  { %v6283_v28 = vadd.f32 %v2654_v11, %v2486_v15  ;;  %v2320_v30 = vadd.f32 %v2319_v19, %v2151_v26  ;;  %2189 = vmatmul.bf16.gmra.mxu0 %v4353_v13  ;;  %v4393_v11 = vor.u32 %v5091_v57, %v4392_v56  ;;  %v4397_v13 = vor.u32 %v5087_v58, %v4394_v0 }
 0x192   :  { %2358 = vmatmul.bf16.gmra.mxu1 %v4357_v14 }
 0x193   :  { %2527 = vmatmul.bf16.gmra.mxu2 %v4361_v23 }
 0x194   :  { %2696 = vmatmul.bf16.gmra.mxu3 %v4365_v24 }
 0x196   :  { %v2488_v32 = vpop.f32.mrf.mxu2  ;;  %v2152_v39 = vpop.f32.mrf.mxu0 }
 0x197   :  { %v2657_v34 = vpop.f32.mrf.mxu3  ;;  %v2489_v38 = vadd.f32 %v2488_v32, %v2320_v30  ;;  %v2321_v41 = vpop.f32.mrf.mxu1  ;;  %v2153_v42 = vadd.f32 %v6280_v25, %v2152_v39  ;;  %v4416_v39 = vld [vmem:[%s7521_s0 + $0x640] sm:$0xf] }
 0x199   :  { %v6286_v44 = vadd.f32 %v2657_v34, %v2489_v38  ;;  %v2322_v46 = vadd.f32 %v2321_v41, %v2153_v42  ;;  %v5098_v41 = vld [vmem:[%s7521_s0 + $0x65c] sm:$0xf0]  ;;  %v5094_v42 = vld [vmem:[%s7521_s0 + $0x644] sm:$0xf] }
 0x19a   :  { %v4417_v58 = vor.u32 %v5098_v41, %v4416_v39  ;;  %v5102_v39 = vld [vmem:[%s7521_s0 + $0x684] sm:$0xf] }
 0x19b   :  { %v4450_v41 = vld [vmem:[%s7521_s0 + $0x6a0] sm:$0xf0] }
 0x19e   :  { %v2490_v1 = vpop.f32.mrf.mxu2  ;;  %v2155_v9 = vpop.f32.mrf.mxu0 }
 0x19f   :  { %v2659_v12 = vpop.f32.mrf.mxu3  ;;  %v2491_v5 = vadd.f32 %v2490_v1, %v2322_v46  ;;  %v2324_v10 = vpop.f32.mrf.mxu1  ;;  %v2156_v14 = vadd.f32 %v6280_v25, %v2155_v9  ;;  %v4418_v46 = vld [vmem:[%s7521_s0 + $0x660] sm:$0xf0] }
 0x1a0   :  { %v4421_v0 = vor.u32 %v5094_v42, %v4418_v46  ;;  %v4456_v42 = vld [vmem:[%s7521_s0 + $0x688] sm:$0xf] }
 0x1a1   :  { %v6313_v15 = vadd.f32 %v2659_v12, %v2491_v5  ;;  %v2325_v17 = vadd.f32 %v2324_v10, %v2156_v14  ;;  %2194 = vmatmul.bf16.gmra.mxu0 %v4385_v3  ;;  %v4429_v5 = vor.u32 %v5095_v49, %v4426_v52  ;;  %v5107_v46 = vld [vmem:[%s7521_s0 + $0x6a4] sm:$0xf0] }
 0x1a2   :  { %2363 = vmatmul.bf16.gmra.mxu1 %v4389_v4  ;;  %v4425_v4 = vor.u32 %v5099_v48, %v4424_v47  ;;  %v5103_v47 = vld [vmem:[%s7521_s0 + $0x68c] sm:$0xf] }
 0x1a3   :  { %2532 = vmatmul.bf16.gmra.mxu2 %v4393_v11  ;;  %v4458_v48 = vld [vmem:[%s7521_s0 + $0x6a8] sm:$0xf0] }
 0x1a4   :  { %2701 = vmatmul.bf16.gmra.mxu3 %v4397_v13 }
 0x1a6   :  { %v2493_v19 = vpop.f32.mrf.mxu2  ;;  %v2157_v26 = vpop.f32.mrf.mxu0 }
 0x1a7   :  { %v2662_v23 = vpop.f32.mrf.mxu3  ;;  %v2494_v24 = vadd.f32 %v2493_v19, %v2325_v17  ;;  %v2326_v30 = vpop.f32.mrf.mxu1  ;;  %v2158_v32 = vadd.f32 %v6280_v25, %v2157_v26 }
 0x1a9   :  { %v6316_v34 = vadd.f32 %v2662_v23, %v2494_v24  ;;  %v2327_v38 = vadd.f32 %v2326_v30, %v2158_v32  ;;  %v4448_v32 = vld [vmem:[%s7521_s0 + $0x680] sm:$0xf] }
 0x1ae   :  { %v2495_v56 = vpop.f32.mrf.mxu2  ;;  %v2160_v12 = vpop.f32.mrf.mxu0 }
 0x1af   :  { %v2664_v57 = vpop.f32.mrf.mxu3  ;;  %v2496_v1 = vadd.f32 %v2495_v56, %v2327_v38  ;;  %v2329_v3 = vpop.f32.mrf.mxu1  ;;  %v2161_v9 = vadd.f32 %v6280_v25, %v2160_v12  ;;  %v5106_v38 = vld [vmem:[%s7521_s0 + $0x69c] sm:$0xf0]  ;;  %v4457_v12 = vor.u32 %v5107_v46, %v4456_v42 }
 0x1b0   :  { %v4449_v56 = vor.u32 %v5106_v38, %v4448_v32  ;;  %v4480_v42 = vld [vmem:[%s7521_s0 + $0x6c0] sm:$0xf] }
 0x1b1   :  { %v6343_v10 = vadd.f32 %v2664_v57, %v2496_v1  ;;  %v2330_v11 = vadd.f32 %v2329_v3, %v2161_v9  ;;  %2199 = vmatmul.bf16.gmra.mxu0 %v4417_v58  ;;  %v4453_v57 = vor.u32 %v5102_v39, %v4450_v41  ;;  %v4461_v3 = vor.u32 %v5103_v47, %v4458_v48  ;;  %v5190_v39 = vld [vmem:[%s7519_s1 + $0x140] sm:$0xff] }
 0x1b2   :  { %2368 = vmatmul.bf16.gmra.mxu1 %v4421_v0  ;;  %v5114_v46 = vld [vmem:[%s7521_s0 + $0x6dc] sm:$0xf0]  ;;  %v5110_v47 = vld [vmem:[%s7521_s0 + $0x6c4] sm:$0xf] }
 0x1b3   :  { %2537 = vmatmul.bf16.gmra.mxu2 %v4425_v4  ;;  %v4482_v48 = vld [vmem:[%s7521_s0 + $0x6e0] sm:$0xf0]  ;;  %2918 = vmatpush.bf16.msrb.mxu1 %v5190_v39 }
 0x1b4   :  { %2706 = vmatmul.bf16.gmra.mxu3 %v4429_v5 }
 0x1b6   :  { %v2498_v13 = vpop.f32.mrf.mxu2  ;;  %v2162_v19 = vpop.f32.mrf.mxu0 }
 0x1b7   :  { %v2667_v14 = vpop.f32.mrf.mxu3  ;;  %v2499_v17 = vadd.f32 %v2498_v13, %v2330_v11  ;;  %v2331_v23 = vpop.f32.mrf.mxu1  ;;  %v2163_v24 = vadd.f32 %v6280_v25, %v2162_v19  ;;  %v5198_v11 = vld [vmem:[%s7519_s1 + $0x180] sm:$0xff] }
 0x1b8   :  { %v5182_v13 = vld [vmem:[%s7519_s1 + $0x100] sm:$0xff]  ;;  %3087 = vmatpush.bf16.msrb.mxu2 %v5198_v11 }
 0x1b9   :  { %v6346_v26 = vadd.f32 %v2667_v14, %v2499_v17  ;;  %v2332_v30 = vadd.f32 %v2331_v23, %v2163_v24  ;;  %v5206_v14 = vld [vmem:[%s7519_s1 + $0x1c0] sm:$0xff]  ;;  %2749 = vmatpush.bf16.msrb.mxu0 %v5182_v13 }
 0x1ba   :  { %3256 = vmatpush.bf16.msrb.mxu3 %v5206_v14 }
 0x1be   :  { %v2500_v49 = vpop.f32.mrf.mxu2  ;;  %v2165_v0 = vpop.f32.mrf.mxu0 }
 0x1bf   :  { %v2669_v52 = vpop.f32.mrf.mxu3  ;;  %v2501_v58 = vadd.f32 %v2500_v49, %v2332_v30  ;;  %v2334_v1 = vpop.f32.mrf.mxu1  ;;  %v2166_v4 = vadd.f32 %v6280_v25, %v2165_v0  ;;  %v4488_v49 = vld [vmem:[%s7521_s0 + $0x6c8] sm:$0xf] }
 0x1c1   :  { %v6373_v5 = vadd.f32 %v2669_v52, %v2501_v58  ;;  %v2335_v9 = vadd.f32 %v2334_v1, %v2166_v4  ;;  %2204 = vmatmul.bf16.gmra.mxu0 %v4449_v56  ;;  %v5115_v52 = vld [vmem:[%s7521_s0 + $0x6e4] sm:$0xf0]  ;;  %v5111_v56 = vld [vmem:[%s7521_s0 + $0x6cc] sm:$0xf]  ;;  %v4481_v1 = vor.u32 %v5114_v46, %v4480_v42 }
 0x1c2   :  { %2373 = vmatmul.bf16.gmra.mxu1 %v4453_v57  ;;  %v4490_v57 = vld [vmem:[%s7521_s0 + $0x6e8] sm:$0xf0]  ;;  %v4489_v11 = vor.u32 %v5115_v52, %v4488_v49  ;;  %v5118_v49 = vld [vmem:[%s7521_s0 + $0x704] sm:$0xf] }
 0x1c3   :  { %2542 = vmatmul.bf16.gmra.mxu2 %v4457_v12  ;;  %v4485_v12 = vor.u32 %v5110_v47, %v4482_v48  ;;  %v4493_v13 = vor.u32 %v5111_v56, %v4490_v57  ;;  %v4512_v47 = vld [vmem:[%s7521_s0 + $0x700] sm:$0xf]  ;;  %v4514_v52 = vld [vmem:[%s7521_s0 + $0x720] sm:$0xf0]  ;;  %v4520_v56 = vld [vmem:[%s7521_s0 + $0x708] sm:$0xf] }
 0x1c4   :  { %2711 = vmatmul.bf16.gmra.mxu3 %v4461_v3  ;;  %v5122_v48 = vld [vmem:[%s7521_s0 + $0x71c] sm:$0xf0]  ;;  %v5123_v57 = vld [vmem:[%s7521_s0 + $0x724] sm:$0xf0] }
 0x1c6   :  { %v2503_v17 = vpop.f32.mrf.mxu2  ;;  %v2167_v24 = vpop.f32.mrf.mxu0 }
 0x1c7   :  { %v2672_v19 = vpop.f32.mrf.mxu3  ;;  %v2504_v23 = vadd.f32 %v2503_v17, %v2335_v9  ;;  %v2336_v30 = vpop.f32.mrf.mxu1  ;;  %v2168_v32 = vadd.f32 %v6280_v25, %v2167_v24 }
 0x1c9   :  { %v6385_v38 = vadd.f32 %v2672_v19, %v2504_v23  ;;  %v2337_v41 = vadd.f32 %v2336_v30, %v2168_v32 }
 0x1ce   :  { %v2505_v58 = vpop.f32.mrf.mxu2  ;;  %v2170_v4 = vpop.f32.mrf.mxu0 }
 0x1cf   :  { %v2674_v0 = vpop.f32.mrf.mxu3  ;;  %v2506_v3 = vadd.f32 %v2505_v58, %v2337_v41  ;;  %v2339_v9 = vpop.f32.mrf.mxu1  ;;  %v2171_v14 = vadd.f32 %v6280_v25, %v2170_v4  ;;  %v5119_v58 = vld [vmem:[%s7521_s0 + $0x70c] sm:$0xf]  ;;  %v4517_v4 = vor.u32 %v5118_v49, %v4514_v52  ;;  %v4544_v52 = vld [vmem:[%s7521_s0 + $0x740] sm:$0xf] }
 0x1d1   :  { %v6415_v17 = vadd.f32 %v2674_v0, %v2506_v3  ;;  %v2340_v19 = vadd.f32 %v2339_v9, %v2171_v14  ;;  %2209 = vmatmul.bf16.gmra.mxu0 %v4481_v1  ;;  %v4522_v0 = vld [vmem:[%s7521_s0 + $0x728] sm:$0xf0]  ;;  %v4513_v3 = vor.u32 %v5122_v48, %v4512_v47  ;;  %v4521_v14 = vor.u32 %v5123_v57, %v4520_v56  ;;  %v5130_v56 = vld [vmem:[%s7521_s0 + $0x75c] sm:$0xf0]  ;;  %v5126_v57 = vld [vmem:[%s7521_s0 + $0x744] sm:$0xf] }
 0x1d2   :  { %2378 = vmatmul.bf16.gmra.mxu1 %v4485_v12 }
 0x1d3   :  { %2547 = vmatmul.bf16.gmra.mxu2 %v4489_v11 }
 0x1d4   :  { %2716 = vmatmul.bf16.gmra.mxu3 %v4493_v13 }
 0x1d6   :  { %v2508_v23 = vpop.f32.mrf.mxu2  ;;  %v2172_v32 = vpop.f32.mrf.mxu0 }
 0x1d7   :  { %v2677_v24 = vpop.f32.mrf.mxu3  ;;  %v2509_v30 = vadd.f32 %v2508_v23, %v2340_v19  ;;  %v2341_v39 = vpop.f32.mrf.mxu1  ;;  %v2173_v41 = vadd.f32 %v6280_v25, %v2172_v32  ;;  %v4525_v19 = vor.u32 %v5119_v58, %v4522_v0  ;;  %v4546_v58 = vld [vmem:[%s7521_s0 + $0x760] sm:$0xf0]  ;;  %v5131_v0 = vld [vmem:[%s7521_s0 + $0x764] sm:$0xf0] }
 0x1d9   :  { %v6418_v42 = vadd.f32 %v2677_v24, %v2509_v30  ;;  %v2342_v46 = vadd.f32 %v2341_v39, %v2173_v41 }
 0x1db   :  { %7523 = vst [vmem:[#allocation2_spill] sm:$0xff] %v6418_v42 }
 0x1de   :  { %v2510_v1 = vpop.f32.mrf.mxu2  ;;  %v2175_v11 = vpop.f32.mrf.mxu0 }
 0x1df   :  { %v2679_v12 = vpop.f32.mrf.mxu3  ;;  %v2511_v9 = vadd.f32 %v2510_v1, %v2342_v46  ;;  %v2344_v13 = vpop.f32.mrf.mxu1  ;;  %v2176_v23 = vadd.f32 %v6280_v25, %v2175_v11  ;;  %v5127_v1 = vld [vmem:[%s7521_s0 + $0x74c] sm:$0xf]  ;;  %v4549_v11 = vor.u32 %v5126_v57, %v4546_v58  ;;  %v4576_v58 = vld [vmem:[%s7521_s0 + $0x780] sm:$0xf] }
 0x1e1   :  { %v6445_v24 = vadd.f32 %v2679_v12, %v2511_v9  ;;  %v2345_v30 = vadd.f32 %v2344_v13, %v2176_v23  ;;  %2214 = vmatmul.bf16.gmra.mxu0 %v4513_v3  ;;  %v4554_v12 = vld [vmem:[%s7521_s0 + $0x768] sm:$0xf0]  ;;  %v4545_v9 = vor.u32 %v5130_v56, %v4544_v52 }
 0x1e2   :  { %2383 = vmatmul.bf16.gmra.mxu1 %v4517_v4 }
 0x1e3   :  { %7524 = vst [vmem:[#allocation3_spill] sm:$0xff] %v6445_v24  ;;  %2552 = vmatmul.bf16.gmra.mxu2 %v4521_v14 }
 0x1e4   :  { %2721 = vmatmul.bf16.gmra.mxu3 %v4525_v19 }
 0x1e6   :  { %v2513_v32 = vpop.f32.mrf.mxu2  ;;  %v2177_v42 = vpop.f32.mrf.mxu0 }
 0x1e7   :  { %v2682_v39 = vpop.f32.mrf.mxu3  ;;  %v2514_v41 = vadd.f32 %v2513_v32, %v2345_v30  ;;  %v2346_v47 = vpop.f32.mrf.mxu1  ;;  %v2178_v46 = vadd.f32 %v6280_v25, %v2177_v42  ;;  %v4552_v42 = vld [vmem:[%s7521_s0 + $0x748] sm:$0xf]  ;;  %v4557_v30 = vor.u32 %v5127_v1, %v4554_v12  ;;  %v4578_v1 = vld [vmem:[%s7521_s0 + $0x7a0] sm:$0xf0]  ;;  %v5135_v12 = vld [vmem:[%s7521_s0 + $0x78c] sm:$0xf] }
 0x1e8   :  { %v4553_v23 = vor.u32 %v5131_v0, %v4552_v42  ;;  %v5138_v42 = vld [vmem:[%s7521_s0 + $0x79c] sm:$0xf0]  ;;  %v5134_v0 = vld [vmem:[%s7521_s0 + $0x784] sm:$0xf] }
 0x1e9   :  { %v6448_v48 = vadd.f32 %v2682_v39, %v2514_v41  ;;  %v2347_v49 = vadd.f32 %v2346_v47, %v2178_v46 }
 0x1eb   :  { %7525 = vst [vmem:[#allocation4_spill] sm:$0xff] %v6448_v48 }
 0x1ee   :  { %v2515_v3 = vpop.f32.mrf.mxu2  ;;  %v2180_v14 = vpop.f32.mrf.mxu0 }
 0x1ef   :  { %v2684_v4 = vpop.f32.mrf.mxu3  ;;  %v2516_v13 = vadd.f32 %v2515_v3, %v2347_v49  ;;  %v2349_v19 = vpop.f32.mrf.mxu1  ;;  %v2181_v32 = vadd.f32 %v6280_v25, %v2180_v14  ;;  %v4586_v3 = vld [vmem:[%s7521_s0 + $0x7a8] sm:$0xf0] }
 0x1f1   :  { %v6475_v39 = vadd.f32 %v2684_v4, %v2516_v13  ;;  %v2350_v41 = vadd.f32 %v2349_v19, %v2181_v32  ;;  %2219 = vmatmul.bf16.gmra.mxu0 %v4545_v9  ;;  %v4581_v13 = vor.u32 %v5134_v0, %v4578_v1  ;;  %v4589_v32 = vor.u32 %v5135_v12, %v4586_v3  ;;  %v4608_v1 = vld [vmem:[%s7521_s0 + $0x7c0] sm:$0xf]  ;;  %v4610_v12 = vld [vmem:[%s7521_s0 + $0x7e0] sm:$0xf0]  ;;  %v5143_v3 = vld [vmem:[%s7521_s0 + $0x7cc] sm:$0xf] }
 0x1f2   :  { %2388 = vmatmul.bf16.gmra.mxu1 %v4549_v11  ;;  %v4577_v11 = vor.u32 %v5138_v42, %v4576_v58 }
 0x1f3   :  { %7526 = vst [vmem:[#allocation5_spill] sm:$0xff] %v6475_v39  ;;  %2557 = vmatmul.bf16.gmra.mxu2 %v4553_v23 }
 0x1f4   :  { %2726 = vmatmul.bf16.gmra.mxu3 %v4557_v30 }
 0x1f6   :  { %v2518_v47 = vpop.f32.mrf.mxu2  ;;  %v2182_v24 = vpop.f32.mrf.mxu0 }
 0x1f7   :  { %v2687_v46 = vpop.f32.mrf.mxu3  ;;  %v2519_v48 = vadd.f32 %v2518_v47, %v2350_v41  ;;  %v2351_v52 = vpop.f32.mrf.mxu1  ;;  %v2183_v49 = vadd.f32 %v6280_v25, %v2182_v24  ;;  %v4584_v24 = vld [vmem:[%s7521_s0 + $0x788] sm:$0xf] }
 0x1f9   :  { %v6478_v56 = vadd.f32 %v2687_v46, %v2519_v48  ;;  %v2352_v57 = vadd.f32 %v2351_v52, %v2183_v49  ;;  %v5139_v48 = vld [vmem:[%s7521_s0 + $0x7a4] sm:$0xf0] }
 0x1fa   :  { %v4585_v30 = vor.u32 %v5139_v48, %v4584_v24  ;;  %v5146_v24 = vld [vmem:[%s7521_s0 + $0x7dc] sm:$0xf0]  ;;  %v5142_v48 = vld [vmem:[%s7521_s0 + $0x7c4] sm:$0xf] }
 0x1fb   :  { %7527 = vst [vmem:[#allocation6_spill] sm:$0xff] %v6478_v56 }
 0x1fe   :  { %v2520_v4 = vpop.f32.mrf.mxu2  ;;  %v2185_v19 = vpop.f32.mrf.mxu0 }
 0x1ff   :  { %v2689_v9 = vpop.f32.mrf.mxu3  ;;  %v2521_v14 = vadd.f32 %v2520_v4, %v2352_v57  ;;  %v2354_v23 = vpop.f32.mrf.mxu1  ;;  %v2186_v41 = vadd.f32 %v6280_v25, %v2185_v19  ;;  %v4618_v4 = vld [vmem:[%s7521_s0 + $0x7e8] sm:$0xf0] }
 0x201   :  { %v6505_v47 = vadd.f32 %v2689_v9, %v2521_v14  ;;  %v2355_v46 = vadd.f32 %v2354_v23, %v2186_v41  ;;  %2224 = vmatmul.bf16.gmra.mxu0 %v4577_v11  ;;  %v4613_v14 = vor.u32 %v5142_v48, %v4610_v12  ;;  %v4621_v41 = vor.u32 %v5143_v3, %v4618_v4  ;;  %v3632_v12 = vld [vmem:[%s7521_s0 + $0x10] sm:$0xf]  ;;  %v3634_v3 = vld [vmem:[%s7521_s0 + $0x30] sm:$0xf0]  ;;  %v4897_v4 = vld [vmem:[%s7521_s0 + $0x1c] sm:$0xf] }
 0x202   :  { %2393 = vmatmul.bf16.gmra.mxu1 %v4581_v13  ;;  %v4609_v13 = vor.u32 %v5146_v24, %v4608_v1 }
 0x203   :  { %7528 = vst [vmem:[#allocation7_spill] sm:$0xff] %v6505_v47  ;;  %2562 = vmatmul.bf16.gmra.mxu2 %v4585_v30 }
 0x204   :  { %2731 = vmatmul.bf16.gmra.mxu3 %v4589_v32 }
 0x206   :  { %v2523_v52 = vpop.f32.mrf.mxu2  ;;  %v2187_v39 = vpop.f32.mrf.mxu0 }
 0x207   :  { %v2692_v49 = vpop.f32.mrf.mxu3  ;;  %v2524_v56 = vadd.f32 %v2523_v52, %v2355_v46  ;;  %v2356_v58 = vpop.f32.mrf.mxu1  ;;  %v2188_v57 = vadd.f32 %v6280_v25, %v2187_v39  ;;  %v4616_v39 = vld [vmem:[%s7521_s0 + $0x7c8] sm:$0xf] }
 0x209   :  { %v6508_v42 = vadd.f32 %v2692_v49, %v2524_v56  ;;  %v2357_v0 = vadd.f32 %v2356_v58, %v2188_v57  ;;  %v5147_v56 = vld [vmem:[%s7521_s0 + $0x7e4] sm:$0xf0] }
 0x20a   :  { %v4617_v32 = vor.u32 %v5147_v56, %v4616_v39  ;;  %v4900_v39 = vld [vmem:[%s7521_s0 + $0x2c] sm:$0xf0]  ;;  %v4896_v56 = vld [vmem:[%s7521_s0 + $0x14] sm:$0xf] }
 0x20b   :  { %7529 = vst [vmem:[#allocation8_spill] sm:$0xff] %v6508_v42 }
 0x20e   :  { %v2525_v9 = vpop.f32.mrf.mxu2  ;;  %v2190_v23 = vpop.f32.mrf.mxu0 }
 0x20f   :  { %v2694_v11 = vpop.f32.mrf.mxu3  ;;  %v2526_v19 = vadd.f32 %v2525_v9, %v2357_v0  ;;  %v2359_v30 = vpop.f32.mrf.mxu1  ;;  %v2191_v46 = vadd.f32 %v6280_v25, %v2190_v23  ;;  %v3642_v9 = vld [vmem:[%s7521_s0 + $0x38] sm:$0xf0] }
 0x211   :  { %v6535_v52 = vadd.f32 %v2694_v11, %v2526_v19  ;;  %v2360_v49 = vadd.f32 %v2359_v30, %v2191_v46  ;;  %2229 = vmatmul.bf16.gmra.mxu0 %v4609_v13  ;;  %v3637_v19 = vor.u32 %v4896_v56, %v3634_v3  ;;  %v3645_v46 = vor.u32 %v4897_v4, %v3642_v9  ;;  %v3664_v3 = vld [vmem:[%s7521_s0 + $0x50] sm:$0xf]  ;;  %v3666_v4 = vld [vmem:[%s7521_s0 + $0x70] sm:$0xf0]  ;;  %v4905_v9 = vld [vmem:[%s7521_s0 + $0x5c] sm:$0xf] }
 0x212   :  { %2398 = vmatmul.bf16.gmra.mxu1 %v4613_v14  ;;  %v3633_v14 = vor.u32 %v4900_v39, %v3632_v12 }
 0x213   :  { %7530 = vst [vmem:[#allocation9_spill] sm:$0xff] %v6535_v52  ;;  %2567 = vmatmul.bf16.gmra.mxu2 %v4617_v32 }
 0x214   :  { %2736 = vmatmul.bf16.gmra.mxu3 %v4621_v41 }
 0x216   :  { %v2528_v58 = vpop.f32.mrf.mxu2  ;;  %v2192_v47 = vpop.f32.mrf.mxu0 }
 0x217   :  { %v2697_v57 = vpop.f32.mrf.mxu3  ;;  %v2529_v42 = vadd.f32 %v2528_v58, %v2360_v49  ;;  %v2361_v1 = vpop.f32.mrf.mxu1  ;;  %v2193_v0 = vadd.f32 %v6280_v25, %v2192_v47  ;;  %v3640_v47 = vld [vmem:[%s7521_s0 + $0x18] sm:$0xf] }
 0x219   :  { %v6538_v24 = vadd.f32 %v2697_v57, %v2529_v42  ;;  %v2362_v48 = vadd.f32 %v2361_v1, %v2193_v0  ;;  %v4901_v42 = vld [vmem:[%s7521_s0 + $0x34] sm:$0xf0] }
 0x21a   :  { %v3641_v41 = vor.u32 %v4901_v42, %v3640_v47  ;;  %v4908_v47 = vld [vmem:[%s7521_s0 + $0x6c] sm:$0xf0]  ;;  %v4904_v42 = vld [vmem:[%s7521_s0 + $0x54] sm:$0xf] }
 0x21b   :  { %7531 = vst [vmem:[#allocation10_spill] sm:$0xff] %v6538_v24 }
 0x21e   :  { %v2530_v11 = vpop.f32.mrf.mxu2  ;;  %v2195_v30 = vpop.f32.mrf.mxu0 }
 0x21f   :  { %v2699_v13 = vpop.f32.mrf.mxu3  ;;  %v2531_v23 = vadd.f32 %v2530_v11, %v2362_v48  ;;  %v2364_v32 = vpop.f32.mrf.mxu1  ;;  %v2196_v49 = vadd.f32 %v6280_v25, %v2195_v30  ;;  %v3674_v11 = vld [vmem:[%s7521_s0 + $0x78] sm:$0xf0] }
 0x221   :  { %v6565_v58 = vadd.f32 %v2699_v13, %v2531_v23  ;;  %v2365_v57 = vadd.f32 %v2364_v32, %v2196_v49  ;;  %2750 = vmatmul.bf16.vlgmr.msrb.gmra.mxu0 %v3633_v14  ;;  %v3669_v23 = vor.u32 %v4904_v42, %v3666_v4  ;;  %v3677_v49 = vor.u32 %v4905_v9, %v3674_v11  ;;  %v3696_v4 = vld [vmem:[%s7521_s0 + $0x90] sm:$0xf]  ;;  %v3698_v9 = vld [vmem:[%s7521_s0 + $0xb0] sm:$0xf0]  ;;  %v4913_v11 = vld [vmem:[%s7521_s0 + $0x9c] sm:$0xf] }
 0x222   :  { %2919 = vmatmul.bf16.vlgmr.msrb.gmra.mxu1 %v3637_v19  ;;  %v3665_v19 = vor.u32 %v4908_v47, %v3664_v3 }
 0x223   :  { %7532 = vst [vmem:[#allocation11_spill] sm:$0xff] %v6565_v58  ;;  %3088 = vmatmul.bf16.vlgmr.msrb.gmra.mxu2 %v3641_v41 }
 0x224   :  { %3257 = vmatmul.bf16.vlgmr.msrb.gmra.mxu3 %v3645_v46 }
 0x226   :  { %v2533_v1 = vpop.f32.mrf.mxu2  ;;  %v2197_v52 = vpop.f32.mrf.mxu0 }
 0x227   :  { %v2702_v0 = vpop.f32.mrf.mxu3  ;;  %v2534_v24 = vadd.f32 %v2533_v1, %v2365_v57  ;;  %v2366_v12 = vpop.f32.mrf.mxu1  ;;  %v2198_v48 = vadd.f32 %v6280_v25, %v2197_v52  ;;  %v3672_v52 = vld [vmem:[%s7521_s0 + $0x58] sm:$0xf] }
 0x229   :  { %v6568_v39 = vadd.f32 %v2702_v0, %v2534_v24  ;;  %v2367_v56 = vadd.f32 %v2366_v12, %v2198_v48  ;;  %v4909_v24 = vld [vmem:[%s7521_s0 + $0x74] sm:$0xf0] }
 0x22a   :  { %v3673_v46 = vor.u32 %v4909_v24, %v3672_v52  ;;  %v4916_v52 = vld [vmem:[%s7521_s0 + $0xac] sm:$0xf0]  ;;  %v4912_v24 = vld [vmem:[%s7521_s0 + $0x94] sm:$0xf] }
 0x22b   :  { %7533 = vst [vmem:[#allocation12_spill] sm:$0xff] %v6568_v39 }
 0x22e   :  { %v2535_v13 = vpop.f32.mrf.mxu2  ;;  %v2200_v32 = vpop.f32.mrf.mxu0 }
 0x22f   :  { %v2704_v14 = vpop.f32.mrf.mxu3  ;;  %v2536_v30 = vadd.f32 %v2535_v13, %v2367_v56  ;;  %v2369_v41 = vpop.f32.mrf.mxu1  ;;  %v2201_v57 = vadd.f32 %v6280_v25, %v2200_v32  ;;  %v3706_v13 = vld [vmem:[%s7521_s0 + $0xb8] sm:$0xf0] }
 0x231   :  { %v6595_v1 = vadd.f32 %v2704_v14, %v2536_v30  ;;  %v2370_v0 = vadd.f32 %v2369_v41, %v2201_v57  ;;  %2755 = vmatmul.bf16.gmra.mxu0 %v3665_v19  ;;  %v3701_v30 = vor.u32 %v4912_v24, %v3698_v9  ;;  %v3709_v57 = vor.u32 %v4913_v11, %v3706_v13  ;;  %v3728_v9 = vld [vmem:[%s7521_s0 + $0xd0] sm:$0xf]  ;;  %v3730_v11 = vld [vmem:[%s7521_s0 + $0xf0] sm:$0xf0]  ;;  %v4921_v13 = vld [vmem:[%s7521_s0 + $0xdc] sm:$0xf] }
 0x232   :  { %2924 = vmatmul.bf16.gmra.mxu1 %v3669_v23  ;;  %v3697_v23 = vor.u32 %v4916_v52, %v3696_v4 }
 0x233   :  { %7534 = vst [vmem:[#allocation13_spill] sm:$0xff] %v6595_v1  ;;  %3093 = vmatmul.bf16.gmra.mxu2 %v3673_v46 }
 0x234   :  { %3262 = vmatmul.bf16.gmra.mxu3 %v3677_v49 }
 0x236   :  { %v2538_v12 = vpop.f32.mrf.mxu2  ;;  %v2202_v58 = vpop.f32.mrf.mxu0 }
 0x237   :  { %v2707_v48 = vpop.f32.mrf.mxu3  ;;  %v2539_v39 = vadd.f32 %v2538_v12, %v2370_v0  ;;  %v2371_v3 = vpop.f32.mrf.mxu1  ;;  %v2203_v56 = vadd.f32 %v6280_v25, %v2202_v58  ;;  %v3704_v58 = vld [vmem:[%s7521_s0 + $0x98] sm:$0xf] }
 0x239   :  { %v6598_v47 = vadd.f32 %v2707_v48, %v2539_v39  ;;  %v2372_v42 = vadd.f32 %v2371_v3, %v2203_v56  ;;  %v4917_v39 = vld [vmem:[%s7521_s0 + $0xb4] sm:$0xf0] }
 0x23a   :  { %v3705_v49 = vor.u32 %v4917_v39, %v3704_v58  ;;  %v4924_v58 = vld [vmem:[%s7521_s0 + $0xec] sm:$0xf0]  ;;  %v4920_v39 = vld [vmem:[%s7521_s0 + $0xd4] sm:$0xf] }
 0x23b   :  { %7535 = vst [vmem:[#allocation14_spill] sm:$0xff] %v6598_v47 }
 0x23e   :  { %v2540_v14 = vpop.f32.mrf.mxu2  ;;  %v2205_v41 = vpop.f32.mrf.mxu0 }
 0x23f   :  { %v2709_v19 = vpop.f32.mrf.mxu3  ;;  %v2541_v32 = vadd.f32 %v2540_v14, %v2372_v42  ;;  %v2374_v46 = vpop.f32.mrf.mxu1  ;;  %v2206_v0 = vadd.f32 %v6280_v25, %v2205_v41  ;;  %v3738_v14 = vld [vmem:[%s7521_s0 + $0xf8] sm:$0xf0] }
 0x241   :  { %v6625_v12 = vadd.f32 %v2709_v19, %v2541_v32  ;;  %v2375_v48 = vadd.f32 %v2374_v46, %v2206_v0  ;;  %2760 = vmatmul.bf16.gmra.mxu0 %v3697_v23  ;;  %v3733_v32 = vor.u32 %v4920_v39, %v3730_v11  ;;  %v3741_v0 = vor.u32 %v4921_v13, %v3738_v14  ;;  %v3760_v11 = vld [vmem:[%s7521_s0 + $0x110] sm:$0xf]  ;;  %v3762_v13 = vld [vmem:[%s7521_s0 + $0x130] sm:$0xf0]  ;;  %v4929_v14 = vld [vmem:[%s7521_s0 + $0x11c] sm:$0xf] }
 0x242   :  { %2929 = vmatmul.bf16.gmra.mxu1 %v3701_v30  ;;  %v3729_v30 = vor.u32 %v4924_v58, %v3728_v9 }
 0x243   :  { %7536 = vst [vmem:[#allocation15_spill] sm:$0xff] %v6625_v12  ;;  %3098 = vmatmul.bf16.gmra.mxu2 %v3705_v49 }
 0x244   :  { %3267 = vmatmul.bf16.gmra.mxu3 %v3709_v57 }
 0x246   :  { %v2543_v3 = vpop.f32.mrf.mxu2  ;;  %v2207_v1 = vpop.f32.mrf.mxu0 }
 0x247   :  { %v2712_v56 = vpop.f32.mrf.mxu3  ;;  %v2544_v47 = vadd.f32 %v2543_v3, %v2375_v48  ;;  %v2376_v4 = vpop.f32.mrf.mxu1  ;;  %v2208_v42 = vadd.f32 %v6280_v25, %v2207_v1  ;;  %v3736_v1 = vld [vmem:[%s7521_s0 + $0xd8] sm:$0xf] }
 0x249   :  { %v6628_v52 = vadd.f32 %v2712_v56, %v2544_v47  ;;  %v2377_v24 = vadd.f32 %v2376_v4, %v2208_v42  ;;  %v4925_v47 = vld [vmem:[%s7521_s0 + $0xf4] sm:$0xf0] }
 0x24a   :  { %v3737_v57 = vor.u32 %v4925_v47, %v3736_v1  ;;  %v4932_v1 = vld [vmem:[%s7521_s0 + $0x12c] sm:$0xf0]  ;;  %v4928_v47 = vld [vmem:[%s7521_s0 + $0x114] sm:$0xf] }
 0x24b   :  { %7537 = vst [vmem:[#allocation16_spill] sm:$0xff] %v6628_v52 }
 0x24e   :  { %v2545_v19 = vpop.f32.mrf.mxu2  ;;  %v2210_v46 = vpop.f32.mrf.mxu0 }
 0x24f   :  { %v2714_v23 = vpop.f32.mrf.mxu3  ;;  %v2546_v41 = vadd.f32 %v2545_v19, %v2377_v24  ;;  %v2379_v49 = vpop.f32.mrf.mxu1  ;;  %v2211_v48 = vadd.f32 %v6280_v25, %v2210_v46  ;;  %v3770_v19 = vld [vmem:[%s7521_s0 + $0x138] sm:$0xf0] }
 0x251   :  { %v6655_v3 = vadd.f32 %v2714_v23, %v2546_v41  ;;  %v2380_v56 = vadd.f32 %v2379_v49, %v2211_v48  ;;  %2765 = vmatmul.bf16.gmra.mxu0 %v3729_v30  ;;  %v3765_v41 = vor.u32 %v4928_v47, %v3762_v13  ;;  %v3773_v48 = vor.u32 %v4929_v14, %v3770_v19  ;;  %v3792_v13 = vld [vmem:[%s7521_s0 + $0x150] sm:$0xf]  ;;  %v3794_v14 = vld [vmem:[%s7521_s0 + $0x170] sm:$0xf0]  ;;  %v4937_v19 = vld [vmem:[%s7521_s0 + $0x15c] sm:$0xf] }
 0x252   :  { %2934 = vmatmul.bf16.gmra.mxu1 %v3733_v32  ;;  %v3761_v32 = vor.u32 %v4932_v1, %v3760_v11 }
 0x253   :  { %7538 = vst [vmem:[#allocation17_spill] sm:$0xff] %v6655_v3  ;;  %3103 = vmatmul.bf16.gmra.mxu2 %v3737_v57 }
 0x254   :  { %3272 = vmatmul.bf16.gmra.mxu3 %v3741_v0 }
 0x256   :  { %v2548_v4 = vpop.f32.mrf.mxu2  ;;  %v2212_v12 = vpop.f32.mrf.mxu0 }
 0x257   :  { %v2717_v42 = vpop.f32.mrf.mxu3  ;;  %v2549_v52 = vadd.f32 %v2548_v4, %v2380_v56  ;;  %v2381_v9 = vpop.f32.mrf.mxu1  ;;  %v2213_v24 = vadd.f32 %v6280_v25, %v2212_v12  ;;  %v3768_v12 = vld [vmem:[%s7521_s0 + $0x118] sm:$0xf] }
 0x259   :  { %v6658_v58 = vadd.f32 %v2717_v42, %v2549_v52  ;;  %v2382_v39 = vadd.f32 %v2381_v9, %v2213_v24  ;;  %v4933_v52 = vld [vmem:[%s7521_s0 + $0x134] sm:$0xf0] }
 0x25a   :  { %v3769_v0 = vor.u32 %v4933_v52, %v3768_v12  ;;  %v4940_v12 = vld [vmem:[%s7521_s0 + $0x16c] sm:$0xf0]  ;;  %v4936_v52 = vld [vmem:[%s7521_s0 + $0x154] sm:$0xf] }
 0x25b   :  { %7539 = vst [vmem:[#allocation18_spill] sm:$0xff] %v6658_v58 }
 0x25e   :  { %v2550_v23 = vpop.f32.mrf.mxu2  ;;  %v2215_v49 = vpop.f32.mrf.mxu0 }
 0x25f   :  { %v2719_v30 = vpop.f32.mrf.mxu3  ;;  %v2551_v46 = vadd.f32 %v2550_v23, %v2382_v39  ;;  %v2384_v57 = vpop.f32.mrf.mxu1  ;;  %v2216_v56 = vadd.f32 %v6280_v25, %v2215_v49  ;;  %v3802_v23 = vld [vmem:[%s7521_s0 + $0x178] sm:$0xf0] }
 0x261   :  { %v6685_v4 = vadd.f32 %v2719_v30, %v2551_v46  ;;  %v2385_v42 = vadd.f32 %v2384_v57, %v2216_v56  ;;  %2770 = vmatmul.bf16.gmra.mxu0 %v3761_v32  ;;  %v3797_v46 = vor.u32 %v4936_v52, %v3794_v14  ;;  %v3805_v56 = vor.u32 %v4937_v19, %v3802_v23  ;;  %v3824_v14 = vld [vmem:[%s7521_s0 + $0x190] sm:$0xf]  ;;  %v3826_v19 = vld [vmem:[%s7521_s0 + $0x1b0] sm:$0xf0]  ;;  %v4945_v23 = vld [vmem:[%s7521_s0 + $0x19c] sm:$0xf] }
 0x262   :  { %2939 = vmatmul.bf16.gmra.mxu1 %v3765_v41  ;;  %v3793_v41 = vor.u32 %v4940_v12, %v3792_v13 }
 0x263   :  { %7540 = vst [vmem:[#allocation19_spill] sm:$0xff] %v6685_v4  ;;  %3108 = vmatmul.bf16.gmra.mxu2 %v3769_v0 }
 0x264   :  { %3277 = vmatmul.bf16.gmra.mxu3 %v3773_v48 }
 0x266   :  { %v2553_v9 = vpop.f32.mrf.mxu2  ;;  %v2217_v3 = vpop.f32.mrf.mxu0 }
 0x267   :  { %v2722_v24 = vpop.f32.mrf.mxu3  ;;  %v2554_v58 = vadd.f32 %v2553_v9, %v2385_v42  ;;  %v2386_v11 = vpop.f32.mrf.mxu1  ;;  %v2218_v39 = vadd.f32 %v6280_v25, %v2217_v3  ;;  %v3800_v3 = vld [vmem:[%s7521_s0 + $0x158] sm:$0xf] }
 0x269   :  { %v6688_v1 = vadd.f32 %v2722_v24, %v2554_v58  ;;  %v2387_v47 = vadd.f32 %v2386_v11, %v2218_v39  ;;  %v4941_v58 = vld [vmem:[%s7521_s0 + $0x174] sm:$0xf0] }
 0x26a   :  { %v3801_v48 = vor.u32 %v4941_v58, %v3800_v3  ;;  %v4948_v3 = vld [vmem:[%s7521_s0 + $0x1ac] sm:$0xf0]  ;;  %v4944_v58 = vld [vmem:[%s7521_s0 + $0x194] sm:$0xf] }
 0x26b   :  { %7541 = vst [vmem:[#allocation20_spill] sm:$0xff] %v6688_v1 }
 0x26e   :  { %v2555_v30 = vpop.f32.mrf.mxu2  ;;  %v2220_v57 = vpop.f32.mrf.mxu0 }
 0x26f   :  { %v2724_v32 = vpop.f32.mrf.mxu3  ;;  %v2556_v49 = vadd.f32 %v2555_v30, %v2387_v47  ;;  %v2389_v0 = vpop.f32.mrf.mxu1  ;;  %v2221_v42 = vadd.f32 %v6280_v25, %v2220_v57  ;;  %v3834_v30 = vld [vmem:[%s7521_s0 + $0x1b8] sm:$0xf0] }
 0x271   :  { %v6715_v9 = vadd.f32 %v2724_v32, %v2556_v49  ;;  %v2390_v24 = vadd.f32 %v2389_v0, %v2221_v42  ;;  %2775 = vmatmul.bf16.gmra.mxu0 %v3793_v41  ;;  %v3829_v49 = vor.u32 %v4944_v58, %v3826_v19  ;;  %v3837_v42 = vor.u32 %v4945_v23, %v3834_v30  ;;  %v3856_v19 = vld [vmem:[%s7521_s0 + $0x1d0] sm:$0xf]  ;;  %v3858_v23 = vld [vmem:[%s7521_s0 + $0x1f0] sm:$0xf0]  ;;  %v3866_v30 = vld [vmem:[%s7521_s0 + $0x1f8] sm:$0xf0] }
 0x272   :  { %2944 = vmatmul.bf16.gmra.mxu1 %v3797_v46  ;;  %v3825_v46 = vor.u32 %v4948_v3, %v3824_v14 }
 0x273   :  { %7542 = vst [vmem:[#allocation21_spill] sm:$0xff] %v6715_v9  ;;  %3113 = vmatmul.bf16.gmra.mxu2 %v3801_v48 }
 0x274   :  { %3282 = vmatmul.bf16.gmra.mxu3 %v3805_v56 }
 0x276   :  { %v2558_v11 = vpop.f32.mrf.mxu2  ;;  %v2222_v4 = vpop.f32.mrf.mxu0 }
 0x277   :  { %v2727_v39 = vpop.f32.mrf.mxu3  ;;  %v2559_v1 = vadd.f32 %v2558_v11, %v2390_v24  ;;  %v2391_v13 = vpop.f32.mrf.mxu1  ;;  %v2223_v47 = vadd.f32 %v6280_v25, %v2222_v4  ;;  %v3832_v4 = vld [vmem:[%s7521_s0 + $0x198] sm:$0xf] }
 0x279   :  { %v6718_v12 = vadd.f32 %v2727_v39, %v2559_v1  ;;  %v2392_v52 = vadd.f32 %v2391_v13, %v2223_v47  ;;  %v4949_v1 = vld [vmem:[%s7521_s0 + $0x1b4] sm:$0xf0] }
 0x27a   :  { %v3833_v56 = vor.u32 %v4949_v1, %v3832_v4  ;;  %v4956_v4 = vld [vmem:[%s7521_s0 + $0x1ec] sm:$0xf0]  ;;  %v4952_v1 = vld [vmem:[%s7521_s0 + $0x1d4] sm:$0xf] }
 0x27b   :  { %7543 = vst [vmem:[#allocation22_spill] sm:$0xff] %v6718_v12 }
 0x27e   :  { %v2560_v32 = vpop.f32.mrf.mxu2  ;;  %v2225_v0 = vpop.f32.mrf.mxu0 }
 0x27f   :  { %v2729_v41 = vpop.f32.mrf.mxu3  ;;  %v2561_v57 = vadd.f32 %v2560_v32, %v2392_v52  ;;  %v2394_v48 = vpop.f32.mrf.mxu1  ;;  %v2226_v24 = vadd.f32 %v6280_v25, %v2225_v0 }
 0x281   :  { %v6745_v11 = vadd.f32 %v2729_v41, %v2561_v57  ;;  %v2395_v39 = vadd.f32 %v2394_v48, %v2226_v24  ;;  %2780 = vmatmul.bf16.gmra.mxu0 %v3825_v46  ;;  %v3857_v46 = vor.u32 %v4956_v4, %v3856_v19  ;;  %v5407_v24 = vld [vmem:[%s7520_s2] ss:$0 sm:$0xff] }
 0x282   :  { %2949 = vmatmul.bf16.gmra.mxu1 %v3829_v49  ;;  %v3861_v49 = vor.u32 %v4952_v1, %v3858_v23 }
 0x283   :  { %7544 = vst [vmem:[#allocation23_spill] sm:$0xff] %v6745_v11  ;;  %3118 = vmatmul.bf16.gmra.mxu2 %v3833_v56 }
 0x284   :  { %3287 = vmatmul.bf16.gmra.mxu3 %v3837_v42 }
 0x286   :  { %v2563_v13 = vpop.f32.mrf.mxu2  ;;  %v2227_v9 = vpop.f32.mrf.mxu0 }
 0x287   :  { %v2732_v47 = vpop.f32.mrf.mxu3  ;;  %v2564_v12 = vadd.f32 %v2563_v13, %v2395_v39  ;;  %v2396_v14 = vpop.f32.mrf.mxu1  ;;  %v2228_v52 = vadd.f32 %v6280_v25, %v2227_v9  ;;  %v3864_v25 = vld [vmem:[%s7521_s0 + $0x1d8] sm:$0xf] }
 0x288   :  { %v4957_v9 = vld [vmem:[%s7521_s0 + $0x1f4] sm:$0xf0] }
 0x289   :  { %v6748_v3 = vadd.f32 %v2732_v47, %v2564_v12  ;;  %v2397_v58 = vadd.f32 %v2396_v14, %v2228_v52  ;;  %v4953_v12 = vld [vmem:[%s7521_s0 + $0x1dc] sm:$0xf]  ;;  %v3865_v56 = vor.u32 %v4957_v9, %v3864_v25  ;;  %v3888_v9 = vld [vmem:[%s7521_s0 + $0x210] sm:$0xf] }
 0x28a   :  { %v3869_v42 = vor.u32 %v4953_v12, %v3866_v30  ;;  %v4964_v12 = vld [vmem:[%s7521_s0 + $0x22c] sm:$0xf0]  ;;  %v4960_v30 = vld [vmem:[%s7521_s0 + $0x214] sm:$0xf] }
 0x28b   :  { %7545 = vst [vmem:[#allocation24_spill] sm:$0xff] %v6748_v3 }
 0x28e   :  { %v2565_v32 = vpop.f32.mrf.mxu2  ;;  %v2230_v0 = vpop.f32.mrf.mxu0 }
 0x28f   :  { %v2734_v41 = vpop.f32.mrf.mxu3  ;;  %v2566_v57 = vadd.f32 %v2565_v32, %v2397_v58  ;;  %v2399_v48 = vpop.f32.mrf.mxu1  ;;  %v2231_v39 = vadd.f32 %v5407_v24, %v2230_v0  ;;  %v3890_v32 = vld [vmem:[%s7521_s0 + $0x230] sm:$0xf0] }
 0x291   :  { %v6777_v13 = vadd.f32 %v2734_v41, %v2566_v57  ;;  %v2400_v47 = vadd.f32 %v2399_v48, %v2231_v39  ;;  %2785 = vmatmul.bf16.gmra.mxu0 %v3857_v46  ;;  %v3896_v41 = vld [vmem:[%s7521_s0 + $0x218] sm:$0xf]  ;;  %v3898_v57 = vld [vmem:[%s7521_s0 + $0x238] sm:$0xf0] }
 0x292   :  { %2954 = vmatmul.bf16.gmra.mxu1 %v3861_v49  ;;  %v4965_v46 = vld [vmem:[%s7521_s0 + $0x234] sm:$0xf0]  ;;  %v4961_v49 = vld [vmem:[%s7521_s0 + $0x21c] sm:$0xf] }
 0x293   :  { %7546 = vst [vmem:[#allocation25_spill] sm:$0xff] %v6777_v13  ;;  %3123 = vmatmul.bf16.gmra.mxu2 %v3865_v56  ;;  %v3889_v56 = vor.u32 %v4964_v12, %v3888_v9  ;;  %v4972_v12 = vld [vmem:[%s7521_s0 + $0x26c] sm:$0xf0] }
 0x294   :  { %3292 = vmatmul.bf16.gmra.mxu3 %v3869_v42  ;;  %v3893_v42 = vor.u32 %v4960_v30, %v3890_v32  ;;  %v3922_v32 = vld [vmem:[%s7521_s0 + $0x270] sm:$0xf0] }
 0x296   :  { %v2568_v14 = vpop.f32.mrf.mxu2  ;;  %v2232_v58 = vpop.f32.mrf.mxu0 }
 0x297   :  { %v2737_v52 = vpop.f32.mrf.mxu3  ;;  %v2569_v19 = vadd.f32 %v2568_v14, %v2400_v47  ;;  %v2401_v4 = vpop.f32.mrf.mxu1  ;;  %v2233_v1 = vadd.f32 %v5407_v24, %v2232_v58  ;;  %v3897_v14 = vor.u32 %v4965_v46, %v3896_v41  ;;  %v3930_v41 = vld [vmem:[%s7521_s0 + $0x278] sm:$0xf0] }
 0x299   :  { %v6779_v23 = vadd.f32 %v2737_v52, %v2569_v19  ;;  %v2402_v25 = vadd.f32 %v2401_v4, %v2233_v1  ;;  %v3901_v52 = vor.u32 %v4961_v49, %v3898_v57 }
 0x29b   :  { %7547 = vst [vmem:[#allocation26_spill] sm:$0xff] %v6779_v23 }
 0x29e   :  { %v2570_v0 = vpop.f32.mrf.mxu2  ;;  %v2751_v39 = vpop.f32.mrf.mxu0 }
 0x29f   :  { %v2739_v48 = vpop.f32.mrf.mxu3  ;;  %v2571_v24 = vadd.f32 %v2570_v0, %v2402_v25  ;;  %v2920_v47 = vpop.f32.mrf.mxu1  ;;  %v2752_v58 = vadd.f32 %v2751_v39, %v5783_v35  ;;  %v3920_v25 = vld [vmem:[%s7521_s0 + $0x250] sm:$0xf]  ;;  %v4968_v35 = vld [vmem:[%s7521_s0 + $0x254] sm:$0xf] }
 0x2a0   :  { %v3921_v0 = vor.u32 %v4972_v12, %v3920_v25 }
 0x2a1   :  { %v6805_v19 = vadd.f32 %v2739_v48, %v2571_v24  ;;  %2790 = vmatmul.bf16.gmra.mxu0 %v3889_v56  ;;  %v2921_v3 = vadd.f32 %v2920_v47, %v2752_v58  ;;  %v3925_v48 = vor.u32 %v4968_v35, %v3922_v32  ;;  %v3952_v35 = vld [vmem:[%s7521_s0 + $0x290] sm:$0xf] }
 0x2a2   :  { %2959 = vmatmul.bf16.gmra.mxu1 %v3893_v42  ;;  %v4980_v32 = vld [vmem:[%s7521_s0 + $0x2ac] sm:$0xf0] }
 0x2a3   :  { %7548 = vst [vmem:[#allocation27_spill] sm:$0xff] %v6805_v19  ;;  %3128 = vmatmul.bf16.gmra.mxu2 %v3897_v14 }
 0x2a4   :  { %3297 = vmatmul.bf16.gmra.mxu3 %v3901_v52 }
 0x2a6   :  { %v3089_v4 = vpop.f32.mrf.mxu2  ;;  %v2753_v23 = vpop.f32.mrf.mxu0 }
 0x2a7   :  { %v3258_v1 = vpop.f32.mrf.mxu3  ;;  %v2922_v13 = vpop.f32.mrf.mxu1  ;;  %v2754_v9 = vadd.f32 %v2753_v23, %v5810_v55  ;;  %v3090_v30 = vadd.f32 %v3089_v4, %v2921_v3  ;;  %v3928_v55 = vld [vmem:[%s7521_s0 + $0x258] sm:$0xf]  ;;  %v4969_v3 = vld [vmem:[%s7521_s0 + $0x25c] sm:$0xf] }
 0x2a8   :  { %v4973_v23 = vld [vmem:[%s7521_s0 + $0x274] sm:$0xf0]  ;;  %v3933_v14 = vor.u32 %v4969_v3, %v3930_v41  ;;  %v4977_v3 = vld [vmem:[%s7521_s0 + $0x29c] sm:$0xf] }
 0x2a9   :  { %v2923_v46 = vadd.f32 %v2922_v13, %v2754_v9  ;;  %v3259_v56 = vadd.f32 %v3258_v1, %v3090_v30  ;;  %v3929_v47 = vor.u32 %v4973_v23, %v3928_v55  ;;  %v4976_v55 = vld [vmem:[%s7521_s0 + $0x294] sm:$0xf]  ;;  %v4981_v23 = vld [vmem:[%s7521_s0 + $0x2b4] sm:$0xf0]  ;;  %v3962_v41 = vld [vmem:[%s7521_s0 + $0x2b8] sm:$0xf0] }
 0x2ab   :  { %v3418_v58 = vmax.f32 %v3259_v56, 0.0 }
 0x2ae   :  { %v3091_v49 = vpop.f32.mrf.mxu2  ;;  %v2756_v24 = vpop.f32.mrf.mxu0 }
 0x2af   :  { %v3260_v57 = vpop.f32.mrf.mxu3  ;;  %v3092_v42 = vadd.f32 %v3091_v49, %v2923_v46  ;;  %v2925_v39 = vpop.f32.mrf.mxu1  ;;  %v2757_v13 = vadd.f32 %v2756_v24, %v5813_v63 }
 0x2b1   :  { %v3261_v52 = vadd.f32 %v3260_v57, %v3092_v42  ;;  %2795 = vmatmul.bf16.gmra.mxu0 %v3921_v0  ;;  %v2926_v12 = vadd.f32 %v2925_v39, %v2757_v13  ;;  %v3953_v0 = vor.u32 %v4980_v32, %v3952_v35  ;;  %v3984_v32 = vld [vmem:[%s7521_s0 + $0x2d0] sm:$0xf] }
 0x2b2   :  { %2964 = vmatmul.bf16.gmra.mxu1 %v3925_v48 }
 0x2b3   :  { %v3419_v4 = vmax.f32 %v3261_v52, 0.0  ;;  %3133 = vmatmul.bf16.gmra.mxu2 %v3929_v47 }
 0x2b4   :  { %3302 = vmatmul.bf16.gmra.mxu3 %v3933_v14  ;;  %v3965_v14 = vor.u32 %v4977_v3, %v3962_v41  ;;  %v3994_v3 = vld [vmem:[%s7521_s0 + $0x2f8] sm:$0xf0] }
 0x2b5   :  { %v5217_v19 = vpack.c.bf16 %v3419_v4, %v3418_v58 }
 0x2b6   :  { %v3094_v9 = vpop.f32.mrf.mxu2  ;;  %v2758_v1 = vpop.f32.mrf.mxu0 }
 0x2b7   :  { %v3263_v11 = vpop.f32.mrf.mxu3  ;;  %5218 = vst [vmem:[%s7522_s3] sm:$0xff] %v5217_v19   ;;  %v2927_v25 = vpop.f32.mrf.mxu1  ;;  %v2759_v30 = vadd.f32 %v2758_v1, %v5840_v20  ;;  %v3095_v63 = vadd.f32 %v3094_v9, %v2926_v12  ;;  %v3954_v19 = vld [vmem:[%s7521_s0 + $0x2b0] sm:$0xf0]  ;;  %v3960_v20 = vld [vmem:[%s7521_s0 + $0x298] sm:$0xf] }
 0x2b8   :  { %v3957_v48 = vor.u32 %v4976_v55, %v3954_v19  ;;  %v3961_v47 = vor.u32 %v4981_v23, %v3960_v20  ;;  %v4984_v55 = vld [vmem:[%s7521_s0 + $0x2d4] sm:$0xf]  ;;  %v4989_v20 = vld [vmem:[%s7521_s0 + $0x2f4] sm:$0xf0]  ;;  %v4985_v23 = vld [vmem:[%s7521_s0 + $0x2dc] sm:$0xf] }
 0x2b9   :  { %v2928_v46 = vadd.f32 %v2927_v25, %v2759_v30  ;;  %v3264_v56 = vadd.f32 %v3263_v11, %v3095_v63  ;;  %v4988_v63 = vld [vmem:[%s7521_s0 + $0x2ec] sm:$0xf0]  ;;  %v3986_v19 = vld [vmem:[%s7521_s0 + $0x2f0] sm:$0xf0] }
 0x2bb   :  { %v3420_v58 = vmax.f32 %v3264_v56, 0.0 }
 0x2be   :  { %v3096_v49 = vpop.f32.mrf.mxu2  ;;  %v2761_v24 = vpop.f32.mrf.mxu0 }
 0x2bf   :  { %v3265_v57 = vpop.f32.mrf.mxu3  ;;  %v3097_v42 = vadd.f32 %v3096_v49, %v2928_v46  ;;  %v2930_v39 = vpop.f32.mrf.mxu1  ;;  %v2762_v9 = vadd.f32 %v2761_v24, %v5852_v31 }
 0x2c1   :  { %v3266_v52 = vadd.f32 %v3265_v57, %v3097_v42  ;;  %2800 = vmatmul.bf16.gmra.mxu0 %v3953_v0  ;;  %v2931_v30 = vadd.f32 %v2930_v39, %v2762_v9  ;;  %v3985_v57 = vor.u32 %v4988_v63, %v3984_v32  ;;  %v3989_v0 = vor.u32 %v4984_v55, %v3986_v19  ;;  %v4996_v32 = vld [vmem:[%s7521_s0 + $0x32c] sm:$0xf0]  ;;  %v4992_v63 = vld [vmem:[%s7521_s0 + $0x314] sm:$0xf]  ;;  %v4997_v55 = vld [vmem:[%s7521_s0 + $0x334] sm:$0xf0] }
 0x2c2   :  { %2969 = vmatmul.bf16.gmra.mxu1 %v3957_v48  ;;  %v4993_v19 = vld [vmem:[%s7521_s0 + $0x31c] sm:$0xf] }
 0x2c3   :  { %v3421_v4 = vmax.f32 %v3266_v52, 0.0  ;;  %3138 = vmatmul.bf16.gmra.mxu2 %v3961_v47  ;;  %v3997_v47 = vor.u32 %v4985_v23, %v3994_v3 }
 0x2c4   :  { %3307 = vmatmul.bf16.gmra.mxu3 %v3965_v14 }
 0x2c5   :  { %v5222_v13 = vpack.c.bf16 %v3421_v4, %v3420_v58 }
 0x2c6   :  { %v3099_v1 = vpop.f32.mrf.mxu2  ;;  %v2763_v11 = vpop.f32.mrf.mxu0 }
 0x2c7   :  { %v3268_v25 = vpop.f32.mrf.mxu3  ;;  %5374 = vst [vmem:[%s7522_s3 + $0x8] sm:$0xff] %v5222_v13   ;;  %v2932_v12 = vpop.f32.mrf.mxu1  ;;  %v2764_v35 = vadd.f32 %v2763_v11, %v5882_v53  ;;  %v3100_v31 = vadd.f32 %v3099_v1, %v2931_v30  ;;  %v3992_v53 = vld [vmem:[%s7521_s0 + $0x2d8] sm:$0xf] }
 0x2c8   :  { %v3993_v39 = vor.u32 %v4989_v20, %v3992_v53  ;;  %v4026_v53 = vld [vmem:[%s7521_s0 + $0x338] sm:$0xf0] }
 0x2c9   :  { %v2933_v41 = vadd.f32 %v2932_v12, %v2764_v35  ;;  %v3269_v48 = vadd.f32 %v3268_v25, %v3100_v31  ;;  %v4016_v35 = vld [vmem:[%s7521_s0 + $0x310] sm:$0xf]  ;;  %v4018_v31 = vld [vmem:[%s7521_s0 + $0x330] sm:$0xf0] }
 0x2cb   :  { %v3422_v52 = vmax.f32 %v3269_v48, 0.0 }
 0x2ce   :  { %v3101_v46 = vpop.f32.mrf.mxu2  ;;  %v2766_v42 = vpop.f32.mrf.mxu0 }
 0x2cf   :  { %v3270_v49 = vpop.f32.mrf.mxu3  ;;  %v3102_v56 = vadd.f32 %v3101_v46, %v2933_v41  ;;  %v2935_v24 = vpop.f32.mrf.mxu1  ;;  %v2767_v13 = vadd.f32 %v2766_v42, %v5885_v62  ;;  %v4017_v41 = vor.u32 %v4996_v32, %v4016_v35  ;;  %v4021_v46 = vor.u32 %v4992_v63, %v4018_v31  ;;  %v4050_v35 = vld [vmem:[%s7521_s0 + $0x370] sm:$0xf0]  ;;  %v5005_v32 = vld [vmem:[%s7521_s0 + $0x374] sm:$0xf0]  ;;  %v4058_v63 = vld [vmem:[%s7521_s0 + $0x378] sm:$0xf0] }
 0x2d0   :  { %v4029_v42 = vor.u32 %v4993_v19, %v4026_v53 }
 0x2d1   :  { %v3271_v14 = vadd.f32 %v3270_v49, %v3102_v56  ;;  %2805 = vmatmul.bf16.gmra.mxu0 %v3985_v57  ;;  %v2936_v12 = vadd.f32 %v2935_v24, %v2767_v13 }
 0x2d2   :  { %2974 = vmatmul.bf16.gmra.mxu1 %v3989_v0 }
 0x2d3   :  { %v3423_v58 = vmax.f32 %v3271_v14, 0.0  ;;  %3143 = vmatmul.bf16.gmra.mxu2 %v3993_v39 }
 0x2d4   :  { %3312 = vmatmul.bf16.gmra.mxu3 %v3997_v47 }
 0x2d5   :  { %v5227_v4 = vpack.c.bf16 %v3423_v58, %v3422_v52 }
 0x2d6   :  { %v3104_v9 = vpop.f32.mrf.mxu2  ;;  %v2768_v25 = vpop.f32.mrf.mxu0 }
 0x2d7   :  { %v3273_v1 = vpop.f32.mrf.mxu3  ;;  %5375 = vst [vmem:[%s7522_s3 + $0x10] sm:$0xff] %v5227_v4   ;;  %v2937_v11 = vpop.f32.mrf.mxu1  ;;  %v2769_v30 = vadd.f32 %v2768_v25, %v5912_v21  ;;  %v3105_v62 = vadd.f32 %v3104_v9, %v2936_v12  ;;  %v4024_v21 = vld [vmem:[%s7521_s0 + $0x318] sm:$0xf]  ;;  %v5004_v12 = vld [vmem:[%s7521_s0 + $0x36c] sm:$0xf0] }
 0x2d8   :  { %v4025_v56 = vor.u32 %v4997_v55, %v4024_v21 }
 0x2d9   :  { %v2938_v20 = vadd.f32 %v2937_v11, %v2769_v30  ;;  %v3274_v49 = vadd.f32 %v3273_v1, %v3105_v62  ;;  %v4048_v11 = vld [vmem:[%s7521_s0 + $0x350] sm:$0xf]  ;;  %v5000_v30 = vld [vmem:[%s7521_s0 + $0x354] sm:$0xf]  ;;  %v5001_v62 = vld [vmem:[%s7521_s0 + $0x35c] sm:$0xf] }
 0x2da   :  { %v4049_v19 = vor.u32 %v5004_v12, %v4048_v11  ;;  %v4053_v53 = vor.u32 %v5000_v30, %v4050_v35  ;;  %v5009_v11 = vld [vmem:[%s7521_s0 + $0x39c] sm:$0xf] }
 0x2db   :  { %v3424_v39 = vmax.f32 %v3274_v49, 0.0  ;;  %v4061_v49 = vor.u32 %v5001_v62, %v4058_v63  ;;  %v4090_v12 = vld [vmem:[%s7521_s0 + $0x3b8] sm:$0xf0] }
 0x2de   :  { %v3106_v23 = vpop.f32.mrf.mxu2  ;;  %v2771_v0 = vpop.f32.mrf.mxu0 }
 0x2df   :  { %v3275_v3 = vpop.f32.mrf.mxu3  ;;  %v3107_v57 = vadd.f32 %v3106_v23, %v2938_v20  ;;  %v2940_v48 = vpop.f32.mrf.mxu1  ;;  %v2772_v52 = vadd.f32 %v2771_v0, %v5915_v29 }
 0x2e1   :  { %v3276_v24 = vadd.f32 %v3275_v3, %v3107_v57  ;;  %2810 = vmatmul.bf16.gmra.mxu0 %v4017_v41  ;;  %v2941_v1 = vadd.f32 %v2940_v48, %v2772_v52 }
 0x2e2   :  { %2979 = vmatmul.bf16.gmra.mxu1 %v4021_v46 }
 0x2e3   :  { %v3425_v47 = vmax.f32 %v3276_v24, 0.0  ;;  %3148 = vmatmul.bf16.gmra.mxu2 %v4025_v56 }
 0x2e4   :  { %3317 = vmatmul.bf16.gmra.mxu3 %v4029_v42 }
 0x2e5   :  { %v5232_v14 = vpack.c.bf16 %v3425_v47, %v3424_v39 }
 0x2e6   :  { %v3109_v58 = vpop.f32.mrf.mxu2  ;;  %v2773_v13 = vpop.f32.mrf.mxu0 }
 0x2e7   :  { %v3278_v4 = vpop.f32.mrf.mxu3  ;;  %5376 = vst [vmem:[%s7522_s3 + $0x18] sm:$0xff] %v5232_v14   ;;  %v2942_v9 = vpop.f32.mrf.mxu1  ;;  %v2774_v25 = vadd.f32 %v2773_v13, %v5942_v51  ;;  %v3110_v29 = vadd.f32 %v3109_v58, %v2941_v1  ;;  %v4056_v51 = vld [vmem:[%s7521_s0 + $0x358] sm:$0xf]  ;;  %v5012_v13 = vld [vmem:[%s7521_s0 + $0x3ac] sm:$0xf0] }
 0x2e8   :  { %v4057_v46 = vor.u32 %v5005_v32, %v4056_v51  ;;  %v4082_v1 = vld [vmem:[%s7521_s0 + $0x3b0] sm:$0xf0] }
 0x2e9   :  { %v2943_v31 = vadd.f32 %v2942_v9, %v2774_v25  ;;  %v3279_v20 = vadd.f32 %v3278_v4, %v3110_v29  ;;  %v4080_v4 = vld [vmem:[%s7521_s0 + $0x390] sm:$0xf]  ;;  %v5008_v9 = vld [vmem:[%s7521_s0 + $0x394] sm:$0xf]  ;;  %v5013_v25 = vld [vmem:[%s7521_s0 + $0x3b4] sm:$0xf0] }
 0x2ea   :  { %v4081_v51 = vor.u32 %v5012_v13, %v4080_v4  ;;  %v4085_v32 = vor.u32 %v5008_v9, %v4082_v1 }
 0x2eb   :  { %v3426_v0 = vmax.f32 %v3279_v20, 0.0 }
 0x2ee   :  { %v3111_v21 = vpop.f32.mrf.mxu2  ;;  %v2776_v3 = vpop.f32.mrf.mxu0 }
 0x2ef   :  { %v3280_v55 = vpop.f32.mrf.mxu3  ;;  %v3112_v23 = vadd.f32 %v3111_v21, %v2943_v31  ;;  %v2945_v41 = vpop.f32.mrf.mxu1  ;;  %v2777_v42 = vadd.f32 %v2776_v3, %v5945_v61 }
 0x2f1   :  { %v3281_v57 = vadd.f32 %v3280_v55, %v3112_v23  ;;  %2815 = vmatmul.bf16.gmra.mxu0 %v4049_v19  ;;  %v2946_v52 = vadd.f32 %v2945_v41, %v2777_v42  ;;  %v4093_v19 = vor.u32 %v5009_v11, %v4090_v12  ;;  %v4112_v42 = vld [vmem:[%s7521_s0 + $0x3d0] sm:$0xf] }
 0x2f2   :  { %2984 = vmatmul.bf16.gmra.mxu1 %v4053_v53 }
 0x2f3   :  { %v3427_v48 = vmax.f32 %v3281_v57, 0.0  ;;  %3153 = vmatmul.bf16.gmra.mxu2 %v4057_v46 }
 0x2f4   :  { %3322 = vmatmul.bf16.gmra.mxu3 %v4061_v49 }
 0x2f5   :  { %v5237_v56 = vpack.c.bf16 %v3427_v48, %v3426_v0 }
 0x2f6   :  { %v3114_v24 = vpop.f32.mrf.mxu2  ;;  %v2778_v47 = vpop.f32.mrf.mxu0 }
 0x2f7   :  { %v3283_v39 = vpop.f32.mrf.mxu3  ;;  %5377 = vst [vmem:[%s7522_s3 + $0x20] sm:$0xff] %v5237_v56   ;;  %v2947_v14 = vpop.f32.mrf.mxu1  ;;  %v2779_v58 = vadd.f32 %v2778_v47, %v5972_v22  ;;  %v3115_v61 = vadd.f32 %v3114_v24, %v2946_v52  ;;  %v4088_v22 = vld [vmem:[%s7521_s0 + $0x398] sm:$0xf]  ;;  %v5020_v24 = vld [vmem:[%s7521_s0 + $0x3ec] sm:$0xf0] }
 0x2f8   :  { %v4089_v55 = vor.u32 %v5013_v25, %v4088_v22  ;;  %v4114_v47 = vld [vmem:[%s7521_s0 + $0x3f0] sm:$0xf0]  ;;  %v5017_v52 = vld [vmem:[%s7521_s0 + $0x3dc] sm:$0xf]  ;;  %v4113_v9 = vor.u32 %v5020_v24, %v4112_v42 }
 0x2f9   :  { %v2948_v29 = vadd.f32 %v2947_v14, %v2779_v58  ;;  %v3284_v62 = vadd.f32 %v3283_v39, %v3115_v61  ;;  %v5016_v39 = vld [vmem:[%s7521_s0 + $0x3d4] sm:$0xf]  ;;  %v5021_v14 = vld [vmem:[%s7521_s0 + $0x3f4] sm:$0xf0]  ;;  %v4122_v58 = vld [vmem:[%s7521_s0 + $0x3f8] sm:$0xf0] }
 0x2fa   :  { %v4117_v1 = vor.u32 %v5016_v39, %v4114_v47 }
 0x2fb   :  { %v3428_v20 = vmax.f32 %v3284_v62, 0.0 }
 0x2fe   :  { %v3116_v30 = vpop.f32.mrf.mxu2  ;;  %v2781_v31 = vpop.f32.mrf.mxu0 }
 0x2ff   :  { %v3285_v35 = vpop.f32.mrf.mxu3  ;;  %v3117_v63 = vadd.f32 %v3116_v30, %v2948_v29  ;;  %v2950_v21 = vpop.f32.mrf.mxu1  ;;  %v2782_v41 = vadd.f32 %v2781_v31, %v5984_v36  ;;  %v4125_v30 = vor.u32 %v5017_v52, %v4122_v58 }
 0x301   :  { %v3286_v53 = vadd.f32 %v3285_v35, %v3117_v63  ;;  %2820 = vmatmul.bf16.gmra.mxu0 %v4081_v51  ;;  %v2951_v48 = vadd.f32 %v2950_v21, %v2782_v41  ;;  %v5024_v41 = vld [vmem:[%s7521_s0 + $0x414] sm:$0xf] }
 0x302   :  { %2989 = vmatmul.bf16.gmra.mxu1 %v4085_v32 }
 0x303   :  { %v3429_v23 = vmax.f32 %v3286_v53, 0.0  ;;  %3158 = vmatmul.bf16.gmra.mxu2 %v4089_v55 }
 0x304   :  { %3327 = vmatmul.bf16.gmra.mxu3 %v4093_v19 }
 0x305   :  { %v5242_v3 = vpack.c.bf16 %v3429_v23, %v3428_v20  ;;  %v4144_v23 = vld [vmem:[%s7521_s0 + $0x410] sm:$0xf] }
 0x306   :  { %v3119_v46 = vpop.f32.mrf.mxu2  ;;  %v2783_v57 = vpop.f32.mrf.mxu0 }
 0x307   :  { %v3288_v49 = vpop.f32.mrf.mxu3  ;;  %5378 = vst [vmem:[%s7522_s3 + $0x28] sm:$0xff] %v5242_v3   ;;  %v2952_v0 = vpop.f32.mrf.mxu1  ;;  %v2784_v56 = vadd.f32 %v2783_v57, %v6014_v60  ;;  %v3120_v36 = vadd.f32 %v3119_v46, %v2951_v48  ;;  %v4120_v60 = vld [vmem:[%s7521_s0 + $0x3d8] sm:$0xf]  ;;  %v5028_v3 = vld [vmem:[%s7521_s0 + $0x42c] sm:$0xf0] }
 0x308   :  { %v4121_v29 = vor.u32 %v5021_v14, %v4120_v60  ;;  %v4146_v46 = vld [vmem:[%s7521_s0 + $0x430] sm:$0xf0]  ;;  %v5025_v57 = vld [vmem:[%s7521_s0 + $0x41c] sm:$0xf]  ;;  %v4145_v24 = vor.u32 %v5028_v3, %v4144_v23 }
 0x309   :  { %v2953_v4 = vadd.f32 %v2952_v0, %v2784_v56  ;;  %v3289_v22 = vadd.f32 %v3288_v49, %v3120_v36  ;;  %v5029_v49 = vld [vmem:[%s7521_s0 + $0x434] sm:$0xf0]  ;;  %v4154_v0 = vld [vmem:[%s7521_s0 + $0x438] sm:$0xf0]  ;;  %v4149_v36 = vor.u32 %v5024_v41, %v4146_v46 }
 0x30a   :  { %v4157_v58 = vor.u32 %v5025_v57, %v4154_v0 }
 0x30b   :  { %v3430_v51 = vmax.f32 %v3289_v22, 0.0 }
 0x30e   :  { %v3121_v13 = vpop.f32.mrf.mxu2  ;;  %v2786_v11 = vpop.f32.mrf.mxu0 }
 0x30f   :  { %v3290_v61 = vpop.f32.mrf.mxu3  ;;  %v3122_v25 = vadd.f32 %v3121_v13, %v2953_v4  ;;  %v2955_v12 = vpop.f32.mrf.mxu1  ;;  %v2787_v63 = vadd.f32 %v2786_v11, %v6017_v7 }
 0x311   :  { %v3291_v35 = vadd.f32 %v3290_v61, %v3122_v25  ;;  %2825 = vmatmul.bf16.gmra.mxu0 %v4113_v9  ;;  %v2956_v53 = vadd.f32 %v2955_v12, %v2787_v63  ;;  %v5037_v63 = vld [vmem:[%s7521_s0 + $0x474] sm:$0xf0] }
 0x312   :  { %2994 = vmatmul.bf16.gmra.mxu1 %v4117_v1 }
 0x313   :  { %v3431_v32 = vmax.f32 %v3291_v35, 0.0  ;;  %3163 = vmatmul.bf16.gmra.mxu2 %v4121_v29  ;;  %v4176_v35 = vld [vmem:[%s7521_s0 + $0x450] sm:$0xf] }
 0x314   :  { %3332 = vmatmul.bf16.gmra.mxu3 %v4125_v30 }
 0x315   :  { %v5247_v62 = vpack.c.bf16 %v3431_v32, %v3430_v51  ;;  %v5036_v51 = vld [vmem:[%s7521_s0 + $0x46c] sm:$0xf0]  ;;  %v5032_v32 = vld [vmem:[%s7521_s0 + $0x454] sm:$0xf] }
 0x316   :  { %v3124_v31 = vpop.f32.mrf.mxu2  ;;  %v2788_v55 = vpop.f32.mrf.mxu0 }
 0x317   :  { %v3293_v21 = vpop.f32.mrf.mxu3  ;;  %5379 = vst [vmem:[%s7522_s3 + $0x30] sm:$0xff] %v5247_v62   ;;  %v2957_v19 = vpop.f32.mrf.mxu1  ;;  %v2789_v20 = vadd.f32 %v2788_v55, %v6044_v33  ;;  %v3125_v7 = vadd.f32 %v3124_v31, %v2956_v53  ;;  %v4152_v33 = vld [vmem:[%s7521_s0 + $0x418] sm:$0xf]  ;;  %v4178_v62 = vld [vmem:[%s7521_s0 + $0x470] sm:$0xf0] }
 0x318   :  { %v4153_v52 = vor.u32 %v5029_v49, %v4152_v33  ;;  %v5033_v31 = vld [vmem:[%s7521_s0 + $0x45c] sm:$0xf]  ;;  %v4181_v23 = vor.u32 %v5032_v32, %v4178_v62 }
 0x319   :  { %v2958_v48 = vadd.f32 %v2957_v19, %v2789_v20  ;;  %v3294_v39 = vadd.f32 %v3293_v21, %v3125_v7  ;;  %v4186_v21 = vld [vmem:[%s7521_s0 + $0x478] sm:$0xf0]  ;;  %v4177_v20 = vor.u32 %v5036_v51, %v4176_v35 }
 0x31a   :  { %v4189_v49 = vor.u32 %v5033_v31, %v4186_v21 }
 0x31b   :  { %v3432_v13 = vmax.f32 %v3294_v39, 0.0 }
 0x31e   :  { %v3126_v56 = vpop.f32.mrf.mxu2  ;;  %v2791_v60 = vpop.f32.mrf.mxu0 }
 0x31f   :  { %v3295_v42 = vpop.f32.mrf.mxu3  ;;  %v3127_v47 = vadd.f32 %v3126_v56, %v2958_v48  ;;  %v2960_v14 = vpop.f32.mrf.mxu1  ;;  %v2792_v1 = vadd.f32 %v2791_v60, %v6047_v43 }
 0x321   :  { %v3296_v4 = vadd.f32 %v3295_v42, %v3127_v47  ;;  %2830 = vmatmul.bf16.gmra.mxu0 %v4145_v24  ;;  %v2961_v29 = vadd.f32 %v2960_v14, %v2792_v1  ;;  %v4218_v1 = vld [vmem:[%s7521_s0 + $0x4b8] sm:$0xf0] }
 0x322   :  { %2999 = vmatmul.bf16.gmra.mxu1 %v4149_v36 }
 0x323   :  { %v3433_v61 = vmax.f32 %v3296_v4, 0.0  ;;  %3168 = vmatmul.bf16.gmra.mxu2 %v4153_v52  ;;  %v4208_v52 = vld [vmem:[%s7521_s0 + $0x490] sm:$0xf]  ;;  %v5040_v4 = vld [vmem:[%s7521_s0 + $0x494] sm:$0xf] }
 0x324   :  { %3337 = vmatmul.bf16.gmra.mxu3 %v4157_v58  ;;  %v5044_v58 = vld [vmem:[%s7521_s0 + $0x4ac] sm:$0xf0] }
 0x325   :  { %v5252_v9 = vpack.c.bf16 %v3433_v61, %v3432_v13  ;;  %v4210_v13 = vld [vmem:[%s7521_s0 + $0x4b0] sm:$0xf0]  ;;  %v5045_v61 = vld [vmem:[%s7521_s0 + $0x4b4] sm:$0xf0] }
 0x326   :  { %v3129_v22 = vpop.f32.mrf.mxu2  ;;  %v2793_v11 = vpop.f32.mrf.mxu0 }
 0x327   :  { %v3298_v25 = vpop.f32.mrf.mxu3  ;;  %5380 = vst [vmem:[%s7522_s3 + $0x38] sm:$0xff] %v5252_v9   ;;  %v2962_v12 = vpop.f32.mrf.mxu1  ;;  %v2794_v30 = vadd.f32 %v2793_v11, %v6074_v6  ;;  %v3130_v43 = vadd.f32 %v3129_v22, %v2961_v29  ;;  %v4184_v6 = vld [vmem:[%s7521_s0 + $0x458] sm:$0xf]  ;;  %v5041_v9 = vld [vmem:[%s7521_s0 + $0x49c] sm:$0xf]  ;;  %v4213_v29 = vor.u32 %v5040_v4, %v4210_v13 }
 0x328   :  { %v4185_v33 = vor.u32 %v5037_v63, %v4184_v6  ;;  %v4221_v62 = vor.u32 %v5041_v9, %v4218_v1 }
 0x329   :  { %v2963_v55 = vadd.f32 %v2962_v12, %v2794_v30  ;;  %v3299_v3 = vadd.f32 %v3298_v25, %v3130_v43  ;;  %v4209_v12 = vor.u32 %v5044_v58, %v4208_v52 }
 0x32b   :  { %v3434_v0 = vmax.f32 %v3299_v3, 0.0 }
 0x32e   :  { %v3131_v19 = vpop.f32.mrf.mxu2  ;;  %v2796_v41 = vpop.f32.mrf.mxu0 }
 0x32f   :  { %v3300_v53 = vpop.f32.mrf.mxu3  ;;  %v3132_v7 = vadd.f32 %v3131_v19, %v2963_v55  ;;  %v2965_v46 = vpop.f32.mrf.mxu1  ;;  %v2797_v42 = vadd.f32 %v2796_v41, %v6077_v16  ;;  %v4240_v41 = vld [vmem:[%s7521_s0 + $0x4d0] sm:$0xf] }
 0x331   :  { %v3301_v57 = vadd.f32 %v3300_v53, %v3132_v7  ;;  %2835 = vmatmul.bf16.gmra.mxu0 %v4177_v20  ;;  %v2966_v60 = vadd.f32 %v2965_v46, %v2797_v42  ;;  %v5052_v46 = vld [vmem:[%s7521_s0 + $0x4ec] sm:$0xf0] }
 0x332   :  { %3004 = vmatmul.bf16.gmra.mxu1 %v4181_v23 }
 0x333   :  { %v3435_v48 = vmax.f32 %v3301_v57, 0.0  ;;  %3173 = vmatmul.bf16.gmra.mxu2 %v4185_v33  ;;  %v5048_v33 = vld [vmem:[%s7521_s0 + $0x4d4] sm:$0xf]  ;;  %v5053_v57 = vld [vmem:[%s7521_s0 + $0x4f4] sm:$0xf0] }
 0x334   :  { %3342 = vmatmul.bf16.gmra.mxu3 %v4189_v49  ;;  %v4242_v49 = vld [vmem:[%s7521_s0 + $0x4f0] sm:$0xf0] }
 0x335   :  { %v5257_v56 = vpack.c.bf16 %v3435_v48, %v3434_v0  ;;  %v5049_v0 = vld [vmem:[%s7521_s0 + $0x4dc] sm:$0xf] }
 0x336   :  { %v3134_v24 = vpop.f32.mrf.mxu2  ;;  %v2798_v39 = vpop.f32.mrf.mxu0  ;;  %v4250_v48 = vld [vmem:[%s7521_s0 + $0x4f8] sm:$0xf0] }
 0x337   :  { %v3303_v36 = vpop.f32.mrf.mxu3  ;;  %5381 = vst [vmem:[%s7522_s3 + $0x40] sm:$0xff] %v5257_v56   ;;  %v2967_v47 = vpop.f32.mrf.mxu1  ;;  %v2799_v14 = vadd.f32 %v2798_v39, %v6104_v45  ;;  %v3135_v16 = vadd.f32 %v3134_v24, %v2966_v60  ;;  %v4216_v45 = vld [vmem:[%s7521_s0 + $0x498] sm:$0xf]  ;;  %v4245_v39 = vor.u32 %v5048_v33, %v4242_v49 }
 0x338   :  { %v4217_v32 = vor.u32 %v5045_v61, %v4216_v45 }
 0x339   :  { %v2968_v22 = vadd.f32 %v2967_v47, %v2799_v14  ;;  %v3304_v30 = vadd.f32 %v3303_v36, %v3135_v16  ;;  %v4241_v36 = vor.u32 %v5052_v46, %v4240_v41  ;;  %v4253_v16 = vor.u32 %v5049_v0, %v4250_v48 }
 0x33b   :  { %v3436_v63 = vmax.f32 %v3304_v30, 0.0  ;;  %v4272_v30 = vld [vmem:[%s7521_s0 + $0x510] sm:$0xf] }
 0x33e   :  { %v3136_v25 = vpop.f32.mrf.mxu2  ;;  %v2801_v51 = vpop.f32.mrf.mxu0 }
 0x33f   :  { %v3305_v11 = vpop.f32.mrf.mxu3  ;;  %v3137_v35 = vadd.f32 %v3136_v25, %v2968_v22  ;;  %v2970_v43 = vpop.f32.mrf.mxu1  ;;  %v2802_v55 = vadd.f32 %v2801_v51, %v6116_v59  ;;  %v5056_v51 = vld [vmem:[%s7521_s0 + $0x514] sm:$0xf] }
 0x341   :  { %v3306_v6 = vadd.f32 %v3305_v11, %v3137_v35  ;;  %2840 = vmatmul.bf16.gmra.mxu0 %v4209_v12  ;;  %v2971_v3 = vadd.f32 %v2970_v43, %v2802_v55  ;;  %v5060_v35 = vld [vmem:[%s7521_s0 + $0x52c] sm:$0xf0]  ;;  %v4274_v43 = vld [vmem:[%s7521_s0 + $0x530] sm:$0xf0] }
 0x342   :  { %3009 = vmatmul.bf16.gmra.mxu1 %v4213_v29  ;;  %v4273_v55 = vor.u32 %v5060_v35, %v4272_v30 }
 0x343   :  { %v3437_v31 = vmax.f32 %v3306_v6, 0.0  ;;  %3178 = vmatmul.bf16.gmra.mxu2 %v4217_v32  ;;  %v5061_v32 = vld [vmem:[%s7521_s0 + $0x534] sm:$0xf0]  ;;  %v4282_v6 = vld [vmem:[%s7521_s0 + $0x538] sm:$0xf0] }
 0x344   :  { %3347 = vmatmul.bf16.gmra.mxu3 %v4221_v62  ;;  %v5057_v62 = vld [vmem:[%s7521_s0 + $0x51c] sm:$0xf] }
 0x345   :  { %v5262_v21 = vpack.c.bf16 %v3437_v31, %v3436_v63  ;;  %v4285_v41 = vor.u32 %v5057_v62, %v4282_v6 }
 0x346   :  { %v3139_v19 = vpop.f32.mrf.mxu2  ;;  %v2803_v20 = vpop.f32.mrf.mxu0 }
 0x347   :  { %v3308_v53 = vpop.f32.mrf.mxu3  ;;  %5382 = vst [vmem:[%s7522_s3 + $0x48] sm:$0xff] %v5262_v21   ;;  %v2972_v23 = vpop.f32.mrf.mxu1  ;;  %v2804_v7 = vadd.f32 %v2803_v20, %v6146_v27  ;;  %v3140_v59 = vadd.f32 %v3139_v19, %v2971_v3  ;;  %v4248_v27 = vld [vmem:[%s7521_s0 + $0x4d8] sm:$0xf]  ;;  %v4277_v19 = vor.u32 %v5056_v51, %v4274_v43 }
 0x348   :  { %v4249_v58 = vor.u32 %v5053_v57, %v4248_v27 }
 0x349   :  { %v2973_v56 = vadd.f32 %v2972_v23, %v2804_v7  ;;  %v3309_v47 = vadd.f32 %v3308_v53, %v3140_v59 }
 0x34b   :  { %v3438_v13 = vmax.f32 %v3309_v47, 0.0  ;;  %v5064_v47 = vld [vmem:[%s7521_s0 + $0x554] sm:$0xf] }
 0x34e   :  { %v3141_v42 = vpop.f32.mrf.mxu2  ;;  %v2806_v14 = vpop.f32.mrf.mxu0 }
 0x34f   :  { %v3310_v24 = vpop.f32.mrf.mxu3  ;;  %v3142_v60 = vadd.f32 %v3141_v42, %v2973_v56  ;;  %v2975_v52 = vpop.f32.mrf.mxu1  ;;  %v2807_v9 = vadd.f32 %v2806_v14, %v6149_v40  ;;  %v5069_v14 = vld [vmem:[%s7521_s0 + $0x574] sm:$0xf0] }
 0x351   :  { %v3311_v4 = vadd.f32 %v3310_v24, %v3142_v60  ;;  %2845 = vmatmul.bf16.gmra.mxu0 %v4241_v36  ;;  %v2976_v12 = vadd.f32 %v2975_v52, %v2807_v9  ;;  %v4304_v36 = vld [vmem:[%s7521_s0 + $0x550] sm:$0xf]  ;;  %v4306_v60 = vld [vmem:[%s7521_s0 + $0x570] sm:$0xf0]  ;;  %v5065_v52 = vld [vmem:[%s7521_s0 + $0x55c] sm:$0xf] }
 0x352   :  { %3014 = vmatmul.bf16.gmra.mxu1 %v4245_v39  ;;  %v5068_v39 = vld [vmem:[%s7521_s0 + $0x56c] sm:$0xf0] }
 0x353   :  { %v3439_v45 = vmax.f32 %v3311_v4, 0.0  ;;  %3183 = vmatmul.bf16.gmra.mxu2 %v4249_v58  ;;  %v4314_v58 = vld [vmem:[%s7521_s0 + $0x578] sm:$0xf0] }
 0x354   :  { %3352 = vmatmul.bf16.gmra.mxu3 %v4253_v16 }
 0x355   :  { %v5267_v61 = vpack.c.bf16 %v3439_v45, %v3438_v13  ;;  %v4305_v45 = vor.u32 %v5068_v39, %v4304_v36 }
 0x356   :  { %v3144_v1 = vpop.f32.mrf.mxu2  ;;  %v2808_v25 = vpop.f32.mrf.mxu0 }
 0x357   :  { %v3313_v22 = vpop.f32.mrf.mxu3  ;;  %5383 = vst [vmem:[%s7522_s3 + $0x50] sm:$0xff] %v5267_v61   ;;  %v2977_v11 = vpop.f32.mrf.mxu1  ;;  %v2809_v29 = vadd.f32 %v2808_v25, %v6176_v8  ;;  %v3145_v40 = vadd.f32 %v3144_v1, %v2976_v12  ;;  %v4280_v8 = vld [vmem:[%s7521_s0 + $0x518] sm:$0xf]  ;;  %v4309_v61 = vor.u32 %v5064_v47, %v4306_v60  ;;  %v4317_v12 = vor.u32 %v5065_v52, %v4314_v58  ;;  %v4368_v58 = vld [vmem:[%s7521_s0 + $0x5d0] sm:$0xf] }
 0x358   :  { %v4281_v7 = vor.u32 %v5061_v32, %v4280_v8 }
 0x359   :  { %v2978_v63 = vadd.f32 %v2977_v11, %v2809_v29  ;;  %v3314_v53 = vadd.f32 %v3313_v22, %v3145_v40 }
 0x35b   :  { %v3440_v59 = vmax.f32 %v3314_v53, 0.0  ;;  %v5077_v53 = vld [vmem:[%s7521_s0 + $0x5b4] sm:$0xf0] }
 0x35e   :  { %v3146_v31 = vpop.f32.mrf.mxu2  ;;  %v2811_v23 = vpop.f32.mrf.mxu0 }
 0x35f   :  { %v3315_v21 = vpop.f32.mrf.mxu3  ;;  %v3147_v20 = vadd.f32 %v3146_v31, %v2978_v63  ;;  %v2980_v3 = vpop.f32.mrf.mxu1  ;;  %v2812_v27 = vadd.f32 %v2811_v23, %v6179_v18  ;;  %v4336_v31 = vld [vmem:[%s7521_s0 + $0x590] sm:$0xf]  ;;  %v4346_v23 = vld [vmem:[%s7521_s0 + $0x5b8] sm:$0xf0] }
 0x361   :  { %v3316_v46 = vadd.f32 %v3315_v21, %v3147_v20  ;;  %2850 = vmatmul.bf16.gmra.mxu0 %v4273_v55  ;;  %v2981_v42 = vadd.f32 %v2980_v3, %v2812_v27  ;;  %v5076_v21 = vld [vmem:[%s7521_s0 + $0x5ac] sm:$0xf0]  ;;  %v5072_v55 = vld [vmem:[%s7521_s0 + $0x594] sm:$0xf]  ;;  %v5073_v20 = vld [vmem:[%s7521_s0 + $0x59c] sm:$0xf] }
 0x362   :  { %3019 = vmatmul.bf16.gmra.mxu1 %v4277_v19  ;;  %v4338_v19 = vld [vmem:[%s7521_s0 + $0x5b0] sm:$0xf0] }
 0x363   :  { %v3441_v33 = vmax.f32 %v3316_v46, 0.0  ;;  %3188 = vmatmul.bf16.gmra.mxu2 %v4281_v7  ;;  %v4337_v46 = vor.u32 %v5076_v21, %v4336_v31 }
 0x364   :  { %3357 = vmatmul.bf16.gmra.mxu3 %v4285_v41 }
 0x365   :  { %v5272_v49 = vpack.c.bf16 %v3441_v33, %v3440_v59  ;;  %v4341_v59 = vor.u32 %v5072_v55, %v4338_v19 }
 0x366   :  { %v3149_v57 = vpop.f32.mrf.mxu2  ;;  %v2813_v48 = vpop.f32.mrf.mxu0 }
 0x367   :  { %v3318_v0 = vpop.f32.mrf.mxu3  ;;  %5384 = vst [vmem:[%s7522_s3 + $0x58] sm:$0xff] %v5272_v49   ;;  %v2982_v56 = vpop.f32.mrf.mxu1  ;;  %v2814_v24 = vadd.f32 %v2813_v48, %v6206_v50  ;;  %v3150_v18 = vadd.f32 %v3149_v57, %v2981_v42  ;;  %v4312_v50 = vld [vmem:[%s7521_s0 + $0x558] sm:$0xf]  ;;  %v4349_v48 = vor.u32 %v5073_v20, %v4346_v23  ;;  %v5092_v20 = vld [vmem:[%s7521_s0 + $0x62c] sm:$0xf0] }
 0x368   :  { %v4313_v11 = vor.u32 %v5069_v14, %v4312_v50  ;;  %v5088_v23 = vld [vmem:[%s7521_s0 + $0x614] sm:$0xf] }
 0x369   :  { %v2983_v16 = vadd.f32 %v2982_v56, %v2814_v24  ;;  %v3319_v9 = vadd.f32 %v3318_v0, %v3150_v18 }
 0x36b   :  { %v3442_v30 = vmax.f32 %v3319_v9, 0.0  ;;  %v4378_v9 = vld [vmem:[%s7521_s0 + $0x5f8] sm:$0xf0] }
 0x36e   :  { %v3151_v4 = vpop.f32.mrf.mxu2  ;;  %v2816_v22 = vpop.f32.mrf.mxu0 }
 0x36f   :  { %v3320_v13 = vpop.f32.mrf.mxu3  ;;  %v3152_v1 = vadd.f32 %v3151_v4, %v2983_v16  ;;  %v2985_v25 = vpop.f32.mrf.mxu1  ;;  %v2817_v51 = vadd.f32 %v2816_v22, %v6209_v2  ;;  %v5084_v16 = vld [vmem:[%s7521_s0 + $0x5ec] sm:$0xf0]  ;;  %v5080_v4 = vld [vmem:[%s7521_s0 + $0x5d4] sm:$0xf] }
 0x371   :  { %v3321_v29 = vadd.f32 %v3320_v13, %v3152_v1  ;;  %2855 = vmatmul.bf16.gmra.mxu0 %v4305_v45  ;;  %v2986_v6 = vadd.f32 %v2985_v25, %v2817_v51  ;;  %v4370_v13 = vld [vmem:[%s7521_s0 + $0x5f0] sm:$0xf0]  ;;  %v5085_v45 = vld [vmem:[%s7521_s0 + $0x5f4] sm:$0xf0] }
 0x372   :  { %3024 = vmatmul.bf16.gmra.mxu1 %v4309_v61  ;;  %v5081_v61 = vld [vmem:[%s7521_s0 + $0x5dc] sm:$0xf] }
 0x373   :  { %v3443_v35 = vmax.f32 %v3321_v29, 0.0  ;;  %3193 = vmatmul.bf16.gmra.mxu2 %v4313_v11  ;;  %v4369_v11 = vor.u32 %v5084_v16, %v4368_v58 }
 0x374   :  { %3362 = vmatmul.bf16.gmra.mxu3 %v4317_v12  ;;  %v4373_v12 = vor.u32 %v5080_v4, %v4370_v13  ;;  %v4432_v13 = vld [vmem:[%s7521_s0 + $0x650] sm:$0xf] }
 0x375   :  { %v5277_v40 = vpack.c.bf16 %v3443_v35, %v3442_v30 }
 0x376   :  { %v3154_v43 = vpop.f32.mrf.mxu2  ;;  %v2818_v32 = vpop.f32.mrf.mxu0 }
 0x377   :  { %v3323_v8 = vpop.f32.mrf.mxu3  ;;  %5385 = vst [vmem:[%s7522_s3 + $0x60] sm:$0xff] %v5277_v40   ;;  %v2987_v62 = vpop.f32.mrf.mxu1  ;;  %v2819_v63 = vadd.f32 %v2818_v32, %v6236_v37  ;;  %v3155_v2 = vadd.f32 %v3154_v43, %v2986_v6  ;;  %v4344_v37 = vld [vmem:[%s7521_s0 + $0x598] sm:$0xf]  ;;  %v4381_v43 = vor.u32 %v5081_v61, %v4378_v9  ;;  %v4434_v61 = vld [vmem:[%s7521_s0 + $0x670] sm:$0xf0] }
 0x378   :  { %v4345_v0 = vor.u32 %v5077_v53, %v4344_v37  ;;  %v4400_v53 = vld [vmem:[%s7521_s0 + $0x610] sm:$0xf]  ;;  %v5101_v9 = vld [vmem:[%s7521_s0 + $0x674] sm:$0xf0] }
 0x379   :  { %v2988_v3 = vadd.f32 %v2987_v62, %v2819_v63  ;;  %v3324_v33 = vadd.f32 %v3323_v8, %v3155_v2 }
 0x37b   :  { %v3444_v42 = vmax.f32 %v3324_v33, 0.0 }
 0x37e   :  { %v3156_v7 = vpop.f32.mrf.mxu2  ;;  %v2821_v27 = vpop.f32.mrf.mxu0 }
 0x37f   :  { %v3325_v41 = vpop.f32.mrf.mxu3  ;;  %v3157_v49 = vadd.f32 %v3156_v7, %v2988_v3  ;;  %v2990_v57 = vpop.f32.mrf.mxu1  ;;  %v2822_v39 = vadd.f32 %v2821_v27, %v6248_v54  ;;  %v4402_v3 = vld [vmem:[%s7521_s0 + $0x630] sm:$0xf0]  ;;  %v5093_v7 = vld [vmem:[%s7521_s0 + $0x634] sm:$0xf0]  ;;  %v4401_v27 = vor.u32 %v5092_v20, %v4400_v53 }
 0x381   :  { %v3326_v56 = vadd.f32 %v3325_v41, %v3157_v49  ;;  %2860 = vmatmul.bf16.gmra.mxu0 %v4337_v46  ;;  %v2991_v14 = vadd.f32 %v2990_v57, %v2822_v39  ;;  %v5089_v41 = vld [vmem:[%s7521_s0 + $0x61c] sm:$0xf]  ;;  %v4405_v57 = vor.u32 %v5088_v23, %v4402_v3  ;;  %v5108_v23 = vld [vmem:[%s7521_s0 + $0x6ac] sm:$0xf0]  ;;  %v5104_v3 = vld [vmem:[%s7521_s0 + $0x694] sm:$0xf] }
 0x382   :  { %3029 = vmatmul.bf16.gmra.mxu1 %v4341_v59  ;;  %v4410_v46 = vld [vmem:[%s7521_s0 + $0x638] sm:$0xf0] }
 0x383   :  { %v3445_v24 = vmax.f32 %v3326_v56, 0.0  ;;  %3198 = vmatmul.bf16.gmra.mxu2 %v4345_v0 }
 0x384   :  { %3367 = vmatmul.bf16.gmra.mxu3 %v4349_v48 }
 0x385   :  { %v5282_v36 = vpack.c.bf16 %v3445_v24, %v3444_v42 }
 0x386   :  { %v3159_v18 = vpop.f32.mrf.mxu2  ;;  %v2823_v60 = vpop.f32.mrf.mxu0 }
 0x387   :  { %v3328_v47 = vpop.f32.mrf.mxu3  ;;  %5386 = vst [vmem:[%s7522_s3 + $0x68] sm:$0xff] %v5282_v36   ;;  %v2992_v50 = vpop.f32.mrf.mxu1  ;;  %v2824_v52 = vadd.f32 %v2823_v60, %v6283_v28  ;;  %v3160_v54 = vadd.f32 %v3159_v18, %v2991_v14  ;;  %v4376_v28 = vld [vmem:[%s7521_s0 + $0x5d8] sm:$0xf]  ;;  %v4413_v36 = vor.u32 %v5089_v41, %v4410_v46  ;;  %v5105_v41 = vld [vmem:[%s7521_s0 + $0x69c] sm:$0xf] }
 0x388   :  { %v4377_v51 = vor.u32 %v5085_v45, %v4376_v28  ;;  %v5100_v28 = vld [vmem:[%s7521_s0 + $0x66c] sm:$0xf0]  ;;  %v5096_v45 = vld [vmem:[%s7521_s0 + $0x654] sm:$0xf]  ;;  %v4474_v46 = vld [vmem:[%s7521_s0 + $0x6b8] sm:$0xf0] }
 0x389   :  { %v2993_v1 = vadd.f32 %v2992_v50, %v2824_v52  ;;  %v3329_v29 = vadd.f32 %v3328_v47, %v3160_v54 }
 0x38b   :  { %v3446_v32 = vmax.f32 %v3329_v29, 0.0  ;;  %v4433_v29 = vor.u32 %v5100_v28, %v4432_v13  ;;  %v4496_v13 = vld [vmem:[%s7521_s0 + $0x6d0] sm:$0xf] }
 0x38c   :  { %v5116_v28 = vld [vmem:[%s7521_s0 + $0x6ec] sm:$0xf0] }
 0x38e   :  { %v3161_v22 = vpop.f32.mrf.mxu2  ;;  %v2826_v35 = vpop.f32.mrf.mxu0 }
 0x38f   :  { %v3330_v25 = vpop.f32.mrf.mxu3  ;;  %v3162_v30 = vadd.f32 %v3161_v22, %v2993_v1  ;;  %v2995_v40 = vpop.f32.mrf.mxu1  ;;  %v2827_v63 = vadd.f32 %v2826_v35, %v6286_v44  ;;  %v5097_v1 = vld [vmem:[%s7521_s0 + $0x65c] sm:$0xf] }
 0x390   :  { %v4442_v22 = vld [vmem:[%s7521_s0 + $0x678] sm:$0xf0] }
 0x391   :  { %v3331_v8 = vadd.f32 %v3330_v25, %v3162_v30  ;;  %2865 = vmatmul.bf16.gmra.mxu0 %v4369_v11  ;;  %v2996_v19 = vadd.f32 %v2995_v40, %v2827_v63  ;;  %v4437_v30 = vor.u32 %v5096_v45, %v4434_v61  ;;  %v4498_v45 = vld [vmem:[%s7521_s0 + $0x6f0] sm:$0xf0]  ;;  %v5117_v61 = vld [vmem:[%s7521_s0 + $0x6f4] sm:$0xf0] }
 0x392   :  { %3034 = vmatmul.bf16.gmra.mxu1 %v4373_v12 }
 0x393   :  { %v3447_v62 = vmax.f32 %v3331_v8, 0.0  ;;  %3203 = vmatmul.bf16.gmra.mxu2 %v4377_v51 }
 0x394   :  { %3372 = vmatmul.bf16.gmra.mxu3 %v4381_v43 }
 0x395   :  { %v5287_v6 = vpack.c.bf16 %v3447_v62, %v3446_v32  ;;  %v4445_v32 = vor.u32 %v5097_v1, %v4442_v22 }
 0x396   :  { %v3164_v31 = vpop.f32.mrf.mxu2  ;;  %v2828_v2 = vpop.f32.mrf.mxu0 }
 0x397   :  { %v3333_v21 = vpop.f32.mrf.mxu3  ;;  %5387 = vst [vmem:[%s7522_s3 + $0x70] sm:$0xff] %v5287_v6   ;;  %v2997_v55 = vpop.f32.mrf.mxu1  ;;  %v2829_v37 = vadd.f32 %v2828_v2, %v6313_v15  ;;  %v3165_v44 = vadd.f32 %v3164_v31, %v2996_v19  ;;  %v4408_v15 = vld [vmem:[%s7521_s0 + $0x618] sm:$0xf] }
 0x398   :  { %v4409_v24 = vor.u32 %v5093_v7, %v4408_v15  ;;  %v4466_v15 = vld [vmem:[%s7521_s0 + $0x6b0] sm:$0xf0]  ;;  %v5109_v7 = vld [vmem:[%s7521_s0 + $0x6b4] sm:$0xf0] }
 0x399   :  { %v2998_v59 = vadd.f32 %v2997_v55, %v2829_v37  ;;  %v3334_v0 = vadd.f32 %v3333_v21, %v3165_v44  ;;  %v4464_v44 = vld [vmem:[%s7521_s0 + $0x690] sm:$0xf] }
 0x39b   :  { %v3448_v18 = vmax.f32 %v3334_v0, 0.0 }
 0x39e   :  { %v3166_v33 = vpop.f32.mrf.mxu2  ;;  %v2831_v56 = vpop.f32.mrf.mxu0 }
 0x39f   :  { %v3335_v49 = vpop.f32.mrf.mxu3  ;;  %v3167_v48 = vadd.f32 %v3166_v33, %v2998_v59  ;;  %v3000_v42 = vpop.f32.mrf.mxu1  ;;  %v2832_v50 = vadd.f32 %v2831_v56, %v6316_v34 }
 0x3a1   :  { %v3336_v39 = vadd.f32 %v3335_v49, %v3167_v48  ;;  %2870 = vmatmul.bf16.gmra.mxu0 %v4401_v27  ;;  %v3001_v54 = vadd.f32 %v3000_v42, %v2832_v50  ;;  %v4465_v27 = vor.u32 %v5108_v23, %v4464_v44  ;;  %v4528_v44 = vld [vmem:[%s7521_s0 + $0x710] sm:$0xf] }
 0x3a2   :  { %3039 = vmatmul.bf16.gmra.mxu1 %v4405_v57  ;;  %v4469_v57 = vor.u32 %v5104_v3, %v4466_v15  ;;  %v5124_v23 = vld [vmem:[%s7521_s0 + $0x72c] sm:$0xf0]  ;;  %v5120_v3 = vld [vmem:[%s7521_s0 + $0x714] sm:$0xf] }
 0x3a3   :  { %v3449_v47 = vmax.f32 %v3336_v39, 0.0  ;;  %3208 = vmatmul.bf16.gmra.mxu2 %v4409_v24  ;;  %v4530_v15 = vld [vmem:[%s7521_s0 + $0x730] sm:$0xf0] }
 0x3a4   :  { %3377 = vmatmul.bf16.gmra.mxu3 %v4413_v36  ;;  %v4477_v36 = vor.u32 %v5105_v41, %v4474_v46  ;;  %v5121_v41 = vld [vmem:[%s7521_s0 + $0x71c] sm:$0xf] }
 0x3a5   :  { %v5292_v60 = vpack.c.bf16 %v3449_v47, %v3448_v18  ;;  %v4538_v46 = vld [vmem:[%s7521_s0 + $0x738] sm:$0xf0] }
 0x3a6   :  { %v3169_v14 = vpop.f32.mrf.mxu2  ;;  %v2833_v58 = vpop.f32.mrf.mxu0 }
 0x3a7   :  { %v3338_v52 = vpop.f32.mrf.mxu3  ;;  %5388 = vst [vmem:[%s7522_s3 + $0x78] sm:$0xff] %v5292_v60   ;;  %v3002_v16 = vpop.f32.mrf.mxu1  ;;  %v2834_v4 = vadd.f32 %v2833_v58, %v6343_v10  ;;  %v3170_v34 = vadd.f32 %v3169_v14, %v3001_v54  ;;  %v4440_v10 = vld [vmem:[%s7521_s0 + $0x658] sm:$0xf] }
 0x3a8   :  { %v4441_v8 = vor.u32 %v5101_v9, %v4440_v10  ;;  %v5113_v10 = vld [vmem:[%s7521_s0 + $0x6dc] sm:$0xf] }
 0x3a9   :  { %v3003_v25 = vadd.f32 %v3002_v16, %v2834_v4  ;;  %v3339_v35 = vadd.f32 %v3338_v52, %v3170_v34  ;;  %v5112_v34 = vld [vmem:[%s7521_s0 + $0x6d4] sm:$0xf]  ;;  %v4506_v9 = vld [vmem:[%s7521_s0 + $0x6f8] sm:$0xf0] }
 0x3ab   :  { %v3450_v6 = vmax.f32 %v3339_v35, 0.0 }
 0x3ae   :  { %v3171_v11 = vpop.f32.mrf.mxu2  ;;  %v2836_v51 = vpop.f32.mrf.mxu0 }
 0x3af   :  { %v3340_v12 = vpop.f32.mrf.mxu3  ;;  %v3172_v40 = vadd.f32 %v3171_v11, %v3003_v25  ;;  %v3005_v43 = vpop.f32.mrf.mxu1  ;;  %v2837_v21 = vadd.f32 %v2836_v51, %v6346_v26  ;;  %v4497_v11 = vor.u32 %v5116_v28, %v4496_v13  ;;  %v7552_v13 = vld [vmem:[#allocation5_spill] sm:$0xff] }
 0x3b1   :  { %v3341_v62 = vadd.f32 %v3340_v12, %v3172_v40  ;;  %2875 = vmatmul.bf16.gmra.mxu0 %v4433_v29  ;;  %v3006_v53 = vadd.f32 %v3005_v43, %v2837_v21  ;;  %v4501_v12 = vor.u32 %v5112_v34, %v4498_v45  ;;  %v4509_v43 = vor.u32 %v5113_v10, %v4506_v9  ;;  %v5132_v34 = vld [vmem:[%s7521_s0 + $0x76c] sm:$0xf0]  ;;  %v4568_v10 = vld [vmem:[%s7521_s0 + $0x758] sm:$0xf] }
 0x3b2   :  { %3044 = vmatmul.bf16.gmra.mxu1 %v4437_v30  ;;  %v5133_v9 = vld [vmem:[%s7521_s0 + $0x774] sm:$0xf0] }
 0x3b3   :  { %v3451_v63 = vmax.f32 %v3341_v62, 0.0  ;;  %3213 = vmatmul.bf16.gmra.mxu2 %v4441_v8 }
 0x3b4   :  { %3382 = vmatmul.bf16.gmra.mxu3 %v4445_v32 }
 0x3b5   :  { %v5297_v31 = vpack.c.bf16 %v3451_v63, %v3450_v6  ;;  %v7549_v63 = vld [vmem:[#allocation2_spill] sm:$0xff] }
 0x3b6   :  { %v3174_v2 = vpop.f32.mrf.mxu2  ;;  %v2838_v19 = vpop.f32.mrf.mxu0 }
 0x3b7   :  { %v3343_v55 = vpop.f32.mrf.mxu3  ;;  %5389 = vst [vmem:[%s7522_s3 + $0x80] sm:$0xff] %v5297_v31   ;;  %v3007_v37 = vpop.f32.mrf.mxu1  ;;  %v2839_v20 = vadd.f32 %v2838_v19, %v6373_v5  ;;  %v3175_v26 = vadd.f32 %v3174_v2, %v3006_v53  ;;  %v4472_v5 = vld [vmem:[%s7521_s0 + $0x698] sm:$0xf]  ;;  %v7550_v53 = vld [vmem:[#allocation3_spill] sm:$0xff] }
 0x3b8   :  { %v4473_v24 = vor.u32 %v5109_v7, %v4472_v5  ;;  %v4536_v5 = vld [vmem:[%s7521_s0 + $0x718] sm:$0xf] }
 0x3b9   :  { %v3008_v59 = vadd.f32 %v3007_v37, %v2839_v20  ;;  %v3344_v0 = vadd.f32 %v3343_v55, %v3175_v26  ;;  %v5125_v7 = vld [vmem:[%s7521_s0 + $0x734] sm:$0xf0] }
 0x3bb   :  { %v3452_v18 = vmax.f32 %v3344_v0, 0.0 }
 0x3be   :  { %v3176_v33 = vpop.f32.mrf.mxu2  ;;  %v2841_v56 = vpop.f32.mrf.mxu0 }
 0x3bf   :  { %v3345_v49 = vpop.f32.mrf.mxu3  ;;  %v3177_v48 = vadd.f32 %v3176_v33, %v3008_v59  ;;  %v3010_v42 = vpop.f32.mrf.mxu1  ;;  %v2842_v50 = vadd.f32 %v2841_v56, %v6385_v38 }
 0x3c1   :  { %v3346_v39 = vadd.f32 %v3345_v49, %v3177_v48  ;;  %2880 = vmatmul.bf16.gmra.mxu0 %v4465_v27  ;;  %v3011_v54 = vadd.f32 %v3010_v42, %v2842_v50  ;;  %v4529_v27 = vor.u32 %v5124_v23, %v4528_v44  ;;  %v7551_v50 = vld [vmem:[#allocation4_spill] sm:$0xff]  ;;  %v7554_v44 = vld [vmem:[#allocation7_spill] sm:$0xff] }
 0x3c2   :  { %3049 = vmatmul.bf16.gmra.mxu1 %v4469_v57  ;;  %v4533_v57 = vor.u32 %v5120_v3, %v4530_v15  ;;  %v5140_v3 = vld [vmem:[%s7521_s0 + $0x7ac] sm:$0xf0] }
 0x3c3   :  { %v3453_v47 = vmax.f32 %v3346_v39, 0.0  ;;  %3218 = vmatmul.bf16.gmra.mxu2 %v4473_v24  ;;  %v4537_v24 = vor.u32 %v5125_v7, %v4536_v5  ;;  %v5136_v5 = vld [vmem:[%s7521_s0 + $0x794] sm:$0xf] }
 0x3c4   :  { %3387 = vmatmul.bf16.gmra.mxu3 %v4477_v36  ;;  %v4541_v36 = vor.u32 %v5121_v41, %v4538_v46  ;;  %v4594_v7 = vld [vmem:[%s7521_s0 + $0x7b0] sm:$0xf0]  ;;  %v4600_v41 = vld [vmem:[%s7521_s0 + $0x798] sm:$0xf] }
 0x3c5   :  { %v5302_v60 = vpack.c.bf16 %v3453_v47, %v3452_v18  ;;  %v5141_v46 = vld [vmem:[%s7521_s0 + $0x7b4] sm:$0xf0] }
 0x3c6   :  { %v3179_v14 = vpop.f32.mrf.mxu2  ;;  %v2843_v58 = vpop.f32.mrf.mxu0 }
 0x3c7   :  { %v3348_v52 = vpop.f32.mrf.mxu3  ;;  %5390 = vst [vmem:[%s7522_s3 + $0x88] sm:$0xff] %v5302_v60   ;;  %v3012_v16 = vpop.f32.mrf.mxu1  ;;  %v2844_v4 = vadd.f32 %v2843_v58, %v6415_v17  ;;  %v3180_v38 = vadd.f32 %v3179_v14, %v3011_v54  ;;  %v4504_v17 = vld [vmem:[%s7521_s0 + $0x6d8] sm:$0xf] }
 0x3c8   :  { %v4505_v51 = vor.u32 %v5117_v61, %v4504_v17  ;;  %v5128_v17 = vld [vmem:[%s7521_s0 + $0x754] sm:$0xf] }
 0x3c9   :  { %v3013_v1 = vadd.f32 %v3012_v16, %v2844_v4  ;;  %v3349_v29 = vadd.f32 %v3348_v52, %v3180_v38  ;;  %v4560_v38 = vld [vmem:[%s7521_s0 + $0x750] sm:$0xf]  ;;  %v4562_v61 = vld [vmem:[%s7521_s0 + $0x770] sm:$0xf0] }
 0x3cb   :  { %v3454_v32 = vmax.f32 %v3349_v29, 0.0  ;;  %v4561_v29 = vor.u32 %v5132_v34, %v4560_v38  ;;  %v7556_v38 = vld [vmem:[#allocation9_spill] sm:$0xff] }
 0x3ce   :  { %v3181_v22 = vpop.f32.mrf.mxu2  ;;  %v2846_v35 = vpop.f32.mrf.mxu0 }
 0x3cf   :  { %v3350_v25 = vpop.f32.mrf.mxu3  ;;  %v3182_v30 = vadd.f32 %v3181_v22, %v3013_v1  ;;  %v3015_v40 = vpop.f32.mrf.mxu1  ;;  %v2847_v31 = vadd.f32 %v2846_v35, %v7549_v63  ;;  %v5129_v1 = vld [vmem:[%s7521_s0 + $0x75c] sm:$0xf] }
 0x3d0   :  { %v4570_v22 = vld [vmem:[%s7521_s0 + $0x778] sm:$0xf0] }
 0x3d1   :  { %v3351_v8 = vadd.f32 %v3350_v25, %v3182_v30  ;;  %2885 = vmatmul.bf16.gmra.mxu0 %v4497_v11  ;;  %v3016_v37 = vadd.f32 %v3015_v40, %v2847_v31  ;;  %v4565_v30 = vor.u32 %v5128_v17, %v4562_v61  ;;  %v5148_v17 = vld [vmem:[%s7521_s0 + $0x7ec] sm:$0xf0] }
 0x3d2   :  { %3054 = vmatmul.bf16.gmra.mxu1 %v4501_v12 }
 0x3d3   :  { %v3455_v62 = vmax.f32 %v3351_v8, 0.0  ;;  %3223 = vmatmul.bf16.gmra.mxu2 %v4505_v51  ;;  %v4569_v8 = vor.u32 %v5133_v9, %v4568_v10  ;;  %v5144_v10 = vld [vmem:[%s7521_s0 + $0x7d4] sm:$0xf] }
 0x3d4   :  { %3392 = vmatmul.bf16.gmra.mxu3 %v4509_v43  ;;  %v4626_v9 = vld [vmem:[%s7521_s0 + $0x7f0] sm:$0xf0] }
 0x3d5   :  { %v5307_v6 = vpack.c.bf16 %v3455_v62, %v3454_v32  ;;  %v4573_v32 = vor.u32 %v5129_v1, %v4570_v22  ;;  %v4632_v1 = vld [vmem:[%s7521_s0 + $0x7d8] sm:$0xf] }
 0x3d6   :  { %v3184_v21 = vpop.f32.mrf.mxu2  ;;  %v2848_v55 = vpop.f32.mrf.mxu0  ;;  %v5149_v22 = vld [vmem:[%s7521_s0 + $0x7f4] sm:$0xf0] }
 0x3d7   :  { %v3353_v2 = vpop.f32.mrf.mxu3  ;;  %5391 = vst [vmem:[%s7522_s3 + $0x90] sm:$0xff] %v5307_v6   ;;  %v3017_v19 = vpop.f32.mrf.mxu1  ;;  %v2849_v20 = vadd.f32 %v2848_v55, %v7550_v53  ;;  %v3185_v26 = vadd.f32 %v3184_v21, %v3016_v37  ;;  %v7553_v21 = vld [vmem:[#allocation6_spill] sm:$0xff] }
 0x3d9   :  { %v3018_v59 = vadd.f32 %v3017_v19, %v2849_v20  ;;  %v3354_v0 = vadd.f32 %v3353_v2, %v3185_v26  ;;  %v4592_v26 = vld [vmem:[%s7521_s0 + $0x790] sm:$0xf] }
 0x3db   :  { %v3456_v18 = vmax.f32 %v3354_v0, 0.0  ;;  %v4593_v0 = vor.u32 %v5140_v3, %v4592_v26  ;;  %v7558_v26 = vld [vmem:[#allocation11_spill] sm:$0xff] }
 0x3de   :  { %v3186_v33 = vpop.f32.mrf.mxu2  ;;  %v2851_v56 = vpop.f32.mrf.mxu0 }
 0x3df   :  { %v3355_v49 = vpop.f32.mrf.mxu3  ;;  %v3187_v48 = vadd.f32 %v3186_v33, %v3018_v59  ;;  %v3020_v42 = vpop.f32.mrf.mxu1  ;;  %v2852_v14 = vadd.f32 %v2851_v56, %v7551_v50  ;;  %v5137_v59 = vld [vmem:[%s7521_s0 + $0x79c] sm:$0xf] }
 0x3e0   :  { %v4602_v33 = vld [vmem:[%s7521_s0 + $0x7b8] sm:$0xf0] }
 0x3e1   :  { %v3356_v39 = vadd.f32 %v3355_v49, %v3187_v48  ;;  %2890 = vmatmul.bf16.gmra.mxu0 %v4529_v27  ;;  %v3021_v4 = vadd.f32 %v3020_v42, %v2852_v14  ;;  %v4597_v48 = vor.u32 %v5136_v5, %v4594_v7 }
 0x3e2   :  { %3059 = vmatmul.bf16.gmra.mxu1 %v4533_v57 }
 0x3e3   :  { %v3457_v47 = vmax.f32 %v3356_v39, 0.0  ;;  %3228 = vmatmul.bf16.gmra.mxu2 %v4537_v24  ;;  %v4601_v39 = vor.u32 %v5141_v46, %v4600_v41 }
 0x3e4   :  { %3397 = vmatmul.bf16.gmra.mxu3 %v4541_v36 }
 0x3e5   :  { %v5312_v60 = vpack.c.bf16 %v3457_v47, %v3456_v18  ;;  %v4605_v18 = vor.u32 %v5137_v59, %v4602_v33 }
 0x3e6   :  { %v3189_v52 = vpop.f32.mrf.mxu2  ;;  %v2853_v16 = vpop.f32.mrf.mxu0 }
 0x3e7   :  { %v3358_v58 = vpop.f32.mrf.mxu3  ;;  %5392 = vst [vmem:[%s7522_s3 + $0x98] sm:$0xff] %v5312_v60   ;;  %v3022_v54 = vpop.f32.mrf.mxu1  ;;  %v2854_v28 = vadd.f32 %v2853_v16, %v7552_v13  ;;  %v3190_v45 = vadd.f32 %v3189_v52, %v3021_v4  ;;  %v7555_v52 = vld [vmem:[#allocation8_spill] sm:$0xff] }
 0x3e9   :  { %v3023_v25 = vadd.f32 %v3022_v54, %v2854_v28  ;;  %v3359_v35 = vadd.f32 %v3358_v58, %v3190_v45  ;;  %v4624_v45 = vld [vmem:[%s7521_s0 + $0x7d0] sm:$0xf] }
 0x3eb   :  { %v3458_v6 = vmax.f32 %v3359_v35, 0.0  ;;  %v4625_v35 = vor.u32 %v5148_v17, %v4624_v45 }
 0x3ee   :  { %v3191_v11 = vpop.f32.mrf.mxu2  ;;  %v2856_v51 = vpop.f32.mrf.mxu0 }
 0x3ef   :  { %v3360_v12 = vpop.f32.mrf.mxu3  ;;  %v3192_v40 = vadd.f32 %v3191_v11, %v3023_v25  ;;  %v3025_v43 = vpop.f32.mrf.mxu1  ;;  %v2857_v2 = vadd.f32 %v2856_v51, %v7553_v21  ;;  %v5145_v25 = vld [vmem:[%s7521_s0 + $0x7dc] sm:$0xf] }
 0x3f0   :  { %v4634_v11 = vld [vmem:[%s7521_s0 + $0x7f8] sm:$0xf0] }
 0x3f1   :  { %v3361_v62 = vadd.f32 %v3360_v12, %v3192_v40  ;;  %2895 = vmatmul.bf16.gmra.mxu0 %v4561_v29  ;;  %v3026_v20 = vadd.f32 %v3025_v43, %v2857_v2  ;;  %v4629_v40 = vor.u32 %v5144_v10, %v4626_v9 }
 0x3f2   :  { %3064 = vmatmul.bf16.gmra.mxu1 %v4565_v30 }
 0x3f3   :  { %v3459_v63 = vmax.f32 %v3361_v62, 0.0  ;;  %3233 = vmatmul.bf16.gmra.mxu2 %v4569_v8  ;;  %v4633_v62 = vor.u32 %v5149_v22, %v4632_v1 }
 0x3f4   :  { %3402 = vmatmul.bf16.gmra.mxu3 %v4573_v32 }
 0x3f5   :  { %v5317_v31 = vpack.c.bf16 %v3459_v63, %v3458_v6  ;;  %v4637_v6 = vor.u32 %v5145_v25, %v4634_v11 }
 0x3f6   :  { %v3194_v55 = vpop.f32.mrf.mxu2  ;;  %v2858_v37 = vpop.f32.mrf.mxu0 }
 0x3f7   :  { %v3363_v19 = vpop.f32.mrf.mxu3  ;;  %5393 = vst [vmem:[%s7522_s3 + $0xa0] sm:$0xff] %v5317_v31   ;;  %v3027_v53 = vpop.f32.mrf.mxu1  ;;  %v2859_v23 = vadd.f32 %v2858_v37, %v7554_v44  ;;  %v3195_v15 = vadd.f32 %v3194_v55, %v3026_v20  ;;  %v7557_v55 = vld [vmem:[#allocation10_spill] sm:$0xff] }
 0x3f9   :  { %v3028_v49 = vadd.f32 %v3027_v53, %v2859_v23  ;;  %v3364_v56 = vadd.f32 %v3363_v19, %v3195_v15 }
 0x3fb   :  { %v3460_v60 = vmax.f32 %v3364_v56, 0.0  ;;  %v7559_v56 = vld [vmem:[#allocation12_spill] sm:$0xff] }
 0x3fe   :  { %v3196_v27 = vpop.f32.mrf.mxu2  ;;  %v2861_v24 = vpop.f32.mrf.mxu0 }
 0x3ff   :  { %v3365_v57 = vpop.f32.mrf.mxu3  ;;  %v3197_v42 = vadd.f32 %v3196_v27, %v3028_v49  ;;  %v3030_v36 = vpop.f32.mrf.mxu1  ;;  %v2862_v58 = vadd.f32 %v2861_v24, %v7555_v52 }
 0x401   :  { %v3366_v47 = vadd.f32 %v3365_v57, %v3197_v42  ;;  %2900 = vmatmul.bf16.gmra.mxu0 %v4593_v0  ;;  %v3031_v28 = vadd.f32 %v3030_v36, %v2862_v58 }
 0x402   :  { %3069 = vmatmul.bf16.gmra.mxu1 %v4597_v48 }
 0x403   :  { %v3461_v50 = vmax.f32 %v3366_v47, 0.0  ;;  %3238 = vmatmul.bf16.gmra.mxu2 %v4601_v39 }
 0x404   :  { %3407 = vmatmul.bf16.gmra.mxu3 %v4605_v18 }
 0x405   :  { %v5322_v14 = vpack.c.bf16 %v3461_v50, %v3460_v60  ;;  %v7560_v60 = vld [vmem:[#allocation13_spill] sm:$0xff] }
 0x406   :  { %v3199_v16 = vpop.f32.mrf.mxu2  ;;  %v2863_v4 = vpop.f32.mrf.mxu0 }
 0x407   :  { %v3368_v54 = vpop.f32.mrf.mxu3  ;;  %5394 = vst [vmem:[%s7522_s3 + $0xa8] sm:$0xff] %v5322_v14   ;;  %v3032_v13 = vpop.f32.mrf.mxu1  ;;  %v2864_v34 = vadd.f32 %v2863_v4, %v7556_v38  ;;  %v3200_v61 = vadd.f32 %v3199_v16, %v3031_v28 }
 0x409   :  { %v3033_v12 = vadd.f32 %v3032_v13, %v2864_v34  ;;  %v3369_v51 = vadd.f32 %v3368_v54, %v3200_v61  ;;  %v7561_v61 = vld [vmem:[#allocation14_spill] sm:$0xff] }
 0x40b   :  { %v3462_v31 = vmax.f32 %v3369_v51, 0.0 }
 0x40e   :  { %v3201_v29 = vpop.f32.mrf.mxu2  ;;  %v2866_v8 = vpop.f32.mrf.mxu0 }
 0x40f   :  { %v3370_v30 = vpop.f32.mrf.mxu3  ;;  %v3202_v43 = vadd.f32 %v3201_v29, %v3033_v12  ;;  %v3035_v32 = vpop.f32.mrf.mxu1  ;;  %v2867_v19 = vadd.f32 %v2866_v8, %v7557_v55  ;;  %v7562_v12 = vld [vmem:[#allocation15_spill] sm:$0xff] }
 0x411   :  { %v3371_v63 = vadd.f32 %v3370_v30, %v3202_v43  ;;  %2905 = vmatmul.bf16.gmra.mxu0 %v4625_v35  ;;  %v3036_v23 = vadd.f32 %v3035_v32, %v2867_v19 }
 0x412   :  { %3074 = vmatmul.bf16.gmra.mxu1 %v4629_v40 }
 0x413   :  { %v3463_v21 = vmax.f32 %v3371_v63, 0.0  ;;  %3243 = vmatmul.bf16.gmra.mxu2 %v4633_v62 }
 0x414   :  { %3412 = vmatmul.bf16.gmra.mxu3 %v4637_v6 }
 0x415   :  { %v5327_v2 = vpack.c.bf16 %v3463_v21, %v3462_v31 }
 0x416   :  { %v3204_v37 = vpop.f32.mrf.mxu2  ;;  %v2868_v20 = vpop.f32.mrf.mxu0 }
 0x417   :  { %v3373_v53 = vpop.f32.mrf.mxu3  ;;  %5395 = vst [vmem:[%s7522_s3 + $0xb0] sm:$0xff] %v5327_v2   ;;  %v3037_v44 = vpop.f32.mrf.mxu1  ;;  %v2869_v3 = vadd.f32 %v2868_v20, %v7558_v26  ;;  %v3205_v15 = vadd.f32 %v3204_v37, %v3036_v23  ;;  %v7563_v2 = vld [vmem:[#allocation16_spill] sm:$0xff]  ;;  %v7564_v23 = vld [vmem:[#allocation17_spill] sm:$0xff] }
 0x419   :  { %v3038_v5 = vadd.f32 %v3037_v44, %v2869_v3  ;;  %v3374_v46 = vadd.f32 %v3373_v53, %v3205_v15 }
 0x41b   :  { %v3464_v57 = vmax.f32 %v3374_v46, 0.0 }
 0x41e   :  { %v3206_v7 = vpop.f32.mrf.mxu2  ;;  %v2871_v33 = vpop.f32.mrf.mxu0 }
 0x41f   :  { %v3375_v41 = vpop.f32.mrf.mxu3  ;;  %v3207_v59 = vadd.f32 %v3206_v7, %v3038_v5  ;;  %v3040_v49 = vpop.f32.mrf.mxu1  ;;  %v2872_v42 = vadd.f32 %v2871_v33, %v7559_v56 }
 0x421   :  { %v3376_v27 = vadd.f32 %v3375_v41, %v3207_v59  ;;  %v3041_v47 = vadd.f32 %v3040_v49, %v2872_v42 }
 0x423   :  { %v3465_v0 = vmax.f32 %v3376_v27, 0.0 }
 0x425   :  { %v5332_v48 = vpack.c.bf16 %v3465_v0, %v3464_v57 }
 0x426   :  { %v3209_v24 = vpop.f32.mrf.mxu2  ;;  %v2873_v39 = vpop.f32.mrf.mxu0 }
 0x427   :  { %v3378_v36 = vpop.f32.mrf.mxu3  ;;  %5396 = vst [vmem:[%s7522_s3 + $0xb8] sm:$0xff] %v5332_v48   ;;  %v3042_v18 = vpop.f32.mrf.mxu1  ;;  %v2874_v50 = vadd.f32 %v2873_v39, %v7560_v60  ;;  %v3210_v14 = vadd.f32 %v3209_v24, %v3041_v47  ;;  %v7565_v48 = vld [vmem:[#allocation18_spill] sm:$0xff]  ;;  %v7566_v47 = vld [vmem:[#allocation19_spill] sm:$0xff] }
 0x429   :  { %v3043_v52 = vadd.f32 %v3042_v18, %v2874_v50  ;;  %v3379_v54 = vadd.f32 %v3378_v36, %v3210_v14 }
 0x42b   :  { %v3466_v34 = vmax.f32 %v3379_v54, 0.0 }
 0x42e   :  { %v3211_v58 = vpop.f32.mrf.mxu2  ;;  %v2876_v13 = vpop.f32.mrf.mxu0 }
 0x42f   :  { %v3380_v16 = vpop.f32.mrf.mxu3  ;;  %v3212_v4 = vadd.f32 %v3211_v58, %v3043_v52  ;;  %v3045_v28 = vpop.f32.mrf.mxu1  ;;  %v2877_v10 = vadd.f32 %v2876_v13, %v7561_v61 }
 0x431   :  { %v3381_v38 = vadd.f32 %v3380_v16, %v3212_v4  ;;  %v3046_v11 = vadd.f32 %v3045_v28, %v2877_v10 }
 0x433   :  { %v3467_v45 = vmax.f32 %v3381_v38, 0.0 }
 0x435   :  { %v5337_v17 = vpack.c.bf16 %v3467_v45, %v3466_v34 }
 0x436   :  { %v3214_v9 = vpop.f32.mrf.mxu2  ;;  %v2878_v22 = vpop.f32.mrf.mxu0 }
 0x437   :  { %v3383_v1 = vpop.f32.mrf.mxu3  ;;  %5397 = vst [vmem:[%s7522_s3 + $0xc0] sm:$0xff] %v5337_v17   ;;  %v3047_v25 = vpop.f32.mrf.mxu1  ;;  %v2879_v29 = vadd.f32 %v2878_v22, %v7562_v12  ;;  %v3215_v30 = vadd.f32 %v3214_v9, %v3046_v11  ;;  %v7567_v17 = vld [vmem:[#allocation20_spill] sm:$0xff]  ;;  %v7568_v11 = vld [vmem:[#allocation21_spill] sm:$0xff] }
 0x439   :  { %v3048_v35 = vadd.f32 %v3047_v25, %v2879_v29  ;;  %v3384_v43 = vadd.f32 %v3383_v1, %v3215_v30 }
 0x43b   :  { %v3468_v63 = vmax.f32 %v3384_v43, 0.0 }
 0x43e   :  { %v3216_v40 = vpop.f32.mrf.mxu2  ;;  %v2881_v32 = vpop.f32.mrf.mxu0 }
 0x43f   :  { %v3385_v51 = vpop.f32.mrf.mxu3  ;;  %v3217_v8 = vadd.f32 %v3216_v40, %v3048_v35  ;;  %v3050_v62 = vpop.f32.mrf.mxu1  ;;  %v2882_v55 = vadd.f32 %v2881_v32, %v7563_v2 }
 0x441   :  { %v3386_v6 = vadd.f32 %v3385_v51, %v3217_v8  ;;  %v3051_v44 = vadd.f32 %v3050_v62, %v2882_v55 }
 0x443   :  { %v3469_v31 = vmax.f32 %v3386_v6, 0.0 }
 0x445   :  { %v5342_v21 = vpack.c.bf16 %v3469_v31, %v3468_v63 }
 0x446   :  { %v3219_v19 = vpop.f32.mrf.mxu2  ;;  %v2883_v53 = vpop.f32.mrf.mxu0 }
 0x447   :  { %v3388_v37 = vpop.f32.mrf.mxu3  ;;  %5398 = vst [vmem:[%s7522_s3 + $0xc8] sm:$0xff] %v5342_v21   ;;  %v3052_v20 = vpop.f32.mrf.mxu1  ;;  %v2884_v26 = vadd.f32 %v2883_v53, %v7564_v23  ;;  %v3220_v3 = vadd.f32 %v3219_v19, %v3051_v44  ;;  %v7569_v21 = vld [vmem:[#allocation22_spill] sm:$0xff]  ;;  %v7570_v44 = vld [vmem:[#allocation23_spill] sm:$0xff] }
 0x449   :  { %v3053_v15 = vadd.f32 %v3052_v20, %v2884_v26  ;;  %v3389_v41 = vadd.f32 %v3388_v37, %v3220_v3 }
 0x44b   :  { %v3470_v27 = vmax.f32 %v3389_v41, 0.0 }
 0x44e   :  { %v3221_v5 = vpop.f32.mrf.mxu2  ;;  %v2886_v59 = vpop.f32.mrf.mxu0 }
 0x44f   :  { %v3390_v7 = vpop.f32.mrf.mxu3  ;;  %v3222_v46 = vadd.f32 %v3221_v5, %v3053_v15  ;;  %v3055_v33 = vpop.f32.mrf.mxu1  ;;  %v2887_v56 = vadd.f32 %v2886_v59, %v7565_v48 }
 0x451   :  { %v3391_v49 = vadd.f32 %v3390_v7, %v3222_v46  ;;  %v3056_v18 = vadd.f32 %v3055_v33, %v2887_v56 }
 0x453   :  { %v3471_v57 = vmax.f32 %v3391_v49, 0.0 }
 0x455   :  { %v5347_v0 = vpack.c.bf16 %v3471_v57, %v3470_v27 }
 0x456   :  { %v3224_v42 = vpop.f32.mrf.mxu2  ;;  %v2888_v36 = vpop.f32.mrf.mxu0 }
 0x457   :  { %v3393_v24 = vpop.f32.mrf.mxu3  ;;  %5399 = vst [vmem:[%s7522_s3 + $0xd0] sm:$0xff] %v5347_v0   ;;  %v3057_v39 = vpop.f32.mrf.mxu1  ;;  %v2889_v60 = vadd.f32 %v2888_v36, %v7566_v47  ;;  %v3225_v50 = vadd.f32 %v3224_v42, %v3056_v18  ;;  %v7571_v0 = vld [vmem:[#allocation24_spill] sm:$0xff]  ;;  %v7572_v18 = vld [vmem:[#allocation25_spill] sm:$0xff] }
 0x459   :  { %v3058_v14 = vadd.f32 %v3057_v39, %v2889_v60  ;;  %v3394_v16 = vadd.f32 %v3393_v24, %v3225_v50 }
 0x45b   :  { %v3472_v38 = vmax.f32 %v3394_v16, 0.0 }
 0x45e   :  { %v3226_v52 = vpop.f32.mrf.mxu2  ;;  %v2891_v4 = vpop.f32.mrf.mxu0 }
 0x45f   :  { %v3395_v58 = vpop.f32.mrf.mxu3  ;;  %v3227_v54 = vadd.f32 %v3226_v52, %v3058_v14  ;;  %v3060_v13 = vpop.f32.mrf.mxu1  ;;  %v2892_v61 = vadd.f32 %v2891_v4, %v7567_v17 }
 0x461   :  { %v3396_v28 = vadd.f32 %v3395_v58, %v3227_v54  ;;  %v3061_v25 = vadd.f32 %v3060_v13, %v2892_v61 }
 0x463   :  { %v3473_v34 = vmax.f32 %v3396_v28, 0.0 }
 0x465   :  { %v5352_v45 = vpack.c.bf16 %v3473_v34, %v3472_v38 }
 0x466   :  { %v3229_v10 = vpop.f32.mrf.mxu2  ;;  %v2893_v1 = vpop.f32.mrf.mxu0 }
 0x467   :  { %v3398_v9 = vpop.f32.mrf.mxu3  ;;  %5400 = vst [vmem:[%s7522_s3 + $0xd8] sm:$0xff] %v5352_v45   ;;  %v3062_v22 = vpop.f32.mrf.mxu1  ;;  %v2894_v12 = vadd.f32 %v2893_v1, %v7568_v11  ;;  %v3230_v29 = vadd.f32 %v3229_v10, %v3061_v25  ;;  %v7573_v45 = vld [vmem:[#allocation26_spill] sm:$0xff] }
 0x469   :  { %v3063_v30 = vadd.f32 %v3062_v22, %v2894_v12  ;;  %v3399_v51 = vadd.f32 %v3398_v9, %v3230_v29  ;;  %v7574_v22 = vld [vmem:[#allocation27_spill] sm:$0xff] }
 0x46b   :  { %v3474_v6 = vmax.f32 %v3399_v51, 0.0 }
 0x46e   :  { %v3231_v35 = vpop.f32.mrf.mxu2  ;;  %v2896_v8 = vpop.f32.mrf.mxu0 }
 0x46f   :  { %v3400_v40 = vpop.f32.mrf.mxu3  ;;  %v3232_v43 = vadd.f32 %v3231_v35, %v3063_v30  ;;  %v3065_v32 = vpop.f32.mrf.mxu1  ;;  %v2897_v2 = vadd.f32 %v2896_v8, %v7569_v21 }
 0x471   :  { %v3401_v62 = vadd.f32 %v3400_v40, %v3232_v43  ;;  %v3066_v20 = vadd.f32 %v3065_v32, %v2897_v2 }
 0x473   :  { %v3475_v63 = vmax.f32 %v3401_v62, 0.0 }
 0x475   :  { %v5357_v31 = vpack.c.bf16 %v3475_v63, %v3474_v6 }
 0x476   :  { %v3234_v55 = vpop.f32.mrf.mxu2  ;;  %v2898_v37 = vpop.f32.mrf.mxu0 }
 0x477   :  { %v3403_v19 = vpop.f32.mrf.mxu3  ;;  %5401 = vst [vmem:[%s7522_s3 + $0xe0] sm:$0xff] %v5357_v31   ;;  %v3067_v53 = vpop.f32.mrf.mxu1  ;;  %v2899_v23 = vadd.f32 %v2898_v37, %v7570_v44  ;;  %v3235_v26 = vadd.f32 %v3234_v55, %v3066_v20 }
 0x479   :  { %v3068_v3 = vadd.f32 %v3067_v53, %v2899_v23  ;;  %v3404_v7 = vadd.f32 %v3403_v19, %v3235_v26 }
 0x47b   :  { %v3476_v49 = vmax.f32 %v3404_v7, 0.0 }
 0x47e   :  { %v3236_v15 = vpop.f32.mrf.mxu2  ;;  %v2901_v46 = vpop.f32.mrf.mxu0 }
 0x47f   :  { %v3405_v5 = vpop.f32.mrf.mxu3  ;;  %v3237_v41 = vadd.f32 %v3236_v15, %v3068_v3  ;;  %v3070_v59 = vpop.f32.mrf.mxu1  ;;  %v2902_v48 = vadd.f32 %v2901_v46, %v7571_v0 }
 0x481   :  { %v3406_v33 = vadd.f32 %v3405_v5, %v3237_v41  ;;  %v3071_v39 = vadd.f32 %v3070_v59, %v2902_v48 }
 0x483   :  { %v3477_v27 = vmax.f32 %v3406_v33, 0.0 }
 0x485   :  { %v5362_v57 = vpack.c.bf16 %v3477_v27, %v3476_v49 }
 0x486   :  { %v3239_v56 = vpop.f32.mrf.mxu2  ;;  %v2903_v24 = vpop.f32.mrf.mxu0 }
 0x487   :  { %v3408_v42 = vpop.f32.mrf.mxu3  ;;  %5402 = vst [vmem:[%s7522_s3 + $0xe8] sm:$0xff] %v5362_v57   ;;  %v3072_v36 = vpop.f32.mrf.mxu1  ;;  %v2904_v47 = vadd.f32 %v2903_v24, %v7572_v18  ;;  %v3240_v60 = vadd.f32 %v3239_v56, %v3071_v39 }
 0x489   :  { %v3073_v50 = vadd.f32 %v3072_v36, %v2904_v47  ;;  %v3409_v58 = vadd.f32 %v3408_v42, %v3240_v60 }
 0x48b   :  { %v3478_v28 = vmax.f32 %v3409_v58, 0.0 }
 0x48e   :  { %v3241_v14 = vpop.f32.mrf.mxu2  ;;  %v2906_v54 = vpop.f32.mrf.mxu0 }
 0x48f   :  { %v3410_v52 = vpop.f32.mrf.mxu3  ;;  %v3242_v16 = vadd.f32 %v3241_v14, %v3073_v50  ;;  %v3075_v13 = vpop.f32.mrf.mxu1  ;;  %v2907_v17 = vadd.f32 %v2906_v54, %v7573_v45 }
 0x491   :  { %v3411_v4 = vadd.f32 %v3410_v52, %v3242_v16  ;;  %v3076_v1 = vadd.f32 %v3075_v13, %v2907_v17 }
 0x493   :  { %v3479_v38 = vmax.f32 %v3411_v4, 0.0 }
 0x495   :  { %v5367_v34 = vpack.c.bf16 %v3479_v38, %v3478_v28 }
 0x496   :  { %v3244_v61 = vpop.f32.mrf.mxu2  ;;  %v2908_v9 = vpop.f32.mrf.mxu0 }
 0x497   :  { %v3413_v10 = vpop.f32.mrf.mxu3  ;;  %5403 = vst [vmem:[%s7522_s3 + $0xf0] sm:$0xff] %v5367_v34   ;;  %v2909_v25 = vadd.f32 %v2908_v9, %v7574_v22  ;;  %v3245_v11 = vadd.f32 %v3244_v61, %v3076_v1  ;;  %v3077_v12 = vpop.f32.mrf.mxu1 }
 0x499   :  { %v3078_v29 = vadd.f32 %v3077_v12, %v2909_v25  ;;  %v3414_v35 = vadd.f32 %v3413_v10, %v3245_v11 }
 0x49b   :  { %v3480_v8 = vmax.f32 %v3414_v35, 0.0 }
 0x49e   :  { %v3246_v30 = vpop.f32.mrf.mxu2 }
 0x49f   :  { %v3247_v40 = vadd.f32 %v3246_v30, %v3078_v29  ;;  %v3415_v51 = vpop.f32.mrf.mxu3 }
 0x4a1   :  { %v3416_v43 = vadd.f32 %v3415_v51, %v3247_v40 }
 0x4a3   :  { %v3481_v32 = vmax.f32 %v3416_v43, 0.0 }
 0x4a5   :  { %v5372_v62 = vpack.c.bf16 %v3481_v32, %v3480_v8 }
 0x4a7   :  { %5404 = vst [vmem:[%s7522_s3 + $0xf8] sm:$0xff] %v5372_v62  }

// kernel: model_d_forward.6
= control target key start
LH: loop header
LB: loop body
LE: loop exit
PB: predicated region body
PF: predicated region fallthrough
CT: control target
= control target key end

     0   :  { %s1648_s1 = inlined_call_operand.vmem [shape: bf16[768,128], index: 1, kind: input, shape index: {}]   ;;  %s1649_s2 = inlined_call_operand.vmem [shape: f32[1,128], index: 2, kind: input, shape index: {}]   ;;  %s1650_s0 = inlined_call_operand.vmem [shape: bf16[80,768], index: 0, kind: input, shape index: {}]   ;;  %s1651_s3 = inlined_call_operand.vmem [shape: bf16[80,128], index: 3, kind: output, shape index: {}]  }
   0x1   :  { %v1169_v0 = vld [vmem:[%s1648_s1 + $0x38] sm:$0xff]  ;;  %v1168_v2 = vld [vmem:[%s1648_s1 + $0x30] sm:$0xff]  ;;  %v1167_v4 = vld [vmem:[%s1648_s1 + $0x28] sm:$0xff] }
   0x2   :  { %v1177_v1 = vld [vmem:[%s1648_s1 + $0x78] sm:$0xff]  ;;  %1239 = vmatpush.bf16.msra.mxu2 %v1169_v0  ;;  %v1176_v3 = vld [vmem:[%s1648_s1 + $0x70] sm:$0xff]  ;;  %582 = vmatpush.bf16.msra.mxu0 %v1169_v0  ;;  %v1175_v5 = vld [vmem:[%s1648_s1 + $0x68] sm:$0xff] }
   0x3   :  { %1247 = vmatpush.bf16.msra.mxu3 %v1177_v1  ;;  %616 = vmatpush.bf16.msra.mxu1 %v1177_v1  ;;  %v1166_v6 = vld [vmem:[%s1648_s1 + $0x20] sm:$0xff]  ;;  %v1165_v8 = vld [vmem:[%s1648_s1 + $0x18] sm:$0xff]  ;;  %v1164_v10 = vld [vmem:[%s1648_s1 + $0x10] sm:$0xff] }
   0x4   :  { %v1174_v7 = vld [vmem:[%s1648_s1 + $0x60] sm:$0xff]  ;;  %v1173_v9 = vld [vmem:[%s1648_s1 + $0x58] sm:$0xff]  ;;  %v1172_v11 = vld [vmem:[%s1648_s1 + $0x50] sm:$0xff] }
   0x5   :  { %v1163_v12 = vld [vmem:[%s1648_s1 + $0x8] sm:$0xff]  ;;  %v1162_v14 = vld [vmem:[%s1648_s1] sm:$0xff]  ;;  %v1147_v17 = vld [vmem:[%s1650_s0 + $0x74] sm:$0xf0] }
   0x6   :  { %1240 = vmatpush.bf16.msra.mxu2 %v1168_v2  ;;  %583 = vmatpush.bf16.msra.mxu0 %v1168_v2  ;;  %v1171_v13 = vld [vmem:[%s1648_s1 + $0x48] sm:$0xff]  ;;  %v1170_v15 = vld [vmem:[%s1648_s1 + $0x40] sm:$0xff]  ;;  %v872_v19 = vld [vmem:[%s1650_s0 + $0x78] sm:$0xf0] }
   0x7   :  { %1248 = vmatpush.bf16.msra.mxu3 %v1176_v3  ;;  %617 = vmatpush.bf16.msra.mxu1 %v1176_v3  ;;  %v870_v16 = vld [vmem:[%s1650_s0 + $0x60] sm:$0xf]  ;;  %v1144_v18 = vld [vmem:[%s1650_s0 + $0x64] sm:$0xf]  ;;  %v1185_v20 = vld [vmem:[%s1648_s1 + $0xb8] sm:$0xff] }
   0x8   :  { %v1193_v21 = vld [vmem:[%s1648_s1 + $0xf8] sm:$0xff]  ;;  %v822_v22 = vld [vmem:[%s1650_s0] sm:$0xf]  ;;  %v871_v23 = vor.u32 %v1147_v17, %v870_v16  ;;  %v875_v24 = vor.u32 %v1144_v18, %v872_v19  ;;  %v1132_v26 = vld [vmem:[%s1650_s0 + $0x4] sm:$0xf] }
   0x9   :  { %v1135_v25 = vld [vmem:[%s1650_s0 + $0x14] sm:$0xf0]  ;;  %v824_v27 = vld [vmem:[%s1650_s0 + $0x18] sm:$0xf0]  ;;  %v1184_v30 = vld [vmem:[%s1648_s1 + $0xb0] sm:$0xff] }
   0xa   :  { %1241 = vmatpush.bf16.msra.mxu2 %v1167_v4  ;;  %584 = vmatpush.bf16.msra.mxu0 %v1167_v4  ;;  %v1201_v28 = vld [vmem:[%s1648_s1 + $0x138] sm:$0xff]  ;;  %v1192_v31 = vld [vmem:[%s1648_s1 + $0xf0] sm:$0xff]  ;;  %v823_v32 = vor.u32 %v1135_v25, %v822_v22  ;;  %v827_v33 = vor.u32 %v1132_v26, %v824_v27  ;;  %v1183_v36 = vld [vmem:[%s1648_s1 + $0xa8] sm:$0xff] }
   0xb   :  { %1249 = vmatpush.bf16.msra.mxu3 %v1175_v5  ;;  %618 = vmatpush.bf16.msra.mxu1 %v1175_v5  ;;  %v1209_v29 = vld [vmem:[%s1648_s1 + $0x178] sm:$0xff]  ;;  %v1200_v34 = vld [vmem:[%s1648_s1 + $0x130] sm:$0xff]  ;;  %v1191_v37 = vld [vmem:[%s1648_s1 + $0xe8] sm:$0xff] }
   0xc   :  { %v1208_v35 = vld [vmem:[%s1648_s1 + $0x170] sm:$0xff]  ;;  %v1199_v38 = vld [vmem:[%s1648_s1 + $0x128] sm:$0xff]  ;;  %v1182_v40 = vld [vmem:[%s1648_s1 + $0xa0] sm:$0xff] }
   0xd   :  { %v1207_v39 = vld [vmem:[%s1648_s1 + $0x168] sm:$0xff]  ;;  %v1190_v41 = vld [vmem:[%s1648_s1 + $0xe0] sm:$0xff]  ;;  %v894_v42 = vld [vmem:[%s1650_s0 + $0x90] sm:$0xf] }
   0xe   :  { %1242 = vmatpush.bf16.msra.mxu2 %v1166_v6  ;;  %585 = vmatpush.bf16.msra.mxu0 %v1166_v6  ;;  %v1153_v43 = vld [vmem:[%s1650_s0 + $0xa4] sm:$0xf0]  ;;  %v1150_v44 = vld [vmem:[%s1650_s0 + $0x94] sm:$0xf]  ;;  %v896_v45 = vld [vmem:[%s1650_s0 + $0xa8] sm:$0xf0] }
   0xf   :  { %1250 = vmatpush.bf16.msra.mxu3 %v1174_v7  ;;  %619 = vmatpush.bf16.msra.mxu1 %v1174_v7  ;;  %v1198_v46 = vld [vmem:[%s1648_s1 + $0x120] sm:$0xff]  ;;  %v1181_v48 = vld [vmem:[%s1648_s1 + $0x98] sm:$0xff]  ;;  %v846_v50 = vld [vmem:[%s1650_s0 + $0x30] sm:$0xf]  ;;  %v895_v51 = vor.u32 %v1153_v43, %v894_v42  ;;  %v899_v52 = vor.u32 %v1150_v44, %v896_v45 }
  0x10   :  { %v1206_v47 = vld [vmem:[%s1648_s1 + $0x160] sm:$0xff]  ;;  %v1189_v49 = vld [vmem:[%s1648_s1 + $0xd8] sm:$0xff]  ;;  %v1141_v53 = vld [vmem:[%s1650_s0 + $0x44] sm:$0xf0] }
  0x11   :  { %v1138_v54 = vld [vmem:[%s1650_s0 + $0x34] sm:$0xf]  ;;  %v848_v55 = vld [vmem:[%s1650_s0 + $0x48] sm:$0xf0]  ;;  %v1197_v56 = vld [vmem:[%s1648_s1 + $0x118] sm:$0xff]  ;;  %v847_v60 = vor.u32 %v1141_v53, %v846_v50 }
  0x12   :  { %1243 = vmatpush.bf16.msra.mxu2 %v1165_v8  ;;  %586 = vmatpush.bf16.msra.mxu0 %v1165_v8  ;;  %v1205_v57 = vld [vmem:[%s1648_s1 + $0x158] sm:$0xff]  ;;  %v1180_v58 = vld [vmem:[%s1648_s1 + $0x90] sm:$0xff]  ;;  %v851_v61 = vor.u32 %v1138_v54, %v848_v55  ;;  %v1179_v0 = vld [vmem:[%s1648_s1 + $0x88] sm:$0xff] }
  0x13   :  { %1251 = vmatpush.bf16.msra.mxu3 %v1173_v9  ;;  %620 = vmatpush.bf16.msra.mxu1 %v1173_v9  ;;  %v1188_v59 = vld [vmem:[%s1648_s1 + $0xd0] sm:$0xff]  ;;  %v1187_v1 = vld [vmem:[%s1648_s1 + $0xc8] sm:$0xff]  ;;  %v1178_v4 = vld [vmem:[%s1648_s1 + $0x80] sm:$0xff] }
  0x14   :  { %v1196_v62 = vld [vmem:[%s1648_s1 + $0x110] sm:$0xff]  ;;  %v1195_v2 = vld [vmem:[%s1648_s1 + $0x108] sm:$0xff]  ;;  %v1186_v5 = vld [vmem:[%s1648_s1 + $0xc0] sm:$0xff] }
  0x15   :  { %v1204_v63 = vld [vmem:[%s1648_s1 + $0x150] sm:$0xff]  ;;  %v1203_v3 = vld [vmem:[%s1648_s1 + $0x148] sm:$0xff]  ;;  %v918_v6 = vld [vmem:[%s1650_s0 + $0xc0] sm:$0xf] }
  0x16   :  { %1244 = vmatpush.bf16.msra.mxu2 %v1164_v10  ;;  %587 = vmatpush.bf16.msra.mxu0 %v1164_v10  ;;  %v1159_v7 = vld [vmem:[%s1650_s0 + $0xd4] sm:$0xf0]  ;;  %v1156_v8 = vld [vmem:[%s1650_s0 + $0xc4] sm:$0xf]  ;;  %v920_v9 = vld [vmem:[%s1650_s0 + $0xd8] sm:$0xf0] }
  0x17   :  { %1252 = vmatpush.bf16.msra.mxu3 %v1172_v11  ;;  %621 = vmatpush.bf16.msra.mxu1 %v1172_v11  ;;  %v1194_v10 = vld [vmem:[%s1648_s1 + $0x100] sm:$0xff]  ;;  %v1134_v16 = vld [vmem:[%s1650_s0 + $0x14] sm:$0xf]  ;;  %v840_v17 = vld [vmem:[%s1650_s0 + $0x28] sm:$0xf0] }
  0x18   :  { %v1202_v11 = vld [vmem:[%s1648_s1 + $0x140] sm:$0xff]  ;;  %v843_v19 = vor.u32 %v1134_v16, %v840_v17  ;;  %v1133_v22 = vld [vmem:[%s1650_s0 + $0xc] sm:$0xf]  ;;  %v1143_v27 = vld [vmem:[%s1650_s0 + $0x54] sm:$0xf0] }
  0x19   :  { %v878_v44 = vld [vmem:[%s1650_s0 + $0x68] sm:$0xf]  ;;  %v1148_v45 = vld [vmem:[%s1650_s0 + $0x7c] sm:$0xf0]  ;;  %v912_v53 = vld [vmem:[%s1650_s0 + $0xb8] sm:$0xf0] }
  0x1a   :  { %1245 = vmatpush.bf16.msra.mxu2 %v1163_v12  ;;  %588 = vmatpush.bf16.msra.mxu0 %v1163_v12  ;;  %v838_v12 = vld [vmem:[%s1650_s0 + $0x10] sm:$0xf] }
  0x1b   :  { %1253 = vmatpush.bf16.msra.mxu3 %v1171_v13  ;;  %622 = vmatpush.bf16.msra.mxu1 %v1171_v13  ;;  %v919_v13 = vor.u32 %v1159_v7, %v918_v6  ;;  %v1157_v6 = vld [vmem:[%s1650_s0 + $0xcc] sm:$0xf]  ;;  %v928_v7 = vld [vmem:[%s1650_s0 + $0xe0] sm:$0xf0] }
  0x1e   :  { %1246 = vmatpush.bf16.msra.mxu2 %v1162_v14  ;;  %589 = vmatpush.bf16.msra.mxu0 %v1162_v14  ;;  %v923_v14 = vor.u32 %v1156_v8, %v920_v9  ;;  %v931_v9 = vor.u32 %v1157_v6, %v928_v7 }
  0x1f   :  { %1254 = vmatpush.bf16.msra.mxu3 %v1170_v15  ;;  %623 = vmatpush.bf16.msra.mxu1 %v1170_v15  ;;  %v1137_v15 = vld [vmem:[%s1650_s0 + $0x24] sm:$0xf0] }
  0x20   :  { %v839_v18 = vor.u32 %v1137_v15, %v838_v12 }
  0x21   :  { %600 = vmatmul.bf16.vlgmr.msra.gmra.mxu2 %v871_v23  ;;  %590 = vmatmul.bf16.vlgmr.msra.gmra.mxu0 %v823_v32  ;;  %v832_v23 = vld [vmem:[%s1650_s0 + $0x20] sm:$0xf0]  ;;  %v854_v32 = vld [vmem:[%s1650_s0 + $0x38] sm:$0xf] }
  0x22   :  { %650 = vmatpush.bf16.msrb.mxu2 %v1185_v20  ;;  %634 = vmatmul.bf16.vlgmr.msra.gmra.mxu3 %v875_v24  ;;  %v830_v20 = vld [vmem:[%s1650_s0 + $0x8] sm:$0xf]  ;;  %v862_v24 = vld [vmem:[%s1650_s0 + $0x40] sm:$0xf]  ;;  %v835_v26 = vor.u32 %v1133_v22, %v832_v23 }
  0x23   :  { %684 = vmatpush.bf16.msrb.mxu3 %v1193_v21  ;;  %718 = vmatpush.bf16.msrb.mxu0 %v1201_v28  ;;  %v1136_v21 = vld [vmem:[%s1650_s0 + $0x1c] sm:$0xf0]  ;;  %v1140_v28 = vld [vmem:[%s1650_s0 + $0x44] sm:$0xf] }
  0x24   :  { %752 = vmatpush.bf16.msrb.mxu1 %v1209_v29  ;;  %v831_v25 = vor.u32 %v1136_v21, %v830_v20  ;;  %v864_v29 = vld [vmem:[%s1650_s0 + $0x58] sm:$0xf0] }
  0x25   :  { %624 = vmatmul.bf16.vlgmr.msra.gmra.mxu1 %v827_v33  ;;  %v1142_v33 = vld [vmem:[%s1650_s0 + $0x4c] sm:$0xf0] }
  0x26   :  { %651 = vmatpush.bf16.msrb.mxu2 %v1184_v30  ;;  %v863_v30 = vor.u32 %v1143_v27, %v862_v24 }
  0x27   :  { %685 = vmatpush.bf16.msrb.mxu3 %v1192_v31  ;;  %719 = vmatpush.bf16.msrb.mxu0 %v1200_v34  ;;  %v867_v31 = vor.u32 %v1140_v28, %v864_v29  ;;  %v1139_v34 = vld [vmem:[%s1650_s0 + $0x3c] sm:$0xf] }
  0x28   :  { %753 = vmatpush.bf16.msrb.mxu1 %v1208_v35  ;;  %v856_v35 = vld [vmem:[%s1650_s0 + $0x50] sm:$0xf0] }
  0x2a   :  { %652 = vmatpush.bf16.msrb.mxu2 %v1183_v36  ;;  %v886_v36 = vld [vmem:[%s1650_s0 + $0x70] sm:$0xf] }
  0x2b   :  { %686 = vmatpush.bf16.msrb.mxu3 %v1191_v37  ;;  %720 = vmatpush.bf16.msrb.mxu0 %v1199_v38  ;;  %v855_v37 = vor.u32 %v1142_v33, %v854_v32  ;;  %v859_v38 = vor.u32 %v1139_v34, %v856_v35 }
  0x2c   :  { %754 = vmatpush.bf16.msrb.mxu1 %v1207_v39  ;;  %v1149_v39 = vld [vmem:[%s1650_s0 + $0x84] sm:$0xf0] }
  0x2d   :  { %v887_v42 = vor.u32 %v1149_v39, %v886_v36 }
  0x2e   :  { %653 = vmatpush.bf16.msrb.mxu2 %v1182_v40  ;;  %v1146_v40 = vld [vmem:[%s1650_s0 + $0x74] sm:$0xf] }
  0x2f   :  { %687 = vmatpush.bf16.msrb.mxu3 %v1190_v41  ;;  %721 = vmatpush.bf16.msrb.mxu0 %v1198_v46  ;;  %v888_v41 = vld [vmem:[%s1650_s0 + $0x88] sm:$0xf0] }
  0x30   :  { %755 = vmatpush.bf16.msrb.mxu1 %v1206_v47  ;;  %v891_v43 = vor.u32 %v1146_v40, %v888_v41  ;;  %v1145_v46 = vld [vmem:[%s1650_s0 + $0x6c] sm:$0xf]  ;;  %v880_v47 = vld [vmem:[%s1650_s0 + $0x80] sm:$0xf0] }
  0x31   :  { %605 = vmatmul.bf16.gmra.mxu2 %v895_v51  ;;  %595 = vmatmul.bf16.gmra.mxu0 %v847_v60  ;;  %v883_v50 = vor.u32 %v1145_v46, %v880_v47  ;;  %v1155_v51 = vld [vmem:[%s1650_s0 + $0xb4] sm:$0xf0]  ;;  %v934_v60 = vld [vmem:[%s1650_s0 + $0xd0] sm:$0xf] }
  0x32   :  { %654 = vmatpush.bf16.msrb.mxu2 %v1181_v48  ;;  %639 = vmatmul.bf16.gmra.mxu3 %v899_v52  ;;  %v910_v48 = vld [vmem:[%s1650_s0 + $0xa0] sm:$0xf]  ;;  %v1152_v52 = vld [vmem:[%s1650_s0 + $0xa4] sm:$0xf] }
  0x33   :  { %688 = vmatpush.bf16.msrb.mxu3 %v1189_v49  ;;  %722 = vmatpush.bf16.msrb.mxu0 %v1197_v56  ;;  %v879_v49 = vor.u32 %v1148_v45, %v878_v44  ;;  %v911_v54 = vor.u32 %v1155_v51, %v910_v48  ;;  %v915_v55 = vor.u32 %v1152_v52, %v912_v53  ;;  %v902_v56 = vld [vmem:[%s1650_s0 + $0x98] sm:$0xf] }
  0x34   :  { %756 = vmatpush.bf16.msrb.mxu1 %v1205_v57  ;;  %v1154_v57 = vld [vmem:[%s1650_s0 + $0xac] sm:$0xf0] }
  0x35   :  { %629 = vmatmul.bf16.gmra.mxu1 %v851_v61  ;;  %v903_v61 = vor.u32 %v1154_v57, %v902_v56 }
  0x36   :  { %655 = vmatpush.bf16.msrb.mxu2 %v1180_v58  ;;  %v1151_v58 = vld [vmem:[%s1650_s0 + $0x9c] sm:$0xf] }
  0x37   :  { %689 = vmatpush.bf16.msrb.mxu3 %v1188_v59  ;;  %723 = vmatpush.bf16.msrb.mxu0 %v1196_v62  ;;  %v904_v59 = vld [vmem:[%s1650_s0 + $0xb0] sm:$0xf0] }
  0x38   :  { %757 = vmatpush.bf16.msrb.mxu1 %v1204_v63  ;;  %v907_v62 = vor.u32 %v1151_v58, %v904_v59  ;;  %v1161_v63 = vld [vmem:[%s1650_s0 + $0xe4] sm:$0xf0] }
  0x3a   :  { %656 = vmatpush.bf16.msrb.mxu2 %v1179_v0  ;;  %v1158_v0 = vld [vmem:[%s1650_s0 + $0xd4] sm:$0xf] }
  0x3b   :  { %690 = vmatpush.bf16.msrb.mxu3 %v1187_v1  ;;  %724 = vmatpush.bf16.msrb.mxu0 %v1195_v2  ;;  %v936_v1 = vld [vmem:[%s1650_s0 + $0xe8] sm:$0xf0]  ;;  %v935_v2 = vor.u32 %v1161_v63, %v934_v60 }
  0x3c   :  { %758 = vmatpush.bf16.msrb.mxu1 %v1203_v3  ;;  %v939_v3 = vor.u32 %v1158_v0, %v936_v1 }
  0x3e   :  { %657 = vmatpush.bf16.msrb.mxu2 %v1178_v4  ;;  %v926_v4 = vld [vmem:[%s1650_s0 + $0xc8] sm:$0xf] }
  0x3f   :  { %691 = vmatpush.bf16.msrb.mxu3 %v1186_v5  ;;  %725 = vmatpush.bf16.msrb.mxu0 %v1194_v10  ;;  %v1160_v5 = vld [vmem:[%s1650_s0 + $0xdc] sm:$0xf0] }
  0x40   :  { %759 = vmatpush.bf16.msrb.mxu1 %v1202_v11  ;;  %v927_v8 = vor.u32 %v1160_v5, %v926_v4  ;;  %v1603_v10 = vld [vmem:[%s1649_s2] ss:$0 sm:$0xff] }
  0x41   :  { %610 = vmatmul.bf16.gmra.mxu2 %v919_v13 }
  0x42   :  { %644 = vmatmul.bf16.gmra.mxu3 %v923_v14  ;;  %726 = vmatmul.bf16.vlgmr.msrb.gmra.mxu0 %v839_v18 }
  0x45   :  { %760 = vmatmul.bf16.vlgmr.msrb.gmra.mxu1 %v843_v19 }
  0x51   :  { %658 = vmatmul.bf16.vlgmr.msrb.gmra.mxu2 %v831_v25 }
  0x52   :  { %692 = vmatmul.bf16.vlgmr.msrb.gmra.mxu3 %v835_v26  ;;  %731 = vmatmul.bf16.gmra.mxu0 %v863_v30 }
  0x55   :  { %765 = vmatmul.bf16.gmra.mxu1 %v867_v31 }
  0x61   :  { %663 = vmatmul.bf16.gmra.mxu2 %v855_v37 }
  0x62   :  { %697 = vmatmul.bf16.gmra.mxu3 %v859_v38  ;;  %736 = vmatmul.bf16.gmra.mxu0 %v887_v42 }
  0x65   :  { %770 = vmatmul.bf16.gmra.mxu1 %v891_v43 }
  0x71   :  { %668 = vmatmul.bf16.gmra.mxu2 %v879_v49 }
  0x72   :  { %702 = vmatmul.bf16.gmra.mxu3 %v883_v50  ;;  %741 = vmatmul.bf16.gmra.mxu0 %v911_v54 }
  0x75   :  { %775 = vmatmul.bf16.gmra.mxu1 %v915_v55 }
  0x81   :  { %673 = vmatmul.bf16.gmra.mxu2 %v903_v61 }
  0x82   :  { %707 = vmatmul.bf16.gmra.mxu3 %v907_v62  ;;  %746 = vmatmul.bf16.gmra.mxu0 %v935_v2 }
  0x85   :  { %780 = vmatmul.bf16.gmra.mxu1 %v939_v3 }
  0x91   :  { %678 = vmatmul.bf16.gmra.mxu2 %v927_v8 }
  0x92   :  { %712 = vmatmul.bf16.gmra.mxu3 %v931_v9 }
  0x9e   :  { %v591_v11 = vpop.f32.mrf.mxu0 }
  0x9f   :  { %v592_v44 = vadd.f32 %v1603_v10, %v591_v11 }
  0xa2   :  { %v625_v12 = vpop.f32.mrf.mxu1 }
  0xa3   :  { %v626_v48 = vadd.f32 %v625_v12, %v592_v44 }
  0xa4   :  { %v601_v13 = vpop.f32.mrf.mxu2 }
  0xa5   :  { %v635_v14 = vpop.f32.mrf.mxu3  ;;  %v602_v15 = vadd.f32 %v1603_v10, %v601_v13 }
  0xa6   :  { %v593_v17 = vpop.f32.mrf.mxu0 }
  0xa7   :  { %v1606_v16 = vadd.f32 %v635_v14, %v602_v15  ;;  %v594_v52 = vadd.f32 %v1603_v10, %v593_v17 }
  0xaa   :  { %v627_v18 = vpop.f32.mrf.mxu1 }
  0xab   :  { %v628_v55 = vadd.f32 %v627_v18, %v594_v52 }
  0xac   :  { %v603_v19 = vpop.f32.mrf.mxu2 }
  0xad   :  { %v637_v20 = vpop.f32.mrf.mxu3  ;;  %v604_v21 = vadd.f32 %v1603_v10, %v603_v19 }
  0xae   :  { %v596_v23 = vpop.f32.mrf.mxu0 }
  0xaf   :  { %v1609_v22 = vadd.f32 %v637_v20, %v604_v21  ;;  %v597_v61 = vadd.f32 %v1603_v10, %v596_v23 }
  0xb2   :  { %v630_v24 = vpop.f32.mrf.mxu1 }
  0xb3   :  { %v631_v1 = vadd.f32 %v630_v24, %v597_v61 }
  0xb4   :  { %v606_v25 = vpop.f32.mrf.mxu2 }
  0xb5   :  { %v640_v26 = vpop.f32.mrf.mxu3  ;;  %v607_v27 = vadd.f32 %v1603_v10, %v606_v25 }
  0xb6   :  { %v598_v29 = vpop.f32.mrf.mxu0 }
  0xb7   :  { %v1612_v28 = vadd.f32 %v640_v26, %v607_v27  ;;  %v599_v11 = vadd.f32 %v1603_v10, %v598_v29 }
  0xba   :  { %v632_v33 = vpop.f32.mrf.mxu1 }
  0xbb   :  { %v633_v14 = vadd.f32 %v632_v33, %v599_v11 }
  0xbc   :  { %v608_v30 = vpop.f32.mrf.mxu2 }
  0xbd   :  { %v642_v31 = vpop.f32.mrf.mxu3  ;;  %v609_v32 = vadd.f32 %v1603_v10, %v608_v30 }
  0xbf   :  { %v1615_v34 = vadd.f32 %v642_v31, %v609_v32  ;;  %v727_v38 = vpop.f32.mrf.mxu0 }
  0xc2   :  { %v761_v40 = vpop.f32.mrf.mxu1 }
  0xc4   :  { %v611_v35 = vpop.f32.mrf.mxu2 }
  0xc5   :  { %v645_v36 = vpop.f32.mrf.mxu3  ;;  %v612_v37 = vadd.f32 %v1603_v10, %v611_v35 }
  0xc7   :  { %v1618_v39 = vadd.f32 %v645_v36, %v612_v37  ;;  %v729_v46 = vpop.f32.mrf.mxu0 }
  0xca   :  { %v763_v47 = vpop.f32.mrf.mxu1 }
  0xcc   :  { %v613_v41 = vpop.f32.mrf.mxu2 }
  0xcd   :  { %v647_v42 = vpop.f32.mrf.mxu3  ;;  %v614_v43 = vadd.f32 %v1603_v10, %v613_v41 }
  0xcf   :  { %v1622_v45 = vadd.f32 %v647_v42, %v614_v43  ;;  %v732_v54 = vpop.f32.mrf.mxu0 }
  0xd2   :  { %v766_v56 = vpop.f32.mrf.mxu1 }
  0xd4   :  { %v659_v49 = vpop.f32.mrf.mxu2 }
  0xd5   :  { %v693_v50 = vpop.f32.mrf.mxu3  ;;  %v660_v51 = vadd.f32 %v659_v49, %v626_v48 }
  0xd7   :  { %v694_v53 = vadd.f32 %v693_v50, %v660_v51  ;;  %v734_v3 = vpop.f32.mrf.mxu0 }
  0xd9   :  { %v728_v59 = vadd.f32 %v727_v38, %v694_v53 }
  0xda   :  { %v768_v9 = vpop.f32.mrf.mxu1 }
  0xdb   :  { %v762_v63 = vadd.f32 %v761_v40, %v728_v59 }
  0xdc   :  { %v661_v57 = vpop.f32.mrf.mxu2 }
  0xdd   :  { %v695_v58 = vpop.f32.mrf.mxu3  ;;  %v662_v60 = vadd.f32 %v661_v57, %v628_v55  ;;  %v786_v6 = vmax.f32 %v762_v63, 0.0 }
  0xdf   :  { %v696_v62 = vadd.f32 %v695_v58, %v662_v60  ;;  %v737_v20 = vpop.f32.mrf.mxu0 }
  0xe1   :  { %v730_v0 = vadd.f32 %v729_v46, %v696_v62 }
  0xe2   :  { %v771_v23 = vpop.f32.mrf.mxu1 }
  0xe3   :  { %v764_v2 = vadd.f32 %v763_v47, %v730_v0 }
  0xe4   :  { %v664_v4 = vpop.f32.mrf.mxu2 }
  0xe5   :  { %v698_v5 = vpop.f32.mrf.mxu3  ;;  %v787_v7 = vmax.f32 %v764_v2, 0.0  ;;  %v665_v8 = vadd.f32 %v664_v4, %v631_v1 }
  0xe7   :  { %v1213_v12 = vpack.c.bf16 %v787_v7, %v786_v6  ;;  %v699_v13 = vadd.f32 %v698_v5, %v665_v8  ;;  %v739_v35 = vpop.f32.mrf.mxu0 }
  0xe9   :  { %1214 = vst [vmem:[%s1651_s3] sm:$0xff] %v1213_v12   ;;  %v733_v18 = vadd.f32 %v732_v54, %v699_v13 }
  0xea   :  { %v773_v36 = vpop.f32.mrf.mxu1 }
  0xeb   :  { %v767_v24 = vadd.f32 %v766_v56, %v733_v18 }
  0xec   :  { %v666_v15 = vpop.f32.mrf.mxu2 }
  0xed   :  { %v700_v17 = vpop.f32.mrf.mxu3  ;;  %v667_v19 = vadd.f32 %v666_v15, %v633_v14  ;;  %v788_v10 = vmax.f32 %v767_v24, 0.0 }
  0xef   :  { %v701_v21 = vadd.f32 %v700_v17, %v667_v19  ;;  %v742_v46 = vpop.f32.mrf.mxu0 }
  0xf1   :  { %v735_v25 = vadd.f32 %v734_v3, %v701_v21 }
  0xf2   :  { %v776_v48 = vpop.f32.mrf.mxu1 }
  0xf3   :  { %v769_v26 = vadd.f32 %v768_v9, %v735_v25 }
  0xf4   :  { %v669_v27 = vpop.f32.mrf.mxu2 }
  0xf5   :  { %v703_v30 = vpop.f32.mrf.mxu3  ;;  %v789_v29 = vmax.f32 %v769_v26, 0.0  ;;  %v670_v31 = vadd.f32 %v669_v27, %v1606_v16 }
  0xf7   :  { %v1218_v32 = vpack.c.bf16 %v789_v29, %v788_v10  ;;  %v704_v33 = vadd.f32 %v703_v30, %v670_v31  ;;  %v744_v55 = vpop.f32.mrf.mxu0 }
  0xf9   :  { %1235 = vst [vmem:[%s1651_s3 + $0x8] sm:$0xff] %v1218_v32   ;;  %v738_v40 = vadd.f32 %v737_v20, %v704_v33 }
  0xfa   :  { %v778_v59 = vpop.f32.mrf.mxu1 }
  0xfb   :  { %v772_v43 = vadd.f32 %v771_v23, %v738_v40 }
  0xfc   :  { %v671_v37 = vpop.f32.mrf.mxu2 }
  0xfd   :  { %v705_v38 = vpop.f32.mrf.mxu3  ;;  %v672_v41 = vadd.f32 %v671_v37, %v1609_v22  ;;  %v790_v50 = vmax.f32 %v772_v43, 0.0 }
  0xff   :  { %v706_v42 = vadd.f32 %v705_v38, %v672_v41  ;;  %v747_v4 = vpop.f32.mrf.mxu0 }
 0x101   :  { %v740_v44 = vadd.f32 %v739_v35, %v706_v42 }
 0x102   :  { %v781_v6 = vpop.f32.mrf.mxu1 }
 0x103   :  { %v774_v47 = vadd.f32 %v773_v36, %v740_v44 }
 0x104   :  { %v674_v16 = vpop.f32.mrf.mxu2 }
 0x105   :  { %v708_v49 = vpop.f32.mrf.mxu3  ;;  %v791_v51 = vmax.f32 %v774_v47, 0.0  ;;  %v675_v52 = vadd.f32 %v674_v16, %v1612_v28 }
 0x107   :  { %v1223_v53 = vpack.c.bf16 %v791_v51, %v790_v50  ;;  %v709_v54 = vadd.f32 %v708_v49, %v675_v52  ;;  %v749_v13 = vpop.f32.mrf.mxu0 }
 0x109   :  { %1236 = vst [vmem:[%s1651_s3 + $0x10] sm:$0xff] %v1223_v53   ;;  %v743_v57 = vadd.f32 %v742_v46, %v709_v54 }
 0x10a   :  { %v783_v17 = vpop.f32.mrf.mxu1 }
 0x10b   :  { %v777_v61 = vadd.f32 %v776_v48, %v743_v57 }
 0x10c   :  { %v676_v22 = vpop.f32.mrf.mxu2 }
 0x10d   :  { %v710_v56 = vpop.f32.mrf.mxu3  ;;  %v677_v58 = vadd.f32 %v676_v22, %v1615_v34  ;;  %v792_v28 = vmax.f32 %v777_v61, 0.0 }
 0x10f   :  { %v711_v60 = vadd.f32 %v710_v56, %v677_v58 }
 0x111   :  { %v745_v62 = vadd.f32 %v744_v55, %v711_v60 }
 0x113   :  { %v779_v63 = vadd.f32 %v778_v59, %v745_v62 }
 0x114   :  { %v679_v0 = vpop.f32.mrf.mxu2 }
 0x115   :  { %v713_v1 = vpop.f32.mrf.mxu3  ;;  %v793_v2 = vmax.f32 %v779_v63, 0.0  ;;  %v680_v3 = vadd.f32 %v679_v0, %v1618_v39 }
 0x117   :  { %v1228_v5 = vpack.c.bf16 %v793_v2, %v792_v28  ;;  %v714_v7 = vadd.f32 %v713_v1, %v680_v3 }
 0x119   :  { %1237 = vst [vmem:[%s1651_s3 + $0x18] sm:$0xff] %v1228_v5   ;;  %v748_v8 = vadd.f32 %v747_v4, %v714_v7 }
 0x11b   :  { %v782_v14 = vadd.f32 %v781_v6, %v748_v8 }
 0x11c   :  { %v681_v34 = vpop.f32.mrf.mxu2 }
 0x11d   :  { %v682_v9 = vadd.f32 %v681_v34, %v1622_v45  ;;  %v715_v11 = vpop.f32.mrf.mxu3  ;;  %v794_v39 = vmax.f32 %v782_v14, 0.0 }
 0x11f   :  { %v716_v12 = vadd.f32 %v715_v11, %v682_v9 }
 0x121   :  { %v750_v15 = vadd.f32 %v749_v13, %v716_v12 }
 0x123   :  { %v784_v18 = vadd.f32 %v783_v17, %v750_v15 }
 0x125   :  { %v795_v19 = vmax.f32 %v784_v18, 0.0 }
 0x127   :  { %v1233_v20 = vpack.c.bf16 %v795_v19, %v794_v39 }
 0x129   :  { %1238 = vst [vmem:[%s1651_s3 + $0x20] sm:$0xff] %v1233_v20  }

// kernel: model_d_forward.7
= control target key start
LH: loop header
LB: loop body
LE: loop exit
PB: predicated region body
PF: predicated region fallthrough
CT: control target
= control target key end

     0   :  { %s19510_s0 = inlined_call_operand.vmem [shape: bf16[16,23424], index: 0, kind: input, shape index: {}]   ;;  %s19511_s1 = inlined_call_operand.vmem [shape: bf16[23424,256], index: 1, kind: input, shape index: {}]   ;;  %s19512_s2 = inlined_call_operand.vmem [shape: f32[1,256], index: 2, kind: input, shape index: {}]   ;;  %s19513_s3 = inlined_call_operand.vmem [shape: f32[16,256], index: 3, kind: output, shape index: {}]  }
   0x1   :  { %19514 = sst [smem:[#allocation5_spill]] %s19510_s0 }
   0x2   :  { %s16554_s12 = smov 0   ;;  %s16556_s13 = smov 0  }
   0x3   :  { %s16558_s14 = smov 0   ;;  %s16560_s15 = smov 0  }
   0x4   :  { %s16562_s16 = smov 0   ;;  %s16564_s17 = smov 0  }
   0x5   :  { %s16566_s18 = smov 0   ;;  %s16568_s19 = smov 0  }
   0x6   :  { %s16570_s20 = smov 0   ;;  %s16572_s21 = smov 0  }
   0x7   :  { %s16574_s22 = smov 0  }
   0x8 LB: > { %s13587_s23 = sadd.s32 4294967295, %s16532_s22   ;;  %s25_s24 = sadd.s32 1, %s16524_s20  ;;  %s16532_s22 = sphi %s16574_s22, %s13_s22   ;;  %s16528_s21 = sphi %s16572_s21, %s19528_s21   ;;  %s16524_s20 = sphi %s16570_s20, %s19527_s20   ;;  %s16520_s19 = sphi %s16568_s19, %s19526_s19   ;;  %s16516_s18 = sphi %s16566_s18, %s19525_s18   ;;  %s16512_s17 = sphi %s16564_s17, %s19524_s17   ;;  %s16508_s16 = sphi %s16562_s16, %s19523_s16   ;;  %s16504_s15 = sphi %s16560_s15, %s19522_s15   ;;  %s16500_s14 = sphi %s16558_s14, %s19521_s14   ;;  %s16496_s13 = sphi %s16556_s13, %s19520_s13   ;;  %s16492_s12 = sphi %s16554_s12, %s19519_s12  }
   0x9   : > { %p26_p0 = scmp.ge.s32.totalorder %s25_s24, 3  ;;  %s28_s25 = sadd.s32 1, %s16528_s21 }
   0xa   : > { %s41_s26 = sadd.s32 1, %s16512_s17  ;;  %p48_p1 = scmp.ne.s32.totalorder %s16512_s17, %s16508_s16 }
   0xb   : > { %s19530_s24 = smov (%p26_p0, %s25_s24), 0  ;;  %s19532_s25 = smov (!%p26_p0, %s28_s25), %s16528_s21 }
   0xc   : > { %s37_s27 = ssub.s32 %s16524_s20, %s19530_s24  ;;  %p49_p2 = scmp.eq.s32.totalorder %s16532_s22, 0 }
   0xd   : > { %p30_p3 = scmp.ge.s32.totalorder %s19532_s25, 2  ;;  %p39_p4 = scmp.eq.s32.totalorder %s37_s27, 0 }
   0xe   : > { %p16621_p5 = por %p49_p2, %p48_p1  ;;  %s69_s29 = sadd.s32 1, %s16504_s15 }
   0xf   : > { %s19534_s25 = smov (%p30_p3, %s19532_s25), 0  ;;  %p76_p6 = scmp.ne.s32.totalorder %s16504_s15, %s16500_s14 }
  0x10   : > { %s16629_s30 = scalar_select %p39_p4, %s16512_s17, %s41_s26  }
  0x11   : > { %s65_s4 = ssub.s32 %s16528_s21, %s19534_s25  ;;  %p16635_p9 = por %p76_p6, %p49_p2 }
  0x12   : > { %s66_s5 = sor.u32 %s65_s4, %s37_s27  ;;  %p121_p7 = scmp.eq.s32.totalorder %s65_s4, 0 }
  0x13   : > { %p67_p8 = scmp.eq.s32.totalorder %s66_s5, 0  ;;  %s123_s7 = sadd.s32 1, %s16496_s13 }
  0x14   : > { %p133_p10 = scmp.ne.s32.totalorder %s16496_s13, %s16492_s12  ;;  %p134_p11 = scmp.eq.s32.totalorder %s13587_s23, 5 }
  0x15   : > { %s16643_s8 = scalar_select %p67_p8, %s16504_s15, %s69_s29  }
  0x16   : > { %s16646_s9 = scalar_select %p121_p7, %s16496_s13, %s123_s7  }
  0x17   : > { %p16648_p12 = por %p134_p11, %p133_p10  ;;  %p13590_p13 = scmp.ge.s32.totalorder %s16532_s22, 6 }
  0x19   : > { %156 = sbr.rel (%p13590_p13) target bundleno = 1084 (0x43c), region = 16 }
  0x1e   : > { %159 = sbr.rel (!%p16621_p5) target bundleno = 101 (0x65), region = 20  ;;  %s161_s11 = sand.u32 (%p16621_p5), 1, %s16512_s17  }
  0x1f   : > { %s15802_s26 = smul.u32 (%p16621_p5), 244, %s16524_s20  ;;  %s19518_s0 = sld [smem:[#allocation5_spill]] (%p16621_p5) }
  0x20   : > { %s16353_s27 = smul.u32 (%p16621_p5), 488, %s161_s11 }
  0x22   : > { %s16665_s23 = scalar_lea.vmem (%p16621_p5), [#allocation2], %s16353_s27 }
  0x25   : > { %s16660_s5 = scalar_lea.vmem %s19518_s0, %s15802_s26 }
  0x26   : > { %v184_v0 = vld [vmem:[%s16660_s5] sm:$0xff]  ;;  %v186_v1 = vld [vmem:[%s16660_s5 + $0x8] sm:$0xff]  ;;  %v188_v2 = vld [vmem:[%s16660_s5 + $0x10] sm:$0xff] }
  0x27   : > { %185 = vst [vmem:[%s16665_s23] sm:$0xff] %v184_v0  ;;  %v190_v3 = vld [vmem:[%s16660_s5 + $0x18] sm:$0xff]  ;;  %v192_v4 = vld [vmem:[%s16660_s5 + $0x20] sm:$0xff]  ;;  %v194_v5 = vld [vmem:[%s16660_s5 + $0x28] sm:$0xff] }
  0x28   : > { %187 = vst [vmem:[%s16665_s23 + $0x8] sm:$0xff] %v186_v1  ;;  %v196_v6 = vld [vmem:[%s16660_s5 + $0x30] sm:$0xff]  ;;  %v198_v7 = vld [vmem:[%s16660_s5 + $0x38] sm:$0xff]  ;;  %v200_v8 = vld [vmem:[%s16660_s5 + $0x40] sm:$0xff] }
  0x29   : > { %189 = vst [vmem:[%s16665_s23 + $0x10] sm:$0xff] %v188_v2  ;;  %v202_v9 = vld [vmem:[%s16660_s5 + $0x48] sm:$0xff]  ;;  %v204_v10 = vld [vmem:[%s16660_s5 + $0x50] sm:$0xff]  ;;  %v206_v11 = vld [vmem:[%s16660_s5 + $0x58] sm:$0xff] }
  0x2a   : > { %191 = vst [vmem:[%s16665_s23 + $0x18] sm:$0xff] %v190_v3  ;;  %v208_v12 = vld [vmem:[%s16660_s5 + $0x60] sm:$0xff]  ;;  %v210_v13 = vld [vmem:[%s16660_s5 + $0x68] sm:$0xff]  ;;  %v212_v14 = vld [vmem:[%s16660_s5 + $0x70] sm:$0xff] }
  0x2b   : > { %193 = vst [vmem:[%s16665_s23 + $0x20] sm:$0xff] %v192_v4  ;;  %v214_v15 = vld [vmem:[%s16660_s5 + $0x78] sm:$0xff]  ;;  %v216_v16 = vld [vmem:[%s16660_s5 + $0x80] sm:$0xff]  ;;  %v218_v17 = vld [vmem:[%s16660_s5 + $0x88] sm:$0xff] }
  0x2c   : > { %195 = vst [vmem:[%s16665_s23 + $0x28] sm:$0xff] %v194_v5  ;;  %v220_v18 = vld [vmem:[%s16660_s5 + $0x90] sm:$0xff]  ;;  %v222_v19 = vld [vmem:[%s16660_s5 + $0x98] sm:$0xff]  ;;  %v224_v20 = vld [vmem:[%s16660_s5 + $0xa0] sm:$0xff] }
  0x2d   : > { %197 = vst [vmem:[%s16665_s23 + $0x30] sm:$0xff] %v196_v6  ;;  %v226_v21 = vld [vmem:[%s16660_s5 + $0xa8] sm:$0xff]  ;;  %v228_v22 = vld [vmem:[%s16660_s5 + $0xb0] sm:$0xff]  ;;  %v230_v23 = vld [vmem:[%s16660_s5 + $0xb8] sm:$0xff] }
  0x2e   : > { %199 = vst [vmem:[%s16665_s23 + $0x38] sm:$0xff] %v198_v7  ;;  %v232_v24 = vld [vmem:[%s16660_s5 + $0xc0] sm:$0xff]  ;;  %v234_v25 = vld [vmem:[%s16660_s5 + $0xc8] sm:$0xff]  ;;  %v236_v26 = vld [vmem:[%s16660_s5 + $0xd0] sm:$0xff] }
  0x2f   : > { %201 = vst [vmem:[%s16665_s23 + $0x40] sm:$0xff] %v200_v8  ;;  %v238_v27 = vld [vmem:[%s16660_s5 + $0xd8] sm:$0xff]  ;;  %v240_v28 = vld [vmem:[%s16660_s5 + $0xe0] sm:$0xff]  ;;  %v242_v29 = vld [vmem:[%s16660_s5 + $0xe8] sm:$0xff] }
  0x30   : > { %203 = vst [vmem:[%s16665_s23 + $0x48] sm:$0xff] %v202_v9  ;;  %v244_v30 = vld [vmem:[%s16660_s5 + $0x2dc] sm:$0xff]  ;;  %v246_v31 = vld [vmem:[%s16660_s5 + $0x2e4] sm:$0xff]  ;;  %v248_v32 = vld [vmem:[%s16660_s5 + $0x2ec] sm:$0xff] }
  0x31   : > { %205 = vst [vmem:[%s16665_s23 + $0x50] sm:$0xff] %v204_v10  ;;  %v250_v33 = vld [vmem:[%s16660_s5 + $0x2f4] sm:$0xff]  ;;  %v252_v34 = vld [vmem:[%s16660_s5 + $0x2fc] sm:$0xff]  ;;  %v254_v35 = vld [vmem:[%s16660_s5 + $0x304] sm:$0xff] }
  0x32   : > { %207 = vst [vmem:[%s16665_s23 + $0x58] sm:$0xff] %v206_v11  ;;  %v256_v36 = vld [vmem:[%s16660_s5 + $0x30c] sm:$0xff]  ;;  %v258_v37 = vld [vmem:[%s16660_s5 + $0x314] sm:$0xff]  ;;  %v260_v38 = vld [vmem:[%s16660_s5 + $0x31c] sm:$0xff] }
  0x33   : > { %209 = vst [vmem:[%s16665_s23 + $0x60] sm:$0xff] %v208_v12  ;;  %v262_v39 = vld [vmem:[%s16660_s5 + $0x324] sm:$0xff]  ;;  %v264_v40 = vld [vmem:[%s16660_s5 + $0x32c] sm:$0xff]  ;;  %v266_v41 = vld [vmem:[%s16660_s5 + $0x334] sm:$0xff] }
  0x34   : > { %211 = vst [vmem:[%s16665_s23 + $0x68] sm:$0xff] %v210_v13  ;;  %v268_v42 = vld [vmem:[%s16660_s5 + $0x33c] sm:$0xff]  ;;  %v270_v43 = vld [vmem:[%s16660_s5 + $0x344] sm:$0xff]  ;;  %v272_v44 = vld [vmem:[%s16660_s5 + $0x34c] sm:$0xff] }
  0x35   : > { %213 = vst [vmem:[%s16665_s23 + $0x70] sm:$0xff] %v212_v14  ;;  %v274_v45 = vld [vmem:[%s16660_s5 + $0x354] sm:$0xff]  ;;  %v276_v46 = vld [vmem:[%s16660_s5 + $0x35c] sm:$0xff]  ;;  %v278_v47 = vld [vmem:[%s16660_s5 + $0x364] sm:$0xff] }
  0x36   : > { %215 = vst [vmem:[%s16665_s23 + $0x78] sm:$0xff] %v214_v15  ;;  %v280_v48 = vld [vmem:[%s16660_s5 + $0x36c] sm:$0xff]  ;;  %v282_v49 = vld [vmem:[%s16660_s5 + $0x374] sm:$0xff]  ;;  %v284_v50 = vld [vmem:[%s16660_s5 + $0x37c] sm:$0xff] }
  0x37   : > { %217 = vst [vmem:[%s16665_s23 + $0x80] sm:$0xff] %v216_v16  ;;  %v286_v51 = vld [vmem:[%s16660_s5 + $0x384] sm:$0xff]  ;;  %v288_v52 = vld [vmem:[%s16660_s5 + $0x38c] sm:$0xff]  ;;  %v290_v53 = vld [vmem:[%s16660_s5 + $0x394] sm:$0xff] }
  0x38   : > { %219 = vst [vmem:[%s16665_s23 + $0x88] sm:$0xff] %v218_v17  ;;  %v292_v54 = vld [vmem:[%s16660_s5 + $0x39c] sm:$0xff]  ;;  %v294_v55 = vld [vmem:[%s16660_s5 + $0x3a4] sm:$0xff]  ;;  %v296_v56 = vld [vmem:[%s16660_s5 + $0x3ac] sm:$0xff] }
  0x39   : > { %221 = vst [vmem:[%s16665_s23 + $0x90] sm:$0xff] %v220_v18  ;;  %v298_v57 = vld [vmem:[%s16660_s5 + $0x3b4] sm:$0xff]  ;;  %v300_v58 = vld [vmem:[%s16660_s5 + $0x3bc] sm:$0xff]  ;;  %v302_v59 = vld [vmem:[%s16660_s5 + $0x3c4] sm:$0xff] }
  0x3a   : > { %223 = vst [vmem:[%s16665_s23 + $0x98] sm:$0xff] %v222_v19  ;;  %v13592_v60 = vld [vmem:[%s16660_s5 + $0xf0] sm:$0xf]  ;;  %v13594_v61 = vld [vmem:[%s16660_s5 + $0x3cc] sm:$0xf] }
  0x3b   : > { %225 = vst [vmem:[%s16665_s23 + $0xa0] sm:$0xff] %v224_v20 }
  0x3c   : > { %227 = vst [vmem:[%s16665_s23 + $0xa8] sm:$0xff] %v226_v21 }
  0x3d   : > { %229 = vst [vmem:[%s16665_s23 + $0xb0] sm:$0xff] %v228_v22 }
  0x3e   : > { %231 = vst [vmem:[%s16665_s23 + $0xb8] sm:$0xff] %v230_v23 }
  0x3f   : > { %233 = vst [vmem:[%s16665_s23 + $0xc0] sm:$0xff] %v232_v24 }
  0x40   : > { %235 = vst [vmem:[%s16665_s23 + $0xc8] sm:$0xff] %v234_v25 }
  0x41   : > { %237 = vst [vmem:[%s16665_s23 + $0xd0] sm:$0xff] %v236_v26 }
  0x42   : > { %239 = vst [vmem:[%s16665_s23 + $0xd8] sm:$0xff] %v238_v27 }
  0x43   : > { %241 = vst [vmem:[%s16665_s23 + $0xe0] sm:$0xff] %v240_v28 }
  0x44   : > { %243 = vst [vmem:[%s16665_s23 + $0xe8] sm:$0xff] %v242_v29 }
  0x45   : > { %245 = vst [vmem:[%s16665_s23 + $0xf4] sm:$0xff] %v244_v30 }
  0x46   : > { %247 = vst [vmem:[%s16665_s23 + $0xfc] sm:$0xff] %v246_v31 }
  0x47   : > { %249 = vst [vmem:[%s16665_s23 + $0x104] sm:$0xff] %v248_v32 }
  0x48   : > { %251 = vst [vmem:[%s16665_s23 + $0x10c] sm:$0xff] %v250_v33 }
  0x49   : > { %253 = vst [vmem:[%s16665_s23 + $0x114] sm:$0xff] %v252_v34 }
  0x4a   : > { %255 = vst [vmem:[%s16665_s23 + $0x11c] sm:$0xff] %v254_v35 }
  0x4b   : > { %257 = vst [vmem:[%s16665_s23 + $0x124] sm:$0xff] %v256_v36 }
  0x4c   : > { %259 = vst [vmem:[%s16665_s23 + $0x12c] sm:$0xff] %v258_v37 }
  0x4d   : > { %261 = vst [vmem:[%s16665_s23 + $0x134] sm:$0xff] %v260_v38 }
  0x4e   : > { %263 = vst [vmem:[%s16665_s23 + $0x13c] sm:$0xff] %v262_v39 }
  0x4f   : > { %265 = vst [vmem:[%s16665_s23 + $0x144] sm:$0xff] %v264_v40 }
  0x50   : > { %267 = vst [vmem:[%s16665_s23 + $0x14c] sm:$0xff] %v266_v41 }
  0x51   : > { %269 = vst [vmem:[%s16665_s23 + $0x154] sm:$0xff] %v268_v42 }
  0x52   : > { %271 = vst [vmem:[%s16665_s23 + $0x15c] sm:$0xff] %v270_v43 }
  0x53   : > { %273 = vst [vmem:[%s16665_s23 + $0x164] sm:$0xff] %v272_v44 }
  0x54   : > { %275 = vst [vmem:[%s16665_s23 + $0x16c] sm:$0xff] %v274_v45 }
  0x55   : > { %277 = vst [vmem:[%s16665_s23 + $0x174] sm:$0xff] %v276_v46 }
  0x56   : > { %279 = vst [vmem:[%s16665_s23 + $0x17c] sm:$0xff] %v278_v47 }
  0x57   : > { %281 = vst [vmem:[%s16665_s23 + $0x184] sm:$0xff] %v280_v48 }
  0x58   : > { %283 = vst [vmem:[%s16665_s23 + $0x18c] sm:$0xff] %v282_v49 }
  0x59   : > { %285 = vst [vmem:[%s16665_s23 + $0x194] sm:$0xff] %v284_v50 }
  0x5a   : > { %287 = vst [vmem:[%s16665_s23 + $0x19c] sm:$0xff] %v286_v51 }
  0x5b   : > { %289 = vst [vmem:[%s16665_s23 + $0x1a4] sm:$0xff] %v288_v52 }
  0x5c   : > { %291 = vst [vmem:[%s16665_s23 + $0x1ac] sm:$0xff] %v290_v53 }
  0x5d   : > { %293 = vst [vmem:[%s16665_s23 + $0x1b4] sm:$0xff] %v292_v54 }
  0x5e   : > { %295 = vst [vmem:[%s16665_s23 + $0x1bc] sm:$0xff] %v294_v55 }
  0x5f   : > { %297 = vst [vmem:[%s16665_s23 + $0x1c4] sm:$0xff] %v296_v56 }
  0x60   : > { %299 = vst [vmem:[%s16665_s23 + $0x1cc] sm:$0xff] %v298_v57 }
  0x61   : > { %301 = vst [vmem:[%s16665_s23 + $0x1d4] sm:$0xff] %v300_v58 }
  0x62   : > { %303 = vst [vmem:[%s16665_s23 + $0x1dc] sm:$0xff] %v302_v59 }
  0x63   : > { %13593 = vst [vmem:[%s16665_s23 + $0xf0] sm:$0xf] %v13592_v60 }
  0x64   : > { %13595 = vst [vmem:[%s16665_s23 + $0x1e4] sm:$0xf] %v13594_v61 }
  0x65 PF: > { %321 = sbr.rel (!%p16635_p9) target bundleno = 1084 (0x43c), region = 46  ;;  %s323_s28 = sand.u32 (%p16635_p9), 1, %s16504_s15  }
  0x66   : > { %s15803_s7 = smul.u32 (%p16635_p9), 1952, %s16524_s20 }
  0x67   : > { %s16354_s11 = smul.u32 (%p16635_p9), 3904, %s323_s28 }
  0x68   : > { %s328_s26 = sadd.s32 (%p16635_p9), %s16528_s21, %s15803_s7 }
  0x69   : > { %s13597_s27 = sshll.u32 (%p16635_p9), %s328_s26, 2  ;;  %s16801_s6 = scalar_lea.vmem (%p16635_p9), [#allocation3], %s16354_s11 }
  0x6a   : > { %s16796_s0 = scalar_lea.vmem %s19511_s1, %s13597_s27 }
  0x6b   : > { %v347_v62 = vld [vmem:[%s16796_s0] sm:$0xf]  ;;  %v349_v63 = vld [vmem:[%s16796_s0 + $0x8] sm:$0xf]  ;;  %v351_v0 = vld [vmem:[%s16796_s0 + $0x10] sm:$0xf] }
  0x6c   : > { %348 = vst [vmem:[%s16801_s6] sm:$0xf] %v347_v62  ;;  %v353_v1 = vld [vmem:[%s16796_s0 + $0x18] sm:$0xf]  ;;  %v355_v2 = vld [vmem:[%s16796_s0 + $0x20] sm:$0xf] }
  0x6d   : > { %350 = vst [vmem:[%s16801_s6 + $0x4] sm:$0xf] %v349_v63  ;;  %v357_v3 = vld [vmem:[%s16796_s0 + $0x28] sm:$0xf]  ;;  %v359_v4 = vld [vmem:[%s16796_s0 + $0x30] sm:$0xf] }
  0x6e   : > { %352 = vst [vmem:[%s16801_s6 + $0x8] sm:$0xf] %v351_v0  ;;  %v361_v5 = vld [vmem:[%s16796_s0 + $0x38] sm:$0xf]  ;;  %v363_v6 = vld [vmem:[%s16796_s0 + $0x40] sm:$0xf] }
  0x6f   : > { %354 = vst [vmem:[%s16801_s6 + $0xc] sm:$0xf] %v353_v1  ;;  %v365_v7 = vld [vmem:[%s16796_s0 + $0x48] sm:$0xf]  ;;  %v367_v8 = vld [vmem:[%s16796_s0 + $0x50] sm:$0xf] }
  0x70   : > { %356 = vst [vmem:[%s16801_s6 + $0x10] sm:$0xf] %v355_v2  ;;  %v369_v9 = vld [vmem:[%s16796_s0 + $0x58] sm:$0xf]  ;;  %v371_v10 = vld [vmem:[%s16796_s0 + $0x60] sm:$0xf] }
  0x71   : > { %358 = vst [vmem:[%s16801_s6 + $0x14] sm:$0xf] %v357_v3  ;;  %v373_v11 = vld [vmem:[%s16796_s0 + $0x68] sm:$0xf]  ;;  %v375_v12 = vld [vmem:[%s16796_s0 + $0x70] sm:$0xf] }
  0x72   : > { %360 = vst [vmem:[%s16801_s6 + $0x18] sm:$0xf] %v359_v4  ;;  %v377_v13 = vld [vmem:[%s16796_s0 + $0x78] sm:$0xf]  ;;  %v379_v14 = vld [vmem:[%s16796_s0 + $0x80] sm:$0xf] }
  0x73   : > { %362 = vst [vmem:[%s16801_s6 + $0x1c] sm:$0xf] %v361_v5  ;;  %v381_v15 = vld [vmem:[%s16796_s0 + $0x88] sm:$0xf]  ;;  %v383_v16 = vld [vmem:[%s16796_s0 + $0x90] sm:$0xf] }
  0x74   : > { %364 = vst [vmem:[%s16801_s6 + $0x20] sm:$0xf] %v363_v6  ;;  %v385_v17 = vld [vmem:[%s16796_s0 + $0x98] sm:$0xf]  ;;  %v387_v18 = vld [vmem:[%s16796_s0 + $0xa0] sm:$0xf] }
  0x75   : > { %366 = vst [vmem:[%s16801_s6 + $0x24] sm:$0xf] %v365_v7  ;;  %v389_v19 = vld [vmem:[%s16796_s0 + $0xa8] sm:$0xf]  ;;  %v391_v20 = vld [vmem:[%s16796_s0 + $0xb0] sm:$0xf] }
  0x76   : > { %368 = vst [vmem:[%s16801_s6 + $0x28] sm:$0xf] %v367_v8  ;;  %v393_v21 = vld [vmem:[%s16796_s0 + $0xb8] sm:$0xf]  ;;  %v395_v22 = vld [vmem:[%s16796_s0 + $0xc0] sm:$0xf] }
  0x77   : > { %370 = vst [vmem:[%s16801_s6 + $0x2c] sm:$0xf] %v369_v9  ;;  %v397_v23 = vld [vmem:[%s16796_s0 + $0xc8] sm:$0xf]  ;;  %v399_v24 = vld [vmem:[%s16796_s0 + $0xd0] sm:$0xf] }
  0x78   : > { %372 = vst [vmem:[%s16801_s6 + $0x30] sm:$0xf] %v371_v10  ;;  %v401_v25 = vld [vmem:[%s16796_s0 + $0xd8] sm:$0xf]  ;;  %v403_v26 = vld [vmem:[%s16796_s0 + $0xe0] sm:$0xf] }
  0x79   : > { %374 = vst [vmem:[%s16801_s6 + $0x34] sm:$0xf] %v373_v11  ;;  %v405_v27 = vld [vmem:[%s16796_s0 + $0xe8] sm:$0xf]  ;;  %v407_v28 = vld [vmem:[%s16796_s0 + $0xf0] sm:$0xf] }
  0x7a   : > { %376 = vst [vmem:[%s16801_s6 + $0x38] sm:$0xf] %v375_v12  ;;  %v409_v29 = vld [vmem:[%s16796_s0 + $0xf8] sm:$0xf]  ;;  %v411_v30 = vld [vmem:[%s16796_s0 + $0x100] sm:$0xf] }
  0x7b   : > { %378 = vst [vmem:[%s16801_s6 + $0x3c] sm:$0xf] %v377_v13  ;;  %v413_v31 = vld [vmem:[%s16796_s0 + $0x108] sm:$0xf]  ;;  %v415_v32 = vld [vmem:[%s16796_s0 + $0x110] sm:$0xf] }
  0x7c   : > { %380 = vst [vmem:[%s16801_s6 + $0x40] sm:$0xf] %v379_v14  ;;  %v417_v33 = vld [vmem:[%s16796_s0 + $0x118] sm:$0xf]  ;;  %v419_v34 = vld [vmem:[%s16796_s0 + $0x120] sm:$0xf] }
  0x7d   : > { %382 = vst [vmem:[%s16801_s6 + $0x44] sm:$0xf] %v381_v15  ;;  %v421_v35 = vld [vmem:[%s16796_s0 + $0x128] sm:$0xf]  ;;  %v423_v36 = vld [vmem:[%s16796_s0 + $0x130] sm:$0xf] }
  0x7e   : > { %384 = vst [vmem:[%s16801_s6 + $0x48] sm:$0xf] %v383_v16  ;;  %v425_v37 = vld [vmem:[%s16796_s0 + $0x138] sm:$0xf]  ;;  %v427_v38 = vld [vmem:[%s16796_s0 + $0x140] sm:$0xf] }
  0x7f   : > { %386 = vst [vmem:[%s16801_s6 + $0x4c] sm:$0xf] %v385_v17  ;;  %v429_v39 = vld [vmem:[%s16796_s0 + $0x148] sm:$0xf]  ;;  %v431_v40 = vld [vmem:[%s16796_s0 + $0x150] sm:$0xf] }
  0x80   : > { %388 = vst [vmem:[%s16801_s6 + $0x50] sm:$0xf] %v387_v18  ;;  %v433_v41 = vld [vmem:[%s16796_s0 + $0x158] sm:$0xf]  ;;  %v435_v42 = vld [vmem:[%s16796_s0 + $0x160] sm:$0xf] }
  0x81   : > { %390 = vst [vmem:[%s16801_s6 + $0x54] sm:$0xf] %v389_v19  ;;  %v437_v43 = vld [vmem:[%s16796_s0 + $0x168] sm:$0xf]  ;;  %v439_v44 = vld [vmem:[%s16796_s0 + $0x170] sm:$0xf] }
  0x82   : > { %392 = vst [vmem:[%s16801_s6 + $0x58] sm:$0xf] %v391_v20  ;;  %v441_v45 = vld [vmem:[%s16796_s0 + $0x178] sm:$0xf]  ;;  %v443_v46 = vld [vmem:[%s16796_s0 + $0x180] sm:$0xf] }
  0x83   : > { %394 = vst [vmem:[%s16801_s6 + $0x5c] sm:$0xf] %v393_v21  ;;  %v445_v47 = vld [vmem:[%s16796_s0 + $0x188] sm:$0xf]  ;;  %v447_v48 = vld [vmem:[%s16796_s0 + $0x190] sm:$0xf] }
  0x84   : > { %396 = vst [vmem:[%s16801_s6 + $0x60] sm:$0xf] %v395_v22  ;;  %v449_v49 = vld [vmem:[%s16796_s0 + $0x198] sm:$0xf]  ;;  %v451_v50 = vld [vmem:[%s16796_s0 + $0x1a0] sm:$0xf] }
  0x85   : > { %398 = vst [vmem:[%s16801_s6 + $0x64] sm:$0xf] %v397_v23  ;;  %v453_v51 = vld [vmem:[%s16796_s0 + $0x1a8] sm:$0xf]  ;;  %v455_v52 = vld [vmem:[%s16796_s0 + $0x1b0] sm:$0xf] }
  0x86   : > { %400 = vst [vmem:[%s16801_s6 + $0x68] sm:$0xf] %v399_v24  ;;  %v457_v53 = vld [vmem:[%s16796_s0 + $0x1b8] sm:$0xf]  ;;  %v459_v54 = vld [vmem:[%s16796_s0 + $0x1c0] sm:$0xf] }
  0x87   : > { %402 = vst [vmem:[%s16801_s6 + $0x6c] sm:$0xf] %v401_v25  ;;  %v461_v55 = vld [vmem:[%s16796_s0 + $0x1c8] sm:$0xf]  ;;  %v463_v56 = vld [vmem:[%s16796_s0 + $0x1d0] sm:$0xf] }
  0x88   : > { %404 = vst [vmem:[%s16801_s6 + $0x70] sm:$0xf] %v403_v26  ;;  %v465_v57 = vld [vmem:[%s16796_s0 + $0x1d8] sm:$0xf]  ;;  %v467_v58 = vld [vmem:[%s16796_s0 + $0x1e0] sm:$0xf] }
  0x89   : > { %406 = vst [vmem:[%s16801_s6 + $0x74] sm:$0xf] %v405_v27  ;;  %v469_v59 = vld [vmem:[%s16796_s0 + $0x1e8] sm:$0xf]  ;;  %v471_v60 = vld [vmem:[%s16796_s0 + $0x1f0] sm:$0xf] }
  0x8a   : > { %408 = vst [vmem:[%s16801_s6 + $0x78] sm:$0xf] %v407_v28  ;;  %v473_v61 = vld [vmem:[%s16796_s0 + $0x1f8] sm:$0xf]  ;;  %v475_v62 = vld [vmem:[%s16796_s0 + $0x200] sm:$0xf] }
  0x8b   : > { %410 = vst [vmem:[%s16801_s6 + $0x7c] sm:$0xf] %v409_v29  ;;  %v477_v63 = vld [vmem:[%s16796_s0 + $0x208] sm:$0xf]  ;;  %v479_v0 = vld [vmem:[%s16796_s0 + $0x210] sm:$0xf] }
  0x8c   : > { %412 = vst [vmem:[%s16801_s6 + $0x80] sm:$0xf] %v411_v30  ;;  %v481_v1 = vld [vmem:[%s16796_s0 + $0x218] sm:$0xf]  ;;  %v483_v2 = vld [vmem:[%s16796_s0 + $0x220] sm:$0xf] }
  0x8d   : > { %414 = vst [vmem:[%s16801_s6 + $0x84] sm:$0xf] %v413_v31  ;;  %v485_v3 = vld [vmem:[%s16796_s0 + $0x228] sm:$0xf]  ;;  %v487_v4 = vld [vmem:[%s16796_s0 + $0x230] sm:$0xf] }
  0x8e   : > { %416 = vst [vmem:[%s16801_s6 + $0x88] sm:$0xf] %v415_v32  ;;  %v489_v5 = vld [vmem:[%s16796_s0 + $0x238] sm:$0xf]  ;;  %v491_v6 = vld [vmem:[%s16796_s0 + $0x240] sm:$0xf] }
  0x8f   : > { %418 = vst [vmem:[%s16801_s6 + $0x8c] sm:$0xf] %v417_v33  ;;  %v493_v7 = vld [vmem:[%s16796_s0 + $0x248] sm:$0xf]  ;;  %v495_v8 = vld [vmem:[%s16796_s0 + $0x250] sm:$0xf] }
  0x90   : > { %420 = vst [vmem:[%s16801_s6 + $0x90] sm:$0xf] %v419_v34  ;;  %v497_v9 = vld [vmem:[%s16796_s0 + $0x258] sm:$0xf]  ;;  %v499_v10 = vld [vmem:[%s16796_s0 + $0x260] sm:$0xf] }
  0x91   : > { %422 = vst [vmem:[%s16801_s6 + $0x94] sm:$0xf] %v421_v35  ;;  %v501_v11 = vld [vmem:[%s16796_s0 + $0x268] sm:$0xf]  ;;  %v503_v12 = vld [vmem:[%s16796_s0 + $0x270] sm:$0xf] }
  0x92   : > { %424 = vst [vmem:[%s16801_s6 + $0x98] sm:$0xf] %v423_v36  ;;  %v505_v13 = vld [vmem:[%s16796_s0 + $0x278] sm:$0xf]  ;;  %v507_v14 = vld [vmem:[%s16796_s0 + $0x280] sm:$0xf] }
  0x93   : > { %426 = vst [vmem:[%s16801_s6 + $0x9c] sm:$0xf] %v425_v37  ;;  %v509_v15 = vld [vmem:[%s16796_s0 + $0x288] sm:$0xf]  ;;  %v511_v16 = vld [vmem:[%s16796_s0 + $0x290] sm:$0xf] }
  0x94   : > { %428 = vst [vmem:[%s16801_s6 + $0xa0] sm:$0xf] %v427_v38  ;;  %v513_v17 = vld [vmem:[%s16796_s0 + $0x298] sm:$0xf]  ;;  %v515_v18 = vld [vmem:[%s16796_s0 + $0x2a0] sm:$0xf] }
  0x95   : > { %430 = vst [vmem:[%s16801_s6 + $0xa4] sm:$0xf] %v429_v39  ;;  %v517_v19 = vld [vmem:[%s16796_s0 + $0x2a8] sm:$0xf]  ;;  %v519_v20 = vld [vmem:[%s16796_s0 + $0x2b0] sm:$0xf] }
  0x96   : > { %432 = vst [vmem:[%s16801_s6 + $0xa8] sm:$0xf] %v431_v40  ;;  %v521_v21 = vld [vmem:[%s16796_s0 + $0x2b8] sm:$0xf]  ;;  %v523_v22 = vld [vmem:[%s16796_s0 + $0x2c0] sm:$0xf] }
  0x97   : > { %434 = vst [vmem:[%s16801_s6 + $0xac] sm:$0xf] %v433_v41  ;;  %v525_v23 = vld [vmem:[%s16796_s0 + $0x2c8] sm:$0xf]  ;;  %v527_v24 = vld [vmem:[%s16796_s0 + $0x2d0] sm:$0xf] }
  0x98   : > { %436 = vst [vmem:[%s16801_s6 + $0xb0] sm:$0xf] %v435_v42  ;;  %v529_v25 = vld [vmem:[%s16796_s0 + $0x2d8] sm:$0xf]  ;;  %v531_v26 = vld [vmem:[%s16796_s0 + $0x2e0] sm:$0xf] }
  0x99   : > { %438 = vst [vmem:[%s16801_s6 + $0xb4] sm:$0xf] %v437_v43  ;;  %v533_v27 = vld [vmem:[%s16796_s0 + $0x2e8] sm:$0xf]  ;;  %v535_v28 = vld [vmem:[%s16796_s0 + $0x2f0] sm:$0xf] }
  0x9a   : > { %440 = vst [vmem:[%s16801_s6 + $0xb8] sm:$0xf] %v439_v44  ;;  %v537_v29 = vld [vmem:[%s16796_s0 + $0x2f8] sm:$0xf]  ;;  %v539_v30 = vld [vmem:[%s16796_s0 + $0x300] sm:$0xf] }
  0x9b   : > { %442 = vst [vmem:[%s16801_s6 + $0xbc] sm:$0xf] %v441_v45  ;;  %v541_v31 = vld [vmem:[%s16796_s0 + $0x308] sm:$0xf]  ;;  %v543_v32 = vld [vmem:[%s16796_s0 + $0x310] sm:$0xf] }
  0x9c   : > { %444 = vst [vmem:[%s16801_s6 + $0xc0] sm:$0xf] %v443_v46  ;;  %v545_v33 = vld [vmem:[%s16796_s0 + $0x318] sm:$0xf]  ;;  %v547_v34 = vld [vmem:[%s16796_s0 + $0x320] sm:$0xf] }
  0x9d   : > { %446 = vst [vmem:[%s16801_s6 + $0xc4] sm:$0xf] %v445_v47  ;;  %v549_v35 = vld [vmem:[%s16796_s0 + $0x328] sm:$0xf]  ;;  %v551_v36 = vld [vmem:[%s16796_s0 + $0x330] sm:$0xf] }
  0x9e   : > { %448 = vst [vmem:[%s16801_s6 + $0xc8] sm:$0xf] %v447_v48  ;;  %v553_v37 = vld [vmem:[%s16796_s0 + $0x338] sm:$0xf]  ;;  %v555_v38 = vld [vmem:[%s16796_s0 + $0x340] sm:$0xf] }
  0x9f   : > { %450 = vst [vmem:[%s16801_s6 + $0xcc] sm:$0xf] %v449_v49  ;;  %v557_v39 = vld [vmem:[%s16796_s0 + $0x348] sm:$0xf]  ;;  %v559_v40 = vld [vmem:[%s16796_s0 + $0x350] sm:$0xf] }
  0xa0   : > { %452 = vst [vmem:[%s16801_s6 + $0xd0] sm:$0xf] %v451_v50  ;;  %v561_v41 = vld [vmem:[%s16796_s0 + $0x358] sm:$0xf]  ;;  %v563_v42 = vld [vmem:[%s16796_s0 + $0x360] sm:$0xf] }
  0xa1   : > { %454 = vst [vmem:[%s16801_s6 + $0xd4] sm:$0xf] %v453_v51  ;;  %v565_v43 = vld [vmem:[%s16796_s0 + $0x368] sm:$0xf]  ;;  %v567_v44 = vld [vmem:[%s16796_s0 + $0x370] sm:$0xf] }
  0xa2   : > { %456 = vst [vmem:[%s16801_s6 + $0xd8] sm:$0xf] %v455_v52  ;;  %v569_v45 = vld [vmem:[%s16796_s0 + $0x378] sm:$0xf]  ;;  %v571_v46 = vld [vmem:[%s16796_s0 + $0x380] sm:$0xf] }
  0xa3   : > { %458 = vst [vmem:[%s16801_s6 + $0xdc] sm:$0xf] %v457_v53  ;;  %v573_v47 = vld [vmem:[%s16796_s0 + $0x388] sm:$0xf]  ;;  %v575_v48 = vld [vmem:[%s16796_s0 + $0x390] sm:$0xf] }
  0xa4   : > { %460 = vst [vmem:[%s16801_s6 + $0xe0] sm:$0xf] %v459_v54  ;;  %v577_v49 = vld [vmem:[%s16796_s0 + $0x398] sm:$0xf]  ;;  %v579_v50 = vld [vmem:[%s16796_s0 + $0x3a0] sm:$0xf] }
  0xa5   : > { %462 = vst [vmem:[%s16801_s6 + $0xe4] sm:$0xf] %v461_v55  ;;  %v581_v51 = vld [vmem:[%s16796_s0 + $0x3a8] sm:$0xf]  ;;  %v583_v52 = vld [vmem:[%s16796_s0 + $0x3b0] sm:$0xf] }
  0xa6   : > { %464 = vst [vmem:[%s16801_s6 + $0xe8] sm:$0xf] %v463_v56  ;;  %v585_v53 = vld [vmem:[%s16796_s0 + $0x3b8] sm:$0xf]  ;;  %v587_v54 = vld [vmem:[%s16796_s0 + $0x3c0] sm:$0xf] }
  0xa7   : > { %466 = vst [vmem:[%s16801_s6 + $0xec] sm:$0xf] %v465_v57  ;;  %v589_v55 = vld [vmem:[%s16796_s0 + $0x3c8] sm:$0xf]  ;;  %v591_v56 = vld [vmem:[%s16796_s0 + $0x3d0] sm:$0xf] }
  0xa8   : > { %468 = vst [vmem:[%s16801_s6 + $0xf0] sm:$0xf] %v467_v58  ;;  %v593_v57 = vld [vmem:[%s16796_s0 + $0x3d8] sm:$0xf]  ;;  %v595_v58 = vld [vmem:[%s16796_s0 + $0x3e0] sm:$0xf] }
  0xa9   : > { %470 = vst [vmem:[%s16801_s6 + $0xf4] sm:$0xf] %v469_v59  ;;  %v597_v59 = vld [vmem:[%s16796_s0 + $0x3e8] sm:$0xf] }
  0xaa   : > { %472 = vst [vmem:[%s16801_s6 + $0xf8] sm:$0xf] %v471_v60  ;;  %v599_v60 = vld [vmem:[%s16796_s0 + $0x3f0] sm:$0xf] }
  0xab   : > { %474 = vst [vmem:[%s16801_s6 + $0xfc] sm:$0xf] %v473_v61  ;;  %v601_v61 = vld [vmem:[%s16796_s0 + $0x3f8] sm:$0xf] }
  0xac   : > { %476 = vst [vmem:[%s16801_s6 + $0x100] sm:$0xf] %v475_v62  ;;  %v603_v62 = vld [vmem:[%s16796_s0 + $0x400] sm:$0xf] }
  0xad   : > { %478 = vst [vmem:[%s16801_s6 + $0x104] sm:$0xf] %v477_v63  ;;  %v605_v63 = vld [vmem:[%s16796_s0 + $0x408] sm:$0xf] }
  0xae   : > { %480 = vst [vmem:[%s16801_s6 + $0x108] sm:$0xf] %v479_v0  ;;  %v607_v0 = vld [vmem:[%s16796_s0 + $0x410] sm:$0xf] }
  0xaf   : > { %482 = vst [vmem:[%s16801_s6 + $0x10c] sm:$0xf] %v481_v1  ;;  %v609_v1 = vld [vmem:[%s16796_s0 + $0x418] sm:$0xf] }
  0xb0   : > { %484 = vst [vmem:[%s16801_s6 + $0x110] sm:$0xf] %v483_v2  ;;  %v611_v2 = vld [vmem:[%s16796_s0 + $0x420] sm:$0xf] }
  0xb1   : > { %486 = vst [vmem:[%s16801_s6 + $0x114] sm:$0xf] %v485_v3  ;;  %v613_v3 = vld [vmem:[%s16796_s0 + $0x428] sm:$0xf] }
  0xb2   : > { %488 = vst [vmem:[%s16801_s6 + $0x118] sm:$0xf] %v487_v4  ;;  %v615_v4 = vld [vmem:[%s16796_s0 + $0x430] sm:$0xf] }
  0xb3   : > { %490 = vst [vmem:[%s16801_s6 + $0x11c] sm:$0xf] %v489_v5  ;;  %v617_v5 = vld [vmem:[%s16796_s0 + $0x438] sm:$0xf] }
  0xb4   : > { %492 = vst [vmem:[%s16801_s6 + $0x120] sm:$0xf] %v491_v6  ;;  %v619_v6 = vld [vmem:[%s16796_s0 + $0x440] sm:$0xf] }
  0xb5   : > { %494 = vst [vmem:[%s16801_s6 + $0x124] sm:$0xf] %v493_v7  ;;  %v621_v7 = vld [vmem:[%s16796_s0 + $0x448] sm:$0xf] }
  0xb6   : > { %496 = vst [vmem:[%s16801_s6 + $0x128] sm:$0xf] %v495_v8  ;;  %v623_v8 = vld [vmem:[%s16796_s0 + $0x450] sm:$0xf] }
  0xb7   : > { %498 = vst [vmem:[%s16801_s6 + $0x12c] sm:$0xf] %v497_v9  ;;  %v625_v9 = vld [vmem:[%s16796_s0 + $0x458] sm:$0xf] }
  0xb8   : > { %500 = vst [vmem:[%s16801_s6 + $0x130] sm:$0xf] %v499_v10  ;;  %v627_v10 = vld [vmem:[%s16796_s0 + $0x460] sm:$0xf] }
  0xb9   : > { %502 = vst [vmem:[%s16801_s6 + $0x134] sm:$0xf] %v501_v11  ;;  %v629_v11 = vld [vmem:[%s16796_s0 + $0x468] sm:$0xf] }
  0xba   : > { %504 = vst [vmem:[%s16801_s6 + $0x138] sm:$0xf] %v503_v12  ;;  %v631_v12 = vld [vmem:[%s16796_s0 + $0x470] sm:$0xf] }
  0xbb   : > { %506 = vst [vmem:[%s16801_s6 + $0x13c] sm:$0xf] %v505_v13  ;;  %v633_v13 = vld [vmem:[%s16796_s0 + $0x478] sm:$0xf] }
  0xbc   : > { %508 = vst [vmem:[%s16801_s6 + $0x140] sm:$0xf] %v507_v14  ;;  %v635_v14 = vld [vmem:[%s16796_s0 + $0x480] sm:$0xf] }
  0xbd   : > { %510 = vst [vmem:[%s16801_s6 + $0x144] sm:$0xf] %v509_v15  ;;  %v637_v15 = vld [vmem:[%s16796_s0 + $0x488] sm:$0xf] }
  0xbe   : > { %512 = vst [vmem:[%s16801_s6 + $0x148] sm:$0xf] %v511_v16  ;;  %v639_v16 = vld [vmem:[%s16796_s0 + $0x490] sm:$0xf] }
  0xbf   : > { %514 = vst [vmem:[%s16801_s6 + $0x14c] sm:$0xf] %v513_v17  ;;  %v641_v17 = vld [vmem:[%s16796_s0 + $0x498] sm:$0xf] }
  0xc0   : > { %516 = vst [vmem:[%s16801_s6 + $0x150] sm:$0xf] %v515_v18  ;;  %v643_v18 = vld [vmem:[%s16796_s0 + $0x4a0] sm:$0xf] }
  0xc1   : > { %518 = vst [vmem:[%s16801_s6 + $0x154] sm:$0xf] %v517_v19  ;;  %v645_v19 = vld [vmem:[%s16796_s0 + $0x4a8] sm:$0xf] }
  0xc2   : > { %520 = vst [vmem:[%s16801_s6 + $0x158] sm:$0xf] %v519_v20  ;;  %v647_v20 = vld [vmem:[%s16796_s0 + $0x4b0] sm:$0xf] }
  0xc3   : > { %522 = vst [vmem:[%s16801_s6 + $0x15c] sm:$0xf] %v521_v21  ;;  %v649_v21 = vld [vmem:[%s16796_s0 + $0x4b8] sm:$0xf] }
  0xc4   : > { %524 = vst [vmem:[%s16801_s6 + $0x160] sm:$0xf] %v523_v22  ;;  %v651_v22 = vld [vmem:[%s16796_s0 + $0x4c0] sm:$0xf] }
  0xc5   : > { %526 = vst [vmem:[%s16801_s6 + $0x164] sm:$0xf] %v525_v23  ;;  %v653_v23 = vld [vmem:[%s16796_s0 + $0x4c8] sm:$0xf] }
  0xc6   : > { %528 = vst [vmem:[%s16801_s6 + $0x168] sm:$0xf] %v527_v24  ;;  %v655_v24 = vld [vmem:[%s16796_s0 + $0x4d0] sm:$0xf] }
  0xc7   : > { %530 = vst [vmem:[%s16801_s6 + $0x16c] sm:$0xf] %v529_v25  ;;  %v657_v25 = vld [vmem:[%s16796_s0 + $0x4d8] sm:$0xf] }
  0xc8   : > { %532 = vst [vmem:[%s16801_s6 + $0x170] sm:$0xf] %v531_v26  ;;  %v659_v26 = vld [vmem:[%s16796_s0 + $0x4e0] sm:$0xf] }
  0xc9   : > { %534 = vst [vmem:[%s16801_s6 + $0x174] sm:$0xf] %v533_v27  ;;  %v661_v27 = vld [vmem:[%s16796_s0 + $0x4e8] sm:$0xf] }
  0xca   : > { %536 = vst [vmem:[%s16801_s6 + $0x178] sm:$0xf] %v535_v28  ;;  %v663_v28 = vld [vmem:[%s16796_s0 + $0x4f0] sm:$0xf] }
  0xcb   : > { %538 = vst [vmem:[%s16801_s6 + $0x17c] sm:$0xf] %v537_v29  ;;  %v665_v29 = vld [vmem:[%s16796_s0 + $0x4f8] sm:$0xf] }
  0xcc   : > { %540 = vst [vmem:[%s16801_s6 + $0x180] sm:$0xf] %v539_v30  ;;  %v667_v30 = vld [vmem:[%s16796_s0 + $0x500] sm:$0xf] }
  0xcd   : > { %542 = vst [vmem:[%s16801_s6 + $0x184] sm:$0xf] %v541_v31  ;;  %v669_v31 = vld [vmem:[%s16796_s0 + $0x508] sm:$0xf] }
  0xce   : > { %544 = vst [vmem:[%s16801_s6 + $0x188] sm:$0xf] %v543_v32  ;;  %v671_v32 = vld [vmem:[%s16796_s0 + $0x510] sm:$0xf] }
  0xcf   : > { %546 = vst [vmem:[%s16801_s6 + $0x18c] sm:$0xf] %v545_v33  ;;  %v673_v33 = vld [vmem:[%s16796_s0 + $0x518] sm:$0xf] }
  0xd0   : > { %548 = vst [vmem:[%s16801_s6 + $0x190] sm:$0xf] %v547_v34  ;;  %v675_v34 = vld [vmem:[%s16796_s0 + $0x520] sm:$0xf] }
  0xd1   : > { %550 = vst [vmem:[%s16801_s6 + $0x194] sm:$0xf] %v549_v35  ;;  %v677_v35 = vld [vmem:[%s16796_s0 + $0x528] sm:$0xf] }
  0xd2   : > { %552 = vst [vmem:[%s16801_s6 + $0x198] sm:$0xf] %v551_v36  ;;  %v679_v36 = vld [vmem:[%s16796_s0 + $0x530] sm:$0xf] }
  0xd3   : > { %554 = vst [vmem:[%s16801_s6 + $0x19c] sm:$0xf] %v553_v37  ;;  %v681_v37 = vld [vmem:[%s16796_s0 + $0x538] sm:$0xf] }
  0xd4   : > { %556 = vst [vmem:[%s16801_s6 + $0x1a0] sm:$0xf] %v555_v38  ;;  %v683_v38 = vld [vmem:[%s16796_s0 + $0x540] sm:$0xf] }
  0xd5   : > { %558 = vst [vmem:[%s16801_s6 + $0x1a4] sm:$0xf] %v557_v39  ;;  %v685_v39 = vld [vmem:[%s16796_s0 + $0x548] sm:$0xf] }
  0xd6   : > { %560 = vst [vmem:[%s16801_s6 + $0x1a8] sm:$0xf] %v559_v40  ;;  %v687_v40 = vld [vmem:[%s16796_s0 + $0x550] sm:$0xf] }
  0xd7   : > { %562 = vst [vmem:[%s16801_s6 + $0x1ac] sm:$0xf] %v561_v41  ;;  %v689_v41 = vld [vmem:[%s16796_s0 + $0x558] sm:$0xf] }
  0xd8   : > { %564 = vst [vmem:[%s16801_s6 + $0x1b0] sm:$0xf] %v563_v42  ;;  %v691_v42 = vld [vmem:[%s16796_s0 + $0x560] sm:$0xf] }
  0xd9   : > { %566 = vst [vmem:[%s16801_s6 + $0x1b4] sm:$0xf] %v565_v43  ;;  %v693_v43 = vld [vmem:[%s16796_s0 + $0x568] sm:$0xf] }
  0xda   : > { %568 = vst [vmem:[%s16801_s6 + $0x1b8] sm:$0xf] %v567_v44  ;;  %v695_v44 = vld [vmem:[%s16796_s0 + $0x570] sm:$0xf] }
  0xdb   : > { %570 = vst [vmem:[%s16801_s6 + $0x1bc] sm:$0xf] %v569_v45  ;;  %v697_v45 = vld [vmem:[%s16796_s0 + $0x578] sm:$0xf] }
  0xdc   : > { %572 = vst [vmem:[%s16801_s6 + $0x1c0] sm:$0xf] %v571_v46  ;;  %v699_v46 = vld [vmem:[%s16796_s0 + $0x580] sm:$0xf] }
  0xdd   : > { %574 = vst [vmem:[%s16801_s6 + $0x1c4] sm:$0xf] %v573_v47  ;;  %v701_v47 = vld [vmem:[%s16796_s0 + $0x588] sm:$0xf] }
  0xde   : > { %576 = vst [vmem:[%s16801_s6 + $0x1c8] sm:$0xf] %v575_v48  ;;  %v703_v48 = vld [vmem:[%s16796_s0 + $0x590] sm:$0xf] }
  0xdf   : > { %578 = vst [vmem:[%s16801_s6 + $0x1cc] sm:$0xf] %v577_v49  ;;  %v705_v49 = vld [vmem:[%s16796_s0 + $0x598] sm:$0xf] }
  0xe0   : > { %580 = vst [vmem:[%s16801_s6 + $0x1d0] sm:$0xf] %v579_v50  ;;  %v707_v50 = vld [vmem:[%s16796_s0 + $0x5a0] sm:$0xf] }
  0xe1   : > { %582 = vst [vmem:[%s16801_s6 + $0x1d4] sm:$0xf] %v581_v51  ;;  %v709_v51 = vld [vmem:[%s16796_s0 + $0x5a8] sm:$0xf] }
  0xe2   : > { %584 = vst [vmem:[%s16801_s6 + $0x1d8] sm:$0xf] %v583_v52  ;;  %v711_v52 = vld [vmem:[%s16796_s0 + $0x5b0] sm:$0xf] }
  0xe3   : > { %586 = vst [vmem:[%s16801_s6 + $0x1dc] sm:$0xf] %v585_v53  ;;  %v713_v53 = vld [vmem:[%s16796_s0 + $0x5b8] sm:$0xf] }
  0xe4   : > { %588 = vst [vmem:[%s16801_s6 + $0x1e0] sm:$0xf] %v587_v54  ;;  %v715_v54 = vld [vmem:[%s16796_s0 + $0x5c0] sm:$0xf] }
  0xe5   : > { %590 = vst [vmem:[%s16801_s6 + $0x1e4] sm:$0xf] %v589_v55  ;;  %v717_v55 = vld [vmem:[%s16796_s0 + $0x5c8] sm:$0xf] }
  0xe6   : > { %592 = vst [vmem:[%s16801_s6 + $0x1e8] sm:$0xf] %v591_v56  ;;  %v719_v56 = vld [vmem:[%s16796_s0 + $0x5d0] sm:$0xf] }
  0xe7   : > { %594 = vst [vmem:[%s16801_s6 + $0x1ec] sm:$0xf] %v593_v57  ;;  %v721_v57 = vld [vmem:[%s16796_s0 + $0x5d8] sm:$0xf] }
  0xe8   : > { %596 = vst [vmem:[%s16801_s6 + $0x1f0] sm:$0xf] %v595_v58  ;;  %v723_v58 = vld [vmem:[%s16796_s0 + $0x5e0] sm:$0xf] }
  0xe9   : > { %598 = vst [vmem:[%s16801_s6 + $0x1f4] sm:$0xf] %v597_v59  ;;  %v725_v59 = vld [vmem:[%s16796_s0 + $0x5e8] sm:$0xf] }
  0xea   : > { %600 = vst [vmem:[%s16801_s6 + $0x1f8] sm:$0xf] %v599_v60  ;;  %v727_v60 = vld [vmem:[%s16796_s0 + $0x5f0] sm:$0xf] }
  0xeb   : > { %602 = vst [vmem:[%s16801_s6 + $0x1fc] sm:$0xf] %v601_v61  ;;  %v729_v61 = vld [vmem:[%s16796_s0 + $0x5f8] sm:$0xf] }
  0xec   : > { %604 = vst [vmem:[%s16801_s6 + $0x200] sm:$0xf] %v603_v62  ;;  %v731_v62 = vld [vmem:[%s16796_s0 + $0x600] sm:$0xf] }
  0xed   : > { %606 = vst [vmem:[%s16801_s6 + $0x204] sm:$0xf] %v605_v63  ;;  %v733_v63 = vld [vmem:[%s16796_s0 + $0x608] sm:$0xf] }
  0xee   : > { %608 = vst [vmem:[%s16801_s6 + $0x208] sm:$0xf] %v607_v0  ;;  %v735_v0 = vld [vmem:[%s16796_s0 + $0x610] sm:$0xf] }
  0xef   : > { %610 = vst [vmem:[%s16801_s6 + $0x20c] sm:$0xf] %v609_v1  ;;  %v737_v1 = vld [vmem:[%s16796_s0 + $0x618] sm:$0xf] }
  0xf0   : > { %612 = vst [vmem:[%s16801_s6 + $0x210] sm:$0xf] %v611_v2  ;;  %v739_v2 = vld [vmem:[%s16796_s0 + $0x620] sm:$0xf] }
  0xf1   : > { %614 = vst [vmem:[%s16801_s6 + $0x214] sm:$0xf] %v613_v3  ;;  %v741_v3 = vld [vmem:[%s16796_s0 + $0x628] sm:$0xf] }
  0xf2   : > { %616 = vst [vmem:[%s16801_s6 + $0x218] sm:$0xf] %v615_v4  ;;  %v743_v4 = vld [vmem:[%s16796_s0 + $0x630] sm:$0xf] }
  0xf3   : > { %618 = vst [vmem:[%s16801_s6 + $0x21c] sm:$0xf] %v617_v5  ;;  %v745_v5 = vld [vmem:[%s16796_s0 + $0x638] sm:$0xf] }
  0xf4   : > { %620 = vst [vmem:[%s16801_s6 + $0x220] sm:$0xf] %v619_v6  ;;  %v747_v6 = vld [vmem:[%s16796_s0 + $0x640] sm:$0xf] }
  0xf5   : > { %622 = vst [vmem:[%s16801_s6 + $0x224] sm:$0xf] %v621_v7  ;;  %v749_v7 = vld [vmem:[%s16796_s0 + $0x648] sm:$0xf] }
  0xf6   : > { %624 = vst [vmem:[%s16801_s6 + $0x228] sm:$0xf] %v623_v8  ;;  %v751_v8 = vld [vmem:[%s16796_s0 + $0x650] sm:$0xf] }
  0xf7   : > { %626 = vst [vmem:[%s16801_s6 + $0x22c] sm:$0xf] %v625_v9  ;;  %v753_v9 = vld [vmem:[%s16796_s0 + $0x658] sm:$0xf] }
  0xf8   : > { %628 = vst [vmem:[%s16801_s6 + $0x230] sm:$0xf] %v627_v10  ;;  %v755_v10 = vld [vmem:[%s16796_s0 + $0x660] sm:$0xf] }
  0xf9   : > { %630 = vst [vmem:[%s16801_s6 + $0x234] sm:$0xf] %v629_v11  ;;  %v757_v11 = vld [vmem:[%s16796_s0 + $0x668] sm:$0xf] }
  0xfa   : > { %632 = vst [vmem:[%s16801_s6 + $0x238] sm:$0xf] %v631_v12  ;;  %v759_v12 = vld [vmem:[%s16796_s0 + $0x670] sm:$0xf] }
  0xfb   : > { %634 = vst [vmem:[%s16801_s6 + $0x23c] sm:$0xf] %v633_v13  ;;  %v761_v13 = vld [vmem:[%s16796_s0 + $0x678] sm:$0xf] }
  0xfc   : > { %636 = vst [vmem:[%s16801_s6 + $0x240] sm:$0xf] %v635_v14  ;;  %v763_v14 = vld [vmem:[%s16796_s0 + $0x680] sm:$0xf] }
  0xfd   : > { %638 = vst [vmem:[%s16801_s6 + $0x244] sm:$0xf] %v637_v15  ;;  %v765_v15 = vld [vmem:[%s16796_s0 + $0x688] sm:$0xf] }
  0xfe   : > { %640 = vst [vmem:[%s16801_s6 + $0x248] sm:$0xf] %v639_v16  ;;  %v767_v16 = vld [vmem:[%s16796_s0 + $0x690] sm:$0xf] }
  0xff   : > { %642 = vst [vmem:[%s16801_s6 + $0x24c] sm:$0xf] %v641_v17  ;;  %v769_v17 = vld [vmem:[%s16796_s0 + $0x698] sm:$0xf] }
 0x100   : > { %644 = vst [vmem:[%s16801_s6 + $0x250] sm:$0xf] %v643_v18  ;;  %v771_v18 = vld [vmem:[%s16796_s0 + $0x6a0] sm:$0xf] }
 0x101   : > { %646 = vst [vmem:[%s16801_s6 + $0x254] sm:$0xf] %v645_v19  ;;  %v773_v19 = vld [vmem:[%s16796_s0 + $0x6a8] sm:$0xf] }
 0x102   : > { %648 = vst [vmem:[%s16801_s6 + $0x258] sm:$0xf] %v647_v20  ;;  %v775_v20 = vld [vmem:[%s16796_s0 + $0x6b0] sm:$0xf] }
 0x103   : > { %650 = vst [vmem:[%s16801_s6 + $0x25c] sm:$0xf] %v649_v21  ;;  %v777_v21 = vld [vmem:[%s16796_s0 + $0x6b8] sm:$0xf] }
 0x104   : > { %652 = vst [vmem:[%s16801_s6 + $0x260] sm:$0xf] %v651_v22  ;;  %v779_v22 = vld [vmem:[%s16796_s0 + $0x6c0] sm:$0xf] }
 0x105   : > { %654 = vst [vmem:[%s16801_s6 + $0x264] sm:$0xf] %v653_v23  ;;  %v781_v23 = vld [vmem:[%s16796_s0 + $0x6c8] sm:$0xf] }
 0x106   : > { %656 = vst [vmem:[%s16801_s6 + $0x268] sm:$0xf] %v655_v24  ;;  %v783_v24 = vld [vmem:[%s16796_s0 + $0x6d0] sm:$0xf] }
 0x107   : > { %658 = vst [vmem:[%s16801_s6 + $0x26c] sm:$0xf] %v657_v25  ;;  %v785_v25 = vld [vmem:[%s16796_s0 + $0x6d8] sm:$0xf] }
 0x108   : > { %660 = vst [vmem:[%s16801_s6 + $0x270] sm:$0xf] %v659_v26  ;;  %v787_v26 = vld [vmem:[%s16796_s0 + $0x6e0] sm:$0xf] }
 0x109   : > { %662 = vst [vmem:[%s16801_s6 + $0x274] sm:$0xf] %v661_v27  ;;  %v789_v27 = vld [vmem:[%s16796_s0 + $0x6e8] sm:$0xf] }
 0x10a   : > { %664 = vst [vmem:[%s16801_s6 + $0x278] sm:$0xf] %v663_v28  ;;  %v791_v28 = vld [vmem:[%s16796_s0 + $0x6f0] sm:$0xf] }
 0x10b   : > { %666 = vst [vmem:[%s16801_s6 + $0x27c] sm:$0xf] %v665_v29  ;;  %v793_v29 = vld [vmem:[%s16796_s0 + $0x6f8] sm:$0xf] }
 0x10c   : > { %668 = vst [vmem:[%s16801_s6 + $0x280] sm:$0xf] %v667_v30  ;;  %v795_v30 = vld [vmem:[%s16796_s0 + $0x700] sm:$0xf] }
 0x10d   : > { %670 = vst [vmem:[%s16801_s6 + $0x284] sm:$0xf] %v669_v31  ;;  %v797_v31 = vld [vmem:[%s16796_s0 + $0x708] sm:$0xf] }
 0x10e   : > { %672 = vst [vmem:[%s16801_s6 + $0x288] sm:$0xf] %v671_v32  ;;  %v799_v32 = vld [vmem:[%s16796_s0 + $0x710] sm:$0xf] }
 0x10f   : > { %674 = vst [vmem:[%s16801_s6 + $0x28c] sm:$0xf] %v673_v33  ;;  %v801_v33 = vld [vmem:[%s16796_s0 + $0x718] sm:$0xf] }
 0x110   : > { %676 = vst [vmem:[%s16801_s6 + $0x290] sm:$0xf] %v675_v34  ;;  %v803_v34 = vld [vmem:[%s16796_s0 + $0x720] sm:$0xf] }
 0x111   : > { %678 = vst [vmem:[%s16801_s6 + $0x294] sm:$0xf] %v677_v35  ;;  %v805_v35 = vld [vmem:[%s16796_s0 + $0x728] sm:$0xf] }
 0x112   : > { %680 = vst [vmem:[%s16801_s6 + $0x298] sm:$0xf] %v679_v36  ;;  %v807_v36 = vld [vmem:[%s16796_s0 + $0x730] sm:$0xf] }
 0x113   : > { %682 = vst [vmem:[%s16801_s6 + $0x29c] sm:$0xf] %v681_v37  ;;  %v809_v37 = vld [vmem:[%s16796_s0 + $0x738] sm:$0xf] }
 0x114   : > { %684 = vst [vmem:[%s16801_s6 + $0x2a0] sm:$0xf] %v683_v38  ;;  %v811_v38 = vld [vmem:[%s16796_s0 + $0x740] sm:$0xf] }
 0x115   : > { %686 = vst [vmem:[%s16801_s6 + $0x2a4] sm:$0xf] %v685_v39  ;;  %v813_v39 = vld [vmem:[%s16796_s0 + $0x748] sm:$0xf] }
 0x116   : > { %688 = vst [vmem:[%s16801_s6 + $0x2a8] sm:$0xf] %v687_v40  ;;  %v815_v40 = vld [vmem:[%s16796_s0 + $0x750] sm:$0xf] }
 0x117   : > { %690 = vst [vmem:[%s16801_s6 + $0x2ac] sm:$0xf] %v689_v41  ;;  %v817_v41 = vld [vmem:[%s16796_s0 + $0x758] sm:$0xf] }
 0x118   : > { %692 = vst [vmem:[%s16801_s6 + $0x2b0] sm:$0xf] %v691_v42  ;;  %v819_v42 = vld [vmem:[%s16796_s0 + $0x760] sm:$0xf] }
 0x119   : > { %694 = vst [vmem:[%s16801_s6 + $0x2b4] sm:$0xf] %v693_v43  ;;  %v821_v43 = vld [vmem:[%s16796_s0 + $0x768] sm:$0xf] }
 0x11a   : > { %696 = vst [vmem:[%s16801_s6 + $0x2b8] sm:$0xf] %v695_v44  ;;  %v823_v44 = vld [vmem:[%s16796_s0 + $0x770] sm:$0xf] }
 0x11b   : > { %698 = vst [vmem:[%s16801_s6 + $0x2bc] sm:$0xf] %v697_v45  ;;  %v825_v45 = vld [vmem:[%s16796_s0 + $0x778] sm:$0xf] }
 0x11c   : > { %700 = vst [vmem:[%s16801_s6 + $0x2c0] sm:$0xf] %v699_v46  ;;  %v827_v46 = vld [vmem:[%s16796_s0 + $0x780] sm:$0xf] }
 0x11d   : > { %702 = vst [vmem:[%s16801_s6 + $0x2c4] sm:$0xf] %v701_v47  ;;  %v829_v47 = vld [vmem:[%s16796_s0 + $0x788] sm:$0xf] }
 0x11e   : > { %704 = vst [vmem:[%s16801_s6 + $0x2c8] sm:$0xf] %v703_v48  ;;  %v831_v48 = vld [vmem:[%s16796_s0 + $0x790] sm:$0xf] }
 0x11f   : > { %706 = vst [vmem:[%s16801_s6 + $0x2cc] sm:$0xf] %v705_v49  ;;  %v833_v49 = vld [vmem:[%s16796_s0 + $0x798] sm:$0xf] }
 0x120   : > { %708 = vst [vmem:[%s16801_s6 + $0x2d0] sm:$0xf] %v707_v50  ;;  %v835_v50 = vld [vmem:[%s16796_s0 + $0x7a0] sm:$0xf] }
 0x121   : > { %710 = vst [vmem:[%s16801_s6 + $0x2d4] sm:$0xf] %v709_v51  ;;  %v837_v51 = vld [vmem:[%s16796_s0 + $0x7a8] sm:$0xf] }
 0x122   : > { %712 = vst [vmem:[%s16801_s6 + $0x2d8] sm:$0xf] %v711_v52  ;;  %v839_v52 = vld [vmem:[%s16796_s0 + $0x7b0] sm:$0xf] }
 0x123   : > { %714 = vst [vmem:[%s16801_s6 + $0x2dc] sm:$0xf] %v713_v53  ;;  %v841_v53 = vld [vmem:[%s16796_s0 + $0x7b8] sm:$0xf] }
 0x124   : > { %716 = vst [vmem:[%s16801_s6 + $0x2e0] sm:$0xf] %v715_v54  ;;  %v843_v54 = vld [vmem:[%s16796_s0 + $0x7c0] sm:$0xf] }
 0x125   : > { %718 = vst [vmem:[%s16801_s6 + $0x2e4] sm:$0xf] %v717_v55  ;;  %v845_v55 = vld [vmem:[%s16796_s0 + $0x7c8] sm:$0xf] }
 0x126   : > { %720 = vst [vmem:[%s16801_s6 + $0x2e8] sm:$0xf] %v719_v56  ;;  %v847_v56 = vld [vmem:[%s16796_s0 + $0x7d0] sm:$0xf] }
 0x127   : > { %722 = vst [vmem:[%s16801_s6 + $0x2ec] sm:$0xf] %v721_v57  ;;  %v849_v57 = vld [vmem:[%s16796_s0 + $0x7d8] sm:$0xf] }
 0x128   : > { %724 = vst [vmem:[%s16801_s6 + $0x2f0] sm:$0xf] %v723_v58  ;;  %v851_v58 = vld [vmem:[%s16796_s0 + $0x7e0] sm:$0xf] }
 0x129   : > { %726 = vst [vmem:[%s16801_s6 + $0x2f4] sm:$0xf] %v725_v59  ;;  %v853_v59 = vld [vmem:[%s16796_s0 + $0x7e8] sm:$0xf] }
 0x12a   : > { %728 = vst [vmem:[%s16801_s6 + $0x2f8] sm:$0xf] %v727_v60  ;;  %v855_v60 = vld [vmem:[%s16796_s0 + $0x7f0] sm:$0xf] }
 0x12b   : > { %730 = vst [vmem:[%s16801_s6 + $0x2fc] sm:$0xf] %v729_v61  ;;  %v857_v61 = vld [vmem:[%s16796_s0 + $0x7f8] sm:$0xf] }
 0x12c   : > { %732 = vst [vmem:[%s16801_s6 + $0x300] sm:$0xf] %v731_v62  ;;  %v859_v62 = vld [vmem:[%s16796_s0 + $0x800] sm:$0xf] }
 0x12d   : > { %734 = vst [vmem:[%s16801_s6 + $0x304] sm:$0xf] %v733_v63  ;;  %v861_v63 = vld [vmem:[%s16796_s0 + $0x808] sm:$0xf] }
 0x12e   : > { %736 = vst [vmem:[%s16801_s6 + $0x308] sm:$0xf] %v735_v0  ;;  %v863_v0 = vld [vmem:[%s16796_s0 + $0x810] sm:$0xf] }
 0x12f   : > { %738 = vst [vmem:[%s16801_s6 + $0x30c] sm:$0xf] %v737_v1  ;;  %v865_v1 = vld [vmem:[%s16796_s0 + $0x818] sm:$0xf] }
 0x130   : > { %740 = vst [vmem:[%s16801_s6 + $0x310] sm:$0xf] %v739_v2  ;;  %v867_v2 = vld [vmem:[%s16796_s0 + $0x820] sm:$0xf] }
 0x131   : > { %742 = vst [vmem:[%s16801_s6 + $0x314] sm:$0xf] %v741_v3  ;;  %v869_v3 = vld [vmem:[%s16796_s0 + $0x828] sm:$0xf] }
 0x132   : > { %744 = vst [vmem:[%s16801_s6 + $0x318] sm:$0xf] %v743_v4  ;;  %v871_v4 = vld [vmem:[%s16796_s0 + $0x830] sm:$0xf] }
 0x133   : > { %746 = vst [vmem:[%s16801_s6 + $0x31c] sm:$0xf] %v745_v5  ;;  %v873_v5 = vld [vmem:[%s16796_s0 + $0x838] sm:$0xf] }
 0x134   : > { %748 = vst [vmem:[%s16801_s6 + $0x320] sm:$0xf] %v747_v6  ;;  %v875_v6 = vld [vmem:[%s16796_s0 + $0x840] sm:$0xf] }
 0x135   : > { %750 = vst [vmem:[%s16801_s6 + $0x324] sm:$0xf] %v749_v7  ;;  %v877_v7 = vld [vmem:[%s16796_s0 + $0x848] sm:$0xf] }
 0x136   : > { %752 = vst [vmem:[%s16801_s6 + $0x328] sm:$0xf] %v751_v8  ;;  %v879_v8 = vld [vmem:[%s16796_s0 + $0x850] sm:$0xf] }
 0x137   : > { %754 = vst [vmem:[%s16801_s6 + $0x32c] sm:$0xf] %v753_v9  ;;  %v881_v9 = vld [vmem:[%s16796_s0 + $0x858] sm:$0xf] }
 0x138   : > { %756 = vst [vmem:[%s16801_s6 + $0x330] sm:$0xf] %v755_v10  ;;  %v883_v10 = vld [vmem:[%s16796_s0 + $0x860] sm:$0xf] }
 0x139   : > { %758 = vst [vmem:[%s16801_s6 + $0x334] sm:$0xf] %v757_v11  ;;  %v885_v11 = vld [vmem:[%s16796_s0 + $0x868] sm:$0xf] }
 0x13a   : > { %760 = vst [vmem:[%s16801_s6 + $0x338] sm:$0xf] %v759_v12  ;;  %v887_v12 = vld [vmem:[%s16796_s0 + $0x870] sm:$0xf] }
 0x13b   : > { %762 = vst [vmem:[%s16801_s6 + $0x33c] sm:$0xf] %v761_v13  ;;  %v889_v13 = vld [vmem:[%s16796_s0 + $0x878] sm:$0xf] }
 0x13c   : > { %764 = vst [vmem:[%s16801_s6 + $0x340] sm:$0xf] %v763_v14  ;;  %v891_v14 = vld [vmem:[%s16796_s0 + $0x880] sm:$0xf] }
 0x13d   : > { %766 = vst [vmem:[%s16801_s6 + $0x344] sm:$0xf] %v765_v15  ;;  %v893_v15 = vld [vmem:[%s16796_s0 + $0x888] sm:$0xf] }
 0x13e   : > { %768 = vst [vmem:[%s16801_s6 + $0x348] sm:$0xf] %v767_v16  ;;  %v895_v16 = vld [vmem:[%s16796_s0 + $0x890] sm:$0xf] }
 0x13f   : > { %770 = vst [vmem:[%s16801_s6 + $0x34c] sm:$0xf] %v769_v17  ;;  %v897_v17 = vld [vmem:[%s16796_s0 + $0x898] sm:$0xf] }
 0x140   : > { %772 = vst [vmem:[%s16801_s6 + $0x350] sm:$0xf] %v771_v18  ;;  %v899_v18 = vld [vmem:[%s16796_s0 + $0x8a0] sm:$0xf] }
 0x141   : > { %774 = vst [vmem:[%s16801_s6 + $0x354] sm:$0xf] %v773_v19  ;;  %v901_v19 = vld [vmem:[%s16796_s0 + $0x8a8] sm:$0xf] }
 0x142   : > { %776 = vst [vmem:[%s16801_s6 + $0x358] sm:$0xf] %v775_v20  ;;  %v903_v20 = vld [vmem:[%s16796_s0 + $0x8b0] sm:$0xf] }
 0x143   : > { %778 = vst [vmem:[%s16801_s6 + $0x35c] sm:$0xf] %v777_v21  ;;  %v905_v21 = vld [vmem:[%s16796_s0 + $0x8b8] sm:$0xf] }
 0x144   : > { %780 = vst [vmem:[%s16801_s6 + $0x360] sm:$0xf] %v779_v22  ;;  %v907_v22 = vld [vmem:[%s16796_s0 + $0x8c0] sm:$0xf] }
 0x145   : > { %782 = vst [vmem:[%s16801_s6 + $0x364] sm:$0xf] %v781_v23  ;;  %v909_v23 = vld [vmem:[%s16796_s0 + $0x8c8] sm:$0xf] }
 0x146   : > { %784 = vst [vmem:[%s16801_s6 + $0x368] sm:$0xf] %v783_v24  ;;  %v911_v24 = vld [vmem:[%s16796_s0 + $0x8d0] sm:$0xf] }
 0x147   : > { %786 = vst [vmem:[%s16801_s6 + $0x36c] sm:$0xf] %v785_v25  ;;  %v913_v25 = vld [vmem:[%s16796_s0 + $0x8d8] sm:$0xf] }
 0x148   : > { %788 = vst [vmem:[%s16801_s6 + $0x370] sm:$0xf] %v787_v26  ;;  %v915_v26 = vld [vmem:[%s16796_s0 + $0x8e0] sm:$0xf] }
 0x149   : > { %790 = vst [vmem:[%s16801_s6 + $0x374] sm:$0xf] %v789_v27  ;;  %v917_v27 = vld [vmem:[%s16796_s0 + $0x8e8] sm:$0xf] }
 0x14a   : > { %792 = vst [vmem:[%s16801_s6 + $0x378] sm:$0xf] %v791_v28  ;;  %v919_v28 = vld [vmem:[%s16796_s0 + $0x8f0] sm:$0xf] }
 0x14b   : > { %794 = vst [vmem:[%s16801_s6 + $0x37c] sm:$0xf] %v793_v29  ;;  %v921_v29 = vld [vmem:[%s16796_s0 + $0x8f8] sm:$0xf] }
 0x14c   : > { %796 = vst [vmem:[%s16801_s6 + $0x380] sm:$0xf] %v795_v30  ;;  %v923_v30 = vld [vmem:[%s16796_s0 + $0x900] sm:$0xf] }
 0x14d   : > { %798 = vst [vmem:[%s16801_s6 + $0x384] sm:$0xf] %v797_v31  ;;  %v925_v31 = vld [vmem:[%s16796_s0 + $0x908] sm:$0xf] }
 0x14e   : > { %800 = vst [vmem:[%s16801_s6 + $0x388] sm:$0xf] %v799_v32  ;;  %v927_v32 = vld [vmem:[%s16796_s0 + $0x910] sm:$0xf] }
 0x14f   : > { %802 = vst [vmem:[%s16801_s6 + $0x38c] sm:$0xf] %v801_v33  ;;  %v929_v33 = vld [vmem:[%s16796_s0 + $0x918] sm:$0xf] }
 0x150   : > { %804 = vst [vmem:[%s16801_s6 + $0x390] sm:$0xf] %v803_v34  ;;  %v931_v34 = vld [vmem:[%s16796_s0 + $0x920] sm:$0xf] }
 0x151   : > { %806 = vst [vmem:[%s16801_s6 + $0x394] sm:$0xf] %v805_v35  ;;  %v933_v35 = vld [vmem:[%s16796_s0 + $0x928] sm:$0xf] }
 0x152   : > { %808 = vst [vmem:[%s16801_s6 + $0x398] sm:$0xf] %v807_v36  ;;  %v935_v36 = vld [vmem:[%s16796_s0 + $0x930] sm:$0xf] }
 0x153   : > { %810 = vst [vmem:[%s16801_s6 + $0x39c] sm:$0xf] %v809_v37  ;;  %v937_v37 = vld [vmem:[%s16796_s0 + $0x938] sm:$0xf] }
 0x154   : > { %812 = vst [vmem:[%s16801_s6 + $0x3a0] sm:$0xf] %v811_v38  ;;  %v939_v38 = vld [vmem:[%s16796_s0 + $0x940] sm:$0xf] }
 0x155   : > { %814 = vst [vmem:[%s16801_s6 + $0x3a4] sm:$0xf] %v813_v39  ;;  %v941_v39 = vld [vmem:[%s16796_s0 + $0x948] sm:$0xf] }
 0x156   : > { %816 = vst [vmem:[%s16801_s6 + $0x3a8] sm:$0xf] %v815_v40  ;;  %v943_v40 = vld [vmem:[%s16796_s0 + $0x950] sm:$0xf] }
 0x157   : > { %818 = vst [vmem:[%s16801_s6 + $0x3ac] sm:$0xf] %v817_v41  ;;  %v945_v41 = vld [vmem:[%s16796_s0 + $0x958] sm:$0xf] }
 0x158   : > { %820 = vst [vmem:[%s16801_s6 + $0x3b0] sm:$0xf] %v819_v42  ;;  %v947_v42 = vld [vmem:[%s16796_s0 + $0x960] sm:$0xf] }
 0x159   : > { %822 = vst [vmem:[%s16801_s6 + $0x3b4] sm:$0xf] %v821_v43  ;;  %v949_v43 = vld [vmem:[%s16796_s0 + $0x968] sm:$0xf] }
 0x15a   : > { %824 = vst [vmem:[%s16801_s6 + $0x3b8] sm:$0xf] %v823_v44  ;;  %v951_v44 = vld [vmem:[%s16796_s0 + $0x970] sm:$0xf] }
 0x15b   : > { %826 = vst [vmem:[%s16801_s6 + $0x3bc] sm:$0xf] %v825_v45  ;;  %v953_v45 = vld [vmem:[%s16796_s0 + $0x978] sm:$0xf] }
 0x15c   : > { %828 = vst [vmem:[%s16801_s6 + $0x3c0] sm:$0xf] %v827_v46  ;;  %v955_v46 = vld [vmem:[%s16796_s0 + $0x980] sm:$0xf] }
 0x15d   : > { %830 = vst [vmem:[%s16801_s6 + $0x3c4] sm:$0xf] %v829_v47  ;;  %v957_v47 = vld [vmem:[%s16796_s0 + $0x988] sm:$0xf] }
 0x15e   : > { %832 = vst [vmem:[%s16801_s6 + $0x3c8] sm:$0xf] %v831_v48  ;;  %v959_v48 = vld [vmem:[%s16796_s0 + $0x990] sm:$0xf] }
 0x15f   : > { %834 = vst [vmem:[%s16801_s6 + $0x3cc] sm:$0xf] %v833_v49  ;;  %v961_v49 = vld [vmem:[%s16796_s0 + $0x998] sm:$0xf] }
 0x160   : > { %836 = vst [vmem:[%s16801_s6 + $0x3d0] sm:$0xf] %v835_v50  ;;  %v963_v50 = vld [vmem:[%s16796_s0 + $0x9a0] sm:$0xf] }
 0x161   : > { %838 = vst [vmem:[%s16801_s6 + $0x3d4] sm:$0xf] %v837_v51  ;;  %v965_v51 = vld [vmem:[%s16796_s0 + $0x9a8] sm:$0xf] }
 0x162   : > { %840 = vst [vmem:[%s16801_s6 + $0x3d8] sm:$0xf] %v839_v52  ;;  %v967_v52 = vld [vmem:[%s16796_s0 + $0x9b0] sm:$0xf] }
 0x163   : > { %842 = vst [vmem:[%s16801_s6 + $0x3dc] sm:$0xf] %v841_v53  ;;  %v969_v53 = vld [vmem:[%s16796_s0 + $0x9b8] sm:$0xf] }
 0x164   : > { %844 = vst [vmem:[%s16801_s6 + $0x3e0] sm:$0xf] %v843_v54  ;;  %v971_v54 = vld [vmem:[%s16796_s0 + $0x9c0] sm:$0xf] }
 0x165   : > { %846 = vst [vmem:[%s16801_s6 + $0x3e4] sm:$0xf] %v845_v55  ;;  %v973_v55 = vld [vmem:[%s16796_s0 + $0x9c8] sm:$0xf] }
 0x166   : > { %848 = vst [vmem:[%s16801_s6 + $0x3e8] sm:$0xf] %v847_v56  ;;  %v975_v56 = vld [vmem:[%s16796_s0 + $0x9d0] sm:$0xf] }
 0x167   : > { %850 = vst [vmem:[%s16801_s6 + $0x3ec] sm:$0xf] %v849_v57  ;;  %v977_v57 = vld [vmem:[%s16796_s0 + $0x9d8] sm:$0xf] }
 0x168   : > { %852 = vst [vmem:[%s16801_s6 + $0x3f0] sm:$0xf] %v851_v58  ;;  %v979_v58 = vld [vmem:[%s16796_s0 + $0x9e0] sm:$0xf] }
 0x169   : > { %854 = vst [vmem:[%s16801_s6 + $0x3f4] sm:$0xf] %v853_v59  ;;  %v981_v59 = vld [vmem:[%s16796_s0 + $0x9e8] sm:$0xf] }
 0x16a   : > { %856 = vst [vmem:[%s16801_s6 + $0x3f8] sm:$0xf] %v855_v60  ;;  %v983_v60 = vld [vmem:[%s16796_s0 + $0x9f0] sm:$0xf] }
 0x16b   : > { %858 = vst [vmem:[%s16801_s6 + $0x3fc] sm:$0xf] %v857_v61  ;;  %v985_v61 = vld [vmem:[%s16796_s0 + $0x9f8] sm:$0xf] }
 0x16c   : > { %860 = vst [vmem:[%s16801_s6 + $0x400] sm:$0xf] %v859_v62  ;;  %v987_v62 = vld [vmem:[%s16796_s0 + $0xa00] sm:$0xf] }
 0x16d   : > { %862 = vst [vmem:[%s16801_s6 + $0x404] sm:$0xf] %v861_v63  ;;  %v989_v63 = vld [vmem:[%s16796_s0 + $0xa08] sm:$0xf] }
 0x16e   : > { %864 = vst [vmem:[%s16801_s6 + $0x408] sm:$0xf] %v863_v0  ;;  %v991_v0 = vld [vmem:[%s16796_s0 + $0xa10] sm:$0xf] }
 0x16f   : > { %866 = vst [vmem:[%s16801_s6 + $0x40c] sm:$0xf] %v865_v1  ;;  %v993_v1 = vld [vmem:[%s16796_s0 + $0xa18] sm:$0xf] }
 0x170   : > { %868 = vst [vmem:[%s16801_s6 + $0x410] sm:$0xf] %v867_v2  ;;  %v995_v2 = vld [vmem:[%s16796_s0 + $0xa20] sm:$0xf] }
 0x171   : > { %870 = vst [vmem:[%s16801_s6 + $0x414] sm:$0xf] %v869_v3  ;;  %v997_v3 = vld [vmem:[%s16796_s0 + $0xa28] sm:$0xf] }
 0x172   : > { %872 = vst [vmem:[%s16801_s6 + $0x418] sm:$0xf] %v871_v4  ;;  %v999_v4 = vld [vmem:[%s16796_s0 + $0xa30] sm:$0xf] }
 0x173   : > { %874 = vst [vmem:[%s16801_s6 + $0x41c] sm:$0xf] %v873_v5  ;;  %v1001_v5 = vld [vmem:[%s16796_s0 + $0xa38] sm:$0xf] }
 0x174   : > { %876 = vst [vmem:[%s16801_s6 + $0x420] sm:$0xf] %v875_v6  ;;  %v1003_v6 = vld [vmem:[%s16796_s0 + $0xa40] sm:$0xf] }
 0x175   : > { %878 = vst [vmem:[%s16801_s6 + $0x424] sm:$0xf] %v877_v7  ;;  %v1005_v7 = vld [vmem:[%s16796_s0 + $0xa48] sm:$0xf] }
 0x176   : > { %880 = vst [vmem:[%s16801_s6 + $0x428] sm:$0xf] %v879_v8  ;;  %v1007_v8 = vld [vmem:[%s16796_s0 + $0xa50] sm:$0xf] }
 0x177   : > { %882 = vst [vmem:[%s16801_s6 + $0x42c] sm:$0xf] %v881_v9  ;;  %v1009_v9 = vld [vmem:[%s16796_s0 + $0xa58] sm:$0xf] }
 0x178   : > { %884 = vst [vmem:[%s16801_s6 + $0x430] sm:$0xf] %v883_v10  ;;  %v1011_v10 = vld [vmem:[%s16796_s0 + $0xa60] sm:$0xf] }
 0x179   : > { %886 = vst [vmem:[%s16801_s6 + $0x434] sm:$0xf] %v885_v11  ;;  %v1013_v11 = vld [vmem:[%s16796_s0 + $0xa68] sm:$0xf] }
 0x17a   : > { %888 = vst [vmem:[%s16801_s6 + $0x438] sm:$0xf] %v887_v12  ;;  %v1015_v12 = vld [vmem:[%s16796_s0 + $0xa70] sm:$0xf] }
 0x17b   : > { %890 = vst [vmem:[%s16801_s6 + $0x43c] sm:$0xf] %v889_v13  ;;  %v1017_v13 = vld [vmem:[%s16796_s0 + $0xa78] sm:$0xf] }
 0x17c   : > { %892 = vst [vmem:[%s16801_s6 + $0x440] sm:$0xf] %v891_v14  ;;  %v1019_v14 = vld [vmem:[%s16796_s0 + $0xa80] sm:$0xf] }
 0x17d   : > { %894 = vst [vmem:[%s16801_s6 + $0x444] sm:$0xf] %v893_v15  ;;  %v1021_v15 = vld [vmem:[%s16796_s0 + $0xa88] sm:$0xf] }
 0x17e   : > { %896 = vst [vmem:[%s16801_s6 + $0x448] sm:$0xf] %v895_v16  ;;  %v1023_v16 = vld [vmem:[%s16796_s0 + $0xa90] sm:$0xf] }
 0x17f   : > { %898 = vst [vmem:[%s16801_s6 + $0x44c] sm:$0xf] %v897_v17  ;;  %v1025_v17 = vld [vmem:[%s16796_s0 + $0xa98] sm:$0xf] }
 0x180   : > { %900 = vst [vmem:[%s16801_s6 + $0x450] sm:$0xf] %v899_v18  ;;  %v1027_v18 = vld [vmem:[%s16796_s0 + $0xaa0] sm:$0xf] }
 0x181   : > { %902 = vst [vmem:[%s16801_s6 + $0x454] sm:$0xf] %v901_v19  ;;  %v1029_v19 = vld [vmem:[%s16796_s0 + $0xaa8] sm:$0xf] }
 0x182   : > { %904 = vst [vmem:[%s16801_s6 + $0x458] sm:$0xf] %v903_v20  ;;  %v1031_v20 = vld [vmem:[%s16796_s0 + $0xab0] sm:$0xf] }
 0x183   : > { %906 = vst [vmem:[%s16801_s6 + $0x45c] sm:$0xf] %v905_v21  ;;  %v1033_v21 = vld [vmem:[%s16796_s0 + $0xab8] sm:$0xf] }
 0x184   : > { %908 = vst [vmem:[%s16801_s6 + $0x460] sm:$0xf] %v907_v22  ;;  %v1035_v22 = vld [vmem:[%s16796_s0 + $0xac0] sm:$0xf] }
 0x185   : > { %910 = vst [vmem:[%s16801_s6 + $0x464] sm:$0xf] %v909_v23  ;;  %v1037_v23 = vld [vmem:[%s16796_s0 + $0xac8] sm:$0xf] }
 0x186   : > { %912 = vst [vmem:[%s16801_s6 + $0x468] sm:$0xf] %v911_v24  ;;  %v1039_v24 = vld [vmem:[%s16796_s0 + $0xad0] sm:$0xf] }
 0x187   : > { %914 = vst [vmem:[%s16801_s6 + $0x46c] sm:$0xf] %v913_v25  ;;  %v1041_v25 = vld [vmem:[%s16796_s0 + $0xad8] sm:$0xf] }
 0x188   : > { %916 = vst [vmem:[%s16801_s6 + $0x470] sm:$0xf] %v915_v26  ;;  %v1043_v26 = vld [vmem:[%s16796_s0 + $0xae0] sm:$0xf] }
 0x189   : > { %918 = vst [vmem:[%s16801_s6 + $0x474] sm:$0xf] %v917_v27  ;;  %v1045_v27 = vld [vmem:[%s16796_s0 + $0xae8] sm:$0xf] }
 0x18a   : > { %920 = vst [vmem:[%s16801_s6 + $0x478] sm:$0xf] %v919_v28  ;;  %v1047_v28 = vld [vmem:[%s16796_s0 + $0xaf0] sm:$0xf] }
 0x18b   : > { %922 = vst [vmem:[%s16801_s6 + $0x47c] sm:$0xf] %v921_v29  ;;  %v1049_v29 = vld [vmem:[%s16796_s0 + $0xaf8] sm:$0xf] }
 0x18c   : > { %924 = vst [vmem:[%s16801_s6 + $0x480] sm:$0xf] %v923_v30  ;;  %v1051_v30 = vld [vmem:[%s16796_s0 + $0xb00] sm:$0xf] }
 0x18d   : > { %926 = vst [vmem:[%s16801_s6 + $0x484] sm:$0xf] %v925_v31  ;;  %v1053_v31 = vld [vmem:[%s16796_s0 + $0xb08] sm:$0xf] }
 0x18e   : > { %928 = vst [vmem:[%s16801_s6 + $0x488] sm:$0xf] %v927_v32  ;;  %v1055_v32 = vld [vmem:[%s16796_s0 + $0xb10] sm:$0xf] }
 0x18f   : > { %930 = vst [vmem:[%s16801_s6 + $0x48c] sm:$0xf] %v929_v33  ;;  %v1057_v33 = vld [vmem:[%s16796_s0 + $0xb18] sm:$0xf] }
 0x190   : > { %932 = vst [vmem:[%s16801_s6 + $0x490] sm:$0xf] %v931_v34  ;;  %v1059_v34 = vld [vmem:[%s16796_s0 + $0xb20] sm:$0xf] }
 0x191   : > { %934 = vst [vmem:[%s16801_s6 + $0x494] sm:$0xf] %v933_v35  ;;  %v1061_v35 = vld [vmem:[%s16796_s0 + $0xb28] sm:$0xf] }
 0x192   : > { %936 = vst [vmem:[%s16801_s6 + $0x498] sm:$0xf] %v935_v36  ;;  %v1063_v36 = vld [vmem:[%s16796_s0 + $0xb30] sm:$0xf] }
 0x193   : > { %938 = vst [vmem:[%s16801_s6 + $0x49c] sm:$0xf] %v937_v37  ;;  %v1065_v37 = vld [vmem:[%s16796_s0 + $0xb38] sm:$0xf] }
 0x194   : > { %940 = vst [vmem:[%s16801_s6 + $0x4a0] sm:$0xf] %v939_v38  ;;  %v1067_v38 = vld [vmem:[%s16796_s0 + $0xb40] sm:$0xf] }
 0x195   : > { %942 = vst [vmem:[%s16801_s6 + $0x4a4] sm:$0xf] %v941_v39  ;;  %v1069_v39 = vld [vmem:[%s16796_s0 + $0xb48] sm:$0xf] }
 0x196   : > { %944 = vst [vmem:[%s16801_s6 + $0x4a8] sm:$0xf] %v943_v40  ;;  %v1071_v40 = vld [vmem:[%s16796_s0 + $0xb50] sm:$0xf] }
 0x197   : > { %946 = vst [vmem:[%s16801_s6 + $0x4ac] sm:$0xf] %v945_v41  ;;  %v1073_v41 = vld [vmem:[%s16796_s0 + $0xb58] sm:$0xf] }
 0x198   : > { %948 = vst [vmem:[%s16801_s6 + $0x4b0] sm:$0xf] %v947_v42  ;;  %v1075_v42 = vld [vmem:[%s16796_s0 + $0xb60] sm:$0xf] }
 0x199   : > { %950 = vst [vmem:[%s16801_s6 + $0x4b4] sm:$0xf] %v949_v43  ;;  %v1077_v43 = vld [vmem:[%s16796_s0 + $0xb68] sm:$0xf] }
 0x19a   : > { %952 = vst [vmem:[%s16801_s6 + $0x4b8] sm:$0xf] %v951_v44  ;;  %v1079_v44 = vld [vmem:[%s16796_s0 + $0xb70] sm:$0xf] }
 0x19b   : > { %954 = vst [vmem:[%s16801_s6 + $0x4bc] sm:$0xf] %v953_v45  ;;  %v1081_v45 = vld [vmem:[%s16796_s0 + $0xb78] sm:$0xf] }
 0x19c   : > { %956 = vst [vmem:[%s16801_s6 + $0x4c0] sm:$0xf] %v955_v46  ;;  %v1083_v46 = vld [vmem:[%s16796_s0 + $0xb80] sm:$0xf] }
 0x19d   : > { %958 = vst [vmem:[%s16801_s6 + $0x4c4] sm:$0xf] %v957_v47  ;;  %v1085_v47 = vld [vmem:[%s16796_s0 + $0xb88] sm:$0xf] }
 0x19e   : > { %960 = vst [vmem:[%s16801_s6 + $0x4c8] sm:$0xf] %v959_v48  ;;  %v1087_v48 = vld [vmem:[%s16796_s0 + $0xb90] sm:$0xf] }
 0x19f   : > { %962 = vst [vmem:[%s16801_s6 + $0x4cc] sm:$0xf] %v961_v49  ;;  %v1089_v49 = vld [vmem:[%s16796_s0 + $0xb98] sm:$0xf] }
 0x1a0   : > { %964 = vst [vmem:[%s16801_s6 + $0x4d0] sm:$0xf] %v963_v50  ;;  %v1091_v50 = vld [vmem:[%s16796_s0 + $0xba0] sm:$0xf] }
 0x1a1   : > { %966 = vst [vmem:[%s16801_s6 + $0x4d4] sm:$0xf] %v965_v51  ;;  %v1093_v51 = vld [vmem:[%s16796_s0 + $0xba8] sm:$0xf] }
 0x1a2   : > { %968 = vst [vmem:[%s16801_s6 + $0x4d8] sm:$0xf] %v967_v52  ;;  %v1095_v52 = vld [vmem:[%s16796_s0 + $0xbb0] sm:$0xf] }
 0x1a3   : > { %970 = vst [vmem:[%s16801_s6 + $0x4dc] sm:$0xf] %v969_v53  ;;  %v1097_v53 = vld [vmem:[%s16796_s0 + $0xbb8] sm:$0xf] }
 0x1a4   : > { %972 = vst [vmem:[%s16801_s6 + $0x4e0] sm:$0xf] %v971_v54  ;;  %v1099_v54 = vld [vmem:[%s16796_s0 + $0xbc0] sm:$0xf] }
 0x1a5   : > { %974 = vst [vmem:[%s16801_s6 + $0x4e4] sm:$0xf] %v973_v55  ;;  %v1101_v55 = vld [vmem:[%s16796_s0 + $0xbc8] sm:$0xf] }
 0x1a6   : > { %976 = vst [vmem:[%s16801_s6 + $0x4e8] sm:$0xf] %v975_v56  ;;  %v1103_v56 = vld [vmem:[%s16796_s0 + $0xbd0] sm:$0xf] }
 0x1a7   : > { %978 = vst [vmem:[%s16801_s6 + $0x4ec] sm:$0xf] %v977_v57  ;;  %v1105_v57 = vld [vmem:[%s16796_s0 + $0xbd8] sm:$0xf] }
 0x1a8   : > { %980 = vst [vmem:[%s16801_s6 + $0x4f0] sm:$0xf] %v979_v58  ;;  %v1107_v58 = vld [vmem:[%s16796_s0 + $0xbe0] sm:$0xf] }
 0x1a9   : > { %982 = vst [vmem:[%s16801_s6 + $0x4f4] sm:$0xf] %v981_v59  ;;  %v1109_v59 = vld [vmem:[%s16796_s0 + $0xbe8] sm:$0xf] }
 0x1aa   : > { %984 = vst [vmem:[%s16801_s6 + $0x4f8] sm:$0xf] %v983_v60  ;;  %v1111_v60 = vld [vmem:[%s16796_s0 + $0xbf0] sm:$0xf] }
 0x1ab   : > { %986 = vst [vmem:[%s16801_s6 + $0x4fc] sm:$0xf] %v985_v61  ;;  %v1113_v61 = vld [vmem:[%s16796_s0 + $0xbf8] sm:$0xf] }
 0x1ac   : > { %988 = vst [vmem:[%s16801_s6 + $0x500] sm:$0xf] %v987_v62  ;;  %v1115_v62 = vld [vmem:[%s16796_s0 + $0xc00] sm:$0xf] }
 0x1ad   : > { %990 = vst [vmem:[%s16801_s6 + $0x504] sm:$0xf] %v989_v63  ;;  %v1117_v63 = vld [vmem:[%s16796_s0 + $0xc08] sm:$0xf] }
 0x1ae   : > { %992 = vst [vmem:[%s16801_s6 + $0x508] sm:$0xf] %v991_v0  ;;  %v1119_v0 = vld [vmem:[%s16796_s0 + $0xc10] sm:$0xf] }
 0x1af   : > { %994 = vst [vmem:[%s16801_s6 + $0x50c] sm:$0xf] %v993_v1  ;;  %v1121_v1 = vld [vmem:[%s16796_s0 + $0xc18] sm:$0xf] }
 0x1b0   : > { %996 = vst [vmem:[%s16801_s6 + $0x510] sm:$0xf] %v995_v2  ;;  %v1123_v2 = vld [vmem:[%s16796_s0 + $0xc20] sm:$0xf] }
 0x1b1   : > { %998 = vst [vmem:[%s16801_s6 + $0x514] sm:$0xf] %v997_v3  ;;  %v1125_v3 = vld [vmem:[%s16796_s0 + $0xc28] sm:$0xf] }
 0x1b2   : > { %1000 = vst [vmem:[%s16801_s6 + $0x518] sm:$0xf] %v999_v4  ;;  %v1127_v4 = vld [vmem:[%s16796_s0 + $0xc30] sm:$0xf] }
 0x1b3   : > { %1002 = vst [vmem:[%s16801_s6 + $0x51c] sm:$0xf] %v1001_v5  ;;  %v1129_v5 = vld [vmem:[%s16796_s0 + $0xc38] sm:$0xf] }
 0x1b4   : > { %1004 = vst [vmem:[%s16801_s6 + $0x520] sm:$0xf] %v1003_v6  ;;  %v1131_v6 = vld [vmem:[%s16796_s0 + $0xc40] sm:$0xf] }
 0x1b5   : > { %1006 = vst [vmem:[%s16801_s6 + $0x524] sm:$0xf] %v1005_v7  ;;  %v1133_v7 = vld [vmem:[%s16796_s0 + $0xc48] sm:$0xf] }
 0x1b6   : > { %1008 = vst [vmem:[%s16801_s6 + $0x528] sm:$0xf] %v1007_v8  ;;  %v1135_v8 = vld [vmem:[%s16796_s0 + $0xc50] sm:$0xf] }
 0x1b7   : > { %1010 = vst [vmem:[%s16801_s6 + $0x52c] sm:$0xf] %v1009_v9  ;;  %v1137_v9 = vld [vmem:[%s16796_s0 + $0xc58] sm:$0xf] }
 0x1b8   : > { %1012 = vst [vmem:[%s16801_s6 + $0x530] sm:$0xf] %v1011_v10  ;;  %v1139_v10 = vld [vmem:[%s16796_s0 + $0xc60] sm:$0xf] }
 0x1b9   : > { %1014 = vst [vmem:[%s16801_s6 + $0x534] sm:$0xf] %v1013_v11  ;;  %v1141_v11 = vld [vmem:[%s16796_s0 + $0xc68] sm:$0xf] }
 0x1ba   : > { %1016 = vst [vmem:[%s16801_s6 + $0x538] sm:$0xf] %v1015_v12  ;;  %v1143_v12 = vld [vmem:[%s16796_s0 + $0xc70] sm:$0xf] }
 0x1bb   : > { %1018 = vst [vmem:[%s16801_s6 + $0x53c] sm:$0xf] %v1017_v13  ;;  %v1145_v13 = vld [vmem:[%s16796_s0 + $0xc78] sm:$0xf] }
 0x1bc   : > { %1020 = vst [vmem:[%s16801_s6 + $0x540] sm:$0xf] %v1019_v14  ;;  %v1147_v14 = vld [vmem:[%s16796_s0 + $0xc80] sm:$0xf] }
 0x1bd   : > { %1022 = vst [vmem:[%s16801_s6 + $0x544] sm:$0xf] %v1021_v15  ;;  %v1149_v15 = vld [vmem:[%s16796_s0 + $0xc88] sm:$0xf] }
 0x1be   : > { %1024 = vst [vmem:[%s16801_s6 + $0x548] sm:$0xf] %v1023_v16  ;;  %v1151_v16 = vld [vmem:[%s16796_s0 + $0xc90] sm:$0xf] }
 0x1bf   : > { %1026 = vst [vmem:[%s16801_s6 + $0x54c] sm:$0xf] %v1025_v17  ;;  %v1153_v17 = vld [vmem:[%s16796_s0 + $0xc98] sm:$0xf] }
 0x1c0   : > { %1028 = vst [vmem:[%s16801_s6 + $0x550] sm:$0xf] %v1027_v18  ;;  %v1155_v18 = vld [vmem:[%s16796_s0 + $0xca0] sm:$0xf] }
 0x1c1   : > { %1030 = vst [vmem:[%s16801_s6 + $0x554] sm:$0xf] %v1029_v19  ;;  %v1157_v19 = vld [vmem:[%s16796_s0 + $0xca8] sm:$0xf] }
 0x1c2   : > { %1032 = vst [vmem:[%s16801_s6 + $0x558] sm:$0xf] %v1031_v20  ;;  %v1159_v20 = vld [vmem:[%s16796_s0 + $0xcb0] sm:$0xf] }
 0x1c3   : > { %1034 = vst [vmem:[%s16801_s6 + $0x55c] sm:$0xf] %v1033_v21  ;;  %v1161_v21 = vld [vmem:[%s16796_s0 + $0xcb8] sm:$0xf] }
 0x1c4   : > { %1036 = vst [vmem:[%s16801_s6 + $0x560] sm:$0xf] %v1035_v22  ;;  %v1163_v22 = vld [vmem:[%s16796_s0 + $0xcc0] sm:$0xf] }
 0x1c5   : > { %1038 = vst [vmem:[%s16801_s6 + $0x564] sm:$0xf] %v1037_v23  ;;  %v1165_v23 = vld [vmem:[%s16796_s0 + $0xcc8] sm:$0xf] }
 0x1c6   : > { %1040 = vst [vmem:[%s16801_s6 + $0x568] sm:$0xf] %v1039_v24  ;;  %v1167_v24 = vld [vmem:[%s16796_s0 + $0xcd0] sm:$0xf] }
 0x1c7   : > { %1042 = vst [vmem:[%s16801_s6 + $0x56c] sm:$0xf] %v1041_v25  ;;  %v1169_v25 = vld [vmem:[%s16796_s0 + $0xcd8] sm:$0xf] }
 0x1c8   : > { %1044 = vst [vmem:[%s16801_s6 + $0x570] sm:$0xf] %v1043_v26  ;;  %v1171_v26 = vld [vmem:[%s16796_s0 + $0xce0] sm:$0xf] }
 0x1c9   : > { %1046 = vst [vmem:[%s16801_s6 + $0x574] sm:$0xf] %v1045_v27  ;;  %v1173_v27 = vld [vmem:[%s16796_s0 + $0xce8] sm:$0xf] }
 0x1ca   : > { %1048 = vst [vmem:[%s16801_s6 + $0x578] sm:$0xf] %v1047_v28  ;;  %v1175_v28 = vld [vmem:[%s16796_s0 + $0xcf0] sm:$0xf] }
 0x1cb   : > { %1050 = vst [vmem:[%s16801_s6 + $0x57c] sm:$0xf] %v1049_v29  ;;  %v1177_v29 = vld [vmem:[%s16796_s0 + $0xcf8] sm:$0xf] }
 0x1cc   : > { %1052 = vst [vmem:[%s16801_s6 + $0x580] sm:$0xf] %v1051_v30  ;;  %v1179_v30 = vld [vmem:[%s16796_s0 + $0xd00] sm:$0xf] }
 0x1cd   : > { %1054 = vst [vmem:[%s16801_s6 + $0x584] sm:$0xf] %v1053_v31  ;;  %v1181_v31 = vld [vmem:[%s16796_s0 + $0xd08] sm:$0xf] }
 0x1ce   : > { %1056 = vst [vmem:[%s16801_s6 + $0x588] sm:$0xf] %v1055_v32  ;;  %v1183_v32 = vld [vmem:[%s16796_s0 + $0xd10] sm:$0xf] }
 0x1cf   : > { %1058 = vst [vmem:[%s16801_s6 + $0x58c] sm:$0xf] %v1057_v33  ;;  %v1185_v33 = vld [vmem:[%s16796_s0 + $0xd18] sm:$0xf] }
 0x1d0   : > { %1060 = vst [vmem:[%s16801_s6 + $0x590] sm:$0xf] %v1059_v34  ;;  %v1187_v34 = vld [vmem:[%s16796_s0 + $0xd20] sm:$0xf] }
 0x1d1   : > { %1062 = vst [vmem:[%s16801_s6 + $0x594] sm:$0xf] %v1061_v35  ;;  %v1189_v35 = vld [vmem:[%s16796_s0 + $0xd28] sm:$0xf] }
 0x1d2   : > { %1064 = vst [vmem:[%s16801_s6 + $0x598] sm:$0xf] %v1063_v36  ;;  %v1191_v36 = vld [vmem:[%s16796_s0 + $0xd30] sm:$0xf] }
 0x1d3   : > { %1066 = vst [vmem:[%s16801_s6 + $0x59c] sm:$0xf] %v1065_v37  ;;  %v1193_v37 = vld [vmem:[%s16796_s0 + $0xd38] sm:$0xf] }
 0x1d4   : > { %1068 = vst [vmem:[%s16801_s6 + $0x5a0] sm:$0xf] %v1067_v38  ;;  %v1195_v38 = vld [vmem:[%s16796_s0 + $0xd40] sm:$0xf] }
 0x1d5   : > { %1070 = vst [vmem:[%s16801_s6 + $0x5a4] sm:$0xf] %v1069_v39  ;;  %v1197_v39 = vld [vmem:[%s16796_s0 + $0xd48] sm:$0xf] }
 0x1d6   : > { %1072 = vst [vmem:[%s16801_s6 + $0x5a8] sm:$0xf] %v1071_v40  ;;  %v1199_v40 = vld [vmem:[%s16796_s0 + $0xd50] sm:$0xf] }
 0x1d7   : > { %1074 = vst [vmem:[%s16801_s6 + $0x5ac] sm:$0xf] %v1073_v41  ;;  %v1201_v41 = vld [vmem:[%s16796_s0 + $0xd58] sm:$0xf] }
 0x1d8   : > { %1076 = vst [vmem:[%s16801_s6 + $0x5b0] sm:$0xf] %v1075_v42  ;;  %v1203_v42 = vld [vmem:[%s16796_s0 + $0xd60] sm:$0xf] }
 0x1d9   : > { %1078 = vst [vmem:[%s16801_s6 + $0x5b4] sm:$0xf] %v1077_v43  ;;  %v1205_v43 = vld [vmem:[%s16796_s0 + $0xd68] sm:$0xf] }
 0x1da   : > { %1080 = vst [vmem:[%s16801_s6 + $0x5b8] sm:$0xf] %v1079_v44  ;;  %v1207_v44 = vld [vmem:[%s16796_s0 + $0xd70] sm:$0xf] }
 0x1db   : > { %1082 = vst [vmem:[%s16801_s6 + $0x5bc] sm:$0xf] %v1081_v45  ;;  %v1209_v45 = vld [vmem:[%s16796_s0 + $0xd78] sm:$0xf] }
 0x1dc   : > { %1084 = vst [vmem:[%s16801_s6 + $0x5c0] sm:$0xf] %v1083_v46  ;;  %v1211_v46 = vld [vmem:[%s16796_s0 + $0xd80] sm:$0xf] }
 0x1dd   : > { %1086 = vst [vmem:[%s16801_s6 + $0x5c4] sm:$0xf] %v1085_v47  ;;  %v1213_v47 = vld [vmem:[%s16796_s0 + $0xd88] sm:$0xf] }
 0x1de   : > { %1088 = vst [vmem:[%s16801_s6 + $0x5c8] sm:$0xf] %v1087_v48  ;;  %v1215_v48 = vld [vmem:[%s16796_s0 + $0xd90] sm:$0xf] }
 0x1df   : > { %1090 = vst [vmem:[%s16801_s6 + $0x5cc] sm:$0xf] %v1089_v49  ;;  %v1217_v49 = vld [vmem:[%s16796_s0 + $0xd98] sm:$0xf] }
 0x1e0   : > { %1092 = vst [vmem:[%s16801_s6 + $0x5d0] sm:$0xf] %v1091_v50  ;;  %v1219_v50 = vld [vmem:[%s16796_s0 + $0xda0] sm:$0xf] }
 0x1e1   : > { %1094 = vst [vmem:[%s16801_s6 + $0x5d4] sm:$0xf] %v1093_v51  ;;  %v1221_v51 = vld [vmem:[%s16796_s0 + $0xda8] sm:$0xf] }
 0x1e2   : > { %1096 = vst [vmem:[%s16801_s6 + $0x5d8] sm:$0xf] %v1095_v52  ;;  %v1223_v52 = vld [vmem:[%s16796_s0 + $0xdb0] sm:$0xf] }
 0x1e3   : > { %1098 = vst [vmem:[%s16801_s6 + $0x5dc] sm:$0xf] %v1097_v53  ;;  %v1225_v53 = vld [vmem:[%s16796_s0 + $0xdb8] sm:$0xf] }
 0x1e4   : > { %1100 = vst [vmem:[%s16801_s6 + $0x5e0] sm:$0xf] %v1099_v54  ;;  %v1227_v54 = vld [vmem:[%s16796_s0 + $0xdc0] sm:$0xf] }
 0x1e5   : > { %1102 = vst [vmem:[%s16801_s6 + $0x5e4] sm:$0xf] %v1101_v55  ;;  %v1229_v55 = vld [vmem:[%s16796_s0 + $0xdc8] sm:$0xf] }
 0x1e6   : > { %1104 = vst [vmem:[%s16801_s6 + $0x5e8] sm:$0xf] %v1103_v56  ;;  %v1231_v56 = vld [vmem:[%s16796_s0 + $0xdd0] sm:$0xf] }
 0x1e7   : > { %1106 = vst [vmem:[%s16801_s6 + $0x5ec] sm:$0xf] %v1105_v57  ;;  %v1233_v57 = vld [vmem:[%s16796_s0 + $0xdd8] sm:$0xf] }
 0x1e8   : > { %1108 = vst [vmem:[%s16801_s6 + $0x5f0] sm:$0xf] %v1107_v58  ;;  %v1235_v58 = vld [vmem:[%s16796_s0 + $0xde0] sm:$0xf] }
 0x1e9   : > { %1110 = vst [vmem:[%s16801_s6 + $0x5f4] sm:$0xf] %v1109_v59  ;;  %v1237_v59 = vld [vmem:[%s16796_s0 + $0xde8] sm:$0xf] }
 0x1ea   : > { %1112 = vst [vmem:[%s16801_s6 + $0x5f8] sm:$0xf] %v1111_v60  ;;  %v1239_v60 = vld [vmem:[%s16796_s0 + $0xdf0] sm:$0xf] }
 0x1eb   : > { %1114 = vst [vmem:[%s16801_s6 + $0x5fc] sm:$0xf] %v1113_v61  ;;  %v1241_v61 = vld [vmem:[%s16796_s0 + $0xdf8] sm:$0xf] }
 0x1ec   : > { %1116 = vst [vmem:[%s16801_s6 + $0x600] sm:$0xf] %v1115_v62  ;;  %v1243_v62 = vld [vmem:[%s16796_s0 + $0xe00] sm:$0xf] }
 0x1ed   : > { %1118 = vst [vmem:[%s16801_s6 + $0x604] sm:$0xf] %v1117_v63  ;;  %v1245_v63 = vld [vmem:[%s16796_s0 + $0xe08] sm:$0xf] }
 0x1ee   : > { %1120 = vst [vmem:[%s16801_s6 + $0x608] sm:$0xf] %v1119_v0  ;;  %v1247_v0 = vld [vmem:[%s16796_s0 + $0xe10] sm:$0xf] }
 0x1ef   : > { %1122 = vst [vmem:[%s16801_s6 + $0x60c] sm:$0xf] %v1121_v1  ;;  %v1249_v1 = vld [vmem:[%s16796_s0 + $0xe18] sm:$0xf] }
 0x1f0   : > { %1124 = vst [vmem:[%s16801_s6 + $0x610] sm:$0xf] %v1123_v2  ;;  %v1251_v2 = vld [vmem:[%s16796_s0 + $0xe20] sm:$0xf] }
 0x1f1   : > { %1126 = vst [vmem:[%s16801_s6 + $0x614] sm:$0xf] %v1125_v3  ;;  %v1253_v3 = vld [vmem:[%s16796_s0 + $0xe28] sm:$0xf] }
 0x1f2   : > { %1128 = vst [vmem:[%s16801_s6 + $0x618] sm:$0xf] %v1127_v4  ;;  %v1255_v4 = vld [vmem:[%s16796_s0 + $0xe30] sm:$0xf] }
 0x1f3   : > { %1130 = vst [vmem:[%s16801_s6 + $0x61c] sm:$0xf] %v1129_v5  ;;  %v1257_v5 = vld [vmem:[%s16796_s0 + $0xe38] sm:$0xf] }
 0x1f4   : > { %1132 = vst [vmem:[%s16801_s6 + $0x620] sm:$0xf] %v1131_v6  ;;  %v1259_v6 = vld [vmem:[%s16796_s0 + $0xe40] sm:$0xf] }
 0x1f5   : > { %1134 = vst [vmem:[%s16801_s6 + $0x624] sm:$0xf] %v1133_v7  ;;  %v1261_v7 = vld [vmem:[%s16796_s0 + $0xe48] sm:$0xf] }
 0x1f6   : > { %1136 = vst [vmem:[%s16801_s6 + $0x628] sm:$0xf] %v1135_v8  ;;  %v1263_v8 = vld [vmem:[%s16796_s0 + $0xe50] sm:$0xf] }
 0x1f7   : > { %1138 = vst [vmem:[%s16801_s6 + $0x62c] sm:$0xf] %v1137_v9  ;;  %v1265_v9 = vld [vmem:[%s16796_s0 + $0xe58] sm:$0xf] }
 0x1f8   : > { %1140 = vst [vmem:[%s16801_s6 + $0x630] sm:$0xf] %v1139_v10  ;;  %v1267_v10 = vld [vmem:[%s16796_s0 + $0xe60] sm:$0xf] }
 0x1f9   : > { %1142 = vst [vmem:[%s16801_s6 + $0x634] sm:$0xf] %v1141_v11  ;;  %v1269_v11 = vld [vmem:[%s16796_s0 + $0xe68] sm:$0xf] }
 0x1fa   : > { %1144 = vst [vmem:[%s16801_s6 + $0x638] sm:$0xf] %v1143_v12  ;;  %v1271_v12 = vld [vmem:[%s16796_s0 + $0xe70] sm:$0xf] }
 0x1fb   : > { %1146 = vst [vmem:[%s16801_s6 + $0x63c] sm:$0xf] %v1145_v13  ;;  %v1273_v13 = vld [vmem:[%s16796_s0 + $0xe78] sm:$0xf] }
 0x1fc   : > { %1148 = vst [vmem:[%s16801_s6 + $0x640] sm:$0xf] %v1147_v14  ;;  %v1275_v14 = vld [vmem:[%s16796_s0 + $0xe80] sm:$0xf] }
 0x1fd   : > { %1150 = vst [vmem:[%s16801_s6 + $0x644] sm:$0xf] %v1149_v15  ;;  %v1277_v15 = vld [vmem:[%s16796_s0 + $0xe88] sm:$0xf] }
 0x1fe   : > { %1152 = vst [vmem:[%s16801_s6 + $0x648] sm:$0xf] %v1151_v16  ;;  %v1279_v16 = vld [vmem:[%s16796_s0 + $0xe90] sm:$0xf] }
 0x1ff   : > { %1154 = vst [vmem:[%s16801_s6 + $0x64c] sm:$0xf] %v1153_v17  ;;  %v1281_v17 = vld [vmem:[%s16796_s0 + $0xe98] sm:$0xf] }
 0x200   : > { %1156 = vst [vmem:[%s16801_s6 + $0x650] sm:$0xf] %v1155_v18  ;;  %v1283_v18 = vld [vmem:[%s16796_s0 + $0xea0] sm:$0xf] }
 0x201   : > { %1158 = vst [vmem:[%s16801_s6 + $0x654] sm:$0xf] %v1157_v19  ;;  %v1285_v19 = vld [vmem:[%s16796_s0 + $0xea8] sm:$0xf] }
 0x202   : > { %1160 = vst [vmem:[%s16801_s6 + $0x658] sm:$0xf] %v1159_v20  ;;  %v1287_v20 = vld [vmem:[%s16796_s0 + $0xeb0] sm:$0xf] }
 0x203   : > { %1162 = vst [vmem:[%s16801_s6 + $0x65c] sm:$0xf] %v1161_v21  ;;  %v1289_v21 = vld [vmem:[%s16796_s0 + $0xeb8] sm:$0xf] }
 0x204   : > { %1164 = vst [vmem:[%s16801_s6 + $0x660] sm:$0xf] %v1163_v22  ;;  %v1291_v22 = vld [vmem:[%s16796_s0 + $0xec0] sm:$0xf] }
 0x205   : > { %1166 = vst [vmem:[%s16801_s6 + $0x664] sm:$0xf] %v1165_v23  ;;  %v1293_v23 = vld [vmem:[%s16796_s0 + $0xec8] sm:$0xf] }
 0x206   : > { %1168 = vst [vmem:[%s16801_s6 + $0x668] sm:$0xf] %v1167_v24  ;;  %v1295_v24 = vld [vmem:[%s16796_s0 + $0xed0] sm:$0xf] }
 0x207   : > { %1170 = vst [vmem:[%s16801_s6 + $0x66c] sm:$0xf] %v1169_v25  ;;  %v1297_v25 = vld [vmem:[%s16796_s0 + $0xed8] sm:$0xf] }
 0x208   : > { %1172 = vst [vmem:[%s16801_s6 + $0x670] sm:$0xf] %v1171_v26  ;;  %v1299_v26 = vld [vmem:[%s16796_s0 + $0xee0] sm:$0xf] }
 0x209   : > { %1174 = vst [vmem:[%s16801_s6 + $0x674] sm:$0xf] %v1173_v27  ;;  %v1301_v27 = vld [vmem:[%s16796_s0 + $0xee8] sm:$0xf] }
 0x20a   : > { %1176 = vst [vmem:[%s16801_s6 + $0x678] sm:$0xf] %v1175_v28  ;;  %v1303_v28 = vld [vmem:[%s16796_s0 + $0xef0] sm:$0xf] }
 0x20b   : > { %1178 = vst [vmem:[%s16801_s6 + $0x67c] sm:$0xf] %v1177_v29  ;;  %v1305_v29 = vld [vmem:[%s16796_s0 + $0xef8] sm:$0xf] }
 0x20c   : > { %1180 = vst [vmem:[%s16801_s6 + $0x680] sm:$0xf] %v1179_v30  ;;  %v1307_v30 = vld [vmem:[%s16796_s0 + $0xf00] sm:$0xf] }
 0x20d   : > { %1182 = vst [vmem:[%s16801_s6 + $0x684] sm:$0xf] %v1181_v31  ;;  %v1309_v31 = vld [vmem:[%s16796_s0 + $0xf08] sm:$0xf] }
 0x20e   : > { %1184 = vst [vmem:[%s16801_s6 + $0x688] sm:$0xf] %v1183_v32  ;;  %v1311_v32 = vld [vmem:[%s16796_s0 + $0xf10] sm:$0xf] }
 0x20f   : > { %1186 = vst [vmem:[%s16801_s6 + $0x68c] sm:$0xf] %v1185_v33  ;;  %v1313_v33 = vld [vmem:[%s16796_s0 + $0xf18] sm:$0xf] }
 0x210   : > { %1188 = vst [vmem:[%s16801_s6 + $0x690] sm:$0xf] %v1187_v34  ;;  %v1315_v34 = vld [vmem:[%s16796_s0 + $0xf20] sm:$0xf] }
 0x211   : > { %1190 = vst [vmem:[%s16801_s6 + $0x694] sm:$0xf] %v1189_v35  ;;  %v1317_v35 = vld [vmem:[%s16796_s0 + $0xf28] sm:$0xf] }
 0x212   : > { %1192 = vst [vmem:[%s16801_s6 + $0x698] sm:$0xf] %v1191_v36  ;;  %v1319_v36 = vld [vmem:[%s16796_s0 + $0xf30] sm:$0xf] }
 0x213   : > { %1194 = vst [vmem:[%s16801_s6 + $0x69c] sm:$0xf] %v1193_v37  ;;  %v1321_v37 = vld [vmem:[%s16796_s0 + $0xf38] sm:$0xf] }
 0x214   : > { %1196 = vst [vmem:[%s16801_s6 + $0x6a0] sm:$0xf] %v1195_v38  ;;  %v1323_v38 = vld [vmem:[%s16796_s0 + $0xf40] sm:$0xf] }
 0x215   : > { %1198 = vst [vmem:[%s16801_s6 + $0x6a4] sm:$0xf] %v1197_v39  ;;  %v1325_v39 = vld [vmem:[%s16796_s0 + $0xf48] sm:$0xf] }
 0x216   : > { %1200 = vst [vmem:[%s16801_s6 + $0x6a8] sm:$0xf] %v1199_v40  ;;  %v1327_v40 = vld [vmem:[%s16796_s0 + $0xf50] sm:$0xf] }
 0x217   : > { %1202 = vst [vmem:[%s16801_s6 + $0x6ac] sm:$0xf] %v1201_v41  ;;  %v1329_v41 = vld [vmem:[%s16796_s0 + $0xf58] sm:$0xf] }
 0x218   : > { %1204 = vst [vmem:[%s16801_s6 + $0x6b0] sm:$0xf] %v1203_v42  ;;  %v1331_v42 = vld [vmem:[%s16796_s0 + $0xf60] sm:$0xf] }
 0x219   : > { %1206 = vst [vmem:[%s16801_s6 + $0x6b4] sm:$0xf] %v1205_v43  ;;  %v1333_v43 = vld [vmem:[%s16796_s0 + $0xf68] sm:$0xf] }
 0x21a   : > { %1208 = vst [vmem:[%s16801_s6 + $0x6b8] sm:$0xf] %v1207_v44  ;;  %v1335_v44 = vld [vmem:[%s16796_s0 + $0xf70] sm:$0xf] }
 0x21b   : > { %1210 = vst [vmem:[%s16801_s6 + $0x6bc] sm:$0xf] %v1209_v45  ;;  %v1337_v45 = vld [vmem:[%s16796_s0 + $0xf78] sm:$0xf] }
 0x21c   : > { %1212 = vst [vmem:[%s16801_s6 + $0x6c0] sm:$0xf] %v1211_v46  ;;  %v1339_v46 = vld [vmem:[%s16796_s0 + $0xf80] sm:$0xf] }
 0x21d   : > { %1214 = vst [vmem:[%s16801_s6 + $0x6c4] sm:$0xf] %v1213_v47  ;;  %v1341_v47 = vld [vmem:[%s16796_s0 + $0xf88] sm:$0xf] }
 0x21e   : > { %1216 = vst [vmem:[%s16801_s6 + $0x6c8] sm:$0xf] %v1215_v48  ;;  %v1343_v48 = vld [vmem:[%s16796_s0 + $0xf90] sm:$0xf] }
 0x21f   : > { %1218 = vst [vmem:[%s16801_s6 + $0x6cc] sm:$0xf] %v1217_v49  ;;  %v1345_v49 = vld [vmem:[%s16796_s0 + $0xf98] sm:$0xf] }
 0x220   : > { %1220 = vst [vmem:[%s16801_s6 + $0x6d0] sm:$0xf] %v1219_v50  ;;  %v1347_v50 = vld [vmem:[%s16796_s0 + $0xfa0] sm:$0xf] }
 0x221   : > { %1222 = vst [vmem:[%s16801_s6 + $0x6d4] sm:$0xf] %v1221_v51  ;;  %v1349_v51 = vld [vmem:[%s16796_s0 + $0xfa8] sm:$0xf] }
 0x222   : > { %1224 = vst [vmem:[%s16801_s6 + $0x6d8] sm:$0xf] %v1223_v52  ;;  %v1351_v52 = vld [vmem:[%s16796_s0 + $0xfb0] sm:$0xf] }
 0x223   : > { %1226 = vst [vmem:[%s16801_s6 + $0x6dc] sm:$0xf] %v1225_v53  ;;  %v1353_v53 = vld [vmem:[%s16796_s0 + $0xfb8] sm:$0xf] }
 0x224   : > { %1228 = vst [vmem:[%s16801_s6 + $0x6e0] sm:$0xf] %v1227_v54  ;;  %v1355_v54 = vld [vmem:[%s16796_s0 + $0xfc0] sm:$0xf] }
 0x225   : > { %1230 = vst [vmem:[%s16801_s6 + $0x6e4] sm:$0xf] %v1229_v55  ;;  %v1357_v55 = vld [vmem:[%s16796_s0 + $0xfc8] sm:$0xf] }
 0x226   : > { %1232 = vst [vmem:[%s16801_s6 + $0x6e8] sm:$0xf] %v1231_v56  ;;  %v1359_v56 = vld [vmem:[%s16796_s0 + $0xfd0] sm:$0xf] }
 0x227   : > { %1234 = vst [vmem:[%s16801_s6 + $0x6ec] sm:$0xf] %v1233_v57  ;;  %v1361_v57 = vld [vmem:[%s16796_s0 + $0xfd8] sm:$0xf] }
 0x228   : > { %1236 = vst [vmem:[%s16801_s6 + $0x6f0] sm:$0xf] %v1235_v58  ;;  %v1363_v58 = vld [vmem:[%s16796_s0 + $0xfe0] sm:$0xf] }
 0x229   : > { %1238 = vst [vmem:[%s16801_s6 + $0x6f4] sm:$0xf] %v1237_v59  ;;  %v1365_v59 = vld [vmem:[%s16796_s0 + $0xfe8] sm:$0xf] }
 0x22a   : > { %1240 = vst [vmem:[%s16801_s6 + $0x6f8] sm:$0xf] %v1239_v60  ;;  %v1367_v60 = vld [vmem:[%s16796_s0 + $0xff0] sm:$0xf] }
 0x22b   : > { %1242 = vst [vmem:[%s16801_s6 + $0x6fc] sm:$0xf] %v1241_v61  ;;  %v1369_v61 = vld [vmem:[%s16796_s0 + $0xff8] sm:$0xf] }
 0x22c   : > { %1244 = vst [vmem:[%s16801_s6 + $0x700] sm:$0xf] %v1243_v62  ;;  %v1371_v62 = vld [vmem:[%s16796_s0 + $0x1000] sm:$0xf] }
 0x22d   : > { %1246 = vst [vmem:[%s16801_s6 + $0x704] sm:$0xf] %v1245_v63  ;;  %v1373_v63 = vld [vmem:[%s16796_s0 + $0x1008] sm:$0xf] }
 0x22e   : > { %1248 = vst [vmem:[%s16801_s6 + $0x708] sm:$0xf] %v1247_v0  ;;  %v1375_v0 = vld [vmem:[%s16796_s0 + $0x1010] sm:$0xf] }
 0x22f   : > { %1250 = vst [vmem:[%s16801_s6 + $0x70c] sm:$0xf] %v1249_v1  ;;  %v1377_v1 = vld [vmem:[%s16796_s0 + $0x1018] sm:$0xf] }
 0x230   : > { %1252 = vst [vmem:[%s16801_s6 + $0x710] sm:$0xf] %v1251_v2  ;;  %v1379_v2 = vld [vmem:[%s16796_s0 + $0x1020] sm:$0xf] }
 0x231   : > { %1254 = vst [vmem:[%s16801_s6 + $0x714] sm:$0xf] %v1253_v3  ;;  %v1381_v3 = vld [vmem:[%s16796_s0 + $0x1028] sm:$0xf] }
 0x232   : > { %1256 = vst [vmem:[%s16801_s6 + $0x718] sm:$0xf] %v1255_v4  ;;  %v1383_v4 = vld [vmem:[%s16796_s0 + $0x1030] sm:$0xf] }
 0x233   : > { %1258 = vst [vmem:[%s16801_s6 + $0x71c] sm:$0xf] %v1257_v5  ;;  %v1385_v5 = vld [vmem:[%s16796_s0 + $0x1038] sm:$0xf] }
 0x234   : > { %1260 = vst [vmem:[%s16801_s6 + $0x720] sm:$0xf] %v1259_v6  ;;  %v1387_v6 = vld [vmem:[%s16796_s0 + $0x1040] sm:$0xf] }
 0x235   : > { %1262 = vst [vmem:[%s16801_s6 + $0x724] sm:$0xf] %v1261_v7  ;;  %v1389_v7 = vld [vmem:[%s16796_s0 + $0x1048] sm:$0xf] }
 0x236   : > { %1264 = vst [vmem:[%s16801_s6 + $0x728] sm:$0xf] %v1263_v8  ;;  %v1391_v8 = vld [vmem:[%s16796_s0 + $0x1050] sm:$0xf] }
 0x237   : > { %1266 = vst [vmem:[%s16801_s6 + $0x72c] sm:$0xf] %v1265_v9  ;;  %v1393_v9 = vld [vmem:[%s16796_s0 + $0x1058] sm:$0xf] }
 0x238   : > { %1268 = vst [vmem:[%s16801_s6 + $0x730] sm:$0xf] %v1267_v10  ;;  %v1395_v10 = vld [vmem:[%s16796_s0 + $0x1060] sm:$0xf] }
 0x239   : > { %1270 = vst [vmem:[%s16801_s6 + $0x734] sm:$0xf] %v1269_v11  ;;  %v1397_v11 = vld [vmem:[%s16796_s0 + $0x1068] sm:$0xf] }
 0x23a   : > { %1272 = vst [vmem:[%s16801_s6 + $0x738] sm:$0xf] %v1271_v12  ;;  %v1399_v12 = vld [vmem:[%s16796_s0 + $0x1070] sm:$0xf] }
 0x23b   : > { %1274 = vst [vmem:[%s16801_s6 + $0x73c] sm:$0xf] %v1273_v13  ;;  %v1401_v13 = vld [vmem:[%s16796_s0 + $0x1078] sm:$0xf] }
 0x23c   : > { %1276 = vst [vmem:[%s16801_s6 + $0x740] sm:$0xf] %v1275_v14  ;;  %v1403_v14 = vld [vmem:[%s16796_s0 + $0x1080] sm:$0xf] }
 0x23d   : > { %1278 = vst [vmem:[%s16801_s6 + $0x744] sm:$0xf] %v1277_v15  ;;  %v1405_v15 = vld [vmem:[%s16796_s0 + $0x1088] sm:$0xf] }
 0x23e   : > { %1280 = vst [vmem:[%s16801_s6 + $0x748] sm:$0xf] %v1279_v16  ;;  %v1407_v16 = vld [vmem:[%s16796_s0 + $0x1090] sm:$0xf] }
 0x23f   : > { %1282 = vst [vmem:[%s16801_s6 + $0x74c] sm:$0xf] %v1281_v17  ;;  %v1409_v17 = vld [vmem:[%s16796_s0 + $0x1098] sm:$0xf] }
 0x240   : > { %1284 = vst [vmem:[%s16801_s6 + $0x750] sm:$0xf] %v1283_v18  ;;  %v1411_v18 = vld [vmem:[%s16796_s0 + $0x10a0] sm:$0xf] }
 0x241   : > { %1286 = vst [vmem:[%s16801_s6 + $0x754] sm:$0xf] %v1285_v19  ;;  %v1413_v19 = vld [vmem:[%s16796_s0 + $0x10a8] sm:$0xf] }
 0x242   : > { %1288 = vst [vmem:[%s16801_s6 + $0x758] sm:$0xf] %v1287_v20  ;;  %v1415_v20 = vld [vmem:[%s16796_s0 + $0x10b0] sm:$0xf] }
 0x243   : > { %1290 = vst [vmem:[%s16801_s6 + $0x75c] sm:$0xf] %v1289_v21  ;;  %v1417_v21 = vld [vmem:[%s16796_s0 + $0x10b8] sm:$0xf] }
 0x244   : > { %1292 = vst [vmem:[%s16801_s6 + $0x760] sm:$0xf] %v1291_v22  ;;  %v1419_v22 = vld [vmem:[%s16796_s0 + $0x10c0] sm:$0xf] }
 0x245   : > { %1294 = vst [vmem:[%s16801_s6 + $0x764] sm:$0xf] %v1293_v23  ;;  %v1421_v23 = vld [vmem:[%s16796_s0 + $0x10c8] sm:$0xf] }
 0x246   : > { %1296 = vst [vmem:[%s16801_s6 + $0x768] sm:$0xf] %v1295_v24  ;;  %v1423_v24 = vld [vmem:[%s16796_s0 + $0x10d0] sm:$0xf] }
 0x247   : > { %1298 = vst [vmem:[%s16801_s6 + $0x76c] sm:$0xf] %v1297_v25  ;;  %v1425_v25 = vld [vmem:[%s16796_s0 + $0x10d8] sm:$0xf] }
 0x248   : > { %1300 = vst [vmem:[%s16801_s6 + $0x770] sm:$0xf] %v1299_v26  ;;  %v1427_v26 = vld [vmem:[%s16796_s0 + $0x10e0] sm:$0xf] }
 0x249   : > { %1302 = vst [vmem:[%s16801_s6 + $0x774] sm:$0xf] %v1301_v27  ;;  %v1429_v27 = vld [vmem:[%s16796_s0 + $0x10e8] sm:$0xf] }
 0x24a   : > { %1304 = vst [vmem:[%s16801_s6 + $0x778] sm:$0xf] %v1303_v28  ;;  %v1431_v28 = vld [vmem:[%s16796_s0 + $0x10f0] sm:$0xf] }
 0x24b   : > { %1306 = vst [vmem:[%s16801_s6 + $0x77c] sm:$0xf] %v1305_v29  ;;  %v1433_v29 = vld [vmem:[%s16796_s0 + $0x10f8] sm:$0xf] }
 0x24c   : > { %1308 = vst [vmem:[%s16801_s6 + $0x780] sm:$0xf] %v1307_v30  ;;  %v1435_v30 = vld [vmem:[%s16796_s0 + $0x1100] sm:$0xf] }
 0x24d   : > { %1310 = vst [vmem:[%s16801_s6 + $0x784] sm:$0xf] %v1309_v31  ;;  %v1437_v31 = vld [vmem:[%s16796_s0 + $0x1108] sm:$0xf] }
 0x24e   : > { %1312 = vst [vmem:[%s16801_s6 + $0x788] sm:$0xf] %v1311_v32  ;;  %v1439_v32 = vld [vmem:[%s16796_s0 + $0x1110] sm:$0xf] }
 0x24f   : > { %1314 = vst [vmem:[%s16801_s6 + $0x78c] sm:$0xf] %v1313_v33  ;;  %v1441_v33 = vld [vmem:[%s16796_s0 + $0x1118] sm:$0xf] }
 0x250   : > { %1316 = vst [vmem:[%s16801_s6 + $0x790] sm:$0xf] %v1315_v34  ;;  %v1443_v34 = vld [vmem:[%s16796_s0 + $0x1120] sm:$0xf] }
 0x251   : > { %1318 = vst [vmem:[%s16801_s6 + $0x794] sm:$0xf] %v1317_v35  ;;  %v1445_v35 = vld [vmem:[%s16796_s0 + $0x1128] sm:$0xf] }
 0x252   : > { %1320 = vst [vmem:[%s16801_s6 + $0x798] sm:$0xf] %v1319_v36  ;;  %v1447_v36 = vld [vmem:[%s16796_s0 + $0x1130] sm:$0xf] }
 0x253   : > { %1322 = vst [vmem:[%s16801_s6 + $0x79c] sm:$0xf] %v1321_v37  ;;  %v1449_v37 = vld [vmem:[%s16796_s0 + $0x1138] sm:$0xf] }
 0x254   : > { %1324 = vst [vmem:[%s16801_s6 + $0x7a0] sm:$0xf] %v1323_v38  ;;  %v1451_v38 = vld [vmem:[%s16796_s0 + $0x1140] sm:$0xf] }
 0x255   : > { %1326 = vst [vmem:[%s16801_s6 + $0x7a4] sm:$0xf] %v1325_v39  ;;  %v1453_v39 = vld [vmem:[%s16796_s0 + $0x1148] sm:$0xf] }
 0x256   : > { %1328 = vst [vmem:[%s16801_s6 + $0x7a8] sm:$0xf] %v1327_v40  ;;  %v1455_v40 = vld [vmem:[%s16796_s0 + $0x1150] sm:$0xf] }
 0x257   : > { %1330 = vst [vmem:[%s16801_s6 + $0x7ac] sm:$0xf] %v1329_v41  ;;  %v1457_v41 = vld [vmem:[%s16796_s0 + $0x1158] sm:$0xf] }
 0x258   : > { %1332 = vst [vmem:[%s16801_s6 + $0x7b0] sm:$0xf] %v1331_v42  ;;  %v1459_v42 = vld [vmem:[%s16796_s0 + $0x1160] sm:$0xf] }
 0x259   : > { %1334 = vst [vmem:[%s16801_s6 + $0x7b4] sm:$0xf] %v1333_v43  ;;  %v1461_v43 = vld [vmem:[%s16796_s0 + $0x1168] sm:$0xf] }
 0x25a   : > { %1336 = vst [vmem:[%s16801_s6 + $0x7b8] sm:$0xf] %v1335_v44  ;;  %v1463_v44 = vld [vmem:[%s16796_s0 + $0x1170] sm:$0xf] }
 0x25b   : > { %1338 = vst [vmem:[%s16801_s6 + $0x7bc] sm:$0xf] %v1337_v45  ;;  %v1465_v45 = vld [vmem:[%s16796_s0 + $0x1178] sm:$0xf] }
 0x25c   : > { %1340 = vst [vmem:[%s16801_s6 + $0x7c0] sm:$0xf] %v1339_v46  ;;  %v1467_v46 = vld [vmem:[%s16796_s0 + $0x1180] sm:$0xf] }
 0x25d   : > { %1342 = vst [vmem:[%s16801_s6 + $0x7c4] sm:$0xf] %v1341_v47  ;;  %v1469_v47 = vld [vmem:[%s16796_s0 + $0x1188] sm:$0xf] }
 0x25e   : > { %1344 = vst [vmem:[%s16801_s6 + $0x7c8] sm:$0xf] %v1343_v48  ;;  %v1471_v48 = vld [vmem:[%s16796_s0 + $0x1190] sm:$0xf] }
 0x25f   : > { %1346 = vst [vmem:[%s16801_s6 + $0x7cc] sm:$0xf] %v1345_v49  ;;  %v1473_v49 = vld [vmem:[%s16796_s0 + $0x1198] sm:$0xf] }
 0x260   : > { %1348 = vst [vmem:[%s16801_s6 + $0x7d0] sm:$0xf] %v1347_v50  ;;  %v1475_v50 = vld [vmem:[%s16796_s0 + $0x11a0] sm:$0xf] }
 0x261   : > { %1350 = vst [vmem:[%s16801_s6 + $0x7d4] sm:$0xf] %v1349_v51  ;;  %v1477_v51 = vld [vmem:[%s16796_s0 + $0x11a8] sm:$0xf] }
 0x262   : > { %1352 = vst [vmem:[%s16801_s6 + $0x7d8] sm:$0xf] %v1351_v52  ;;  %v1479_v52 = vld [vmem:[%s16796_s0 + $0x11b0] sm:$0xf] }
 0x263   : > { %1354 = vst [vmem:[%s16801_s6 + $0x7dc] sm:$0xf] %v1353_v53  ;;  %v1481_v53 = vld [vmem:[%s16796_s0 + $0x11b8] sm:$0xf] }
 0x264   : > { %1356 = vst [vmem:[%s16801_s6 + $0x7e0] sm:$0xf] %v1355_v54  ;;  %v1483_v54 = vld [vmem:[%s16796_s0 + $0x11c0] sm:$0xf] }
 0x265   : > { %1358 = vst [vmem:[%s16801_s6 + $0x7e4] sm:$0xf] %v1357_v55  ;;  %v1485_v55 = vld [vmem:[%s16796_s0 + $0x11c8] sm:$0xf] }
 0x266   : > { %1360 = vst [vmem:[%s16801_s6 + $0x7e8] sm:$0xf] %v1359_v56  ;;  %v1487_v56 = vld [vmem:[%s16796_s0 + $0x11d0] sm:$0xf] }
 0x267   : > { %1362 = vst [vmem:[%s16801_s6 + $0x7ec] sm:$0xf] %v1361_v57  ;;  %v1489_v57 = vld [vmem:[%s16796_s0 + $0x11d8] sm:$0xf] }
 0x268   : > { %1364 = vst [vmem:[%s16801_s6 + $0x7f0] sm:$0xf] %v1363_v58  ;;  %v1491_v58 = vld [vmem:[%s16796_s0 + $0x11e0] sm:$0xf] }
 0x269   : > { %1366 = vst [vmem:[%s16801_s6 + $0x7f4] sm:$0xf] %v1365_v59  ;;  %v1493_v59 = vld [vmem:[%s16796_s0 + $0x11e8] sm:$0xf] }
 0x26a   : > { %1368 = vst [vmem:[%s16801_s6 + $0x7f8] sm:$0xf] %v1367_v60  ;;  %v1495_v60 = vld [vmem:[%s16796_s0 + $0x11f0] sm:$0xf] }
 0x26b   : > { %1370 = vst [vmem:[%s16801_s6 + $0x7fc] sm:$0xf] %v1369_v61  ;;  %v1497_v61 = vld [vmem:[%s16796_s0 + $0x11f8] sm:$0xf] }
 0x26c   : > { %1372 = vst [vmem:[%s16801_s6 + $0x800] sm:$0xf] %v1371_v62  ;;  %v1499_v62 = vld [vmem:[%s16796_s0 + $0x1200] sm:$0xf] }
 0x26d   : > { %1374 = vst [vmem:[%s16801_s6 + $0x804] sm:$0xf] %v1373_v63  ;;  %v1501_v63 = vld [vmem:[%s16796_s0 + $0x1208] sm:$0xf] }
 0x26e   : > { %1376 = vst [vmem:[%s16801_s6 + $0x808] sm:$0xf] %v1375_v0  ;;  %v1503_v0 = vld [vmem:[%s16796_s0 + $0x1210] sm:$0xf] }
 0x26f   : > { %1378 = vst [vmem:[%s16801_s6 + $0x80c] sm:$0xf] %v1377_v1  ;;  %v1505_v1 = vld [vmem:[%s16796_s0 + $0x1218] sm:$0xf] }
 0x270   : > { %1380 = vst [vmem:[%s16801_s6 + $0x810] sm:$0xf] %v1379_v2  ;;  %v1507_v2 = vld [vmem:[%s16796_s0 + $0x1220] sm:$0xf] }
 0x271   : > { %1382 = vst [vmem:[%s16801_s6 + $0x814] sm:$0xf] %v1381_v3  ;;  %v1509_v3 = vld [vmem:[%s16796_s0 + $0x1228] sm:$0xf] }
 0x272   : > { %1384 = vst [vmem:[%s16801_s6 + $0x818] sm:$0xf] %v1383_v4  ;;  %v1511_v4 = vld [vmem:[%s16796_s0 + $0x1230] sm:$0xf] }
 0x273   : > { %1386 = vst [vmem:[%s16801_s6 + $0x81c] sm:$0xf] %v1385_v5  ;;  %v1513_v5 = vld [vmem:[%s16796_s0 + $0x1238] sm:$0xf] }
 0x274   : > { %1388 = vst [vmem:[%s16801_s6 + $0x820] sm:$0xf] %v1387_v6  ;;  %v1515_v6 = vld [vmem:[%s16796_s0 + $0x1240] sm:$0xf] }
 0x275   : > { %1390 = vst [vmem:[%s16801_s6 + $0x824] sm:$0xf] %v1389_v7  ;;  %v1517_v7 = vld [vmem:[%s16796_s0 + $0x1248] sm:$0xf] }
 0x276   : > { %1392 = vst [vmem:[%s16801_s6 + $0x828] sm:$0xf] %v1391_v8  ;;  %v1519_v8 = vld [vmem:[%s16796_s0 + $0x1250] sm:$0xf] }
 0x277   : > { %1394 = vst [vmem:[%s16801_s6 + $0x82c] sm:$0xf] %v1393_v9  ;;  %v1521_v9 = vld [vmem:[%s16796_s0 + $0x1258] sm:$0xf] }
 0x278   : > { %1396 = vst [vmem:[%s16801_s6 + $0x830] sm:$0xf] %v1395_v10  ;;  %v1523_v10 = vld [vmem:[%s16796_s0 + $0x1260] sm:$0xf] }
 0x279   : > { %1398 = vst [vmem:[%s16801_s6 + $0x834] sm:$0xf] %v1397_v11  ;;  %v1525_v11 = vld [vmem:[%s16796_s0 + $0x1268] sm:$0xf] }
 0x27a   : > { %1400 = vst [vmem:[%s16801_s6 + $0x838] sm:$0xf] %v1399_v12  ;;  %v1527_v12 = vld [vmem:[%s16796_s0 + $0x1270] sm:$0xf] }
 0x27b   : > { %1402 = vst [vmem:[%s16801_s6 + $0x83c] sm:$0xf] %v1401_v13  ;;  %v1529_v13 = vld [vmem:[%s16796_s0 + $0x1278] sm:$0xf] }
 0x27c   : > { %1404 = vst [vmem:[%s16801_s6 + $0x840] sm:$0xf] %v1403_v14  ;;  %v1531_v14 = vld [vmem:[%s16796_s0 + $0x1280] sm:$0xf] }
 0x27d   : > { %1406 = vst [vmem:[%s16801_s6 + $0x844] sm:$0xf] %v1405_v15  ;;  %v1533_v15 = vld [vmem:[%s16796_s0 + $0x1288] sm:$0xf] }
 0x27e   : > { %1408 = vst [vmem:[%s16801_s6 + $0x848] sm:$0xf] %v1407_v16  ;;  %v1535_v16 = vld [vmem:[%s16796_s0 + $0x1290] sm:$0xf] }
 0x27f   : > { %1410 = vst [vmem:[%s16801_s6 + $0x84c] sm:$0xf] %v1409_v17  ;;  %v1537_v17 = vld [vmem:[%s16796_s0 + $0x1298] sm:$0xf] }
 0x280   : > { %1412 = vst [vmem:[%s16801_s6 + $0x850] sm:$0xf] %v1411_v18  ;;  %v1539_v18 = vld [vmem:[%s16796_s0 + $0x12a0] sm:$0xf] }
 0x281   : > { %1414 = vst [vmem:[%s16801_s6 + $0x854] sm:$0xf] %v1413_v19  ;;  %v1541_v19 = vld [vmem:[%s16796_s0 + $0x12a8] sm:$0xf] }
 0x282   : > { %1416 = vst [vmem:[%s16801_s6 + $0x858] sm:$0xf] %v1415_v20  ;;  %v1543_v20 = vld [vmem:[%s16796_s0 + $0x12b0] sm:$0xf] }
 0x283   : > { %1418 = vst [vmem:[%s16801_s6 + $0x85c] sm:$0xf] %v1417_v21  ;;  %v1545_v21 = vld [vmem:[%s16796_s0 + $0x12b8] sm:$0xf] }
 0x284   : > { %1420 = vst [vmem:[%s16801_s6 + $0x860] sm:$0xf] %v1419_v22  ;;  %v1547_v22 = vld [vmem:[%s16796_s0 + $0x12c0] sm:$0xf] }
 0x285   : > { %1422 = vst [vmem:[%s16801_s6 + $0x864] sm:$0xf] %v1421_v23  ;;  %v1549_v23 = vld [vmem:[%s16796_s0 + $0x12c8] sm:$0xf] }
 0x286   : > { %1424 = vst [vmem:[%s16801_s6 + $0x868] sm:$0xf] %v1423_v24  ;;  %v1551_v24 = vld [vmem:[%s16796_s0 + $0x12d0] sm:$0xf] }
 0x287   : > { %1426 = vst [vmem:[%s16801_s6 + $0x86c] sm:$0xf] %v1425_v25  ;;  %v1553_v25 = vld [vmem:[%s16796_s0 + $0x12d8] sm:$0xf] }
 0x288   : > { %1428 = vst [vmem:[%s16801_s6 + $0x870] sm:$0xf] %v1427_v26  ;;  %v1555_v26 = vld [vmem:[%s16796_s0 + $0x12e0] sm:$0xf] }
 0x289   : > { %1430 = vst [vmem:[%s16801_s6 + $0x874] sm:$0xf] %v1429_v27  ;;  %v1557_v27 = vld [vmem:[%s16796_s0 + $0x12e8] sm:$0xf] }
 0x28a   : > { %1432 = vst [vmem:[%s16801_s6 + $0x878] sm:$0xf] %v1431_v28  ;;  %v1559_v28 = vld [vmem:[%s16796_s0 + $0x12f0] sm:$0xf] }
 0x28b   : > { %1434 = vst [vmem:[%s16801_s6 + $0x87c] sm:$0xf] %v1433_v29  ;;  %v1561_v29 = vld [vmem:[%s16796_s0 + $0x12f8] sm:$0xf] }
 0x28c   : > { %1436 = vst [vmem:[%s16801_s6 + $0x880] sm:$0xf] %v1435_v30  ;;  %v1563_v30 = vld [vmem:[%s16796_s0 + $0x1300] sm:$0xf] }
 0x28d   : > { %1438 = vst [vmem:[%s16801_s6 + $0x884] sm:$0xf] %v1437_v31  ;;  %v1565_v31 = vld [vmem:[%s16796_s0 + $0x1308] sm:$0xf] }
 0x28e   : > { %1440 = vst [vmem:[%s16801_s6 + $0x888] sm:$0xf] %v1439_v32  ;;  %v1567_v32 = vld [vmem:[%s16796_s0 + $0x1310] sm:$0xf] }
 0x28f   : > { %1442 = vst [vmem:[%s16801_s6 + $0x88c] sm:$0xf] %v1441_v33  ;;  %v1569_v33 = vld [vmem:[%s16796_s0 + $0x1318] sm:$0xf] }
 0x290   : > { %1444 = vst [vmem:[%s16801_s6 + $0x890] sm:$0xf] %v1443_v34  ;;  %v1571_v34 = vld [vmem:[%s16796_s0 + $0x1320] sm:$0xf] }
 0x291   : > { %1446 = vst [vmem:[%s16801_s6 + $0x894] sm:$0xf] %v1445_v35  ;;  %v1573_v35 = vld [vmem:[%s16796_s0 + $0x1328] sm:$0xf] }
 0x292   : > { %1448 = vst [vmem:[%s16801_s6 + $0x898] sm:$0xf] %v1447_v36  ;;  %v1575_v36 = vld [vmem:[%s16796_s0 + $0x1330] sm:$0xf] }
 0x293   : > { %1450 = vst [vmem:[%s16801_s6 + $0x89c] sm:$0xf] %v1449_v37  ;;  %v1577_v37 = vld [vmem:[%s16796_s0 + $0x1338] sm:$0xf] }
 0x294   : > { %1452 = vst [vmem:[%s16801_s6 + $0x8a0] sm:$0xf] %v1451_v38  ;;  %v1579_v38 = vld [vmem:[%s16796_s0 + $0x1340] sm:$0xf] }
 0x295   : > { %1454 = vst [vmem:[%s16801_s6 + $0x8a4] sm:$0xf] %v1453_v39  ;;  %v1581_v39 = vld [vmem:[%s16796_s0 + $0x1348] sm:$0xf] }
 0x296   : > { %1456 = vst [vmem:[%s16801_s6 + $0x8a8] sm:$0xf] %v1455_v40  ;;  %v1583_v40 = vld [vmem:[%s16796_s0 + $0x1350] sm:$0xf] }
 0x297   : > { %1458 = vst [vmem:[%s16801_s6 + $0x8ac] sm:$0xf] %v1457_v41  ;;  %v1585_v41 = vld [vmem:[%s16796_s0 + $0x1358] sm:$0xf] }
 0x298   : > { %1460 = vst [vmem:[%s16801_s6 + $0x8b0] sm:$0xf] %v1459_v42  ;;  %v1587_v42 = vld [vmem:[%s16796_s0 + $0x1360] sm:$0xf] }
 0x299   : > { %1462 = vst [vmem:[%s16801_s6 + $0x8b4] sm:$0xf] %v1461_v43  ;;  %v1589_v43 = vld [vmem:[%s16796_s0 + $0x1368] sm:$0xf] }
 0x29a   : > { %1464 = vst [vmem:[%s16801_s6 + $0x8b8] sm:$0xf] %v1463_v44  ;;  %v1591_v44 = vld [vmem:[%s16796_s0 + $0x1370] sm:$0xf] }
 0x29b   : > { %1466 = vst [vmem:[%s16801_s6 + $0x8bc] sm:$0xf] %v1465_v45  ;;  %v1593_v45 = vld [vmem:[%s16796_s0 + $0x1378] sm:$0xf] }
 0x29c   : > { %1468 = vst [vmem:[%s16801_s6 + $0x8c0] sm:$0xf] %v1467_v46  ;;  %v1595_v46 = vld [vmem:[%s16796_s0 + $0x1380] sm:$0xf] }
 0x29d   : > { %1470 = vst [vmem:[%s16801_s6 + $0x8c4] sm:$0xf] %v1469_v47  ;;  %v1597_v47 = vld [vmem:[%s16796_s0 + $0x1388] sm:$0xf] }
 0x29e   : > { %1472 = vst [vmem:[%s16801_s6 + $0x8c8] sm:$0xf] %v1471_v48  ;;  %v1599_v48 = vld [vmem:[%s16796_s0 + $0x1390] sm:$0xf] }
 0x29f   : > { %1474 = vst [vmem:[%s16801_s6 + $0x8cc] sm:$0xf] %v1473_v49  ;;  %v1601_v49 = vld [vmem:[%s16796_s0 + $0x1398] sm:$0xf] }
 0x2a0   : > { %1476 = vst [vmem:[%s16801_s6 + $0x8d0] sm:$0xf] %v1475_v50  ;;  %v1603_v50 = vld [vmem:[%s16796_s0 + $0x13a0] sm:$0xf] }
 0x2a1   : > { %1478 = vst [vmem:[%s16801_s6 + $0x8d4] sm:$0xf] %v1477_v51  ;;  %v1605_v51 = vld [vmem:[%s16796_s0 + $0x13a8] sm:$0xf] }
 0x2a2   : > { %1480 = vst [vmem:[%s16801_s6 + $0x8d8] sm:$0xf] %v1479_v52  ;;  %v1607_v52 = vld [vmem:[%s16796_s0 + $0x13b0] sm:$0xf] }
 0x2a3   : > { %1482 = vst [vmem:[%s16801_s6 + $0x8dc] sm:$0xf] %v1481_v53  ;;  %v1609_v53 = vld [vmem:[%s16796_s0 + $0x13b8] sm:$0xf] }
 0x2a4   : > { %1484 = vst [vmem:[%s16801_s6 + $0x8e0] sm:$0xf] %v1483_v54  ;;  %v1611_v54 = vld [vmem:[%s16796_s0 + $0x13c0] sm:$0xf] }
 0x2a5   : > { %1486 = vst [vmem:[%s16801_s6 + $0x8e4] sm:$0xf] %v1485_v55  ;;  %v1613_v55 = vld [vmem:[%s16796_s0 + $0x13c8] sm:$0xf] }
 0x2a6   : > { %1488 = vst [vmem:[%s16801_s6 + $0x8e8] sm:$0xf] %v1487_v56  ;;  %v1615_v56 = vld [vmem:[%s16796_s0 + $0x13d0] sm:$0xf] }
 0x2a7   : > { %1490 = vst [vmem:[%s16801_s6 + $0x8ec] sm:$0xf] %v1489_v57  ;;  %v1617_v57 = vld [vmem:[%s16796_s0 + $0x13d8] sm:$0xf] }
 0x2a8   : > { %1492 = vst [vmem:[%s16801_s6 + $0x8f0] sm:$0xf] %v1491_v58  ;;  %v1619_v58 = vld [vmem:[%s16796_s0 + $0x13e0] sm:$0xf] }
 0x2a9   : > { %1494 = vst [vmem:[%s16801_s6 + $0x8f4] sm:$0xf] %v1493_v59  ;;  %v1621_v59 = vld [vmem:[%s16796_s0 + $0x13e8] sm:$0xf] }
 0x2aa   : > { %1496 = vst [vmem:[%s16801_s6 + $0x8f8] sm:$0xf] %v1495_v60  ;;  %v1623_v60 = vld [vmem:[%s16796_s0 + $0x13f0] sm:$0xf] }
 0x2ab   : > { %1498 = vst [vmem:[%s16801_s6 + $0x8fc] sm:$0xf] %v1497_v61  ;;  %v1625_v61 = vld [vmem:[%s16796_s0 + $0x13f8] sm:$0xf] }
 0x2ac   : > { %1500 = vst [vmem:[%s16801_s6 + $0x900] sm:$0xf] %v1499_v62  ;;  %v1627_v62 = vld [vmem:[%s16796_s0 + $0x1400] sm:$0xf] }
 0x2ad   : > { %1502 = vst [vmem:[%s16801_s6 + $0x904] sm:$0xf] %v1501_v63  ;;  %v1629_v63 = vld [vmem:[%s16796_s0 + $0x1408] sm:$0xf] }
 0x2ae   : > { %1504 = vst [vmem:[%s16801_s6 + $0x908] sm:$0xf] %v1503_v0  ;;  %v1631_v0 = vld [vmem:[%s16796_s0 + $0x1410] sm:$0xf] }
 0x2af   : > { %1506 = vst [vmem:[%s16801_s6 + $0x90c] sm:$0xf] %v1505_v1  ;;  %v1633_v1 = vld [vmem:[%s16796_s0 + $0x1418] sm:$0xf] }
 0x2b0   : > { %1508 = vst [vmem:[%s16801_s6 + $0x910] sm:$0xf] %v1507_v2  ;;  %v1635_v2 = vld [vmem:[%s16796_s0 + $0x1420] sm:$0xf] }
 0x2b1   : > { %1510 = vst [vmem:[%s16801_s6 + $0x914] sm:$0xf] %v1509_v3  ;;  %v1637_v3 = vld [vmem:[%s16796_s0 + $0x1428] sm:$0xf] }
 0x2b2   : > { %1512 = vst [vmem:[%s16801_s6 + $0x918] sm:$0xf] %v1511_v4  ;;  %v1639_v4 = vld [vmem:[%s16796_s0 + $0x1430] sm:$0xf] }
 0x2b3   : > { %1514 = vst [vmem:[%s16801_s6 + $0x91c] sm:$0xf] %v1513_v5  ;;  %v1641_v5 = vld [vmem:[%s16796_s0 + $0x1438] sm:$0xf] }
 0x2b4   : > { %1516 = vst [vmem:[%s16801_s6 + $0x920] sm:$0xf] %v1515_v6  ;;  %v1643_v6 = vld [vmem:[%s16796_s0 + $0x1440] sm:$0xf] }
 0x2b5   : > { %1518 = vst [vmem:[%s16801_s6 + $0x924] sm:$0xf] %v1517_v7  ;;  %v1645_v7 = vld [vmem:[%s16796_s0 + $0x1448] sm:$0xf] }
 0x2b6   : > { %1520 = vst [vmem:[%s16801_s6 + $0x928] sm:$0xf] %v1519_v8  ;;  %v1647_v8 = vld [vmem:[%s16796_s0 + $0x1450] sm:$0xf] }
 0x2b7   : > { %1522 = vst [vmem:[%s16801_s6 + $0x92c] sm:$0xf] %v1521_v9  ;;  %v1649_v9 = vld [vmem:[%s16796_s0 + $0x1458] sm:$0xf] }
 0x2b8   : > { %1524 = vst [vmem:[%s16801_s6 + $0x930] sm:$0xf] %v1523_v10  ;;  %v1651_v10 = vld [vmem:[%s16796_s0 + $0x1460] sm:$0xf] }
 0x2b9   : > { %1526 = vst [vmem:[%s16801_s6 + $0x934] sm:$0xf] %v1525_v11  ;;  %v1653_v11 = vld [vmem:[%s16796_s0 + $0x1468] sm:$0xf] }
 0x2ba   : > { %1528 = vst [vmem:[%s16801_s6 + $0x938] sm:$0xf] %v1527_v12  ;;  %v1655_v12 = vld [vmem:[%s16796_s0 + $0x1470] sm:$0xf] }
 0x2bb   : > { %1530 = vst [vmem:[%s16801_s6 + $0x93c] sm:$0xf] %v1529_v13  ;;  %v1657_v13 = vld [vmem:[%s16796_s0 + $0x1478] sm:$0xf] }
 0x2bc   : > { %1532 = vst [vmem:[%s16801_s6 + $0x940] sm:$0xf] %v1531_v14  ;;  %v1659_v14 = vld [vmem:[%s16796_s0 + $0x1480] sm:$0xf] }
 0x2bd   : > { %1534 = vst [vmem:[%s16801_s6 + $0x944] sm:$0xf] %v1533_v15  ;;  %v1661_v15 = vld [vmem:[%s16796_s0 + $0x1488] sm:$0xf] }
 0x2be   : > { %1536 = vst [vmem:[%s16801_s6 + $0x948] sm:$0xf] %v1535_v16  ;;  %v1663_v16 = vld [vmem:[%s16796_s0 + $0x1490] sm:$0xf] }
 0x2bf   : > { %1538 = vst [vmem:[%s16801_s6 + $0x94c] sm:$0xf] %v1537_v17  ;;  %v1665_v17 = vld [vmem:[%s16796_s0 + $0x1498] sm:$0xf] }
 0x2c0   : > { %1540 = vst [vmem:[%s16801_s6 + $0x950] sm:$0xf] %v1539_v18  ;;  %v1667_v18 = vld [vmem:[%s16796_s0 + $0x14a0] sm:$0xf] }
 0x2c1   : > { %1542 = vst [vmem:[%s16801_s6 + $0x954] sm:$0xf] %v1541_v19  ;;  %v1669_v19 = vld [vmem:[%s16796_s0 + $0x14a8] sm:$0xf] }
 0x2c2   : > { %1544 = vst [vmem:[%s16801_s6 + $0x958] sm:$0xf] %v1543_v20  ;;  %v1671_v20 = vld [vmem:[%s16796_s0 + $0x14b0] sm:$0xf] }
 0x2c3   : > { %1546 = vst [vmem:[%s16801_s6 + $0x95c] sm:$0xf] %v1545_v21  ;;  %v1673_v21 = vld [vmem:[%s16796_s0 + $0x14b8] sm:$0xf] }
 0x2c4   : > { %1548 = vst [vmem:[%s16801_s6 + $0x960] sm:$0xf] %v1547_v22  ;;  %v1675_v22 = vld [vmem:[%s16796_s0 + $0x14c0] sm:$0xf] }
 0x2c5   : > { %1550 = vst [vmem:[%s16801_s6 + $0x964] sm:$0xf] %v1549_v23  ;;  %v1677_v23 = vld [vmem:[%s16796_s0 + $0x14c8] sm:$0xf] }
 0x2c6   : > { %1552 = vst [vmem:[%s16801_s6 + $0x968] sm:$0xf] %v1551_v24  ;;  %v1679_v24 = vld [vmem:[%s16796_s0 + $0x14d0] sm:$0xf] }
 0x2c7   : > { %1554 = vst [vmem:[%s16801_s6 + $0x96c] sm:$0xf] %v1553_v25  ;;  %v1681_v25 = vld [vmem:[%s16796_s0 + $0x14d8] sm:$0xf] }
 0x2c8   : > { %1556 = vst [vmem:[%s16801_s6 + $0x970] sm:$0xf] %v1555_v26  ;;  %v1683_v26 = vld [vmem:[%s16796_s0 + $0x14e0] sm:$0xf] }
 0x2c9   : > { %1558 = vst [vmem:[%s16801_s6 + $0x974] sm:$0xf] %v1557_v27  ;;  %v1685_v27 = vld [vmem:[%s16796_s0 + $0x14e8] sm:$0xf] }
 0x2ca   : > { %1560 = vst [vmem:[%s16801_s6 + $0x978] sm:$0xf] %v1559_v28  ;;  %v1687_v28 = vld [vmem:[%s16796_s0 + $0x14f0] sm:$0xf] }
 0x2cb   : > { %1562 = vst [vmem:[%s16801_s6 + $0x97c] sm:$0xf] %v1561_v29  ;;  %v1689_v29 = vld [vmem:[%s16796_s0 + $0x14f8] sm:$0xf] }
 0x2cc   : > { %1564 = vst [vmem:[%s16801_s6 + $0x980] sm:$0xf] %v1563_v30  ;;  %v1691_v30 = vld [vmem:[%s16796_s0 + $0x1500] sm:$0xf] }
 0x2cd   : > { %1566 = vst [vmem:[%s16801_s6 + $0x984] sm:$0xf] %v1565_v31  ;;  %v1693_v31 = vld [vmem:[%s16796_s0 + $0x1508] sm:$0xf] }
 0x2ce   : > { %1568 = vst [vmem:[%s16801_s6 + $0x988] sm:$0xf] %v1567_v32  ;;  %v1695_v32 = vld [vmem:[%s16796_s0 + $0x1510] sm:$0xf] }
 0x2cf   : > { %1570 = vst [vmem:[%s16801_s6 + $0x98c] sm:$0xf] %v1569_v33  ;;  %v1697_v33 = vld [vmem:[%s16796_s0 + $0x1518] sm:$0xf] }
 0x2d0   : > { %1572 = vst [vmem:[%s16801_s6 + $0x990] sm:$0xf] %v1571_v34  ;;  %v1699_v34 = vld [vmem:[%s16796_s0 + $0x1520] sm:$0xf] }
 0x2d1   : > { %1574 = vst [vmem:[%s16801_s6 + $0x994] sm:$0xf] %v1573_v35  ;;  %v1701_v35 = vld [vmem:[%s16796_s0 + $0x1528] sm:$0xf] }
 0x2d2   : > { %1576 = vst [vmem:[%s16801_s6 + $0x998] sm:$0xf] %v1575_v36  ;;  %v1703_v36 = vld [vmem:[%s16796_s0 + $0x1530] sm:$0xf] }
 0x2d3   : > { %1578 = vst [vmem:[%s16801_s6 + $0x99c] sm:$0xf] %v1577_v37  ;;  %v1705_v37 = vld [vmem:[%s16796_s0 + $0x1538] sm:$0xf] }
 0x2d4   : > { %1580 = vst [vmem:[%s16801_s6 + $0x9a0] sm:$0xf] %v1579_v38  ;;  %v1707_v38 = vld [vmem:[%s16796_s0 + $0x1540] sm:$0xf] }
 0x2d5   : > { %1582 = vst [vmem:[%s16801_s6 + $0x9a4] sm:$0xf] %v1581_v39  ;;  %v1709_v39 = vld [vmem:[%s16796_s0 + $0x1548] sm:$0xf] }
 0x2d6   : > { %1584 = vst [vmem:[%s16801_s6 + $0x9a8] sm:$0xf] %v1583_v40  ;;  %v1711_v40 = vld [vmem:[%s16796_s0 + $0x1550] sm:$0xf] }
 0x2d7   : > { %1586 = vst [vmem:[%s16801_s6 + $0x9ac] sm:$0xf] %v1585_v41  ;;  %v1713_v41 = vld [vmem:[%s16796_s0 + $0x1558] sm:$0xf] }
 0x2d8   : > { %1588 = vst [vmem:[%s16801_s6 + $0x9b0] sm:$0xf] %v1587_v42  ;;  %v1715_v42 = vld [vmem:[%s16796_s0 + $0x1560] sm:$0xf] }
 0x2d9   : > { %1590 = vst [vmem:[%s16801_s6 + $0x9b4] sm:$0xf] %v1589_v43  ;;  %v1717_v43 = vld [vmem:[%s16796_s0 + $0x1568] sm:$0xf] }
 0x2da   : > { %1592 = vst [vmem:[%s16801_s6 + $0x9b8] sm:$0xf] %v1591_v44  ;;  %v1719_v44 = vld [vmem:[%s16796_s0 + $0x1570] sm:$0xf] }
 0x2db   : > { %1594 = vst [vmem:[%s16801_s6 + $0x9bc] sm:$0xf] %v1593_v45  ;;  %v1721_v45 = vld [vmem:[%s16796_s0 + $0x1578] sm:$0xf] }
 0x2dc   : > { %1596 = vst [vmem:[%s16801_s6 + $0x9c0] sm:$0xf] %v1595_v46  ;;  %v1723_v46 = vld [vmem:[%s16796_s0 + $0x1580] sm:$0xf] }
 0x2dd   : > { %1598 = vst [vmem:[%s16801_s6 + $0x9c4] sm:$0xf] %v1597_v47  ;;  %v1725_v47 = vld [vmem:[%s16796_s0 + $0x1588] sm:$0xf] }
 0x2de   : > { %1600 = vst [vmem:[%s16801_s6 + $0x9c8] sm:$0xf] %v1599_v48  ;;  %v1727_v48 = vld [vmem:[%s16796_s0 + $0x1590] sm:$0xf] }
 0x2df   : > { %1602 = vst [vmem:[%s16801_s6 + $0x9cc] sm:$0xf] %v1601_v49  ;;  %v1729_v49 = vld [vmem:[%s16796_s0 + $0x1598] sm:$0xf] }
 0x2e0   : > { %1604 = vst [vmem:[%s16801_s6 + $0x9d0] sm:$0xf] %v1603_v50  ;;  %v1731_v50 = vld [vmem:[%s16796_s0 + $0x15a0] sm:$0xf] }
 0x2e1   : > { %1606 = vst [vmem:[%s16801_s6 + $0x9d4] sm:$0xf] %v1605_v51  ;;  %v1733_v51 = vld [vmem:[%s16796_s0 + $0x15a8] sm:$0xf] }
 0x2e2   : > { %1608 = vst [vmem:[%s16801_s6 + $0x9d8] sm:$0xf] %v1607_v52  ;;  %v1735_v52 = vld [vmem:[%s16796_s0 + $0x15b0] sm:$0xf] }
 0x2e3   : > { %1610 = vst [vmem:[%s16801_s6 + $0x9dc] sm:$0xf] %v1609_v53  ;;  %v1737_v53 = vld [vmem:[%s16796_s0 + $0x15b8] sm:$0xf] }
 0x2e4   : > { %1612 = vst [vmem:[%s16801_s6 + $0x9e0] sm:$0xf] %v1611_v54  ;;  %v1739_v54 = vld [vmem:[%s16796_s0 + $0x15c0] sm:$0xf] }
 0x2e5   : > { %1614 = vst [vmem:[%s16801_s6 + $0x9e4] sm:$0xf] %v1613_v55  ;;  %v1741_v55 = vld [vmem:[%s16796_s0 + $0x15c8] sm:$0xf] }
 0x2e6   : > { %1616 = vst [vmem:[%s16801_s6 + $0x9e8] sm:$0xf] %v1615_v56  ;;  %v1743_v56 = vld [vmem:[%s16796_s0 + $0x15d0] sm:$0xf] }
 0x2e7   : > { %1618 = vst [vmem:[%s16801_s6 + $0x9ec] sm:$0xf] %v1617_v57  ;;  %v1745_v57 = vld [vmem:[%s16796_s0 + $0x15d8] sm:$0xf] }
 0x2e8   : > { %1620 = vst [vmem:[%s16801_s6 + $0x9f0] sm:$0xf] %v1619_v58  ;;  %v1747_v58 = vld [vmem:[%s16796_s0 + $0x15e0] sm:$0xf] }
 0x2e9   : > { %1622 = vst [vmem:[%s16801_s6 + $0x9f4] sm:$0xf] %v1621_v59  ;;  %v1749_v59 = vld [vmem:[%s16796_s0 + $0x15e8] sm:$0xf] }
 0x2ea   : > { %1624 = vst [vmem:[%s16801_s6 + $0x9f8] sm:$0xf] %v1623_v60  ;;  %v1751_v60 = vld [vmem:[%s16796_s0 + $0x15f0] sm:$0xf] }
 0x2eb   : > { %1626 = vst [vmem:[%s16801_s6 + $0x9fc] sm:$0xf] %v1625_v61  ;;  %v1753_v61 = vld [vmem:[%s16796_s0 + $0x15f8] sm:$0xf] }
 0x2ec   : > { %1628 = vst [vmem:[%s16801_s6 + $0xa00] sm:$0xf] %v1627_v62  ;;  %v1755_v62 = vld [vmem:[%s16796_s0 + $0x1600] sm:$0xf] }
 0x2ed   : > { %1630 = vst [vmem:[%s16801_s6 + $0xa04] sm:$0xf] %v1629_v63  ;;  %v1757_v63 = vld [vmem:[%s16796_s0 + $0x1608] sm:$0xf] }
 0x2ee   : > { %1632 = vst [vmem:[%s16801_s6 + $0xa08] sm:$0xf] %v1631_v0  ;;  %v1759_v0 = vld [vmem:[%s16796_s0 + $0x1610] sm:$0xf] }
 0x2ef   : > { %1634 = vst [vmem:[%s16801_s6 + $0xa0c] sm:$0xf] %v1633_v1  ;;  %v1761_v1 = vld [vmem:[%s16796_s0 + $0x1618] sm:$0xf] }
 0x2f0   : > { %1636 = vst [vmem:[%s16801_s6 + $0xa10] sm:$0xf] %v1635_v2  ;;  %v1763_v2 = vld [vmem:[%s16796_s0 + $0x1620] sm:$0xf] }
 0x2f1   : > { %1638 = vst [vmem:[%s16801_s6 + $0xa14] sm:$0xf] %v1637_v3  ;;  %v1765_v3 = vld [vmem:[%s16796_s0 + $0x1628] sm:$0xf] }
 0x2f2   : > { %1640 = vst [vmem:[%s16801_s6 + $0xa18] sm:$0xf] %v1639_v4  ;;  %v1767_v4 = vld [vmem:[%s16796_s0 + $0x1630] sm:$0xf] }
 0x2f3   : > { %1642 = vst [vmem:[%s16801_s6 + $0xa1c] sm:$0xf] %v1641_v5  ;;  %v1769_v5 = vld [vmem:[%s16796_s0 + $0x1638] sm:$0xf] }
 0x2f4   : > { %1644 = vst [vmem:[%s16801_s6 + $0xa20] sm:$0xf] %v1643_v6  ;;  %v1771_v6 = vld [vmem:[%s16796_s0 + $0x1640] sm:$0xf] }
 0x2f5   : > { %1646 = vst [vmem:[%s16801_s6 + $0xa24] sm:$0xf] %v1645_v7  ;;  %v1773_v7 = vld [vmem:[%s16796_s0 + $0x1648] sm:$0xf] }
 0x2f6   : > { %1648 = vst [vmem:[%s16801_s6 + $0xa28] sm:$0xf] %v1647_v8  ;;  %v1775_v8 = vld [vmem:[%s16796_s0 + $0x1650] sm:$0xf] }
 0x2f7   : > { %1650 = vst [vmem:[%s16801_s6 + $0xa2c] sm:$0xf] %v1649_v9  ;;  %v1777_v9 = vld [vmem:[%s16796_s0 + $0x1658] sm:$0xf] }
 0x2f8   : > { %1652 = vst [vmem:[%s16801_s6 + $0xa30] sm:$0xf] %v1651_v10  ;;  %v1779_v10 = vld [vmem:[%s16796_s0 + $0x1660] sm:$0xf] }
 0x2f9   : > { %1654 = vst [vmem:[%s16801_s6 + $0xa34] sm:$0xf] %v1653_v11  ;;  %v1781_v11 = vld [vmem:[%s16796_s0 + $0x1668] sm:$0xf] }
 0x2fa   : > { %1656 = vst [vmem:[%s16801_s6 + $0xa38] sm:$0xf] %v1655_v12  ;;  %v1783_v12 = vld [vmem:[%s16796_s0 + $0x1670] sm:$0xf] }
 0x2fb   : > { %1658 = vst [vmem:[%s16801_s6 + $0xa3c] sm:$0xf] %v1657_v13  ;;  %v1785_v13 = vld [vmem:[%s16796_s0 + $0x1678] sm:$0xf] }
 0x2fc   : > { %1660 = vst [vmem:[%s16801_s6 + $0xa40] sm:$0xf] %v1659_v14  ;;  %v1787_v14 = vld [vmem:[%s16796_s0 + $0x1680] sm:$0xf] }
 0x2fd   : > { %1662 = vst [vmem:[%s16801_s6 + $0xa44] sm:$0xf] %v1661_v15  ;;  %v1789_v15 = vld [vmem:[%s16796_s0 + $0x1688] sm:$0xf] }
 0x2fe   : > { %1664 = vst [vmem:[%s16801_s6 + $0xa48] sm:$0xf] %v1663_v16  ;;  %v1791_v16 = vld [vmem:[%s16796_s0 + $0x1690] sm:$0xf] }
 0x2ff   : > { %1666 = vst [vmem:[%s16801_s6 + $0xa4c] sm:$0xf] %v1665_v17  ;;  %v1793_v17 = vld [vmem:[%s16796_s0 + $0x1698] sm:$0xf] }
 0x300   : > { %1668 = vst [vmem:[%s16801_s6 + $0xa50] sm:$0xf] %v1667_v18  ;;  %v1795_v18 = vld [vmem:[%s16796_s0 + $0x16a0] sm:$0xf] }
 0x301   : > { %1670 = vst [vmem:[%s16801_s6 + $0xa54] sm:$0xf] %v1669_v19  ;;  %v1797_v19 = vld [vmem:[%s16796_s0 + $0x16a8] sm:$0xf] }
 0x302   : > { %1672 = vst [vmem:[%s16801_s6 + $0xa58] sm:$0xf] %v1671_v20  ;;  %v1799_v20 = vld [vmem:[%s16796_s0 + $0x16b0] sm:$0xf] }
 0x303   : > { %1674 = vst [vmem:[%s16801_s6 + $0xa5c] sm:$0xf] %v1673_v21  ;;  %v1801_v21 = vld [vmem:[%s16796_s0 + $0x16b8] sm:$0xf] }
 0x304   : > { %1676 = vst [vmem:[%s16801_s6 + $0xa60] sm:$0xf] %v1675_v22  ;;  %v1803_v22 = vld [vmem:[%s16796_s0 + $0x16c0] sm:$0xf] }
 0x305   : > { %1678 = vst [vmem:[%s16801_s6 + $0xa64] sm:$0xf] %v1677_v23  ;;  %v1805_v23 = vld [vmem:[%s16796_s0 + $0x16c8] sm:$0xf] }
 0x306   : > { %1680 = vst [vmem:[%s16801_s6 + $0xa68] sm:$0xf] %v1679_v24  ;;  %v1807_v24 = vld [vmem:[%s16796_s0 + $0x16d0] sm:$0xf] }
 0x307   : > { %1682 = vst [vmem:[%s16801_s6 + $0xa6c] sm:$0xf] %v1681_v25  ;;  %v1809_v25 = vld [vmem:[%s16796_s0 + $0x16d8] sm:$0xf] }
 0x308   : > { %1684 = vst [vmem:[%s16801_s6 + $0xa70] sm:$0xf] %v1683_v26  ;;  %v1811_v26 = vld [vmem:[%s16796_s0 + $0x16e0] sm:$0xf] }
 0x309   : > { %1686 = vst [vmem:[%s16801_s6 + $0xa74] sm:$0xf] %v1685_v27  ;;  %v1813_v27 = vld [vmem:[%s16796_s0 + $0x16e8] sm:$0xf] }
 0x30a   : > { %1688 = vst [vmem:[%s16801_s6 + $0xa78] sm:$0xf] %v1687_v28  ;;  %v1815_v28 = vld [vmem:[%s16796_s0 + $0x16f0] sm:$0xf] }
 0x30b   : > { %1690 = vst [vmem:[%s16801_s6 + $0xa7c] sm:$0xf] %v1689_v29  ;;  %v1817_v29 = vld [vmem:[%s16796_s0 + $0x16f8] sm:$0xf] }
 0x30c   : > { %1692 = vst [vmem:[%s16801_s6 + $0xa80] sm:$0xf] %v1691_v30  ;;  %v1819_v30 = vld [vmem:[%s16796_s0 + $0x1700] sm:$0xf] }
 0x30d   : > { %1694 = vst [vmem:[%s16801_s6 + $0xa84] sm:$0xf] %v1693_v31  ;;  %v1821_v31 = vld [vmem:[%s16796_s0 + $0x1708] sm:$0xf] }
 0x30e   : > { %1696 = vst [vmem:[%s16801_s6 + $0xa88] sm:$0xf] %v1695_v32  ;;  %v1823_v32 = vld [vmem:[%s16796_s0 + $0x1710] sm:$0xf] }
 0x30f   : > { %1698 = vst [vmem:[%s16801_s6 + $0xa8c] sm:$0xf] %v1697_v33  ;;  %v1825_v33 = vld [vmem:[%s16796_s0 + $0x1718] sm:$0xf] }
 0x310   : > { %1700 = vst [vmem:[%s16801_s6 + $0xa90] sm:$0xf] %v1699_v34  ;;  %v1827_v34 = vld [vmem:[%s16796_s0 + $0x1720] sm:$0xf] }
 0x311   : > { %1702 = vst [vmem:[%s16801_s6 + $0xa94] sm:$0xf] %v1701_v35  ;;  %v1829_v35 = vld [vmem:[%s16796_s0 + $0x1728] sm:$0xf] }
 0x312   : > { %1704 = vst [vmem:[%s16801_s6 + $0xa98] sm:$0xf] %v1703_v36  ;;  %v1831_v36 = vld [vmem:[%s16796_s0 + $0x1730] sm:$0xf] }
 0x313   : > { %1706 = vst [vmem:[%s16801_s6 + $0xa9c] sm:$0xf] %v1705_v37  ;;  %v1833_v37 = vld [vmem:[%s16796_s0 + $0x1738] sm:$0xf] }
 0x314   : > { %1708 = vst [vmem:[%s16801_s6 + $0xaa0] sm:$0xf] %v1707_v38  ;;  %v1835_v38 = vld [vmem:[%s16796_s0 + $0x1740] sm:$0xf] }
 0x315   : > { %1710 = vst [vmem:[%s16801_s6 + $0xaa4] sm:$0xf] %v1709_v39  ;;  %v1837_v39 = vld [vmem:[%s16796_s0 + $0x1748] sm:$0xf] }
 0x316   : > { %1712 = vst [vmem:[%s16801_s6 + $0xaa8] sm:$0xf] %v1711_v40  ;;  %v1839_v40 = vld [vmem:[%s16796_s0 + $0x1750] sm:$0xf] }
 0x317   : > { %1714 = vst [vmem:[%s16801_s6 + $0xaac] sm:$0xf] %v1713_v41  ;;  %v1841_v41 = vld [vmem:[%s16796_s0 + $0x1758] sm:$0xf] }
 0x318   : > { %1716 = vst [vmem:[%s16801_s6 + $0xab0] sm:$0xf] %v1715_v42  ;;  %v1843_v42 = vld [vmem:[%s16796_s0 + $0x1760] sm:$0xf] }
 0x319   : > { %1718 = vst [vmem:[%s16801_s6 + $0xab4] sm:$0xf] %v1717_v43  ;;  %v1845_v43 = vld [vmem:[%s16796_s0 + $0x1768] sm:$0xf] }
 0x31a   : > { %1720 = vst [vmem:[%s16801_s6 + $0xab8] sm:$0xf] %v1719_v44  ;;  %v1847_v44 = vld [vmem:[%s16796_s0 + $0x1770] sm:$0xf] }
 0x31b   : > { %1722 = vst [vmem:[%s16801_s6 + $0xabc] sm:$0xf] %v1721_v45  ;;  %v1849_v45 = vld [vmem:[%s16796_s0 + $0x1778] sm:$0xf] }
 0x31c   : > { %1724 = vst [vmem:[%s16801_s6 + $0xac0] sm:$0xf] %v1723_v46  ;;  %v1851_v46 = vld [vmem:[%s16796_s0 + $0x1780] sm:$0xf] }
 0x31d   : > { %1726 = vst [vmem:[%s16801_s6 + $0xac4] sm:$0xf] %v1725_v47  ;;  %v1853_v47 = vld [vmem:[%s16796_s0 + $0x1788] sm:$0xf] }
 0x31e   : > { %1728 = vst [vmem:[%s16801_s6 + $0xac8] sm:$0xf] %v1727_v48  ;;  %v1855_v48 = vld [vmem:[%s16796_s0 + $0x1790] sm:$0xf] }
 0x31f   : > { %1730 = vst [vmem:[%s16801_s6 + $0xacc] sm:$0xf] %v1729_v49  ;;  %v1857_v49 = vld [vmem:[%s16796_s0 + $0x1798] sm:$0xf] }
 0x320   : > { %1732 = vst [vmem:[%s16801_s6 + $0xad0] sm:$0xf] %v1731_v50  ;;  %v1859_v50 = vld [vmem:[%s16796_s0 + $0x17a0] sm:$0xf] }
 0x321   : > { %1734 = vst [vmem:[%s16801_s6 + $0xad4] sm:$0xf] %v1733_v51  ;;  %v1861_v51 = vld [vmem:[%s16796_s0 + $0x17a8] sm:$0xf] }
 0x322   : > { %1736 = vst [vmem:[%s16801_s6 + $0xad8] sm:$0xf] %v1735_v52  ;;  %v1863_v52 = vld [vmem:[%s16796_s0 + $0x17b0] sm:$0xf] }
 0x323   : > { %1738 = vst [vmem:[%s16801_s6 + $0xadc] sm:$0xf] %v1737_v53  ;;  %v1865_v53 = vld [vmem:[%s16796_s0 + $0x17b8] sm:$0xf] }
 0x324   : > { %1740 = vst [vmem:[%s16801_s6 + $0xae0] sm:$0xf] %v1739_v54  ;;  %v1867_v54 = vld [vmem:[%s16796_s0 + $0x17c0] sm:$0xf] }
 0x325   : > { %1742 = vst [vmem:[%s16801_s6 + $0xae4] sm:$0xf] %v1741_v55  ;;  %v1869_v55 = vld [vmem:[%s16796_s0 + $0x17c8] sm:$0xf] }
 0x326   : > { %1744 = vst [vmem:[%s16801_s6 + $0xae8] sm:$0xf] %v1743_v56  ;;  %v1871_v56 = vld [vmem:[%s16796_s0 + $0x17d0] sm:$0xf] }
 0x327   : > { %1746 = vst [vmem:[%s16801_s6 + $0xaec] sm:$0xf] %v1745_v57  ;;  %v1873_v57 = vld [vmem:[%s16796_s0 + $0x17d8] sm:$0xf] }
 0x328   : > { %1748 = vst [vmem:[%s16801_s6 + $0xaf0] sm:$0xf] %v1747_v58  ;;  %v1875_v58 = vld [vmem:[%s16796_s0 + $0x17e0] sm:$0xf] }
 0x329   : > { %1750 = vst [vmem:[%s16801_s6 + $0xaf4] sm:$0xf] %v1749_v59  ;;  %v1877_v59 = vld [vmem:[%s16796_s0 + $0x17e8] sm:$0xf] }
 0x32a   : > { %1752 = vst [vmem:[%s16801_s6 + $0xaf8] sm:$0xf] %v1751_v60  ;;  %v1879_v60 = vld [vmem:[%s16796_s0 + $0x17f0] sm:$0xf] }
 0x32b   : > { %1754 = vst [vmem:[%s16801_s6 + $0xafc] sm:$0xf] %v1753_v61  ;;  %v1881_v61 = vld [vmem:[%s16796_s0 + $0x17f8] sm:$0xf] }
 0x32c   : > { %1756 = vst [vmem:[%s16801_s6 + $0xb00] sm:$0xf] %v1755_v62  ;;  %v1883_v62 = vld [vmem:[%s16796_s0 + $0x1800] sm:$0xf] }
 0x32d   : > { %1758 = vst [vmem:[%s16801_s6 + $0xb04] sm:$0xf] %v1757_v63  ;;  %v1885_v63 = vld [vmem:[%s16796_s0 + $0x1808] sm:$0xf] }
 0x32e   : > { %1760 = vst [vmem:[%s16801_s6 + $0xb08] sm:$0xf] %v1759_v0  ;;  %v1887_v0 = vld [vmem:[%s16796_s0 + $0x1810] sm:$0xf] }
 0x32f   : > { %1762 = vst [vmem:[%s16801_s6 + $0xb0c] sm:$0xf] %v1761_v1  ;;  %v1889_v1 = vld [vmem:[%s16796_s0 + $0x1818] sm:$0xf] }
 0x330   : > { %1764 = vst [vmem:[%s16801_s6 + $0xb10] sm:$0xf] %v1763_v2  ;;  %v1891_v2 = vld [vmem:[%s16796_s0 + $0x1820] sm:$0xf] }
 0x331   : > { %1766 = vst [vmem:[%s16801_s6 + $0xb14] sm:$0xf] %v1765_v3  ;;  %v1893_v3 = vld [vmem:[%s16796_s0 + $0x1828] sm:$0xf] }
 0x332   : > { %1768 = vst [vmem:[%s16801_s6 + $0xb18] sm:$0xf] %v1767_v4  ;;  %v1895_v4 = vld [vmem:[%s16796_s0 + $0x1830] sm:$0xf] }
 0x333   : > { %1770 = vst [vmem:[%s16801_s6 + $0xb1c] sm:$0xf] %v1769_v5  ;;  %v1897_v5 = vld [vmem:[%s16796_s0 + $0x1838] sm:$0xf] }
 0x334   : > { %1772 = vst [vmem:[%s16801_s6 + $0xb20] sm:$0xf] %v1771_v6  ;;  %v1899_v6 = vld [vmem:[%s16796_s0 + $0x1840] sm:$0xf] }
 0x335   : > { %1774 = vst [vmem:[%s16801_s6 + $0xb24] sm:$0xf] %v1773_v7  ;;  %v1901_v7 = vld [vmem:[%s16796_s0 + $0x1848] sm:$0xf] }
 0x336   : > { %1776 = vst [vmem:[%s16801_s6 + $0xb28] sm:$0xf] %v1775_v8  ;;  %v1903_v8 = vld [vmem:[%s16796_s0 + $0x1850] sm:$0xf] }
 0x337   : > { %1778 = vst [vmem:[%s16801_s6 + $0xb2c] sm:$0xf] %v1777_v9  ;;  %v1905_v9 = vld [vmem:[%s16796_s0 + $0x1858] sm:$0xf] }
 0x338   : > { %1780 = vst [vmem:[%s16801_s6 + $0xb30] sm:$0xf] %v1779_v10  ;;  %v1907_v10 = vld [vmem:[%s16796_s0 + $0x1860] sm:$0xf] }
 0x339   : > { %1782 = vst [vmem:[%s16801_s6 + $0xb34] sm:$0xf] %v1781_v11  ;;  %v1909_v11 = vld [vmem:[%s16796_s0 + $0x1868] sm:$0xf] }
 0x33a   : > { %1784 = vst [vmem:[%s16801_s6 + $0xb38] sm:$0xf] %v1783_v12  ;;  %v1911_v12 = vld [vmem:[%s16796_s0 + $0x1870] sm:$0xf] }
 0x33b   : > { %1786 = vst [vmem:[%s16801_s6 + $0xb3c] sm:$0xf] %v1785_v13  ;;  %v1913_v13 = vld [vmem:[%s16796_s0 + $0x1878] sm:$0xf] }
 0x33c   : > { %1788 = vst [vmem:[%s16801_s6 + $0xb40] sm:$0xf] %v1787_v14  ;;  %v1915_v14 = vld [vmem:[%s16796_s0 + $0x1880] sm:$0xf] }
 0x33d   : > { %1790 = vst [vmem:[%s16801_s6 + $0xb44] sm:$0xf] %v1789_v15  ;;  %v1917_v15 = vld [vmem:[%s16796_s0 + $0x1888] sm:$0xf] }
 0x33e   : > { %1792 = vst [vmem:[%s16801_s6 + $0xb48] sm:$0xf] %v1791_v16  ;;  %v1919_v16 = vld [vmem:[%s16796_s0 + $0x1890] sm:$0xf] }
 0x33f   : > { %1794 = vst [vmem:[%s16801_s6 + $0xb4c] sm:$0xf] %v1793_v17  ;;  %v1921_v17 = vld [vmem:[%s16796_s0 + $0x1898] sm:$0xf] }
 0x340   : > { %1796 = vst [vmem:[%s16801_s6 + $0xb50] sm:$0xf] %v1795_v18  ;;  %v1923_v18 = vld [vmem:[%s16796_s0 + $0x18a0] sm:$0xf] }
 0x341   : > { %1798 = vst [vmem:[%s16801_s6 + $0xb54] sm:$0xf] %v1797_v19  ;;  %v1925_v19 = vld [vmem:[%s16796_s0 + $0x18a8] sm:$0xf] }
 0x342   : > { %1800 = vst [vmem:[%s16801_s6 + $0xb58] sm:$0xf] %v1799_v20  ;;  %v1927_v20 = vld [vmem:[%s16796_s0 + $0x18b0] sm:$0xf] }
 0x343   : > { %1802 = vst [vmem:[%s16801_s6 + $0xb5c] sm:$0xf] %v1801_v21  ;;  %v1929_v21 = vld [vmem:[%s16796_s0 + $0x18b8] sm:$0xf] }
 0x344   : > { %1804 = vst [vmem:[%s16801_s6 + $0xb60] sm:$0xf] %v1803_v22  ;;  %v1931_v22 = vld [vmem:[%s16796_s0 + $0x18c0] sm:$0xf] }
 0x345   : > { %1806 = vst [vmem:[%s16801_s6 + $0xb64] sm:$0xf] %v1805_v23  ;;  %v1933_v23 = vld [vmem:[%s16796_s0 + $0x18c8] sm:$0xf] }
 0x346   : > { %1808 = vst [vmem:[%s16801_s6 + $0xb68] sm:$0xf] %v1807_v24  ;;  %v1935_v24 = vld [vmem:[%s16796_s0 + $0x18d0] sm:$0xf] }
 0x347   : > { %1810 = vst [vmem:[%s16801_s6 + $0xb6c] sm:$0xf] %v1809_v25  ;;  %v1937_v25 = vld [vmem:[%s16796_s0 + $0x18d8] sm:$0xf] }
 0x348   : > { %1812 = vst [vmem:[%s16801_s6 + $0xb70] sm:$0xf] %v1811_v26  ;;  %v1939_v26 = vld [vmem:[%s16796_s0 + $0x18e0] sm:$0xf] }
 0x349   : > { %1814 = vst [vmem:[%s16801_s6 + $0xb74] sm:$0xf] %v1813_v27  ;;  %v1941_v27 = vld [vmem:[%s16796_s0 + $0x18e8] sm:$0xf] }
 0x34a   : > { %1816 = vst [vmem:[%s16801_s6 + $0xb78] sm:$0xf] %v1815_v28  ;;  %v1943_v28 = vld [vmem:[%s16796_s0 + $0x18f0] sm:$0xf] }
 0x34b   : > { %1818 = vst [vmem:[%s16801_s6 + $0xb7c] sm:$0xf] %v1817_v29  ;;  %v1945_v29 = vld [vmem:[%s16796_s0 + $0x18f8] sm:$0xf] }
 0x34c   : > { %1820 = vst [vmem:[%s16801_s6 + $0xb80] sm:$0xf] %v1819_v30  ;;  %v1947_v30 = vld [vmem:[%s16796_s0 + $0x1900] sm:$0xf] }
 0x34d   : > { %1822 = vst [vmem:[%s16801_s6 + $0xb84] sm:$0xf] %v1821_v31  ;;  %v1949_v31 = vld [vmem:[%s16796_s0 + $0x1908] sm:$0xf] }
 0x34e   : > { %1824 = vst [vmem:[%s16801_s6 + $0xb88] sm:$0xf] %v1823_v32  ;;  %v1951_v32 = vld [vmem:[%s16796_s0 + $0x1910] sm:$0xf] }
 0x34f   : > { %1826 = vst [vmem:[%s16801_s6 + $0xb8c] sm:$0xf] %v1825_v33  ;;  %v1953_v33 = vld [vmem:[%s16796_s0 + $0x1918] sm:$0xf] }
 0x350   : > { %1828 = vst [vmem:[%s16801_s6 + $0xb90] sm:$0xf] %v1827_v34  ;;  %v1955_v34 = vld [vmem:[%s16796_s0 + $0x1920] sm:$0xf] }
 0x351   : > { %1830 = vst [vmem:[%s16801_s6 + $0xb94] sm:$0xf] %v1829_v35  ;;  %v1957_v35 = vld [vmem:[%s16796_s0 + $0x1928] sm:$0xf] }
 0x352   : > { %1832 = vst [vmem:[%s16801_s6 + $0xb98] sm:$0xf] %v1831_v36  ;;  %v1959_v36 = vld [vmem:[%s16796_s0 + $0x1930] sm:$0xf] }
 0x353   : > { %1834 = vst [vmem:[%s16801_s6 + $0xb9c] sm:$0xf] %v1833_v37  ;;  %v1961_v37 = vld [vmem:[%s16796_s0 + $0x1938] sm:$0xf] }
 0x354   : > { %1836 = vst [vmem:[%s16801_s6 + $0xba0] sm:$0xf] %v1835_v38  ;;  %v1963_v38 = vld [vmem:[%s16796_s0 + $0x1940] sm:$0xf] }
 0x355   : > { %1838 = vst [vmem:[%s16801_s6 + $0xba4] sm:$0xf] %v1837_v39  ;;  %v1965_v39 = vld [vmem:[%s16796_s0 + $0x1948] sm:$0xf] }
 0x356   : > { %1840 = vst [vmem:[%s16801_s6 + $0xba8] sm:$0xf] %v1839_v40  ;;  %v1967_v40 = vld [vmem:[%s16796_s0 + $0x1950] sm:$0xf] }
 0x357   : > { %1842 = vst [vmem:[%s16801_s6 + $0xbac] sm:$0xf] %v1841_v41  ;;  %v1969_v41 = vld [vmem:[%s16796_s0 + $0x1958] sm:$0xf] }
 0x358   : > { %1844 = vst [vmem:[%s16801_s6 + $0xbb0] sm:$0xf] %v1843_v42  ;;  %v1971_v42 = vld [vmem:[%s16796_s0 + $0x1960] sm:$0xf] }
 0x359   : > { %1846 = vst [vmem:[%s16801_s6 + $0xbb4] sm:$0xf] %v1845_v43  ;;  %v1973_v43 = vld [vmem:[%s16796_s0 + $0x1968] sm:$0xf] }
 0x35a   : > { %1848 = vst [vmem:[%s16801_s6 + $0xbb8] sm:$0xf] %v1847_v44  ;;  %v1975_v44 = vld [vmem:[%s16796_s0 + $0x1970] sm:$0xf] }
 0x35b   : > { %1850 = vst [vmem:[%s16801_s6 + $0xbbc] sm:$0xf] %v1849_v45  ;;  %v1977_v45 = vld [vmem:[%s16796_s0 + $0x1978] sm:$0xf] }
 0x35c   : > { %1852 = vst [vmem:[%s16801_s6 + $0xbc0] sm:$0xf] %v1851_v46  ;;  %v1979_v46 = vld [vmem:[%s16796_s0 + $0x1980] sm:$0xf] }
 0x35d   : > { %1854 = vst [vmem:[%s16801_s6 + $0xbc4] sm:$0xf] %v1853_v47  ;;  %v1981_v47 = vld [vmem:[%s16796_s0 + $0x1988] sm:$0xf] }
 0x35e   : > { %1856 = vst [vmem:[%s16801_s6 + $0xbc8] sm:$0xf] %v1855_v48  ;;  %v1983_v48 = vld [vmem:[%s16796_s0 + $0x1990] sm:$0xf] }
 0x35f   : > { %1858 = vst [vmem:[%s16801_s6 + $0xbcc] sm:$0xf] %v1857_v49  ;;  %v1985_v49 = vld [vmem:[%s16796_s0 + $0x1998] sm:$0xf] }
 0x360   : > { %1860 = vst [vmem:[%s16801_s6 + $0xbd0] sm:$0xf] %v1859_v50  ;;  %v1987_v50 = vld [vmem:[%s16796_s0 + $0x19a0] sm:$0xf] }
 0x361   : > { %1862 = vst [vmem:[%s16801_s6 + $0xbd4] sm:$0xf] %v1861_v51  ;;  %v1989_v51 = vld [vmem:[%s16796_s0 + $0x19a8] sm:$0xf] }
 0x362   : > { %1864 = vst [vmem:[%s16801_s6 + $0xbd8] sm:$0xf] %v1863_v52  ;;  %v1991_v52 = vld [vmem:[%s16796_s0 + $0x19b0] sm:$0xf] }
 0x363   : > { %1866 = vst [vmem:[%s16801_s6 + $0xbdc] sm:$0xf] %v1865_v53  ;;  %v1993_v53 = vld [vmem:[%s16796_s0 + $0x19b8] sm:$0xf] }
 0x364   : > { %1868 = vst [vmem:[%s16801_s6 + $0xbe0] sm:$0xf] %v1867_v54  ;;  %v1995_v54 = vld [vmem:[%s16796_s0 + $0x19c0] sm:$0xf] }
 0x365   : > { %1870 = vst [vmem:[%s16801_s6 + $0xbe4] sm:$0xf] %v1869_v55  ;;  %v1997_v55 = vld [vmem:[%s16796_s0 + $0x19c8] sm:$0xf] }
 0x366   : > { %1872 = vst [vmem:[%s16801_s6 + $0xbe8] sm:$0xf] %v1871_v56  ;;  %v1999_v56 = vld [vmem:[%s16796_s0 + $0x19d0] sm:$0xf] }
 0x367   : > { %1874 = vst [vmem:[%s16801_s6 + $0xbec] sm:$0xf] %v1873_v57  ;;  %v2001_v57 = vld [vmem:[%s16796_s0 + $0x19d8] sm:$0xf] }
 0x368   : > { %1876 = vst [vmem:[%s16801_s6 + $0xbf0] sm:$0xf] %v1875_v58  ;;  %v2003_v58 = vld [vmem:[%s16796_s0 + $0x19e0] sm:$0xf] }
 0x369   : > { %1878 = vst [vmem:[%s16801_s6 + $0xbf4] sm:$0xf] %v1877_v59  ;;  %v2005_v59 = vld [vmem:[%s16796_s0 + $0x19e8] sm:$0xf] }
 0x36a   : > { %1880 = vst [vmem:[%s16801_s6 + $0xbf8] sm:$0xf] %v1879_v60  ;;  %v2007_v60 = vld [vmem:[%s16796_s0 + $0x19f0] sm:$0xf] }
 0x36b   : > { %1882 = vst [vmem:[%s16801_s6 + $0xbfc] sm:$0xf] %v1881_v61  ;;  %v2009_v61 = vld [vmem:[%s16796_s0 + $0x19f8] sm:$0xf] }
 0x36c   : > { %1884 = vst [vmem:[%s16801_s6 + $0xc00] sm:$0xf] %v1883_v62  ;;  %v2011_v62 = vld [vmem:[%s16796_s0 + $0x1a00] sm:$0xf] }
 0x36d   : > { %1886 = vst [vmem:[%s16801_s6 + $0xc04] sm:$0xf] %v1885_v63  ;;  %v2013_v63 = vld [vmem:[%s16796_s0 + $0x1a08] sm:$0xf] }
 0x36e   : > { %1888 = vst [vmem:[%s16801_s6 + $0xc08] sm:$0xf] %v1887_v0  ;;  %v2015_v0 = vld [vmem:[%s16796_s0 + $0x1a10] sm:$0xf] }
 0x36f   : > { %1890 = vst [vmem:[%s16801_s6 + $0xc0c] sm:$0xf] %v1889_v1  ;;  %v2017_v1 = vld [vmem:[%s16796_s0 + $0x1a18] sm:$0xf] }
 0x370   : > { %1892 = vst [vmem:[%s16801_s6 + $0xc10] sm:$0xf] %v1891_v2  ;;  %v2019_v2 = vld [vmem:[%s16796_s0 + $0x1a20] sm:$0xf] }
 0x371   : > { %1894 = vst [vmem:[%s16801_s6 + $0xc14] sm:$0xf] %v1893_v3  ;;  %v2021_v3 = vld [vmem:[%s16796_s0 + $0x1a28] sm:$0xf] }
 0x372   : > { %1896 = vst [vmem:[%s16801_s6 + $0xc18] sm:$0xf] %v1895_v4  ;;  %v2023_v4 = vld [vmem:[%s16796_s0 + $0x1a30] sm:$0xf] }
 0x373   : > { %1898 = vst [vmem:[%s16801_s6 + $0xc1c] sm:$0xf] %v1897_v5  ;;  %v2025_v5 = vld [vmem:[%s16796_s0 + $0x1a38] sm:$0xf] }
 0x374   : > { %1900 = vst [vmem:[%s16801_s6 + $0xc20] sm:$0xf] %v1899_v6  ;;  %v2027_v6 = vld [vmem:[%s16796_s0 + $0x1a40] sm:$0xf] }
 0x375   : > { %1902 = vst [vmem:[%s16801_s6 + $0xc24] sm:$0xf] %v1901_v7  ;;  %v2029_v7 = vld [vmem:[%s16796_s0 + $0x1a48] sm:$0xf] }
 0x376   : > { %1904 = vst [vmem:[%s16801_s6 + $0xc28] sm:$0xf] %v1903_v8  ;;  %v2031_v8 = vld [vmem:[%s16796_s0 + $0x1a50] sm:$0xf] }
 0x377   : > { %1906 = vst [vmem:[%s16801_s6 + $0xc2c] sm:$0xf] %v1905_v9  ;;  %v2033_v9 = vld [vmem:[%s16796_s0 + $0x1a58] sm:$0xf] }
 0x378   : > { %1908 = vst [vmem:[%s16801_s6 + $0xc30] sm:$0xf] %v1907_v10  ;;  %v2035_v10 = vld [vmem:[%s16796_s0 + $0x1a60] sm:$0xf] }
 0x379   : > { %1910 = vst [vmem:[%s16801_s6 + $0xc34] sm:$0xf] %v1909_v11  ;;  %v2037_v11 = vld [vmem:[%s16796_s0 + $0x1a68] sm:$0xf] }
 0x37a   : > { %1912 = vst [vmem:[%s16801_s6 + $0xc38] sm:$0xf] %v1911_v12  ;;  %v2039_v12 = vld [vmem:[%s16796_s0 + $0x1a70] sm:$0xf] }
 0x37b   : > { %1914 = vst [vmem:[%s16801_s6 + $0xc3c] sm:$0xf] %v1913_v13  ;;  %v2041_v13 = vld [vmem:[%s16796_s0 + $0x1a78] sm:$0xf] }
 0x37c   : > { %1916 = vst [vmem:[%s16801_s6 + $0xc40] sm:$0xf] %v1915_v14  ;;  %v2043_v14 = vld [vmem:[%s16796_s0 + $0x1a80] sm:$0xf] }
 0x37d   : > { %1918 = vst [vmem:[%s16801_s6 + $0xc44] sm:$0xf] %v1917_v15  ;;  %v2045_v15 = vld [vmem:[%s16796_s0 + $0x1a88] sm:$0xf] }
 0x37e   : > { %1920 = vst [vmem:[%s16801_s6 + $0xc48] sm:$0xf] %v1919_v16  ;;  %v2047_v16 = vld [vmem:[%s16796_s0 + $0x1a90] sm:$0xf] }
 0x37f   : > { %1922 = vst [vmem:[%s16801_s6 + $0xc4c] sm:$0xf] %v1921_v17  ;;  %v2049_v17 = vld [vmem:[%s16796_s0 + $0x1a98] sm:$0xf] }
 0x380   : > { %1924 = vst [vmem:[%s16801_s6 + $0xc50] sm:$0xf] %v1923_v18  ;;  %v2051_v18 = vld [vmem:[%s16796_s0 + $0x1aa0] sm:$0xf] }
 0x381   : > { %1926 = vst [vmem:[%s16801_s6 + $0xc54] sm:$0xf] %v1925_v19  ;;  %v2053_v19 = vld [vmem:[%s16796_s0 + $0x1aa8] sm:$0xf] }
 0x382   : > { %1928 = vst [vmem:[%s16801_s6 + $0xc58] sm:$0xf] %v1927_v20  ;;  %v2055_v20 = vld [vmem:[%s16796_s0 + $0x1ab0] sm:$0xf] }
 0x383   : > { %1930 = vst [vmem:[%s16801_s6 + $0xc5c] sm:$0xf] %v1929_v21  ;;  %v2057_v21 = vld [vmem:[%s16796_s0 + $0x1ab8] sm:$0xf] }
 0x384   : > { %1932 = vst [vmem:[%s16801_s6 + $0xc60] sm:$0xf] %v1931_v22  ;;  %v2059_v22 = vld [vmem:[%s16796_s0 + $0x1ac0] sm:$0xf] }
 0x385   : > { %1934 = vst [vmem:[%s16801_s6 + $0xc64] sm:$0xf] %v1933_v23  ;;  %v2061_v23 = vld [vmem:[%s16796_s0 + $0x1ac8] sm:$0xf] }
 0x386   : > { %1936 = vst [vmem:[%s16801_s6 + $0xc68] sm:$0xf] %v1935_v24  ;;  %v2063_v24 = vld [vmem:[%s16796_s0 + $0x1ad0] sm:$0xf] }
 0x387   : > { %1938 = vst [vmem:[%s16801_s6 + $0xc6c] sm:$0xf] %v1937_v25  ;;  %v2065_v25 = vld [vmem:[%s16796_s0 + $0x1ad8] sm:$0xf] }
 0x388   : > { %1940 = vst [vmem:[%s16801_s6 + $0xc70] sm:$0xf] %v1939_v26  ;;  %v2067_v26 = vld [vmem:[%s16796_s0 + $0x1ae0] sm:$0xf] }
 0x389   : > { %1942 = vst [vmem:[%s16801_s6 + $0xc74] sm:$0xf] %v1941_v27  ;;  %v2069_v27 = vld [vmem:[%s16796_s0 + $0x1ae8] sm:$0xf] }
 0x38a   : > { %1944 = vst [vmem:[%s16801_s6 + $0xc78] sm:$0xf] %v1943_v28  ;;  %v2071_v28 = vld [vmem:[%s16796_s0 + $0x1af0] sm:$0xf] }
 0x38b   : > { %1946 = vst [vmem:[%s16801_s6 + $0xc7c] sm:$0xf] %v1945_v29  ;;  %v2073_v29 = vld [vmem:[%s16796_s0 + $0x1af8] sm:$0xf] }
 0x38c   : > { %1948 = vst [vmem:[%s16801_s6 + $0xc80] sm:$0xf] %v1947_v30  ;;  %v2075_v30 = vld [vmem:[%s16796_s0 + $0x1b00] sm:$0xf] }
 0x38d   : > { %1950 = vst [vmem:[%s16801_s6 + $0xc84] sm:$0xf] %v1949_v31  ;;  %v2077_v31 = vld [vmem:[%s16796_s0 + $0x1b08] sm:$0xf] }
 0x38e   : > { %1952 = vst [vmem:[%s16801_s6 + $0xc88] sm:$0xf] %v1951_v32  ;;  %v2079_v32 = vld [vmem:[%s16796_s0 + $0x1b10] sm:$0xf] }
 0x38f   : > { %1954 = vst [vmem:[%s16801_s6 + $0xc8c] sm:$0xf] %v1953_v33  ;;  %v2081_v33 = vld [vmem:[%s16796_s0 + $0x1b18] sm:$0xf] }
 0x390   : > { %1956 = vst [vmem:[%s16801_s6 + $0xc90] sm:$0xf] %v1955_v34  ;;  %v2083_v34 = vld [vmem:[%s16796_s0 + $0x1b20] sm:$0xf] }
 0x391   : > { %1958 = vst [vmem:[%s16801_s6 + $0xc94] sm:$0xf] %v1957_v35  ;;  %v2085_v35 = vld [vmem:[%s16796_s0 + $0x1b28] sm:$0xf] }
 0x392   : > { %1960 = vst [vmem:[%s16801_s6 + $0xc98] sm:$0xf] %v1959_v36  ;;  %v2087_v36 = vld [vmem:[%s16796_s0 + $0x1b30] sm:$0xf] }
 0x393   : > { %1962 = vst [vmem:[%s16801_s6 + $0xc9c] sm:$0xf] %v1961_v37  ;;  %v2089_v37 = vld [vmem:[%s16796_s0 + $0x1b38] sm:$0xf] }
 0x394   : > { %1964 = vst [vmem:[%s16801_s6 + $0xca0] sm:$0xf] %v1963_v38  ;;  %v2091_v38 = vld [vmem:[%s16796_s0 + $0x1b40] sm:$0xf] }
 0x395   : > { %1966 = vst [vmem:[%s16801_s6 + $0xca4] sm:$0xf] %v1965_v39  ;;  %v2093_v39 = vld [vmem:[%s16796_s0 + $0x1b48] sm:$0xf] }
 0x396   : > { %1968 = vst [vmem:[%s16801_s6 + $0xca8] sm:$0xf] %v1967_v40  ;;  %v2095_v40 = vld [vmem:[%s16796_s0 + $0x1b50] sm:$0xf] }
 0x397   : > { %1970 = vst [vmem:[%s16801_s6 + $0xcac] sm:$0xf] %v1969_v41  ;;  %v2097_v41 = vld [vmem:[%s16796_s0 + $0x1b58] sm:$0xf] }
 0x398   : > { %1972 = vst [vmem:[%s16801_s6 + $0xcb0] sm:$0xf] %v1971_v42  ;;  %v2099_v42 = vld [vmem:[%s16796_s0 + $0x1b60] sm:$0xf] }
 0x399   : > { %1974 = vst [vmem:[%s16801_s6 + $0xcb4] sm:$0xf] %v1973_v43  ;;  %v2101_v43 = vld [vmem:[%s16796_s0 + $0x1b68] sm:$0xf] }
 0x39a   : > { %1976 = vst [vmem:[%s16801_s6 + $0xcb8] sm:$0xf] %v1975_v44  ;;  %v2103_v44 = vld [vmem:[%s16796_s0 + $0x1b70] sm:$0xf] }
 0x39b   : > { %1978 = vst [vmem:[%s16801_s6 + $0xcbc] sm:$0xf] %v1977_v45  ;;  %v2105_v45 = vld [vmem:[%s16796_s0 + $0x1b78] sm:$0xf] }
 0x39c   : > { %1980 = vst [vmem:[%s16801_s6 + $0xcc0] sm:$0xf] %v1979_v46  ;;  %v2107_v46 = vld [vmem:[%s16796_s0 + $0x1b80] sm:$0xf] }
 0x39d   : > { %1982 = vst [vmem:[%s16801_s6 + $0xcc4] sm:$0xf] %v1981_v47  ;;  %v2109_v47 = vld [vmem:[%s16796_s0 + $0x1b88] sm:$0xf] }
 0x39e   : > { %1984 = vst [vmem:[%s16801_s6 + $0xcc8] sm:$0xf] %v1983_v48  ;;  %v2111_v48 = vld [vmem:[%s16796_s0 + $0x1b90] sm:$0xf] }
 0x39f   : > { %1986 = vst [vmem:[%s16801_s6 + $0xccc] sm:$0xf] %v1985_v49  ;;  %v2113_v49 = vld [vmem:[%s16796_s0 + $0x1b98] sm:$0xf] }
 0x3a0   : > { %1988 = vst [vmem:[%s16801_s6 + $0xcd0] sm:$0xf] %v1987_v50  ;;  %v2115_v50 = vld [vmem:[%s16796_s0 + $0x1ba0] sm:$0xf] }
 0x3a1   : > { %1990 = vst [vmem:[%s16801_s6 + $0xcd4] sm:$0xf] %v1989_v51  ;;  %v2117_v51 = vld [vmem:[%s16796_s0 + $0x1ba8] sm:$0xf] }
 0x3a2   : > { %1992 = vst [vmem:[%s16801_s6 + $0xcd8] sm:$0xf] %v1991_v52  ;;  %v2119_v52 = vld [vmem:[%s16796_s0 + $0x1bb0] sm:$0xf] }
 0x3a3   : > { %1994 = vst [vmem:[%s16801_s6 + $0xcdc] sm:$0xf] %v1993_v53  ;;  %v2121_v53 = vld [vmem:[%s16796_s0 + $0x1bb8] sm:$0xf] }
 0x3a4   : > { %1996 = vst [vmem:[%s16801_s6 + $0xce0] sm:$0xf] %v1995_v54  ;;  %v2123_v54 = vld [vmem:[%s16796_s0 + $0x1bc0] sm:$0xf] }
 0x3a5   : > { %1998 = vst [vmem:[%s16801_s6 + $0xce4] sm:$0xf] %v1997_v55  ;;  %v2125_v55 = vld [vmem:[%s16796_s0 + $0x1bc8] sm:$0xf] }
 0x3a6   : > { %2000 = vst [vmem:[%s16801_s6 + $0xce8] sm:$0xf] %v1999_v56  ;;  %v2127_v56 = vld [vmem:[%s16796_s0 + $0x1bd0] sm:$0xf] }
 0x3a7   : > { %2002 = vst [vmem:[%s16801_s6 + $0xcec] sm:$0xf] %v2001_v57  ;;  %v2129_v57 = vld [vmem:[%s16796_s0 + $0x1bd8] sm:$0xf] }
 0x3a8   : > { %2004 = vst [vmem:[%s16801_s6 + $0xcf0] sm:$0xf] %v2003_v58  ;;  %v2131_v58 = vld [vmem:[%s16796_s0 + $0x1be0] sm:$0xf] }
 0x3a9   : > { %2006 = vst [vmem:[%s16801_s6 + $0xcf4] sm:$0xf] %v2005_v59  ;;  %v2133_v59 = vld [vmem:[%s16796_s0 + $0x1be8] sm:$0xf] }
 0x3aa   : > { %2008 = vst [vmem:[%s16801_s6 + $0xcf8] sm:$0xf] %v2007_v60  ;;  %v2135_v60 = vld [vmem:[%s16796_s0 + $0x1bf0] sm:$0xf] }
 0x3ab   : > { %2010 = vst [vmem:[%s16801_s6 + $0xcfc] sm:$0xf] %v2009_v61  ;;  %v2137_v61 = vld [vmem:[%s16796_s0 + $0x1bf8] sm:$0xf] }
 0x3ac   : > { %2012 = vst [vmem:[%s16801_s6 + $0xd00] sm:$0xf] %v2011_v62  ;;  %v2139_v62 = vld [vmem:[%s16796_s0 + $0x1c00] sm:$0xf] }
 0x3ad   : > { %2014 = vst [vmem:[%s16801_s6 + $0xd04] sm:$0xf] %v2013_v63  ;;  %v2141_v63 = vld [vmem:[%s16796_s0 + $0x1c08] sm:$0xf] }
 0x3ae   : > { %2016 = vst [vmem:[%s16801_s6 + $0xd08] sm:$0xf] %v2015_v0  ;;  %v2143_v0 = vld [vmem:[%s16796_s0 + $0x1c10] sm:$0xf] }
 0x3af   : > { %2018 = vst [vmem:[%s16801_s6 + $0xd0c] sm:$0xf] %v2017_v1  ;;  %v2145_v1 = vld [vmem:[%s16796_s0 + $0x1c18] sm:$0xf] }
 0x3b0   : > { %2020 = vst [vmem:[%s16801_s6 + $0xd10] sm:$0xf] %v2019_v2  ;;  %v2147_v2 = vld [vmem:[%s16796_s0 + $0x1c20] sm:$0xf] }
 0x3b1   : > { %2022 = vst [vmem:[%s16801_s6 + $0xd14] sm:$0xf] %v2021_v3  ;;  %v2149_v3 = vld [vmem:[%s16796_s0 + $0x1c28] sm:$0xf] }
 0x3b2   : > { %2024 = vst [vmem:[%s16801_s6 + $0xd18] sm:$0xf] %v2023_v4  ;;  %v2151_v4 = vld [vmem:[%s16796_s0 + $0x1c30] sm:$0xf] }
 0x3b3   : > { %2026 = vst [vmem:[%s16801_s6 + $0xd1c] sm:$0xf] %v2025_v5  ;;  %v2153_v5 = vld [vmem:[%s16796_s0 + $0x1c38] sm:$0xf] }
 0x3b4   : > { %2028 = vst [vmem:[%s16801_s6 + $0xd20] sm:$0xf] %v2027_v6  ;;  %v2155_v6 = vld [vmem:[%s16796_s0 + $0x1c40] sm:$0xf] }
 0x3b5   : > { %2030 = vst [vmem:[%s16801_s6 + $0xd24] sm:$0xf] %v2029_v7  ;;  %v2157_v7 = vld [vmem:[%s16796_s0 + $0x1c48] sm:$0xf] }
 0x3b6   : > { %2032 = vst [vmem:[%s16801_s6 + $0xd28] sm:$0xf] %v2031_v8  ;;  %v2159_v8 = vld [vmem:[%s16796_s0 + $0x1c50] sm:$0xf] }
 0x3b7   : > { %2034 = vst [vmem:[%s16801_s6 + $0xd2c] sm:$0xf] %v2033_v9  ;;  %v2161_v9 = vld [vmem:[%s16796_s0 + $0x1c58] sm:$0xf] }
 0x3b8   : > { %2036 = vst [vmem:[%s16801_s6 + $0xd30] sm:$0xf] %v2035_v10  ;;  %v2163_v10 = vld [vmem:[%s16796_s0 + $0x1c60] sm:$0xf] }
 0x3b9   : > { %2038 = vst [vmem:[%s16801_s6 + $0xd34] sm:$0xf] %v2037_v11  ;;  %v2165_v11 = vld [vmem:[%s16796_s0 + $0x1c68] sm:$0xf] }
 0x3ba   : > { %2040 = vst [vmem:[%s16801_s6 + $0xd38] sm:$0xf] %v2039_v12  ;;  %v2167_v12 = vld [vmem:[%s16796_s0 + $0x1c70] sm:$0xf] }
 0x3bb   : > { %2042 = vst [vmem:[%s16801_s6 + $0xd3c] sm:$0xf] %v2041_v13  ;;  %v2169_v13 = vld [vmem:[%s16796_s0 + $0x1c78] sm:$0xf] }
 0x3bc   : > { %2044 = vst [vmem:[%s16801_s6 + $0xd40] sm:$0xf] %v2043_v14  ;;  %v2171_v14 = vld [vmem:[%s16796_s0 + $0x1c80] sm:$0xf] }
 0x3bd   : > { %2046 = vst [vmem:[%s16801_s6 + $0xd44] sm:$0xf] %v2045_v15  ;;  %v2173_v15 = vld [vmem:[%s16796_s0 + $0x1c88] sm:$0xf] }
 0x3be   : > { %2048 = vst [vmem:[%s16801_s6 + $0xd48] sm:$0xf] %v2047_v16  ;;  %v2175_v16 = vld [vmem:[%s16796_s0 + $0x1c90] sm:$0xf] }
 0x3bf   : > { %2050 = vst [vmem:[%s16801_s6 + $0xd4c] sm:$0xf] %v2049_v17  ;;  %v2177_v17 = vld [vmem:[%s16796_s0 + $0x1c98] sm:$0xf] }
 0x3c0   : > { %2052 = vst [vmem:[%s16801_s6 + $0xd50] sm:$0xf] %v2051_v18  ;;  %v2179_v18 = vld [vmem:[%s16796_s0 + $0x1ca0] sm:$0xf] }
 0x3c1   : > { %2054 = vst [vmem:[%s16801_s6 + $0xd54] sm:$0xf] %v2053_v19  ;;  %v2181_v19 = vld [vmem:[%s16796_s0 + $0x1ca8] sm:$0xf] }
 0x3c2   : > { %2056 = vst [vmem:[%s16801_s6 + $0xd58] sm:$0xf] %v2055_v20  ;;  %v2183_v20 = vld [vmem:[%s16796_s0 + $0x1cb0] sm:$0xf] }
 0x3c3   : > { %2058 = vst [vmem:[%s16801_s6 + $0xd5c] sm:$0xf] %v2057_v21  ;;  %v2185_v21 = vld [vmem:[%s16796_s0 + $0x1cb8] sm:$0xf] }
 0x3c4   : > { %2060 = vst [vmem:[%s16801_s6 + $0xd60] sm:$0xf] %v2059_v22  ;;  %v2187_v22 = vld [vmem:[%s16796_s0 + $0x1cc0] sm:$0xf] }
 0x3c5   : > { %2062 = vst [vmem:[%s16801_s6 + $0xd64] sm:$0xf] %v2061_v23  ;;  %v2189_v23 = vld [vmem:[%s16796_s0 + $0x1cc8] sm:$0xf] }
 0x3c6   : > { %2064 = vst [vmem:[%s16801_s6 + $0xd68] sm:$0xf] %v2063_v24  ;;  %v2191_v24 = vld [vmem:[%s16796_s0 + $0x1cd0] sm:$0xf] }
 0x3c7   : > { %2066 = vst [vmem:[%s16801_s6 + $0xd6c] sm:$0xf] %v2065_v25  ;;  %v2193_v25 = vld [vmem:[%s16796_s0 + $0x1cd8] sm:$0xf] }
 0x3c8   : > { %2068 = vst [vmem:[%s16801_s6 + $0xd70] sm:$0xf] %v2067_v26  ;;  %v2195_v26 = vld [vmem:[%s16796_s0 + $0x1ce0] sm:$0xf] }
 0x3c9   : > { %2070 = vst [vmem:[%s16801_s6 + $0xd74] sm:$0xf] %v2069_v27  ;;  %v2197_v27 = vld [vmem:[%s16796_s0 + $0x1ce8] sm:$0xf] }
 0x3ca   : > { %2072 = vst [vmem:[%s16801_s6 + $0xd78] sm:$0xf] %v2071_v28  ;;  %v2199_v28 = vld [vmem:[%s16796_s0 + $0x1cf0] sm:$0xf] }
 0x3cb   : > { %2074 = vst [vmem:[%s16801_s6 + $0xd7c] sm:$0xf] %v2073_v29  ;;  %v2201_v29 = vld [vmem:[%s16796_s0 + $0x1cf8] sm:$0xf] }
 0x3cc   : > { %2076 = vst [vmem:[%s16801_s6 + $0xd80] sm:$0xf] %v2075_v30  ;;  %v2203_v30 = vld [vmem:[%s16796_s0 + $0x1d00] sm:$0xf] }
 0x3cd   : > { %2078 = vst [vmem:[%s16801_s6 + $0xd84] sm:$0xf] %v2077_v31  ;;  %v2205_v31 = vld [vmem:[%s16796_s0 + $0x1d08] sm:$0xf] }
 0x3ce   : > { %2080 = vst [vmem:[%s16801_s6 + $0xd88] sm:$0xf] %v2079_v32  ;;  %v2207_v32 = vld [vmem:[%s16796_s0 + $0x1d10] sm:$0xf] }
 0x3cf   : > { %2082 = vst [vmem:[%s16801_s6 + $0xd8c] sm:$0xf] %v2081_v33  ;;  %v2209_v33 = vld [vmem:[%s16796_s0 + $0x1d18] sm:$0xf] }
 0x3d0   : > { %2084 = vst [vmem:[%s16801_s6 + $0xd90] sm:$0xf] %v2083_v34  ;;  %v2211_v34 = vld [vmem:[%s16796_s0 + $0x1d20] sm:$0xf] }
 0x3d1   : > { %2086 = vst [vmem:[%s16801_s6 + $0xd94] sm:$0xf] %v2085_v35  ;;  %v2213_v35 = vld [vmem:[%s16796_s0 + $0x1d28] sm:$0xf] }
 0x3d2   : > { %2088 = vst [vmem:[%s16801_s6 + $0xd98] sm:$0xf] %v2087_v36  ;;  %v2215_v36 = vld [vmem:[%s16796_s0 + $0x1d30] sm:$0xf] }
 0x3d3   : > { %2090 = vst [vmem:[%s16801_s6 + $0xd9c] sm:$0xf] %v2089_v37  ;;  %v2217_v37 = vld [vmem:[%s16796_s0 + $0x1d38] sm:$0xf] }
 0x3d4   : > { %2092 = vst [vmem:[%s16801_s6 + $0xda0] sm:$0xf] %v2091_v38  ;;  %v2219_v38 = vld [vmem:[%s16796_s0 + $0x1d40] sm:$0xf] }
 0x3d5   : > { %2094 = vst [vmem:[%s16801_s6 + $0xda4] sm:$0xf] %v2093_v39  ;;  %v2221_v39 = vld [vmem:[%s16796_s0 + $0x1d48] sm:$0xf] }
 0x3d6   : > { %2096 = vst [vmem:[%s16801_s6 + $0xda8] sm:$0xf] %v2095_v40  ;;  %v2223_v40 = vld [vmem:[%s16796_s0 + $0x1d50] sm:$0xf] }
 0x3d7   : > { %2098 = vst [vmem:[%s16801_s6 + $0xdac] sm:$0xf] %v2097_v41  ;;  %v2225_v41 = vld [vmem:[%s16796_s0 + $0x1d58] sm:$0xf] }
 0x3d8   : > { %2100 = vst [vmem:[%s16801_s6 + $0xdb0] sm:$0xf] %v2099_v42  ;;  %v2227_v42 = vld [vmem:[%s16796_s0 + $0x1d60] sm:$0xf] }
 0x3d9   : > { %2102 = vst [vmem:[%s16801_s6 + $0xdb4] sm:$0xf] %v2101_v43  ;;  %v2229_v43 = vld [vmem:[%s16796_s0 + $0x1d68] sm:$0xf] }
 0x3da   : > { %2104 = vst [vmem:[%s16801_s6 + $0xdb8] sm:$0xf] %v2103_v44  ;;  %v2231_v44 = vld [vmem:[%s16796_s0 + $0x1d70] sm:$0xf] }
 0x3db   : > { %2106 = vst [vmem:[%s16801_s6 + $0xdbc] sm:$0xf] %v2105_v45  ;;  %v2233_v45 = vld [vmem:[%s16796_s0 + $0x1d78] sm:$0xf] }
 0x3dc   : > { %2108 = vst [vmem:[%s16801_s6 + $0xdc0] sm:$0xf] %v2107_v46  ;;  %v2235_v46 = vld [vmem:[%s16796_s0 + $0x1d80] sm:$0xf] }
 0x3dd   : > { %2110 = vst [vmem:[%s16801_s6 + $0xdc4] sm:$0xf] %v2109_v47  ;;  %v2237_v47 = vld [vmem:[%s16796_s0 + $0x1d88] sm:$0xf] }
 0x3de   : > { %2112 = vst [vmem:[%s16801_s6 + $0xdc8] sm:$0xf] %v2111_v48  ;;  %v2239_v48 = vld [vmem:[%s16796_s0 + $0x1d90] sm:$0xf] }
 0x3df   : > { %2114 = vst [vmem:[%s16801_s6 + $0xdcc] sm:$0xf] %v2113_v49  ;;  %v2241_v49 = vld [vmem:[%s16796_s0 + $0x1d98] sm:$0xf] }
 0x3e0   : > { %2116 = vst [vmem:[%s16801_s6 + $0xdd0] sm:$0xf] %v2115_v50  ;;  %v2243_v50 = vld [vmem:[%s16796_s0 + $0x1da0] sm:$0xf] }
 0x3e1   : > { %2118 = vst [vmem:[%s16801_s6 + $0xdd4] sm:$0xf] %v2117_v51  ;;  %v2245_v51 = vld [vmem:[%s16796_s0 + $0x1da8] sm:$0xf] }
 0x3e2   : > { %2120 = vst [vmem:[%s16801_s6 + $0xdd8] sm:$0xf] %v2119_v52  ;;  %v2247_v52 = vld [vmem:[%s16796_s0 + $0x1db0] sm:$0xf] }
 0x3e3   : > { %2122 = vst [vmem:[%s16801_s6 + $0xddc] sm:$0xf] %v2121_v53  ;;  %v2249_v53 = vld [vmem:[%s16796_s0 + $0x1db8] sm:$0xf] }
 0x3e4   : > { %2124 = vst [vmem:[%s16801_s6 + $0xde0] sm:$0xf] %v2123_v54  ;;  %v2251_v54 = vld [vmem:[%s16796_s0 + $0x1dc0] sm:$0xf] }
 0x3e5   : > { %2126 = vst [vmem:[%s16801_s6 + $0xde4] sm:$0xf] %v2125_v55  ;;  %v2253_v55 = vld [vmem:[%s16796_s0 + $0x1dc8] sm:$0xf] }
 0x3e6   : > { %2128 = vst [vmem:[%s16801_s6 + $0xde8] sm:$0xf] %v2127_v56  ;;  %v2255_v56 = vld [vmem:[%s16796_s0 + $0x1dd0] sm:$0xf] }
 0x3e7   : > { %2130 = vst [vmem:[%s16801_s6 + $0xdec] sm:$0xf] %v2129_v57  ;;  %v2257_v57 = vld [vmem:[%s16796_s0 + $0x1dd8] sm:$0xf] }
 0x3e8   : > { %2132 = vst [vmem:[%s16801_s6 + $0xdf0] sm:$0xf] %v2131_v58  ;;  %v2259_v58 = vld [vmem:[%s16796_s0 + $0x1de0] sm:$0xf] }
 0x3e9   : > { %2134 = vst [vmem:[%s16801_s6 + $0xdf4] sm:$0xf] %v2133_v59  ;;  %v2261_v59 = vld [vmem:[%s16796_s0 + $0x1de8] sm:$0xf] }
 0x3ea   : > { %2136 = vst [vmem:[%s16801_s6 + $0xdf8] sm:$0xf] %v2135_v60  ;;  %v2263_v60 = vld [vmem:[%s16796_s0 + $0x1df0] sm:$0xf] }
 0x3eb   : > { %2138 = vst [vmem:[%s16801_s6 + $0xdfc] sm:$0xf] %v2137_v61  ;;  %v2265_v61 = vld [vmem:[%s16796_s0 + $0x1df8] sm:$0xf] }
 0x3ec   : > { %2140 = vst [vmem:[%s16801_s6 + $0xe00] sm:$0xf] %v2139_v62  ;;  %v2267_v62 = vld [vmem:[%s16796_s0 + $0x1e00] sm:$0xf] }
 0x3ed   : > { %2142 = vst [vmem:[%s16801_s6 + $0xe04] sm:$0xf] %v2141_v63  ;;  %v2269_v63 = vld [vmem:[%s16796_s0 + $0x1e08] sm:$0xf] }
 0x3ee   : > { %2144 = vst [vmem:[%s16801_s6 + $0xe08] sm:$0xf] %v2143_v0  ;;  %v2271_v0 = vld [vmem:[%s16796_s0 + $0x1e10] sm:$0xf] }
 0x3ef   : > { %2146 = vst [vmem:[%s16801_s6 + $0xe0c] sm:$0xf] %v2145_v1  ;;  %v2273_v1 = vld [vmem:[%s16796_s0 + $0x1e18] sm:$0xf] }
 0x3f0   : > { %2148 = vst [vmem:[%s16801_s6 + $0xe10] sm:$0xf] %v2147_v2  ;;  %v2275_v2 = vld [vmem:[%s16796_s0 + $0x1e20] sm:$0xf] }
 0x3f1   : > { %2150 = vst [vmem:[%s16801_s6 + $0xe14] sm:$0xf] %v2149_v3  ;;  %v2277_v3 = vld [vmem:[%s16796_s0 + $0x1e28] sm:$0xf] }
 0x3f2   : > { %2152 = vst [vmem:[%s16801_s6 + $0xe18] sm:$0xf] %v2151_v4  ;;  %v2279_v4 = vld [vmem:[%s16796_s0 + $0x1e30] sm:$0xf] }
 0x3f3   : > { %2154 = vst [vmem:[%s16801_s6 + $0xe1c] sm:$0xf] %v2153_v5  ;;  %v2281_v5 = vld [vmem:[%s16796_s0 + $0x1e38] sm:$0xf] }
 0x3f4   : > { %2156 = vst [vmem:[%s16801_s6 + $0xe20] sm:$0xf] %v2155_v6  ;;  %v2283_v6 = vld [vmem:[%s16796_s0 + $0x1e40] sm:$0xf] }
 0x3f5   : > { %2158 = vst [vmem:[%s16801_s6 + $0xe24] sm:$0xf] %v2157_v7  ;;  %v2285_v7 = vld [vmem:[%s16796_s0 + $0x1e48] sm:$0xf] }
 0x3f6   : > { %2160 = vst [vmem:[%s16801_s6 + $0xe28] sm:$0xf] %v2159_v8  ;;  %v2287_v8 = vld [vmem:[%s16796_s0 + $0x1e50] sm:$0xf] }
 0x3f7   : > { %2162 = vst [vmem:[%s16801_s6 + $0xe2c] sm:$0xf] %v2161_v9  ;;  %v2289_v9 = vld [vmem:[%s16796_s0 + $0x1e58] sm:$0xf] }
 0x3f8   : > { %2164 = vst [vmem:[%s16801_s6 + $0xe30] sm:$0xf] %v2163_v10  ;;  %v2291_v10 = vld [vmem:[%s16796_s0 + $0x1e60] sm:$0xf] }
 0x3f9   : > { %2166 = vst [vmem:[%s16801_s6 + $0xe34] sm:$0xf] %v2165_v11  ;;  %v2293_v11 = vld [vmem:[%s16796_s0 + $0x1e68] sm:$0xf] }
 0x3fa   : > { %2168 = vst [vmem:[%s16801_s6 + $0xe38] sm:$0xf] %v2167_v12  ;;  %v2295_v12 = vld [vmem:[%s16796_s0 + $0x1e70] sm:$0xf] }
 0x3fb   : > { %2170 = vst [vmem:[%s16801_s6 + $0xe3c] sm:$0xf] %v2169_v13  ;;  %v2297_v13 = vld [vmem:[%s16796_s0 + $0x1e78] sm:$0xf] }
 0x3fc   : > { %2172 = vst [vmem:[%s16801_s6 + $0xe40] sm:$0xf] %v2171_v14 }
 0x3fd   : > { %2174 = vst [vmem:[%s16801_s6 + $0xe44] sm:$0xf] %v2173_v15 }
 0x3fe   : > { %2176 = vst [vmem:[%s16801_s6 + $0xe48] sm:$0xf] %v2175_v16 }
 0x3ff   : > { %2178 = vst [vmem:[%s16801_s6 + $0xe4c] sm:$0xf] %v2177_v17 }
 0x400   : > { %2180 = vst [vmem:[%s16801_s6 + $0xe50] sm:$0xf] %v2179_v18 }
 0x401   : > { %2182 = vst [vmem:[%s16801_s6 + $0xe54] sm:$0xf] %v2181_v19 }
 0x402   : > { %2184 = vst [vmem:[%s16801_s6 + $0xe58] sm:$0xf] %v2183_v20 }
 0x403   : > { %2186 = vst [vmem:[%s16801_s6 + $0xe5c] sm:$0xf] %v2185_v21 }
 0x404   : > { %2188 = vst [vmem:[%s16801_s6 + $0xe60] sm:$0xf] %v2187_v22 }
 0x405   : > { %2190 = vst [vmem:[%s16801_s6 + $0xe64] sm:$0xf] %v2189_v23 }
 0x406   : > { %2192 = vst [vmem:[%s16801_s6 + $0xe68] sm:$0xf] %v2191_v24 }
 0x407   : > { %2194 = vst [vmem:[%s16801_s6 + $0xe6c] sm:$0xf] %v2193_v25 }
 0x408   : > { %2196 = vst [vmem:[%s16801_s6 + $0xe70] sm:$0xf] %v2195_v26 }
 0x409   : > { %2198 = vst [vmem:[%s16801_s6 + $0xe74] sm:$0xf] %v2197_v27 }
 0x40a   : > { %2200 = vst [vmem:[%s16801_s6 + $0xe78] sm:$0xf] %v2199_v28 }
 0x40b   : > { %2202 = vst [vmem:[%s16801_s6 + $0xe7c] sm:$0xf] %v2201_v29 }
 0x40c   : > { %2204 = vst [vmem:[%s16801_s6 + $0xe80] sm:$0xf] %v2203_v30 }
 0x40d   : > { %2206 = vst [vmem:[%s16801_s6 + $0xe84] sm:$0xf] %v2205_v31 }
 0x40e   : > { %2208 = vst [vmem:[%s16801_s6 + $0xe88] sm:$0xf] %v2207_v32 }
 0x40f   : > { %2210 = vst [vmem:[%s16801_s6 + $0xe8c] sm:$0xf] %v2209_v33 }
 0x410   : > { %2212 = vst [vmem:[%s16801_s6 + $0xe90] sm:$0xf] %v2211_v34 }
 0x411   : > { %2214 = vst [vmem:[%s16801_s6 + $0xe94] sm:$0xf] %v2213_v35 }
 0x412   : > { %2216 = vst [vmem:[%s16801_s6 + $0xe98] sm:$0xf] %v2215_v36 }
 0x413   : > { %2218 = vst [vmem:[%s16801_s6 + $0xe9c] sm:$0xf] %v2217_v37 }
 0x414   : > { %2220 = vst [vmem:[%s16801_s6 + $0xea0] sm:$0xf] %v2219_v38 }
 0x415   : > { %2222 = vst [vmem:[%s16801_s6 + $0xea4] sm:$0xf] %v2221_v39 }
 0x416   : > { %2224 = vst [vmem:[%s16801_s6 + $0xea8] sm:$0xf] %v2223_v40 }
 0x417   : > { %2226 = vst [vmem:[%s16801_s6 + $0xeac] sm:$0xf] %v2225_v41 }
 0x418   : > { %2228 = vst [vmem:[%s16801_s6 + $0xeb0] sm:$0xf] %v2227_v42 }
 0x419   : > { %2230 = vst [vmem:[%s16801_s6 + $0xeb4] sm:$0xf] %v2229_v43 }
 0x41a   : > { %2232 = vst [vmem:[%s16801_s6 + $0xeb8] sm:$0xf] %v2231_v44 }
 0x41b   : > { %2234 = vst [vmem:[%s16801_s6 + $0xebc] sm:$0xf] %v2233_v45 }
 0x41c   : > { %2236 = vst [vmem:[%s16801_s6 + $0xec0] sm:$0xf] %v2235_v46 }
 0x41d   : > { %2238 = vst [vmem:[%s16801_s6 + $0xec4] sm:$0xf] %v2237_v47 }
 0x41e   : > { %2240 = vst [vmem:[%s16801_s6 + $0xec8] sm:$0xf] %v2239_v48 }
 0x41f   : > { %2242 = vst [vmem:[%s16801_s6 + $0xecc] sm:$0xf] %v2241_v49 }
 0x420   : > { %2244 = vst [vmem:[%s16801_s6 + $0xed0] sm:$0xf] %v2243_v50 }
 0x421   : > { %2246 = vst [vmem:[%s16801_s6 + $0xed4] sm:$0xf] %v2245_v51 }
 0x422   : > { %2248 = vst [vmem:[%s16801_s6 + $0xed8] sm:$0xf] %v2247_v52 }
 0x423   : > { %2250 = vst [vmem:[%s16801_s6 + $0xedc] sm:$0xf] %v2249_v53 }
 0x424   : > { %2252 = vst [vmem:[%s16801_s6 + $0xee0] sm:$0xf] %v2251_v54 }
 0x425   : > { %2254 = vst [vmem:[%s16801_s6 + $0xee4] sm:$0xf] %v2253_v55 }
 0x426   : > { %2256 = vst [vmem:[%s16801_s6 + $0xee8] sm:$0xf] %v2255_v56 }
 0x427   : > { %2258 = vst [vmem:[%s16801_s6 + $0xeec] sm:$0xf] %v2257_v57 }
 0x428   : > { %2260 = vst [vmem:[%s16801_s6 + $0xef0] sm:$0xf] %v2259_v58 }
 0x429   : > { %2262 = vst [vmem:[%s16801_s6 + $0xef4] sm:$0xf] %v2261_v59 }
 0x42a   : > { %2264 = vst [vmem:[%s16801_s6 + $0xef8] sm:$0xf] %v2263_v60 }
 0x42b   : > { %2266 = vst [vmem:[%s16801_s6 + $0xefc] sm:$0xf] %v2265_v61 }
 0x42c   : > { %2268 = vst [vmem:[%s16801_s6 + $0xf00] sm:$0xf] %v2267_v62 }
 0x42d   : > { %2270 = vst [vmem:[%s16801_s6 + $0xf04] sm:$0xf] %v2269_v63 }
 0x42e   : > { %2272 = vst [vmem:[%s16801_s6 + $0xf08] sm:$0xf] %v2271_v0 }
 0x42f   : > { %2274 = vst [vmem:[%s16801_s6 + $0xf0c] sm:$0xf] %v2273_v1 }
 0x430   : > { %2276 = vst [vmem:[%s16801_s6 + $0xf10] sm:$0xf] %v2275_v2 }
 0x431   : > { %2278 = vst [vmem:[%s16801_s6 + $0xf14] sm:$0xf] %v2277_v3 }
 0x432   : > { %2280 = vst [vmem:[%s16801_s6 + $0xf18] sm:$0xf] %v2279_v4 }
 0x433   : > { %2282 = vst [vmem:[%s16801_s6 + $0xf1c] sm:$0xf] %v2281_v5 }
 0x434   : > { %2284 = vst [vmem:[%s16801_s6 + $0xf20] sm:$0xf] %v2283_v6 }
 0x435   : > { %2286 = vst [vmem:[%s16801_s6 + $0xf24] sm:$0xf] %v2285_v7 }
 0x436   : > { %2288 = vst [vmem:[%s16801_s6 + $0xf28] sm:$0xf] %v2287_v8 }
 0x437   : > { %2290 = vst [vmem:[%s16801_s6 + $0xf2c] sm:$0xf] %v2289_v9 }
 0x438   : > { %2292 = vst [vmem:[%s16801_s6 + $0xf30] sm:$0xf] %v2291_v10 }
 0x439   : > { %2294 = vst [vmem:[%s16801_s6 + $0xf34] sm:$0xf] %v2293_v11 }
 0x43a   : > { %2296 = vst [vmem:[%s16801_s6 + $0xf38] sm:$0xf] %v2295_v12 }
 0x43b   : > { %2298 = vst [vmem:[%s16801_s6 + $0xf3c] sm:$0xf] %v2297_v13 }
 0x43c PF: > { %p13598_p0 = scmp.ge.s32.totalorder %s16532_s22, 1  ;;  %p8209_p1 = scmp.lt.s32.totalorder %s16532_s22, 7 }
 0x43e   : > { %p8210_p2 = pnand %p13598_p0, %p8209_p1 }
 0x43f   : > { %s8223_s5 = sand.u32 (!%p8210_p2), 1, %s16500_s14   ;;  %s8249_s23 = sand.u32 (!%p8210_p2), 1, %s16492_s12  }
 0x440   : > { %8213 = sbr.rel (%p8210_p2) target bundleno = 1781 (0x6f5), region = 102  ;;  %s18756_s7 = sshll.u32 (!%p8210_p2), %s8249_s23, 4 }
 0x441   : > { %s16356_s28 = smul.u32 (!%p8210_p2), 3904, %s8223_s5  ;;  %p8255_p3 = scmp.lt.s32.totalorder (!%p8210_p2), %s16520_s19, 1 }
 0x442   : > { %s8216_s27 = sand.u32 (!%p8210_p2), 1, %s16508_s16   ;;  %s19448_s4 = scalar_lea.vmem (!%p8210_p2), [#allocation4], %s18756_s7 }
 0x443   : > { %s18762_s11 = scalar_lea.vmem (!%p8210_p2), [#allocation3], %s16356_s28  ;;  %s16355_s29 = smul.u32 (!%p8210_p2), 488, %s8216_s27 }
 0x444   : > { %p15796_p4 = scmp.ne.s32.totalorder (!%p8210_p2), %s16516_s18, 0 }
 0x445   : > { %s18760_s0 = scalar_select %p8255_p3, %s16520_s19, 1  ;;  %v15872_v14 = vld [vmem:[%s18762_s11 + $0x38] sm:$0xff]  ;;  %v15871_v18 = vld [vmem:[%s18762_s11 + $0x30] sm:$0xff]  ;;  %v15870_v22 = vld [vmem:[%s18762_s11 + $0x28] sm:$0xff] }
 0x446   : > { %v15888_v15 = vld [vmem:[%s18762_s11 + $0xb8] sm:$0xff]  ;;  %12531 = vmatpush.bf16.msra.mxu0 %v15872_v14  ;;  %v15887_v19 = vld [vmem:[%s18762_s11 + $0xb0] sm:$0xff]  ;;  %v15886_v23 = vld [vmem:[%s18762_s11 + $0xa8] sm:$0xff]  ;;  %s18803_s16 = scalar_lea.vmem [#allocation2], %s16355_s29 }
 0x447   : > { %v15880_v16 = vld [vmem:[%s18762_s11 + $0x78] sm:$0xff]  ;;  %s8257_s26 = scalar_lea.vmem %s19512_s2, %s18760_s0  ;;  %12559 = vmatpush.bf16.msra.mxu2 %v15888_v15  ;;  %v15879_v20 = vld [vmem:[%s18762_s11 + $0x70] sm:$0xff]  ;;  %v15878_v24 = vld [vmem:[%s18762_s11 + $0x68] sm:$0xff] }
 0x448   : > { %v15896_v17 = vld [vmem:[%s18762_s11 + $0xf8] sm:$0xff]  ;;  %12545 = vmatpush.bf16.msra.mxu1 %v15880_v16  ;;  %v15895_v21 = vld [vmem:[%s18762_s11 + $0xf0] sm:$0xff]  ;;  %v15894_v25 = vld [vmem:[%s18762_s11 + $0xe8] sm:$0xff] }
 0x449   : > { %12573 = vmatpush.bf16.msra.mxu3 %v15896_v17  ;;  %v15869_v26 = vld [vmem:[%s18762_s11 + $0x20] sm:$0xff]  ;;  %v15868_v30 = vld [vmem:[%s18762_s11 + $0x18] sm:$0xff]  ;;  %v15867_v34 = vld [vmem:[%s18762_s11 + $0x10] sm:$0xff] }
 0x44a   : > { %12532 = vmatpush.bf16.msra.mxu0 %v15871_v18  ;;  %v15885_v27 = vld [vmem:[%s18762_s11 + $0xa0] sm:$0xff]  ;;  %v15884_v31 = vld [vmem:[%s18762_s11 + $0x98] sm:$0xff]  ;;  %v15883_v35 = vld [vmem:[%s18762_s11 + $0x90] sm:$0xff] }
 0x44b   : > { %12560 = vmatpush.bf16.msra.mxu2 %v15887_v19  ;;  %v15877_v28 = vld [vmem:[%s18762_s11 + $0x60] sm:$0xff]  ;;  %v15876_v32 = vld [vmem:[%s18762_s11 + $0x58] sm:$0xff]  ;;  %v15875_v36 = vld [vmem:[%s18762_s11 + $0x50] sm:$0xff] }
 0x44c   : > { %12546 = vmatpush.bf16.msra.mxu1 %v15879_v20  ;;  %v15893_v29 = vld [vmem:[%s18762_s11 + $0xe0] sm:$0xff]  ;;  %v15892_v33 = vld [vmem:[%s18762_s11 + $0xd8] sm:$0xff]  ;;  %v15891_v37 = vld [vmem:[%s18762_s11 + $0xd0] sm:$0xff] }
 0x44d   : > { %12574 = vmatpush.bf16.msra.mxu3 %v15895_v21  ;;  %v15866_v38 = vld [vmem:[%s18762_s11 + $0x8] sm:$0xff]  ;;  %v15865_v42 = vld [vmem:[%s18762_s11] sm:$0xff]  ;;  %v15904_v44 = vld [vmem:[%s18762_s11 + $0x138] sm:$0xff] }
 0x44e   : > { %12533 = vmatpush.bf16.msra.mxu0 %v15870_v22  ;;  %v15882_v39 = vld [vmem:[%s18762_s11 + $0x88] sm:$0xff]  ;;  %v15881_v43 = vld [vmem:[%s18762_s11 + $0x80] sm:$0xff]  ;;  %v15920_v45 = vld [vmem:[%s18762_s11 + $0x1b8] sm:$0xff] }
 0x44f   : > { %12561 = vmatpush.bf16.msra.mxu2 %v15886_v23  ;;  %v15874_v40 = vld [vmem:[%s18762_s11 + $0x48] sm:$0xff]  ;;  %v15873_v46 = vld [vmem:[%s18762_s11 + $0x40] sm:$0xff]  ;;  %v13602_v48 = vld [vmem:[%s18803_s16] sm:$0xf] }
 0x450   : > { %12547 = vmatpush.bf16.msra.mxu1 %v15878_v24  ;;  %v15890_v41 = vld [vmem:[%s18762_s11 + $0xc8] sm:$0xff]  ;;  %v15889_v47 = vld [vmem:[%s18762_s11 + $0xc0] sm:$0xff]  ;;  %v15912_v52 = vld [vmem:[%s18762_s11 + $0x178] sm:$0xff] }
 0x451   : > { %12575 = vmatpush.bf16.msra.mxu3 %v15894_v25  ;;  %v15834_v49 = vld [vmem:[%s18803_s16 + $0xf0] sm:$0xf0]  ;;  %v13610_v50 = vld [vmem:[%s18803_s16 + $0x8] sm:$0xf]  ;;  %v15835_v51 = vld [vmem:[%s18803_s16 + $0xf8] sm:$0xf0] }
 0x452   : > { %12534 = vmatpush.bf16.msra.mxu0 %v15869_v26  ;;  %v15928_v53 = vld [vmem:[%s18762_s11 + $0x1f8] sm:$0xff]  ;;  %v13604_v55 = vld [vmem:[%s18803_s16 + $0xf4] sm:$0xf0]  ;;  %v13603_v58 = vor.u32 %v15834_v49, %v13602_v48  ;;  %v13611_v59 = vor.u32 %v15835_v51, %v13610_v50  ;;  %v15901_v6 = vld [vmem:[%s18762_s11 + $0x120] sm:$0xff] }
 0x453   : > { %12562 = vmatpush.bf16.msra.mxu2 %v15885_v27  ;;  %v15804_v54 = vld [vmem:[%s18803_s16 + $0x4] sm:$0xf]  ;;  %v15805_v56 = vld [vmem:[%s18803_s16 + $0xc] sm:$0xf]  ;;  %v13612_v57 = vld [vmem:[%s18803_s16 + $0xfc] sm:$0xf0] }
 0x454   : > { %12548 = vmatpush.bf16.msra.mxu1 %v15877_v28  ;;  %v15903_v60 = vld [vmem:[%s18762_s11 + $0x130] sm:$0xff]  ;;  %v13607_v62 = vor.u32 %v15804_v54, %v13604_v55  ;;  %v13615_v63 = vor.u32 %v15805_v56, %v13612_v57  ;;  %v15902_v2 = vld [vmem:[%s18762_s11 + $0x128] sm:$0xff]  ;;  %v15917_v7 = vld [vmem:[%s18762_s11 + $0x1a0] sm:$0xff] }
 0x455   : > { %12576 = vmatpush.bf16.msra.mxu3 %v15893_v29  ;;  %v15919_v61 = vld [vmem:[%s18762_s11 + $0x1b0] sm:$0xff]  ;;  %v15918_v3 = vld [vmem:[%s18762_s11 + $0x1a8] sm:$0xff]  ;;  %v15909_v8 = vld [vmem:[%s18762_s11 + $0x160] sm:$0xff] }
 0x456   : > { %12535 = vmatpush.bf16.msra.mxu0 %v15868_v30  ;;  %v15911_v0 = vld [vmem:[%s18762_s11 + $0x170] sm:$0xff]  ;;  %v15910_v4 = vld [vmem:[%s18762_s11 + $0x168] sm:$0xff]  ;;  %v15925_v9 = vld [vmem:[%s18762_s11 + $0x1e0] sm:$0xff] }
 0x457   : > { %12563 = vmatpush.bf16.msra.mxu2 %v15884_v31  ;;  %v15927_v1 = vld [vmem:[%s18762_s11 + $0x1f0] sm:$0xff]  ;;  %v15926_v5 = vld [vmem:[%s18762_s11 + $0x1e8] sm:$0xff]  ;;  %v15900_v10 = vld [vmem:[%s18762_s11 + $0x118] sm:$0xff] }
 0x458   : > { %12549 = vmatpush.bf16.msra.mxu1 %v15876_v32  ;;  %v15916_v11 = vld [vmem:[%s18762_s11 + $0x198] sm:$0xff]  ;;  %v15899_v14 = vld [vmem:[%s18762_s11 + $0x110] sm:$0xff]  ;;  %v15898_v18 = vld [vmem:[%s18762_s11 + $0x108] sm:$0xff] }
 0x459   : > { %12577 = vmatpush.bf16.msra.mxu3 %v15892_v33  ;;  %v15908_v12 = vld [vmem:[%s18762_s11 + $0x158] sm:$0xff]  ;;  %v15915_v15 = vld [vmem:[%s18762_s11 + $0x190] sm:$0xff]  ;;  %v15914_v19 = vld [vmem:[%s18762_s11 + $0x188] sm:$0xff] }
 0x45a   : > { %12536 = vmatpush.bf16.msra.mxu0 %v15867_v34  ;;  %v15924_v13 = vld [vmem:[%s18762_s11 + $0x1d8] sm:$0xff]  ;;  %v15907_v16 = vld [vmem:[%s18762_s11 + $0x150] sm:$0xff]  ;;  %v15906_v20 = vld [vmem:[%s18762_s11 + $0x148] sm:$0xff] }
 0x45b   : > { %12564 = vmatpush.bf16.msra.mxu2 %v15883_v35  ;;  %v15923_v17 = vld [vmem:[%s18762_s11 + $0x1d0] sm:$0xff]  ;;  %v15922_v21 = vld [vmem:[%s18762_s11 + $0x1c8] sm:$0xff]  ;;  %v15897_v22 = vld [vmem:[%s18762_s11 + $0x100] sm:$0xff] }
 0x45c   : > { %12550 = vmatpush.bf16.msra.mxu1 %v15875_v36  ;;  %v15913_v23 = vld [vmem:[%s18762_s11 + $0x180] sm:$0xff]  ;;  %v15936_v24 = vld [vmem:[%s18762_s11 + $0x238] sm:$0xff]  ;;  %v13626_v28 = vld [vmem:[%s18803_s16 + $0x18] sm:$0xf] }
 0x45d   : > { %12578 = vmatpush.bf16.msra.mxu3 %v15891_v37  ;;  %v15952_v25 = vld [vmem:[%s18762_s11 + $0x2b8] sm:$0xff]  ;;  %v13618_v26 = vld [vmem:[%s18803_s16 + $0x10] sm:$0xf]  ;;  %v15806_v32 = vld [vmem:[%s18803_s16 + $0x14] sm:$0xf] }
 0x45e   : > { %12537 = vmatpush.bf16.msra.mxu0 %v15866_v38  ;;  %v15836_v27 = vld [vmem:[%s18803_s16 + $0x100] sm:$0xf0]  ;;  %v15837_v29 = vld [vmem:[%s18803_s16 + $0x108] sm:$0xf0]  ;;  %v13620_v33 = vld [vmem:[%s18803_s16 + $0x104] sm:$0xf0] }
 0x45f   : > { %12565 = vmatpush.bf16.msra.mxu2 %v15882_v39  ;;  %v15905_v30 = vld [vmem:[%s18762_s11 + $0x140] sm:$0xff]  ;;  %v15807_v34 = vld [vmem:[%s18803_s16 + $0x1c] sm:$0xf]  ;;  %v13619_v36 = vor.u32 %v15836_v27, %v13618_v26  ;;  %v13627_v37 = vor.u32 %v15837_v29, %v13626_v28  ;;  %v15944_v38 = vld [vmem:[%s18762_s11 + $0x278] sm:$0xff] }
 0x460   : > { %12551 = vmatpush.bf16.msra.mxu1 %v15874_v40  ;;  %v15921_v31 = vld [vmem:[%s18762_s11 + $0x1c0] sm:$0xff]  ;;  %v15960_v39 = vld [vmem:[%s18762_s11 + $0x2f8] sm:$0xff]  ;;  %v13623_v40 = vor.u32 %v15806_v32, %v13620_v33  ;;  %v15942_v48 = vld [vmem:[%s18762_s11 + $0x268] sm:$0xff] }
 0x461   : > { %12579 = vmatpush.bf16.msra.mxu3 %v15890_v41  ;;  %v13628_v35 = vld [vmem:[%s18803_s16 + $0x10c] sm:$0xf0]  ;;  %v15932_v54 = vld [vmem:[%s18762_s11 + $0x218] sm:$0xff] }
 0x462   : > { %12538 = vmatpush.bf16.msra.mxu0 %v15865_v42  ;;  %v13631_v41 = vor.u32 %v15807_v34, %v13628_v35  ;;  %v15935_v42 = vld [vmem:[%s18762_s11 + $0x230] sm:$0xff]  ;;  %v15958_v49 = vld [vmem:[%s18762_s11 + $0x2e8] sm:$0xff]  ;;  %v15933_v50 = vld [vmem:[%s18762_s11 + $0x220] sm:$0xff] }
 0x463   : > { %12566 = vmatpush.bf16.msra.mxu2 %v15881_v43  ;;  %v15951_v43 = vld [vmem:[%s18762_s11 + $0x2b0] sm:$0xff]  ;;  %v15949_v51 = vld [vmem:[%s18762_s11 + $0x2a0] sm:$0xff]  ;;  %v15948_v55 = vld [vmem:[%s18762_s11 + $0x298] sm:$0xff] }
 0x464   : > { %12552 = vmatpush.bf16.msra.mxu1 %v15873_v46  ;;  %v15934_v46 = vld [vmem:[%s18762_s11 + $0x228] sm:$0xff]  ;;  %v15940_v56 = vld [vmem:[%s18762_s11 + $0x258] sm:$0xff]  ;;  %v15973_v32 = vld [vmem:[%s18762_s11 + $0x360] sm:$0xff] }
 0x465   : > { %12580 = vmatpush.bf16.msra.mxu3 %v15889_v47  ;;  %12539 = vmatmul.bf16.vlgmr.msra.gmra.mxu0 %v13603_v58  ;;  %v15950_v47 = vld [vmem:[%s18762_s11 + $0x2a8] sm:$0xff]  ;;  %v15956_v57 = vld [vmem:[%s18762_s11 + $0x2d8] sm:$0xff]  ;;  %v15931_v58 = vld [vmem:[%s18762_s11 + $0x210] sm:$0xff] }
 0x466   : > { %12587 = vmatpush.bf16.msrb.mxu0 %v15904_v44  ;;  %12567 = vmatmul.bf16.vlgmr.msra.gmra.mxu2 %v13611_v59  ;;  %v15943_v44 = vld [vmem:[%s18762_s11 + $0x270] sm:$0xff]  ;;  %v15966_v26 = vld [vmem:[%s18762_s11 + $0x328] sm:$0xff]  ;;  %v15989_v33 = vld [vmem:[%s18762_s11 + $0x3e0] sm:$0xff] }
 0x467   : > { %12615 = vmatpush.bf16.msrb.mxu2 %v15920_v45  ;;  %12553 = vmatmul.bf16.vlgmr.msra.gmra.mxu1 %v13607_v62  ;;  %v15959_v45 = vld [vmem:[%s18762_s11 + $0x2f0] sm:$0xff]  ;;  %v15930_v62 = vld [vmem:[%s18762_s11 + $0x208] sm:$0xff]  ;;  %v15964_v34 = vld [vmem:[%s18762_s11 + $0x318] sm:$0xff] }
 0x468   : > { %12601 = vmatpush.bf16.msrb.mxu1 %v15912_v52  ;;  %12581 = vmatmul.bf16.vlgmr.msra.gmra.mxu3 %v13615_v63  ;;  %v15941_v52 = vld [vmem:[%s18762_s11 + $0x260] sm:$0xff]  ;;  %v15947_v59 = vld [vmem:[%s18762_s11 + $0x290] sm:$0xff]  ;;  %v15946_v63 = vld [vmem:[%s18762_s11 + $0x288] sm:$0xff] }
 0x469   : > { %12629 = vmatpush.bf16.msrb.mxu3 %v15928_v53  ;;  %v15957_v53 = vld [vmem:[%s18762_s11 + $0x2e0] sm:$0xff]  ;;  %v15982_v27 = vld [vmem:[%s18762_s11 + $0x3a8] sm:$0xff]  ;;  %v15980_v35 = vld [vmem:[%s18762_s11 + $0x398] sm:$0xff] }
 0x46a   : > { %12588 = vmatpush.bf16.msrb.mxu0 %v15903_v60  ;;  %v15939_v60 = vld [vmem:[%s18762_s11 + $0x250] sm:$0xff]  ;;  %v15974_v28 = vld [vmem:[%s18762_s11 + $0x368] sm:$0xff] }
 0x46b   : > { %12616 = vmatpush.bf16.msrb.mxu2 %v15919_v61  ;;  %v15955_v61 = vld [vmem:[%s18762_s11 + $0x2d0] sm:$0xff]  ;;  %v15990_v29 = vld [vmem:[%s18762_s11 + $0x3e8] sm:$0xff] }
 0x46c   : > { %12602 = vmatpush.bf16.msrb.mxu1 %v15911_v0  ;;  %v15938_v0 = vld [vmem:[%s18762_s11 + $0x248] sm:$0xff] }
 0x46d   : > { %12630 = vmatpush.bf16.msrb.mxu3 %v15927_v1  ;;  %v15954_v1 = vld [vmem:[%s18762_s11 + $0x2c8] sm:$0xff] }
 0x46e   : > { %12589 = vmatpush.bf16.msrb.mxu0 %v15902_v2  ;;  %v15929_v2 = vld [vmem:[%s18762_s11 + $0x200] sm:$0xff] }
 0x46f   : > { %12617 = vmatpush.bf16.msrb.mxu2 %v15918_v3  ;;  %v15945_v3 = vld [vmem:[%s18762_s11 + $0x280] sm:$0xff] }
 0x470   : > { %12603 = vmatpush.bf16.msrb.mxu1 %v15910_v4  ;;  %v15968_v4 = vld [vmem:[%s18762_s11 + $0x338] sm:$0xff] }
 0x471   : > { %12631 = vmatpush.bf16.msrb.mxu3 %v15926_v5  ;;  %v15984_v5 = vld [vmem:[%s18762_s11 + $0x3b8] sm:$0xff] }
 0x472   : > { %12590 = vmatpush.bf16.msrb.mxu0 %v15901_v6  ;;  %v13634_v6 = vld [vmem:[%s18803_s16 + $0x20] sm:$0xf] }
 0x473   : > { %12618 = vmatpush.bf16.msrb.mxu2 %v15917_v7  ;;  %v15838_v7 = vld [vmem:[%s18803_s16 + $0x110] sm:$0xf0] }
 0x474   : > { %12604 = vmatpush.bf16.msrb.mxu1 %v15909_v8  ;;  %v13642_v8 = vld [vmem:[%s18803_s16 + $0x28] sm:$0xf] }
 0x475   : > { %12632 = vmatpush.bf16.msrb.mxu3 %v15925_v9  ;;  %v15839_v9 = vld [vmem:[%s18803_s16 + $0x118] sm:$0xf0] }
 0x476   : > { %12591 = vmatpush.bf16.msrb.mxu0 %v15900_v10  ;;  %v15937_v10 = vld [vmem:[%s18762_s11 + $0x240] sm:$0xff] }
 0x477   : > { %12619 = vmatpush.bf16.msrb.mxu2 %v15916_v11  ;;  %v15953_v11 = vld [vmem:[%s18762_s11 + $0x2c0] sm:$0xff] }
 0x478   : > { %12605 = vmatpush.bf16.msrb.mxu1 %v15908_v12  ;;  %v15808_v12 = vld [vmem:[%s18803_s16 + $0x24] sm:$0xf] }
 0x479   : > { %12633 = vmatpush.bf16.msrb.mxu3 %v15924_v13  ;;  %v13636_v13 = vld [vmem:[%s18803_s16 + $0x114] sm:$0xf0] }
 0x47a   : > { %12592 = vmatpush.bf16.msrb.mxu0 %v15899_v14  ;;  %v15809_v14 = vld [vmem:[%s18803_s16 + $0x2c] sm:$0xf] }
 0x47b   : > { %12620 = vmatpush.bf16.msrb.mxu2 %v15915_v15  ;;  %v13644_v15 = vld [vmem:[%s18803_s16 + $0x11c] sm:$0xf0] }
 0x47c   : > { %12606 = vmatpush.bf16.msrb.mxu1 %v15907_v16  ;;  %v13635_v16 = vor.u32 %v15838_v7, %v13634_v6  ;;  %v15998_v6 = vld [vmem:[%s18762_s11 + $0x428] sm:$0xff] }
 0x47d   : > { %12634 = vmatpush.bf16.msrb.mxu3 %v15923_v17  ;;  %v13643_v17 = vor.u32 %v15839_v9, %v13642_v8  ;;  %v16014_v7 = vld [vmem:[%s18762_s11 + $0x4a8] sm:$0xff] }
 0x47e   : > { %12593 = vmatpush.bf16.msrb.mxu0 %v15898_v18  ;;  %v15976_v18 = vld [vmem:[%s18762_s11 + $0x378] sm:$0xff]  ;;  %v16006_v8 = vld [vmem:[%s18762_s11 + $0x468] sm:$0xff] }
 0x47f   : > { %12621 = vmatpush.bf16.msrb.mxu2 %v15914_v19  ;;  %v15992_v19 = vld [vmem:[%s18762_s11 + $0x3f8] sm:$0xff]  ;;  %v16022_v9 = vld [vmem:[%s18762_s11 + $0x4e8] sm:$0xff] }
 0x480   : > { %12607 = vmatpush.bf16.msrb.mxu1 %v15906_v20  ;;  %v13639_v20 = vor.u32 %v15808_v12, %v13636_v13  ;;  %v16005_v12 = vld [vmem:[%s18762_s11 + $0x460] sm:$0xff] }
 0x481   : > { %12635 = vmatpush.bf16.msrb.mxu3 %v15922_v21  ;;  %v13647_v21 = vor.u32 %v15809_v14, %v13644_v15  ;;  %v16021_v13 = vld [vmem:[%s18762_s11 + $0x4e0] sm:$0xff]  ;;  %v15996_v14 = vld [vmem:[%s18762_s11 + $0x418] sm:$0xff] }
 0x482   : > { %12594 = vmatpush.bf16.msrb.mxu0 %v15897_v22  ;;  %v15967_v22 = vld [vmem:[%s18762_s11 + $0x330] sm:$0xff]  ;;  %v16012_v15 = vld [vmem:[%s18762_s11 + $0x498] sm:$0xff] }
 0x483   : > { %12622 = vmatpush.bf16.msrb.mxu2 %v15913_v23  ;;  %v15983_v23 = vld [vmem:[%s18762_s11 + $0x3b0] sm:$0xff] }
 0x484   : > { %12608 = vmatpush.bf16.msrb.mxu1 %v15905_v30  ;;  %v15965_v30 = vld [vmem:[%s18762_s11 + $0x320] sm:$0xff] }
 0x485   : > { %12636 = vmatpush.bf16.msrb.mxu3 %v15921_v31  ;;  %12595 = vmatmul.bf16.vlgmr.msrb.gmra.mxu0 %v13619_v36  ;;  %v15981_v31 = vld [vmem:[%s18762_s11 + $0x3a0] sm:$0xff]  ;;  %v15972_v36 = vld [vmem:[%s18762_s11 + $0x358] sm:$0xff] }
 0x486   : > { %12643 = vmatpush.bf16.msra.mxu0 %v15936_v24  ;;  %12623 = vmatmul.bf16.vlgmr.msrb.gmra.mxu2 %v13627_v37  ;;  %v15975_v24 = vld [vmem:[%s18762_s11 + $0x370] sm:$0xff]  ;;  %v15988_v37 = vld [vmem:[%s18762_s11 + $0x3d8] sm:$0xff] }
 0x487   : > { %12671 = vmatpush.bf16.msra.mxu2 %v15952_v25  ;;  %12609 = vmatmul.bf16.vlgmr.msrb.gmra.mxu1 %v13623_v40  ;;  %v15991_v25 = vld [vmem:[%s18762_s11 + $0x3f0] sm:$0xff] }
 0x488   : > { %12657 = vmatpush.bf16.msra.mxu1 %v15944_v38  ;;  %12637 = vmatmul.bf16.vlgmr.msrb.gmra.mxu3 %v13631_v41  ;;  %v15963_v38 = vld [vmem:[%s18762_s11 + $0x310] sm:$0xff] }
 0x489   : > { %12685 = vmatpush.bf16.msra.mxu3 %v15960_v39  ;;  %v15979_v39 = vld [vmem:[%s18762_s11 + $0x390] sm:$0xff] }
 0x48a   : > { %12644 = vmatpush.bf16.msra.mxu0 %v15935_v42  ;;  %v15971_v40 = vld [vmem:[%s18762_s11 + $0x350] sm:$0xff]  ;;  %v15962_v42 = vld [vmem:[%s18762_s11 + $0x308] sm:$0xff] }
 0x48b   : > { %12672 = vmatpush.bf16.msra.mxu2 %v15951_v43  ;;  %v15987_v41 = vld [vmem:[%s18762_s11 + $0x3d0] sm:$0xff]  ;;  %v15978_v43 = vld [vmem:[%s18762_s11 + $0x388] sm:$0xff] }
 0x48c   : > { %12658 = vmatpush.bf16.msra.mxu1 %v15943_v44  ;;  %v15970_v44 = vld [vmem:[%s18762_s11 + $0x348] sm:$0xff] }
 0x48d   : > { %12686 = vmatpush.bf16.msra.mxu3 %v15959_v45  ;;  %v15986_v45 = vld [vmem:[%s18762_s11 + $0x3c8] sm:$0xff] }
 0x48e   : > { %12645 = vmatpush.bf16.msra.mxu0 %v15934_v46  ;;  %v15961_v46 = vld [vmem:[%s18762_s11 + $0x300] sm:$0xff] }
 0x48f   : > { %12673 = vmatpush.bf16.msra.mxu2 %v15950_v47  ;;  %v15977_v47 = vld [vmem:[%s18762_s11 + $0x380] sm:$0xff] }
 0x490   : > { %12659 = vmatpush.bf16.msra.mxu1 %v15942_v48  ;;  %v16000_v48 = vld [vmem:[%s18762_s11 + $0x438] sm:$0xff] }
 0x491   : > { %12687 = vmatpush.bf16.msra.mxu3 %v15958_v49  ;;  %v16016_v49 = vld [vmem:[%s18762_s11 + $0x4b8] sm:$0xff] }
 0x492   : > { %12646 = vmatpush.bf16.msra.mxu0 %v15933_v50  ;;  %v13650_v50 = vld [vmem:[%s18803_s16 + $0x30] sm:$0xf] }
 0x493   : > { %12674 = vmatpush.bf16.msra.mxu2 %v15949_v51  ;;  %v15840_v51 = vld [vmem:[%s18803_s16 + $0x120] sm:$0xf0] }
 0x494   : > { %12660 = vmatpush.bf16.msra.mxu1 %v15941_v52  ;;  %v13658_v52 = vld [vmem:[%s18803_s16 + $0x38] sm:$0xf] }
 0x495   : > { %12688 = vmatpush.bf16.msra.mxu3 %v15957_v53  ;;  %v15841_v53 = vld [vmem:[%s18803_s16 + $0x128] sm:$0xf0] }
 0x496   : > { %12647 = vmatpush.bf16.msra.mxu0 %v15932_v54  ;;  %v15969_v54 = vld [vmem:[%s18762_s11 + $0x340] sm:$0xff] }
 0x497   : > { %12675 = vmatpush.bf16.msra.mxu2 %v15948_v55  ;;  %v15985_v55 = vld [vmem:[%s18762_s11 + $0x3c0] sm:$0xff] }
 0x498   : > { %12661 = vmatpush.bf16.msra.mxu1 %v15940_v56  ;;  %v15810_v56 = vld [vmem:[%s18803_s16 + $0x34] sm:$0xf] }
 0x499   : > { %12689 = vmatpush.bf16.msra.mxu3 %v15956_v57  ;;  %v13652_v57 = vld [vmem:[%s18803_s16 + $0x124] sm:$0xf0] }
 0x49a   : > { %12648 = vmatpush.bf16.msra.mxu0 %v15931_v58  ;;  %v15811_v58 = vld [vmem:[%s18803_s16 + $0x3c] sm:$0xf] }
 0x49b   : > { %12676 = vmatpush.bf16.msra.mxu2 %v15947_v59  ;;  %v13660_v59 = vld [vmem:[%s18803_s16 + $0x12c] sm:$0xf0] }
 0x49c   : > { %12662 = vmatpush.bf16.msra.mxu1 %v15939_v60  ;;  %v13651_v60 = vor.u32 %v15840_v51, %v13650_v50  ;;  %v16030_v50 = vld [vmem:[%s18762_s11 + $0x528] sm:$0xff] }
 0x49d   : > { %12690 = vmatpush.bf16.msra.mxu3 %v15955_v61  ;;  %v13659_v61 = vor.u32 %v15841_v53, %v13658_v52  ;;  %v16046_v51 = vld [vmem:[%s18762_s11 + $0x5a8] sm:$0xff] }
 0x49e   : > { %12649 = vmatpush.bf16.msra.mxu0 %v15930_v62  ;;  %v16008_v62 = vld [vmem:[%s18762_s11 + $0x478] sm:$0xff]  ;;  %v16038_v52 = vld [vmem:[%s18762_s11 + $0x568] sm:$0xff] }
 0x49f   : > { %12677 = vmatpush.bf16.msra.mxu2 %v15946_v63  ;;  %v16024_v63 = vld [vmem:[%s18762_s11 + $0x4f8] sm:$0xff]  ;;  %v16054_v53 = vld [vmem:[%s18762_s11 + $0x5e8] sm:$0xff] }
 0x4a0   : > { %12663 = vmatpush.bf16.msra.mxu1 %v15938_v0  ;;  %v13655_v0 = vor.u32 %v15810_v56, %v13652_v57  ;;  %v16037_v56 = vld [vmem:[%s18762_s11 + $0x560] sm:$0xff] }
 0x4a1   : > { %12691 = vmatpush.bf16.msra.mxu3 %v15954_v1  ;;  %v13663_v1 = vor.u32 %v15811_v58, %v13660_v59  ;;  %v16053_v57 = vld [vmem:[%s18762_s11 + $0x5e0] sm:$0xff] }
 0x4a2   : > { %12650 = vmatpush.bf16.msra.mxu0 %v15929_v2  ;;  %v15999_v2 = vld [vmem:[%s18762_s11 + $0x430] sm:$0xff] }
 0x4a3   : > { %12678 = vmatpush.bf16.msra.mxu2 %v15945_v3  ;;  %v16015_v3 = vld [vmem:[%s18762_s11 + $0x4b0] sm:$0xff] }
 0x4a4   : > { %12664 = vmatpush.bf16.msra.mxu1 %v15937_v10  ;;  %v15997_v10 = vld [vmem:[%s18762_s11 + $0x420] sm:$0xff] }
 0x4a5   : > { %12692 = vmatpush.bf16.msra.mxu3 %v15953_v11  ;;  %12651 = vmatmul.bf16.vlgmr.msra.gmra.mxu0 %v13635_v16  ;;  %v16013_v11 = vld [vmem:[%s18762_s11 + $0x4a0] sm:$0xff]  ;;  %v16004_v16 = vld [vmem:[%s18762_s11 + $0x458] sm:$0xff] }
 0x4a6   : > { %12699 = vmatpush.bf16.msrb.mxu0 %v15968_v4  ;;  %12679 = vmatmul.bf16.vlgmr.msra.gmra.mxu2 %v13643_v17  ;;  %v16007_v4 = vld [vmem:[%s18762_s11 + $0x470] sm:$0xff]  ;;  %v16020_v17 = vld [vmem:[%s18762_s11 + $0x4d8] sm:$0xff] }
 0x4a7   : > { %12727 = vmatpush.bf16.msrb.mxu2 %v15984_v5  ;;  %12665 = vmatmul.bf16.vlgmr.msra.gmra.mxu1 %v13639_v20  ;;  %v16023_v5 = vld [vmem:[%s18762_s11 + $0x4f0] sm:$0xff] }
 0x4a8   : > { %12713 = vmatpush.bf16.msrb.mxu1 %v15976_v18  ;;  %12693 = vmatmul.bf16.vlgmr.msra.gmra.mxu3 %v13647_v21  ;;  %v15995_v18 = vld [vmem:[%s18762_s11 + $0x410] sm:$0xff] }
 0x4a9   : > { %12741 = vmatpush.bf16.msrb.mxu3 %v15992_v19  ;;  %v16011_v19 = vld [vmem:[%s18762_s11 + $0x490] sm:$0xff] }
 0x4aa   : > { %12700 = vmatpush.bf16.msrb.mxu0 %v15967_v22  ;;  %v16003_v20 = vld [vmem:[%s18762_s11 + $0x450] sm:$0xff]  ;;  %v15994_v22 = vld [vmem:[%s18762_s11 + $0x408] sm:$0xff] }
 0x4ab   : > { %12728 = vmatpush.bf16.msrb.mxu2 %v15983_v23  ;;  %v16019_v21 = vld [vmem:[%s18762_s11 + $0x4d0] sm:$0xff]  ;;  %v16010_v23 = vld [vmem:[%s18762_s11 + $0x488] sm:$0xff] }
 0x4ac   : > { %12714 = vmatpush.bf16.msrb.mxu1 %v15975_v24  ;;  %v16002_v24 = vld [vmem:[%s18762_s11 + $0x448] sm:$0xff] }
 0x4ad   : > { %12742 = vmatpush.bf16.msrb.mxu3 %v15991_v25  ;;  %v16018_v25 = vld [vmem:[%s18762_s11 + $0x4c8] sm:$0xff] }
 0x4ae   : > { %12701 = vmatpush.bf16.msrb.mxu0 %v15966_v26  ;;  %v15993_v26 = vld [vmem:[%s18762_s11 + $0x400] sm:$0xff] }
 0x4af   : > { %12729 = vmatpush.bf16.msrb.mxu2 %v15982_v27  ;;  %v16009_v27 = vld [vmem:[%s18762_s11 + $0x480] sm:$0xff] }
 0x4b0   : > { %12715 = vmatpush.bf16.msrb.mxu1 %v15974_v28  ;;  %v16032_v28 = vld [vmem:[%s18762_s11 + $0x538] sm:$0xff] }
 0x4b1   : > { %12743 = vmatpush.bf16.msrb.mxu3 %v15990_v29  ;;  %v16048_v29 = vld [vmem:[%s18762_s11 + $0x5b8] sm:$0xff] }
 0x4b2   : > { %12702 = vmatpush.bf16.msrb.mxu0 %v15965_v30  ;;  %v13666_v30 = vld [vmem:[%s18803_s16 + $0x40] sm:$0xf] }
 0x4b3   : > { %12730 = vmatpush.bf16.msrb.mxu2 %v15981_v31  ;;  %v15842_v31 = vld [vmem:[%s18803_s16 + $0x130] sm:$0xf0] }
 0x4b4   : > { %12716 = vmatpush.bf16.msrb.mxu1 %v15973_v32  ;;  %v13674_v32 = vld [vmem:[%s18803_s16 + $0x48] sm:$0xf] }
 0x4b5   : > { %12744 = vmatpush.bf16.msrb.mxu3 %v15989_v33  ;;  %v15843_v33 = vld [vmem:[%s18803_s16 + $0x138] sm:$0xf0] }
 0x4b6   : > { %12703 = vmatpush.bf16.msrb.mxu0 %v15964_v34  ;;  %v16001_v34 = vld [vmem:[%s18762_s11 + $0x440] sm:$0xff] }
 0x4b7   : > { %12731 = vmatpush.bf16.msrb.mxu2 %v15980_v35  ;;  %v16017_v35 = vld [vmem:[%s18762_s11 + $0x4c0] sm:$0xff] }
 0x4b8   : > { %12717 = vmatpush.bf16.msrb.mxu1 %v15972_v36  ;;  %v15812_v36 = vld [vmem:[%s18803_s16 + $0x44] sm:$0xf] }
 0x4b9   : > { %12745 = vmatpush.bf16.msrb.mxu3 %v15988_v37  ;;  %v13668_v37 = vld [vmem:[%s18803_s16 + $0x134] sm:$0xf0] }
 0x4ba   : > { %12704 = vmatpush.bf16.msrb.mxu0 %v15963_v38  ;;  %v15813_v38 = vld [vmem:[%s18803_s16 + $0x4c] sm:$0xf] }
 0x4bb   : > { %12732 = vmatpush.bf16.msrb.mxu2 %v15979_v39  ;;  %v13676_v39 = vld [vmem:[%s18803_s16 + $0x13c] sm:$0xf0] }
 0x4bc   : > { %12718 = vmatpush.bf16.msrb.mxu1 %v15971_v40  ;;  %v13667_v40 = vor.u32 %v15842_v31, %v13666_v30  ;;  %v16072_v30 = vld [vmem:[%s18762_s11 + $0x678] sm:$0xff] }
 0x4bd   : > { %12746 = vmatpush.bf16.msrb.mxu3 %v15987_v41  ;;  %v13675_v41 = vor.u32 %v15843_v33, %v13674_v32  ;;  %v16088_v31 = vld [vmem:[%s18762_s11 + $0x6f8] sm:$0xff] }
 0x4be   : > { %12705 = vmatpush.bf16.msrb.mxu0 %v15962_v42  ;;  %v16040_v42 = vld [vmem:[%s18762_s11 + $0x578] sm:$0xff] }
 0x4bf   : > { %12733 = vmatpush.bf16.msrb.mxu2 %v15978_v43  ;;  %v16056_v43 = vld [vmem:[%s18762_s11 + $0x5f8] sm:$0xff] }
 0x4c0   : > { %12719 = vmatpush.bf16.msrb.mxu1 %v15970_v44  ;;  %v13671_v44 = vor.u32 %v15812_v36, %v13668_v37  ;;  %v16079_v36 = vld [vmem:[%s18762_s11 + $0x6b0] sm:$0xff] }
 0x4c1   : > { %12747 = vmatpush.bf16.msrb.mxu3 %v15986_v45  ;;  %v13679_v45 = vor.u32 %v15813_v38, %v13676_v39  ;;  %v16071_v37 = vld [vmem:[%s18762_s11 + $0x670] sm:$0xff] }
 0x4c2   : > { %12706 = vmatpush.bf16.msrb.mxu0 %v15961_v46  ;;  %v16031_v46 = vld [vmem:[%s18762_s11 + $0x530] sm:$0xff] }
 0x4c3   : > { %12734 = vmatpush.bf16.msrb.mxu2 %v15977_v47  ;;  %v16047_v47 = vld [vmem:[%s18762_s11 + $0x5b0] sm:$0xff] }
 0x4c4   : > { %12720 = vmatpush.bf16.msrb.mxu1 %v15969_v54  ;;  %v16029_v54 = vld [vmem:[%s18762_s11 + $0x520] sm:$0xff]  ;;  %v16087_v38 = vld [vmem:[%s18762_s11 + $0x6f0] sm:$0xff] }
 0x4c5   : > { %12748 = vmatpush.bf16.msrb.mxu3 %v15985_v55  ;;  %12707 = vmatmul.bf16.vlgmr.msrb.gmra.mxu0 %v13651_v60  ;;  %v16045_v55 = vld [vmem:[%s18762_s11 + $0x5a0] sm:$0xff] }
 0x4c6   : > { %12755 = vmatpush.bf16.msra.mxu0 %v16000_v48  ;;  %12735 = vmatmul.bf16.vlgmr.msrb.gmra.mxu2 %v13659_v61  ;;  %v16039_v48 = vld [vmem:[%s18762_s11 + $0x570] sm:$0xff]  ;;  %v16028_v61 = vld [vmem:[%s18762_s11 + $0x518] sm:$0xff] }
 0x4c7   : > { %12783 = vmatpush.bf16.msra.mxu2 %v16016_v49  ;;  %12721 = vmatmul.bf16.vlgmr.msrb.gmra.mxu1 %v13655_v0  ;;  %v16055_v49 = vld [vmem:[%s18762_s11 + $0x5f0] sm:$0xff]  ;;  %v16052_v0 = vld [vmem:[%s18762_s11 + $0x5d8] sm:$0xff] }
 0x4c8   : > { %12769 = vmatpush.bf16.msra.mxu1 %v16008_v62  ;;  %12749 = vmatmul.bf16.vlgmr.msrb.gmra.mxu3 %v13663_v1  ;;  %v16044_v62 = vld [vmem:[%s18762_s11 + $0x598] sm:$0xff] }
 0x4c9   : > { %12797 = vmatpush.bf16.msra.mxu3 %v16024_v63  ;;  %v16036_v63 = vld [vmem:[%s18762_s11 + $0x558] sm:$0xff] }
 0x4ca   : > { %12756 = vmatpush.bf16.msra.mxu0 %v15999_v2 }
 0x4cb   : > { %12784 = vmatpush.bf16.msra.mxu2 %v16015_v3  ;;  %v16027_v3 = vld [vmem:[%s18762_s11 + $0x510] sm:$0xff] }
 0x4cc   : > { %12770 = vmatpush.bf16.msra.mxu1 %v16007_v4  ;;  %v16043_v4 = vld [vmem:[%s18762_s11 + $0x590] sm:$0xff] }
 0x4cd   : > { %12798 = vmatpush.bf16.msra.mxu3 %v16023_v5 }
 0x4ce   : > { %12757 = vmatpush.bf16.msra.mxu0 %v15998_v6 }
 0x4cf   : > { %12785 = vmatpush.bf16.msra.mxu2 %v16014_v7  ;;  %v16035_v7 = vld [vmem:[%s18762_s11 + $0x550] sm:$0xff] }
 0x4d0   : > { %12771 = vmatpush.bf16.msra.mxu1 %v16006_v8  ;;  %v16051_v8 = vld [vmem:[%s18762_s11 + $0x5d0] sm:$0xff] }
 0x4d1   : > { %12799 = vmatpush.bf16.msra.mxu3 %v16022_v9  ;;  %v16026_v9 = vld [vmem:[%s18762_s11 + $0x508] sm:$0xff] }
 0x4d2   : > { %12758 = vmatpush.bf16.msra.mxu0 %v15997_v10  ;;  %v16042_v10 = vld [vmem:[%s18762_s11 + $0x588] sm:$0xff] }
 0x4d3   : > { %12786 = vmatpush.bf16.msra.mxu2 %v16013_v11  ;;  %v16034_v11 = vld [vmem:[%s18762_s11 + $0x548] sm:$0xff] }
 0x4d4   : > { %12772 = vmatpush.bf16.msra.mxu1 %v16005_v12  ;;  %v16050_v12 = vld [vmem:[%s18762_s11 + $0x5c8] sm:$0xff] }
 0x4d5   : > { %12800 = vmatpush.bf16.msra.mxu3 %v16021_v13  ;;  %v16025_v13 = vld [vmem:[%s18762_s11 + $0x500] sm:$0xff] }
 0x4d6   : > { %12759 = vmatpush.bf16.msra.mxu0 %v15996_v14  ;;  %v16041_v14 = vld [vmem:[%s18762_s11 + $0x580] sm:$0xff] }
 0x4d7   : > { %12787 = vmatpush.bf16.msra.mxu2 %v16012_v15  ;;  %v16064_v15 = vld [vmem:[%s18762_s11 + $0x638] sm:$0xff] }
 0x4d8   : > { %12773 = vmatpush.bf16.msra.mxu1 %v16004_v16  ;;  %v16080_v16 = vld [vmem:[%s18762_s11 + $0x6b8] sm:$0xff] }
 0x4d9   : > { %12801 = vmatpush.bf16.msra.mxu3 %v16020_v17  ;;  %v13682_v17 = vld [vmem:[%s18803_s16 + $0x50] sm:$0xf] }
 0x4da   : > { %12760 = vmatpush.bf16.msra.mxu0 %v15995_v18  ;;  %v15844_v18 = vld [vmem:[%s18803_s16 + $0x140] sm:$0xf0] }
 0x4db   : > { %12788 = vmatpush.bf16.msra.mxu2 %v16011_v19  ;;  %v13690_v19 = vld [vmem:[%s18803_s16 + $0x58] sm:$0xf] }
 0x4dc   : > { %12774 = vmatpush.bf16.msra.mxu1 %v16003_v20  ;;  %v15845_v20 = vld [vmem:[%s18803_s16 + $0x148] sm:$0xf0] }
 0x4dd   : > { %12802 = vmatpush.bf16.msra.mxu3 %v16019_v21  ;;  %v16033_v21 = vld [vmem:[%s18762_s11 + $0x540] sm:$0xff] }
 0x4de   : > { %12761 = vmatpush.bf16.msra.mxu0 %v15994_v22  ;;  %v16049_v22 = vld [vmem:[%s18762_s11 + $0x5c0] sm:$0xff] }
 0x4df   : > { %12789 = vmatpush.bf16.msra.mxu2 %v16010_v23  ;;  %v15814_v23 = vld [vmem:[%s18803_s16 + $0x54] sm:$0xf] }
 0x4e0   : > { %12775 = vmatpush.bf16.msra.mxu1 %v16002_v24 }
 0x4e1   : > { %12803 = vmatpush.bf16.msra.mxu3 %v16018_v25  ;;  %v13684_v25 = vld [vmem:[%s18803_s16 + $0x144] sm:$0xf0] }
 0x4e2   : > { %12762 = vmatpush.bf16.msra.mxu0 %v15993_v26  ;;  %v12540_v58 = vpop.f32.mrf.mxu0  ;;  %v15815_v26 = vld [vmem:[%s18803_s16 + $0x5c] sm:$0xf]  ;;  %v13687_v33 = vor.u32 %v15814_v23, %v13684_v25  ;;  %v16120_v23 = vld [vmem:[%s18762_s11 + $0x7f8] sm:$0xff] }
 0x4e3   : > { %12790 = vmatpush.bf16.msra.mxu2 %v16009_v27  ;;  %v13692_v27 = vld [vmem:[%s18803_s16 + $0x14c] sm:$0xf0] }
 0x4e4   : > { %12776 = vmatpush.bf16.msra.mxu1 %v16001_v34  ;;  %v12554_v59 = vpop.f32.mrf.mxu1  ;;  %v13695_v34 = vor.u32 %v15815_v26, %v13692_v27 }
 0x4e5   : > { %12804 = vmatpush.bf16.msra.mxu3 %v16017_v35  ;;  %12763 = vmatmul.bf16.vlgmr.msra.gmra.mxu0 %v13667_v40  ;;  %v12555_v60 = vadd.f32 %v12554_v59, %v12540_v58  ;;  %v16063_v35 = vld [vmem:[%s18762_s11 + $0x630] sm:$0xff]  ;;  %v16062_v40 = vld [vmem:[%s18762_s11 + $0x628] sm:$0xff]  ;;  %v16084_v58 = vld [vmem:[%s18762_s11 + $0x6d8] sm:$0xff] }
 0x4e6   : > { %12811 = vmatpush.bf16.msrb.mxu0 %v16032_v28  ;;  %12791 = vmatmul.bf16.vlgmr.msra.gmra.mxu2 %v13675_v41  ;;  %v13683_v28 = vor.u32 %v15844_v18, %v13682_v17  ;;  %v16078_v41 = vld [vmem:[%s18762_s11 + $0x6a8] sm:$0xff]  ;;  %v15817_v17 = vld [vmem:[%s18803_s16 + $0x6c] sm:$0xf]  ;;  %v13708_v18 = vld [vmem:[%s18803_s16 + $0x15c] sm:$0xf0] }
 0x4e7   : > { %12839 = vmatpush.bf16.msrb.mxu2 %v16048_v29  ;;  %12777 = vmatmul.bf16.vlgmr.msra.gmra.mxu1 %v13671_v44  ;;  %v13691_v29 = vor.u32 %v15845_v20, %v13690_v19  ;;  %v16086_v44 = vld [vmem:[%s18762_s11 + $0x6e8] sm:$0xff]  ;;  %v13711_v26 = vor.u32 %v15817_v17, %v13708_v18 }
 0x4e8   : > { %12825 = vmatpush.bf16.msrb.mxu1 %v16040_v42  ;;  %12805 = vmatmul.bf16.vlgmr.msra.gmra.mxu3 %v13679_v45 }
 0x4e9   : > { %12853 = vmatpush.bf16.msrb.mxu3 %v16056_v43  ;;  %v12568_v1 = vpop.f32.mrf.mxu2  ;;  %v16070_v43 = vld [vmem:[%s18762_s11 + $0x668] sm:$0xff] }
 0x4ea   : > { %12812 = vmatpush.bf16.msrb.mxu0 %v16031_v46  ;;  %v12569_v2 = vadd.f32 %v12568_v1, %v12555_v60  ;;  %v19012_v24 = vpop.f32.mrf.mxu0  ;;  %v16058_v1 = vld [vmem:[%s18762_s11 + $0x608] sm:$0xff] }
 0x4eb   : > { %12840 = vmatpush.bf16.msrb.mxu2 %v16047_v47  ;;  %v12582_v5 = vpop.f32.mrf.mxu3  ;;  %v16061_v47 = vld [vmem:[%s18762_s11 + $0x620] sm:$0xff] }
 0x4ec   : > { %12826 = vmatpush.bf16.msrb.mxu1 %v16039_v48  ;;  %v18993_v6 = vadd.f32 %v12582_v5, %v12569_v2  ;;  %v19019_v32 = vpop.f32.mrf.mxu1  ;;  %v16077_v48 = vld [vmem:[%s18762_s11 + $0x6a0] sm:$0xff]  ;;  %v16074_v2 = vld [vmem:[%s18762_s11 + $0x688] sm:$0xff] }
 0x4ed   : > { %12854 = vmatpush.bf16.msrb.mxu3 %v16055_v49  ;;  %v16057_v5 = vld [vmem:[%s18762_s11 + $0x600] sm:$0xff] }
 0x4ee   : > { %12813 = vmatpush.bf16.msrb.mxu0 %v16030_v50 }
 0x4ef   : > { %12841 = vmatpush.bf16.msrb.mxu2 %v16046_v51  ;;  %v16069_v51 = vld [vmem:[%s18762_s11 + $0x660] sm:$0xff] }
 0x4f0   : > { %12827 = vmatpush.bf16.msrb.mxu1 %v16038_v52  ;;  %v16085_v52 = vld [vmem:[%s18762_s11 + $0x6e0] sm:$0xff] }
 0x4f1   : > { %12855 = vmatpush.bf16.msrb.mxu3 %v16054_v53  ;;  %v19025_v39 = vpop.f32.mrf.mxu2  ;;  %v16060_v53 = vld [vmem:[%s18762_s11 + $0x618] sm:$0xff] }
 0x4f2   : > { %12814 = vmatpush.bf16.msrb.mxu0 %v16029_v54  ;;  %v16076_v54 = vld [vmem:[%s18762_s11 + $0x698] sm:$0xff] }
 0x4f3   : > { %12842 = vmatpush.bf16.msrb.mxu2 %v16045_v55  ;;  %v19029_v42 = vpop.f32.mrf.mxu3 }
 0x4f4   : > { %12828 = vmatpush.bf16.msrb.mxu1 %v16037_v56 }
 0x4f5   : > { %12856 = vmatpush.bf16.msrb.mxu3 %v16053_v57  ;;  %v16068_v57 = vld [vmem:[%s18762_s11 + $0x658] sm:$0xff] }
 0x4f6   : > { %12815 = vmatpush.bf16.msrb.mxu0 %v16028_v61  ;;  %v16059_v61 = vld [vmem:[%s18762_s11 + $0x610] sm:$0xff] }
 0x4f7   : > { %12843 = vmatpush.bf16.msrb.mxu2 %v16044_v62  ;;  %v16075_v62 = vld [vmem:[%s18762_s11 + $0x690] sm:$0xff] }
 0x4f8   : > { %12829 = vmatpush.bf16.msrb.mxu1 %v16036_v63  ;;  %v16067_v63 = vld [vmem:[%s18762_s11 + $0x650] sm:$0xff] }
 0x4f9   : > { %12857 = vmatpush.bf16.msrb.mxu3 %v16052_v0  ;;  %v16083_v0 = vld [vmem:[%s18762_s11 + $0x6d0] sm:$0xff] }
 0x4fa   : > { %12816 = vmatpush.bf16.msrb.mxu0 %v16027_v3  ;;  %v16066_v3 = vld [vmem:[%s18762_s11 + $0x648] sm:$0xff] }
 0x4fb   : > { %12844 = vmatpush.bf16.msrb.mxu2 %v16043_v4  ;;  %v16082_v4 = vld [vmem:[%s18762_s11 + $0x6c8] sm:$0xff] }
 0x4fc   : > { %12830 = vmatpush.bf16.msrb.mxu1 %v16035_v7  ;;  %v16096_v7 = vld [vmem:[%s18762_s11 + $0x738] sm:$0xff] }
 0x4fd   : > { %12858 = vmatpush.bf16.msrb.mxu3 %v16051_v8  ;;  %v16112_v8 = vld [vmem:[%s18762_s11 + $0x7b8] sm:$0xff] }
 0x4fe   : > { %12817 = vmatpush.bf16.msrb.mxu0 %v16026_v9  ;;  %v13698_v9 = vld [vmem:[%s18803_s16 + $0x60] sm:$0xf] }
 0x4ff   : > { %12845 = vmatpush.bf16.msrb.mxu2 %v16042_v10  ;;  %v15846_v10 = vld [vmem:[%s18803_s16 + $0x150] sm:$0xf0] }
 0x500   : > { %12831 = vmatpush.bf16.msrb.mxu1 %v16034_v11  ;;  %v13706_v11 = vld [vmem:[%s18803_s16 + $0x68] sm:$0xf]  ;;  %v13699_v19 = vor.u32 %v15846_v10, %v13698_v9 }
 0x501   : > { %12859 = vmatpush.bf16.msrb.mxu3 %v16050_v12  ;;  %v15847_v12 = vld [vmem:[%s18803_s16 + $0x158] sm:$0xf0]  ;;  %v16097_v10 = vld [vmem:[%s18762_s11 + $0x740] sm:$0xff] }
 0x502   : > { %12818 = vmatpush.bf16.msrb.mxu0 %v16025_v13  ;;  %v12596_v45 = vpop.f32.mrf.mxu0  ;;  %v16065_v13 = vld [vmem:[%s18762_s11 + $0x640] sm:$0xff]  ;;  %v13707_v20 = vor.u32 %v15847_v12, %v13706_v11 }
 0x503   : > { %12846 = vmatpush.bf16.msrb.mxu2 %v16041_v14  ;;  %v12597_v46 = vadd.f32 %v12596_v45, %v18993_v6  ;;  %v16073_v6 = vld [vmem:[%s18762_s11 + $0x680] sm:$0xff] }
 0x504   : > { %12832 = vmatpush.bf16.msrb.mxu1 %v16033_v21  ;;  %v12610_v49 = vpop.f32.mrf.mxu1  ;;  %v16081_v14 = vld [vmem:[%s18762_s11 + $0x6c0] sm:$0xff] }
 0x505   : > { %12860 = vmatpush.bf16.msrb.mxu3 %v16049_v22  ;;  %12819 = vmatmul.bf16.vlgmr.msrb.gmra.mxu0 %v13683_v28  ;;  %v12611_v50 = vadd.f32 %v12610_v49, %v12597_v46  ;;  %v16104_v22 = vld [vmem:[%s18762_s11 + $0x778] sm:$0xff]  ;;  %v16095_v28 = vld [vmem:[%s18762_s11 + $0x730] sm:$0xff]  ;;  %v12557_v49 = vadd.f32 %v19019_v32, %v19012_v24  ;;  %v16113_v11 = vld [vmem:[%s18762_s11 + $0x7c0] sm:$0xff] }
 0x506   : > { %12867 = vmatpush.bf16.msra.mxu0 %v16064_v15  ;;  %12847 = vmatmul.bf16.vlgmr.msrb.gmra.mxu2 %v13691_v29  ;;  %v15816_v15 = vld [vmem:[%s18803_s16 + $0x64] sm:$0xf]  ;;  %v15818_v12 = vld [vmem:[%s18803_s16 + $0x74] sm:$0xf] }
 0x507   : > { %12895 = vmatpush.bf16.msra.mxu2 %v16080_v16  ;;  %12833 = vmatmul.bf16.vlgmr.msrb.gmra.mxu1 %v13687_v33  ;;  %v13700_v16 = vld [vmem:[%s18803_s16 + $0x154] sm:$0xf0] }
 0x508   : > { %12881 = vmatpush.bf16.msra.mxu1 %v16072_v30  ;;  %12861 = vmatmul.bf16.vlgmr.msrb.gmra.mxu3 %v13695_v34  ;;  %v13703_v25 = vor.u32 %v15816_v15, %v13700_v16  ;;  %v16111_v29 = vld [vmem:[%s18762_s11 + $0x7b0] sm:$0xff]  ;;  %v16094_v34 = vld [vmem:[%s18762_s11 + $0x728] sm:$0xff] }
 0x509   : > { %12909 = vmatpush.bf16.msra.mxu3 %v16088_v31  ;;  %v12624_v55 = vpop.f32.mrf.mxu2  ;;  %v16103_v30 = vld [vmem:[%s18762_s11 + $0x770] sm:$0xff]  ;;  %v13724_v15 = vld [vmem:[%s18803_s16 + $0x16c] sm:$0xf0] }
 0x50a   : > { %12868 = vmatpush.bf16.msra.mxu0 %v16063_v35  ;;  %v12625_v56 = vadd.f32 %v12624_v55, %v12611_v50  ;;  %v19066_v21 = vpop.f32.mrf.mxu0  ;;  %v16119_v31 = vld [vmem:[%s18762_s11 + $0x7f0] sm:$0xff]  ;;  %v16110_v35 = vld [vmem:[%s18762_s11 + $0x7a8] sm:$0xff]  ;;  %v16092_v50 = vld [vmem:[%s18762_s11 + $0x718] sm:$0xff] }
 0x50b   : > { %12896 = vmatpush.bf16.msra.mxu2 %v16079_v36  ;;  %v12638_v59 = vpop.f32.mrf.mxu3  ;;  %v16116_v55 = vld [vmem:[%s18762_s11 + $0x7d8] sm:$0xff]  ;;  %v16091_v32 = vld [vmem:[%s18762_s11 + $0x710] sm:$0xff] }
 0x50c   : > { %12882 = vmatpush.bf16.msra.mxu1 %v16071_v37  ;;  %v19042_v60 = vadd.f32 %v12638_v59, %v12625_v56  ;;  %v19070_v27 = vpop.f32.mrf.mxu1  ;;  %v16102_v37 = vld [vmem:[%s18762_s11 + $0x768] sm:$0xff]  ;;  %v16099_v59 = vld [vmem:[%s18762_s11 + $0x750] sm:$0xff] }
 0x50d   : > { %12910 = vmatpush.bf16.msra.mxu3 %v16087_v38  ;;  %v16118_v38 = vld [vmem:[%s18762_s11 + $0x7e8] sm:$0xff] }
 0x50e   : > { %12869 = vmatpush.bf16.msra.mxu0 %v16062_v40 }
 0x50f   : > { %12897 = vmatpush.bf16.msra.mxu2 %v16078_v41 }
 0x510   : > { %12883 = vmatpush.bf16.msra.mxu1 %v16070_v43  ;;  %v16093_v43 = vld [vmem:[%s18762_s11 + $0x720] sm:$0xff] }
 0x511   : > { %12911 = vmatpush.bf16.msra.mxu3 %v16086_v44  ;;  %v19076_v33 = vpop.f32.mrf.mxu2  ;;  %v16109_v44 = vld [vmem:[%s18762_s11 + $0x7a0] sm:$0xff] }
 0x512   : > { %12870 = vmatpush.bf16.msra.mxu0 %v16061_v47  ;;  %v16101_v47 = vld [vmem:[%s18762_s11 + $0x760] sm:$0xff] }
 0x513   : > { %12898 = vmatpush.bf16.msra.mxu2 %v16077_v48  ;;  %v19080_v36 = vpop.f32.mrf.mxu3  ;;  %v16117_v48 = vld [vmem:[%s18762_s11 + $0x7e0] sm:$0xff] }
 0x514   : > { %12884 = vmatpush.bf16.msra.mxu1 %v16069_v51  ;;  %v16108_v51 = vld [vmem:[%s18762_s11 + $0x798] sm:$0xff] }
 0x515   : > { %12912 = vmatpush.bf16.msra.mxu3 %v16085_v52 }
 0x516   : > { %12871 = vmatpush.bf16.msra.mxu0 %v16060_v53 }
 0x517   : > { %12899 = vmatpush.bf16.msra.mxu2 %v16076_v54  ;;  %v16100_v54 = vld [vmem:[%s18762_s11 + $0x758] sm:$0xff] }
 0x518   : > { %12885 = vmatpush.bf16.msra.mxu1 %v16068_v57  ;;  %v12571_v57 = vadd.f32 %v19025_v39, %v12557_v49  ;;  %v16090_v39 = vld [vmem:[%s18762_s11 + $0x708] sm:$0xff]  ;;  %v16133_v49 = vld [vmem:[%s18762_s11 + $0x860] sm:$0xff] }
 0x519   : > { %12913 = vmatpush.bf16.msra.mxu3 %v16084_v58  ;;  %v16107_v58 = vld [vmem:[%s18762_s11 + $0x790] sm:$0xff] }
 0x51a   : > { %12872 = vmatpush.bf16.msra.mxu0 %v16059_v61  ;;  %v12585_v61 = vadd.f32 %v19029_v42, %v12571_v57  ;;  %v16128_v42 = vld [vmem:[%s18762_s11 + $0x838] sm:$0xff] }
 0x51b   : > { %12900 = vmatpush.bf16.msra.mxu2 %v16075_v62  ;;  %v16106_v62 = vld [vmem:[%s18762_s11 + $0x788] sm:$0xff]  ;;  %v16148_v57 = vld [vmem:[%s18762_s11 + $0x8d8] sm:$0xff] }
 0x51c   : > { %12886 = vmatpush.bf16.msra.mxu1 %v16067_v63  ;;  %v12599_v63 = vadd.f32 %v19066_v21, %v12585_v61  ;;  %v16152_v21 = vld [vmem:[%s18762_s11 + $0x8f8] sm:$0xff]  ;;  %v16139_v61 = vld [vmem:[%s18762_s11 + $0x890] sm:$0xff] }
 0x51d   : > { %12914 = vmatpush.bf16.msra.mxu3 %v16083_v0  ;;  %v16098_v0 = vld [vmem:[%s18762_s11 + $0x748] sm:$0xff] }
 0x51e   : > { %12873 = vmatpush.bf16.msra.mxu0 %v16058_v1  ;;  %v16114_v1 = vld [vmem:[%s18762_s11 + $0x7c8] sm:$0xff]  ;;  %v12613_v9 = vadd.f32 %v19070_v27, %v12599_v63  ;;  %v16143_v27 = vld [vmem:[%s18762_s11 + $0x8b0] sm:$0xff] }
 0x51f   : > { %12901 = vmatpush.bf16.msra.mxu2 %v16074_v2  ;;  %v16089_v2 = vld [vmem:[%s18762_s11 + $0x700] sm:$0xff]  ;;  %v16147_v63 = vld [vmem:[%s18762_s11 + $0x8d0] sm:$0xff] }
 0x520   : > { %12887 = vmatpush.bf16.msra.mxu1 %v16066_v3  ;;  %v16105_v3 = vld [vmem:[%s18762_s11 + $0x780] sm:$0xff]  ;;  %v12627_v16 = vadd.f32 %v19076_v33, %v12613_v9 }
 0x521   : > { %12915 = vmatpush.bf16.msra.mxu3 %v16082_v4  ;;  %v16144_v4 = vld [vmem:[%s18762_s11 + $0x8b8] sm:$0xff] }
 0x522   : > { %12874 = vmatpush.bf16.msra.mxu0 %v16057_v5  ;;  %v12652_v40 = vpop.f32.mrf.mxu0  ;;  %v13714_v5 = vld [vmem:[%s18803_s16 + $0x70] sm:$0xf] }
 0x523   : > { %12902 = vmatpush.bf16.msra.mxu2 %v16073_v6  ;;  %v12653_v41 = vadd.f32 %v12652_v40, %v19042_v60  ;;  %v16115_v60 = vld [vmem:[%s18762_s11 + $0x7d0] sm:$0xff] }
 0x524   : > { %12888 = vmatpush.bf16.msra.mxu1 %v16065_v13  ;;  %v12666_v45 = vpop.f32.mrf.mxu1  ;;  %v15848_v6 = vld [vmem:[%s18803_s16 + $0x160] sm:$0xf0]  ;;  %v13716_v13 = vld [vmem:[%s18803_s16 + $0x164] sm:$0xf0] }
 0x525   : > { %12916 = vmatpush.bf16.msra.mxu3 %v16081_v14  ;;  %12875 = vmatmul.bf16.vlgmr.msra.gmra.mxu0 %v13699_v19  ;;  %v12667_v46 = vadd.f32 %v12666_v45, %v12653_v41  ;;  %v15819_v14 = vld [vmem:[%s18803_s16 + $0x7c] sm:$0xf]  ;;  %v13715_v17 = vor.u32 %v15848_v6, %v13714_v5  ;;  %v16141_v45 = vld [vmem:[%s18762_s11 + $0x8a0] sm:$0xff] }
 0x526   : > { %12923 = vmatpush.bf16.msrb.mxu0 %v16096_v7  ;;  %12903 = vmatmul.bf16.vlgmr.msra.gmra.mxu2 %v13707_v20  ;;  %v13722_v7 = vld [vmem:[%s18803_s16 + $0x78] sm:$0xf]  ;;  %v16136_v20 = vld [vmem:[%s18762_s11 + $0x878] sm:$0xff] }
 0x527   : > { %12951 = vmatpush.bf16.msrb.mxu2 %v16112_v8  ;;  %12889 = vmatmul.bf16.vlgmr.msra.gmra.mxu1 %v13703_v25  ;;  %v15849_v8 = vld [vmem:[%s18803_s16 + $0x168] sm:$0xf0]  ;;  %v16146_v5 = vld [vmem:[%s18762_s11 + $0x8c8] sm:$0xff] }
 0x528   : > { %12937 = vmatpush.bf16.msrb.mxu1 %v16104_v22  ;;  %12917 = vmatmul.bf16.vlgmr.msra.gmra.mxu3 %v13711_v26  ;;  %v13723_v18 = vor.u32 %v15849_v8, %v13722_v7  ;;  %v13719_v22 = vor.u32 %v15818_v12, %v13716_v13  ;;  %v16127_v26 = vld [vmem:[%s18762_s11 + $0x830] sm:$0xff]  ;;  %v16121_v7 = vld [vmem:[%s18762_s11 + $0x800] sm:$0xff] }
 0x529   : > { %12965 = vmatpush.bf16.msrb.mxu3 %v16120_v23  ;;  %v12680_v52 = vpop.f32.mrf.mxu2  ;;  %v13727_v23 = vor.u32 %v15819_v14, %v13724_v15  ;;  %v16137_v8 = vld [vmem:[%s18762_s11 + $0x880] sm:$0xff]  ;;  %v13730_v12 = vld [vmem:[%s18803_s16 + $0x80] sm:$0xf]  ;;  %v15851_v15 = vld [vmem:[%s18803_s16 + $0x178] sm:$0xf0] }
 0x52a   : > { %12924 = vmatpush.bf16.msrb.mxu0 %v16095_v28  ;;  %v12681_v53 = vadd.f32 %v12680_v52, %v12667_v46  ;;  %v12654_v19 = vpop.f32.mrf.mxu0  ;;  %v12641_v28 = vadd.f32 %v19080_v36, %v12627_v16  ;;  %v16134_v36 = vld [vmem:[%s18762_s11 + $0x868] sm:$0xff]  ;;  %v16140_v52 = vld [vmem:[%s18762_s11 + $0x898] sm:$0xff]  ;;  %v16129_v16 = vld [vmem:[%s18762_s11 + $0x840] sm:$0xff] }
 0x52b   : > { %12952 = vmatpush.bf16.msrb.mxu2 %v16111_v29  ;;  %v12694_v56 = vpop.f32.mrf.mxu3  ;;  %v16135_v29 = vld [vmem:[%s18762_s11 + $0x870] sm:$0xff]  ;;  %v15850_v13 = vld [vmem:[%s18803_s16 + $0x170] sm:$0xf0]  ;;  %v13738_v14 = vld [vmem:[%s18803_s16 + $0x88] sm:$0xf] }
 0x52c   : > { %12938 = vmatpush.bf16.msrb.mxu1 %v16103_v30  ;;  %v19096_v24 = vadd.f32 %v12694_v56, %v12681_v53  ;;  %v12668_v25 = vpop.f32.mrf.mxu1  ;;  %v16151_v30 = vld [vmem:[%s18762_s11 + $0x8f0] sm:$0xff]  ;;  %v16132_v56 = vld [vmem:[%s18762_s11 + $0x858] sm:$0xff] }
 0x52d   : > { %12966 = vmatpush.bf16.msrb.mxu3 %v16119_v31  ;;  %v12655_v31 = vadd.f32 %v12654_v19, %v12641_v28  ;;  %v13732_v19 = vld [vmem:[%s18803_s16 + $0x174] sm:$0xf0] }
 0x52e   : > { %12925 = vmatpush.bf16.msrb.mxu0 %v16094_v34  ;;  %v16126_v34 = vld [vmem:[%s18762_s11 + $0x828] sm:$0xff] }
 0x52f   : > { %12953 = vmatpush.bf16.msrb.mxu2 %v16110_v35  ;;  %v16142_v35 = vld [vmem:[%s18762_s11 + $0x8a8] sm:$0xff]  ;;  %v12669_v41 = vadd.f32 %v12668_v25, %v12655_v31  ;;  %v16168_v25 = vld [vmem:[%s18762_s11 + $0x978] sm:$0xff]  ;;  %v16167_v31 = vld [vmem:[%s18762_s11 + $0x970] sm:$0xff] }
 0x530   : > { %12939 = vmatpush.bf16.msrb.mxu1 %v16102_v37 }
 0x531   : > { %12967 = vmatpush.bf16.msrb.mxu3 %v16118_v38  ;;  %v12682_v33 = vpop.f32.mrf.mxu2  ;;  %v16150_v38 = vld [vmem:[%s18762_s11 + $0x8e8] sm:$0xff] }
 0x532   : > { %12926 = vmatpush.bf16.msrb.mxu0 %v16093_v43 }
 0x533   : > { %12954 = vmatpush.bf16.msrb.mxu2 %v16109_v44  ;;  %v12696_v37 = vpop.f32.mrf.mxu3  ;;  %v16125_v44 = vld [vmem:[%s18762_s11 + $0x820] sm:$0xff] }
 0x534   : > { %12940 = vmatpush.bf16.msrb.mxu1 %v16101_v47  ;;  %v12683_v47 = vadd.f32 %v12682_v33, %v12669_v41  ;;  %v16183_v33 = vld [vmem:[%s18762_s11 + $0x9f0] sm:$0xff]  ;;  %v16157_v41 = vld [vmem:[%s18762_s11 + $0x920] sm:$0xff] }
 0x535   : > { %12968 = vmatpush.bf16.msrb.mxu3 %v16117_v48 }
 0x536   : > { %12927 = vmatpush.bf16.msrb.mxu0 %v16092_v50  ;;  %v16149_v50 = vld [vmem:[%s18762_s11 + $0x8e0] sm:$0xff] }
 0x537   : > { %12955 = vmatpush.bf16.msrb.mxu2 %v16108_v51  ;;  %v16124_v51 = vld [vmem:[%s18762_s11 + $0x818] sm:$0xff] }
 0x538   : > { %12941 = vmatpush.bf16.msrb.mxu1 %v16100_v54  ;;  %v12697_v54 = vadd.f32 %v12696_v37, %v12683_v47  ;;  %v16166_v37 = vld [vmem:[%s18762_s11 + $0x968] sm:$0xff]  ;;  %v16181_v47 = vld [vmem:[%s18762_s11 + $0x9e0] sm:$0xff] }
 0x539   : > { %12969 = vmatpush.bf16.msrb.mxu3 %v16116_v55 }
 0x53a   : > { %12928 = vmatpush.bf16.msrb.mxu0 %v16091_v32 }
 0x53b   : > { %12956 = vmatpush.bf16.msrb.mxu2 %v16107_v58 }
 0x53c   : > { %12942 = vmatpush.bf16.msrb.mxu1 %v16099_v59 }
 0x53d   : > { %12970 = vmatpush.bf16.msrb.mxu3 %v16115_v60  ;;  %v16123_v60 = vld [vmem:[%s18762_s11 + $0x810] sm:$0xff] }
 0x53e   : > { %12929 = vmatpush.bf16.msrb.mxu0 %v16090_v39 }
 0x53f   : > { %12957 = vmatpush.bf16.msrb.mxu2 %v16106_v62  ;;  %v16131_v62 = vld [vmem:[%s18762_s11 + $0x850] sm:$0xff] }
 0x540   : > { %12943 = vmatpush.bf16.msrb.mxu1 %v16098_v0 }
 0x541   : > { %12971 = vmatpush.bf16.msrb.mxu3 %v16114_v1  ;;  %v16122_v1 = vld [vmem:[%s18762_s11 + $0x808] sm:$0xff] }
 0x542   : > { %12930 = vmatpush.bf16.msrb.mxu0 %v16089_v2  ;;  %v12708_v40 = vpop.f32.mrf.mxu0  ;;  %v16138_v2 = vld [vmem:[%s18762_s11 + $0x888] sm:$0xff] }
 0x543   : > { %12958 = vmatpush.bf16.msrb.mxu2 %v16105_v3  ;;  %v12709_v43 = vadd.f32 %v12708_v40, %v19096_v24 }
 0x544   : > { %12944 = vmatpush.bf16.msrb.mxu1 %v16097_v10  ;;  %v12722_v46 = vpop.f32.mrf.mxu1  ;;  %v16160_v10 = vld [vmem:[%s18762_s11 + $0x938] sm:$0xff] }
 0x545   : > { %12972 = vmatpush.bf16.msrb.mxu3 %v16113_v11  ;;  %12931 = vmatmul.bf16.vlgmr.msrb.gmra.mxu0 %v13715_v17  ;;  %v12723_v48 = vadd.f32 %v12722_v46, %v12709_v43  ;;  %v16176_v11 = vld [vmem:[%s18762_s11 + $0x9b8] sm:$0xff]  ;;  %v16145_v17 = vld [vmem:[%s18762_s11 + $0x8c0] sm:$0xff] }
 0x546   : > { %12979 = vmatpush.bf16.msra.mxu0 %v16128_v42  ;;  %12959 = vmatmul.bf16.vlgmr.msrb.gmra.mxu2 %v13723_v18  ;;  %v15820_v18 = vld [vmem:[%s18803_s16 + $0x84] sm:$0xf]  ;;  %v16173_v43 = vld [vmem:[%s18762_s11 + $0x9a0] sm:$0xff] }
 0x547   : > { %13007 = vmatpush.bf16.msra.mxu2 %v16144_v4  ;;  %12945 = vmatmul.bf16.vlgmr.msrb.gmra.mxu1 %v13719_v22  ;;  %v16130_v4 = vld [vmem:[%s18762_s11 + $0x848] sm:$0xff]  ;;  %v13731_v22 = vor.u32 %v15850_v13, %v13730_v12  ;;  %v16165_v46 = vld [vmem:[%s18762_s11 + $0x960] sm:$0xff] }
 0x548   : > { %12993 = vmatpush.bf16.msra.mxu1 %v16136_v20  ;;  %12973 = vmatmul.bf16.vlgmr.msrb.gmra.mxu3 %v13727_v23  ;;  %v15821_v20 = vld [vmem:[%s18803_s16 + $0x8c] sm:$0xf]  ;;  %v13739_v23 = vor.u32 %v15851_v15, %v13738_v14  ;;  %v15822_v14 = vld [vmem:[%s18803_s16 + $0x94] sm:$0xf]  ;;  %v13748_v15 = vld [vmem:[%s18803_s16 + $0x184] sm:$0xf0] }
 0x549   : > { %13021 = vmatpush.bf16.msra.mxu3 %v16152_v21  ;;  %v12736_v53 = vpop.f32.mrf.mxu2  ;;  %v13740_v21 = vld [vmem:[%s18803_s16 + $0x17c] sm:$0xf0]  ;;  %v16161_v12 = vld [vmem:[%s18762_s11 + $0x940] sm:$0xff] }
 0x54a   : > { %12980 = vmatpush.bf16.msra.mxu0 %v16127_v26  ;;  %v12737_v55 = vadd.f32 %v12736_v53, %v12723_v48  ;;  %v12710_v24 = vpop.f32.mrf.mxu0  ;;  %v16184_v26 = vld [vmem:[%s18762_s11 + $0x9f8] sm:$0xff]  ;;  %v13743_v28 = vor.u32 %v15821_v20, %v13740_v21  ;;  %v16177_v13 = vld [vmem:[%s18762_s11 + $0x9c0] sm:$0xff] }
 0x54b   : > { %13008 = vmatpush.bf16.msra.mxu2 %v16143_v27  ;;  %v12750_v32 = vpop.f32.mrf.mxu3  ;;  %v12711_v58 = vadd.f32 %v12710_v24, %v12697_v54  ;;  %v13735_v27 = vor.u32 %v15820_v18, %v13732_v19  ;;  %v16156_v48 = vld [vmem:[%s18762_s11 + $0x918] sm:$0xff]  ;;  %v16155_v24 = vld [vmem:[%s18762_s11 + $0x910] sm:$0xff] }
 0x54c   : > { %12994 = vmatpush.bf16.msra.mxu1 %v16135_v29  ;;  %v19144_v59 = vadd.f32 %v12750_v32, %v12737_v55  ;;  %v12724_v39 = vpop.f32.mrf.mxu1  ;;  %v16159_v29 = vld [vmem:[%s18762_s11 + $0x930] sm:$0xff]  ;;  %v16180_v53 = vld [vmem:[%s18762_s11 + $0x9d8] sm:$0xff] }
 0x54d   : > { %13022 = vmatpush.bf16.msra.mxu3 %v16151_v30  ;;  %v12725_v0 = vadd.f32 %v12724_v39, %v12711_v58  ;;  %v16175_v30 = vld [vmem:[%s18762_s11 + $0x9b0] sm:$0xff]  ;;  %v16154_v39 = vld [vmem:[%s18762_s11 + $0x908] sm:$0xff]  ;;  %v16200_v20 = vld [vmem:[%s18762_s11 + $0xa78] sm:$0xff] }
 0x54e   : > { %12981 = vmatpush.bf16.msra.mxu0 %v16126_v34  ;;  %v16158_v34 = vld [vmem:[%s18762_s11 + $0x928] sm:$0xff]  ;;  %v16171_v32 = vld [vmem:[%s18762_s11 + $0x990] sm:$0xff]  ;;  %v16216_v21 = vld [vmem:[%s18762_s11 + $0xaf8] sm:$0xff] }
 0x54f   : > { %13009 = vmatpush.bf16.msra.mxu2 %v16142_v35  ;;  %v16174_v35 = vld [vmem:[%s18762_s11 + $0x9a8] sm:$0xff] }
 0x550   : > { %12995 = vmatpush.bf16.msra.mxu1 %v16134_v36  ;;  %v16182_v36 = vld [vmem:[%s18762_s11 + $0x9e8] sm:$0xff] }
 0x551   : > { %13023 = vmatpush.bf16.msra.mxu3 %v16150_v38  ;;  %v12738_v3 = vpop.f32.mrf.mxu2 }
 0x552   : > { %12982 = vmatpush.bf16.msra.mxu0 %v16125_v44  ;;  %v12739_v42 = vadd.f32 %v12738_v3, %v12725_v0 }
 0x553   : > { %13010 = vmatpush.bf16.msra.mxu2 %v16141_v45  ;;  %v12752_v6 = vpop.f32.mrf.mxu3 }
 0x554   : > { %12996 = vmatpush.bf16.msra.mxu1 %v16133_v49  ;;  %v19156_v9 = vadd.f32 %v12752_v6, %v12739_v42  ;;  %v16172_v49 = vld [vmem:[%s18762_s11 + $0x998] sm:$0xff]  ;;  %v16153_v42 = vld [vmem:[%s18762_s11 + $0x900] sm:$0xff] }
 0x555   : > { %13024 = vmatpush.bf16.msra.mxu3 %v16149_v50  ;;  %v16192_v6 = vld [vmem:[%s18762_s11 + $0xa38] sm:$0xff] }
 0x556   : > { %12983 = vmatpush.bf16.msra.mxu0 %v16124_v51 }
 0x557   : > { %13011 = vmatpush.bf16.msra.mxu2 %v16140_v52  ;;  %v16164_v52 = vld [vmem:[%s18762_s11 + $0x958] sm:$0xff] }
 0x558   : > { %12997 = vmatpush.bf16.msra.mxu1 %v16132_v56 }
 0x559   : > { %13025 = vmatpush.bf16.msra.mxu3 %v16148_v57 }
 0x55a   : > { %12984 = vmatpush.bf16.msra.mxu0 %v16123_v60  ;;  %v16163_v60 = vld [vmem:[%s18762_s11 + $0x950] sm:$0xff] }
 0x55b   : > { %13012 = vmatpush.bf16.msra.mxu2 %v16139_v61  ;;  %v16179_v61 = vld [vmem:[%s18762_s11 + $0x9d0] sm:$0xff] }
 0x55c   : > { %12998 = vmatpush.bf16.msra.mxu1 %v16131_v62  ;;  %v16170_v62 = vld [vmem:[%s18762_s11 + $0x988] sm:$0xff] }
 0x55d   : > { %13026 = vmatpush.bf16.msra.mxu3 %v16147_v63 }
 0x55e   : > { %12985 = vmatpush.bf16.msra.mxu0 %v16122_v1  ;;  %v16162_v1 = vld [vmem:[%s18762_s11 + $0x948] sm:$0xff] }
 0x55f   : > { %13013 = vmatpush.bf16.msra.mxu2 %v16138_v2  ;;  %v16178_v2 = vld [vmem:[%s18762_s11 + $0x9c8] sm:$0xff] }
 0x560   : > { %12999 = vmatpush.bf16.msra.mxu1 %v16130_v4  ;;  %v16169_v4 = vld [vmem:[%s18762_s11 + $0x980] sm:$0xff] }
 0x561   : > { %13027 = vmatpush.bf16.msra.mxu3 %v16146_v5 }
 0x562   : > { %12986 = vmatpush.bf16.msra.mxu0 %v16121_v7  ;;  %v12764_v38 = vpop.f32.mrf.mxu0  ;;  %v16208_v7 = vld [vmem:[%s18762_s11 + $0xab8] sm:$0xff] }
 0x563   : > { %13014 = vmatpush.bf16.msra.mxu2 %v16137_v8  ;;  %v12765_v40 = vadd.f32 %v12764_v38, %v19144_v59  ;;  %v13746_v8 = vld [vmem:[%s18803_s16 + $0x90] sm:$0xf] }
 0x564   : > { %13000 = vmatpush.bf16.msra.mxu1 %v16129_v16  ;;  %v12778_v44 = vpop.f32.mrf.mxu1  ;;  %v15823_v16 = vld [vmem:[%s18803_s16 + $0x9c] sm:$0xf] }
 0x565   : > { %13028 = vmatpush.bf16.msra.mxu3 %v16145_v17  ;;  %12987 = vmatmul.bf16.vlgmr.msra.gmra.mxu0 %v13731_v22  ;;  %v12779_v45 = vadd.f32 %v12778_v44, %v12765_v40  ;;  %v13756_v17 = vld [vmem:[%s18803_s16 + $0x18c] sm:$0xf0]  ;;  %v13751_v22 = vor.u32 %v15822_v14, %v13748_v15  ;;  %v16188_v44 = vld [vmem:[%s18762_s11 + $0xa18] sm:$0xff] }
 0x566   : > { %13035 = vmatpush.bf16.msrb.mxu0 %v16160_v10  ;;  %13015 = vmatmul.bf16.vlgmr.msra.gmra.mxu2 %v13739_v23  ;;  %v13754_v10 = vld [vmem:[%s18803_s16 + $0x98] sm:$0xf]  ;;  %v13759_v23 = vor.u32 %v15823_v16, %v13756_v17  ;;  %v16232_v16 = vld [vmem:[%s18762_s11 + $0xb78] sm:$0xff] }
 0x567   : > { %13063 = vmatpush.bf16.msrb.mxu2 %v16176_v11  ;;  %13001 = vmatmul.bf16.vlgmr.msra.gmra.mxu1 %v13735_v27  ;;  %v15853_v11 = vld [vmem:[%s18803_s16 + $0x188] sm:$0xf0]  ;;  %v16199_v27 = vld [vmem:[%s18762_s11 + $0xa70] sm:$0xff] }
 0x568   : > { %13049 = vmatpush.bf16.msrb.mxu1 %v16168_v25  ;;  %13029 = vmatmul.bf16.vlgmr.msra.gmra.mxu3 %v13743_v28  ;;  %v13755_v19 = vor.u32 %v15853_v11, %v13754_v10  ;;  %v16191_v25 = vld [vmem:[%s18762_s11 + $0xa30] sm:$0xff]  ;;  %v16248_v17 = vld [vmem:[%s18762_s11 + $0xbf8] sm:$0xff] }
 0x569   : > { %13077 = vmatpush.bf16.msrb.mxu3 %v16184_v26  ;;  %v12792_v50 = vpop.f32.mrf.mxu2  ;;  %v16207_v26 = vld [vmem:[%s18762_s11 + $0xab0] sm:$0xff] }
 0x56a   : > { %13036 = vmatpush.bf16.msrb.mxu0 %v16159_v29  ;;  %v12793_v51 = vadd.f32 %v12792_v50, %v12779_v45  ;;  %v12766_v54 = vpop.f32.mrf.mxu0  ;;  %v16215_v28 = vld [vmem:[%s18762_s11 + $0xaf0] sm:$0xff]  ;;  %v16190_v29 = vld [vmem:[%s18762_s11 + $0xa28] sm:$0xff]  ;;  %v16204_v45 = vld [vmem:[%s18762_s11 + $0xa98] sm:$0xff] }
 0x56b   : > { %13064 = vmatpush.bf16.msrb.mxu2 %v16175_v30  ;;  %v12806_v55 = vpop.f32.mrf.mxu3  ;;  %v12767_v56 = vadd.f32 %v12766_v54, %v19156_v9  ;;  %v15852_v9 = vld [vmem:[%s18803_s16 + $0x180] sm:$0xf0]  ;;  %v16206_v30 = vld [vmem:[%s18762_s11 + $0xaa8] sm:$0xff] }
 0x56c   : > { %13050 = vmatpush.bf16.msrb.mxu1 %v16167_v31  ;;  %v19190_v57 = vadd.f32 %v12806_v55, %v12793_v51  ;;  %v12780_v58 = vpop.f32.mrf.mxu1  ;;  %v13747_v18 = vor.u32 %v15852_v9, %v13746_v8  ;;  %v16198_v31 = vld [vmem:[%s18762_s11 + $0xa68] sm:$0xff]  ;;  %v16187_v54 = vld [vmem:[%s18762_s11 + $0xa10] sm:$0xff]  ;;  %v16193_v8 = vld [vmem:[%s18762_s11 + $0xa40] sm:$0xff] }
 0x56d   : > { %13078 = vmatpush.bf16.msrb.mxu3 %v16183_v33  ;;  %v12781_v59 = vadd.f32 %v12780_v58, %v12767_v56  ;;  %v16214_v33 = vld [vmem:[%s18762_s11 + $0xae8] sm:$0xff]  ;;  %v16203_v55 = vld [vmem:[%s18762_s11 + $0xa90] sm:$0xff]  ;;  %v16209_v9 = vld [vmem:[%s18762_s11 + $0xac0] sm:$0xff] }
 0x56e   : > { %13037 = vmatpush.bf16.msrb.mxu0 %v16158_v34  ;;  %v16186_v58 = vld [vmem:[%s18762_s11 + $0xa08] sm:$0xff]  ;;  %v15824_v10 = vld [vmem:[%s18803_s16 + $0xa4] sm:$0xf] }
 0x56f   : > { %13065 = vmatpush.bf16.msrb.mxu2 %v16174_v35  ;;  %v13764_v11 = vld [vmem:[%s18803_s16 + $0x194] sm:$0xf0] }
 0x570   : > { %13051 = vmatpush.bf16.msrb.mxu1 %v16166_v37  ;;  %v16189_v37 = vld [vmem:[%s18762_s11 + $0xa20] sm:$0xff] }
 0x571   : > { %13079 = vmatpush.bf16.msrb.mxu3 %v16182_v36  ;;  %v12794_v63 = vpop.f32.mrf.mxu2  ;;  %v16205_v36 = vld [vmem:[%s18762_s11 + $0xaa0] sm:$0xff] }
 0x572   : > { %13038 = vmatpush.bf16.msrb.mxu0 %v16157_v41  ;;  %v12795_v0 = vadd.f32 %v12794_v63, %v12781_v59  ;;  %v16197_v41 = vld [vmem:[%s18762_s11 + $0xa60] sm:$0xff]  ;;  %v16202_v59 = vld [vmem:[%s18762_s11 + $0xa88] sm:$0xff] }
 0x573   : > { %13066 = vmatpush.bf16.msrb.mxu2 %v16173_v43  ;;  %v12808_v3 = vpop.f32.mrf.mxu3  ;;  %v16213_v43 = vld [vmem:[%s18762_s11 + $0xae0] sm:$0xff] }
 0x574   : > { %13052 = vmatpush.bf16.msrb.mxu1 %v16165_v46  ;;  %v19202_v5 = vadd.f32 %v12808_v3, %v12795_v0  ;;  %v16185_v0 = vld [vmem:[%s18762_s11 + $0xa00] sm:$0xff]  ;;  %v16224_v3 = vld [vmem:[%s18762_s11 + $0xb38] sm:$0xff] }
 0x575   : > { %13080 = vmatpush.bf16.msrb.mxu3 %v16181_v47 }
 0x576   : > { %13039 = vmatpush.bf16.msrb.mxu0 %v16156_v48  ;;  %v16196_v48 = vld [vmem:[%s18762_s11 + $0xa58] sm:$0xff] }
 0x577   : > { %13067 = vmatpush.bf16.msrb.mxu2 %v16172_v49  ;;  %v16212_v49 = vld [vmem:[%s18762_s11 + $0xad8] sm:$0xff] }
 0x578   : > { %13053 = vmatpush.bf16.msrb.mxu1 %v16164_v52 }
 0x579   : > { %13081 = vmatpush.bf16.msrb.mxu3 %v16180_v53 }
 0x57a   : > { %13040 = vmatpush.bf16.msrb.mxu0 %v16155_v24  ;;  %v16195_v24 = vld [vmem:[%s18762_s11 + $0xa50] sm:$0xff] }
 0x57b   : > { %13068 = vmatpush.bf16.msrb.mxu2 %v16171_v32  ;;  %v16211_v32 = vld [vmem:[%s18762_s11 + $0xad0] sm:$0xff] }
 0x57c   : > { %13054 = vmatpush.bf16.msrb.mxu1 %v16163_v60 }
 0x57d   : > { %13082 = vmatpush.bf16.msrb.mxu3 %v16179_v61 }
 0x57e   : > { %13041 = vmatpush.bf16.msrb.mxu0 %v16154_v39  ;;  %v16194_v39 = vld [vmem:[%s18762_s11 + $0xa48] sm:$0xff] }
 0x57f   : > { %13069 = vmatpush.bf16.msrb.mxu2 %v16170_v62  ;;  %v16210_v62 = vld [vmem:[%s18762_s11 + $0xac8] sm:$0xff] }
 0x580   : > { %13055 = vmatpush.bf16.msrb.mxu1 %v16162_v1  ;;  %v16201_v1 = vld [vmem:[%s18762_s11 + $0xa80] sm:$0xff] }
 0x581   : > { %13083 = vmatpush.bf16.msrb.mxu3 %v16178_v2 }
 0x582   : > { %13042 = vmatpush.bf16.msrb.mxu0 %v16153_v42  ;;  %v12820_v34 = vpop.f32.mrf.mxu0  ;;  %v16240_v42 = vld [vmem:[%s18762_s11 + $0xbb8] sm:$0xff] }
 0x583   : > { %13070 = vmatpush.bf16.msrb.mxu2 %v16169_v4  ;;  %v12821_v35 = vadd.f32 %v12820_v34, %v19190_v57  ;;  %v13762_v4 = vld [vmem:[%s18803_s16 + $0xa0] sm:$0xf] }
 0x584   : > { %13056 = vmatpush.bf16.msrb.mxu1 %v16161_v12  ;;  %v12834_v38 = vpop.f32.mrf.mxu1  ;;  %v15825_v12 = vld [vmem:[%s18803_s16 + $0xac] sm:$0xf] }
 0x585   : > { %13084 = vmatpush.bf16.msrb.mxu3 %v16177_v13  ;;  %13043 = vmatmul.bf16.vlgmr.msrb.gmra.mxu0 %v13747_v18  ;;  %v12835_v40 = vadd.f32 %v12834_v38, %v12821_v35  ;;  %v13772_v13 = vld [vmem:[%s18803_s16 + $0x19c] sm:$0xf0]  ;;  %v13767_v18 = vor.u32 %v15824_v10, %v13764_v11 }
 0x586   : > { %13091 = vmatpush.bf16.msra.mxu0 %v16192_v6  ;;  %13071 = vmatmul.bf16.vlgmr.msrb.gmra.mxu2 %v13755_v19  ;;  %v13770_v6 = vld [vmem:[%s18803_s16 + $0xa8] sm:$0xf]  ;;  %v13775_v19 = vor.u32 %v15825_v12, %v13772_v13 }
 0x587   : > { %13119 = vmatpush.bf16.msra.mxu2 %v16208_v7  ;;  %13057 = vmatmul.bf16.vlgmr.msrb.gmra.mxu1 %v13751_v22  ;;  %v15855_v7 = vld [vmem:[%s18803_s16 + $0x198] sm:$0xf0]  ;;  %v16220_v38 = vld [vmem:[%s18762_s11 + $0xb18] sm:$0xff] }
 0x588   : > { %13105 = vmatpush.bf16.msra.mxu1 %v16200_v20  ;;  %13085 = vmatmul.bf16.vlgmr.msrb.gmra.mxu3 %v13759_v23  ;;  %v13771_v15 = vor.u32 %v15855_v7, %v13770_v6  ;;  %v16223_v20 = vld [vmem:[%s18762_s11 + $0xb30] sm:$0xff]  ;;  %v15826_v6 = vld [vmem:[%s18803_s16 + $0xb4] sm:$0xf]  ;;  %v13780_v7 = vld [vmem:[%s18803_s16 + $0x1a4] sm:$0xf0] }
 0x589   : > { %13133 = vmatpush.bf16.msra.mxu3 %v16216_v21  ;;  %v12848_v46 = vpop.f32.mrf.mxu2  ;;  %v16239_v21 = vld [vmem:[%s18762_s11 + $0xbb0] sm:$0xff]  ;;  %v16264_v12 = vld [vmem:[%s18762_s11 + $0xc78] sm:$0xff] }
 0x58a   : > { %13092 = vmatpush.bf16.msra.mxu0 %v16191_v25  ;;  %v12849_v47 = vadd.f32 %v12848_v46, %v12835_v40  ;;  %v12822_v50 = vpop.f32.mrf.mxu0  ;;  %v16231_v22 = vld [vmem:[%s18762_s11 + $0xb70] sm:$0xff]  ;;  %v16222_v25 = vld [vmem:[%s18762_s11 + $0xb28] sm:$0xff]  ;;  %v16236_v40 = vld [vmem:[%s18762_s11 + $0xb98] sm:$0xff] }
 0x58b   : > { %13120 = vmatpush.bf16.msra.mxu2 %v16207_v26  ;;  %v12862_v51 = vpop.f32.mrf.mxu3  ;;  %v12823_v52 = vadd.f32 %v12822_v50, %v19202_v5  ;;  %v15854_v5 = vld [vmem:[%s18803_s16 + $0x190] sm:$0xf0]  ;;  %v16247_v23 = vld [vmem:[%s18762_s11 + $0xbf0] sm:$0xff]  ;;  %v16280_v13 = vld [vmem:[%s18762_s11 + $0xcf8] sm:$0xff] }
 0x58c   : > { %13106 = vmatpush.bf16.msra.mxu1 %v16199_v27  ;;  %v19236_v53 = vadd.f32 %v12862_v51, %v12849_v47  ;;  %v12836_v56 = vpop.f32.mrf.mxu1  ;;  %v13763_v14 = vor.u32 %v15854_v5, %v13762_v4  ;;  %v16238_v26 = vld [vmem:[%s18762_s11 + $0xba8] sm:$0xff]  ;;  %v16219_v50 = vld [vmem:[%s18762_s11 + $0xb10] sm:$0xff]  ;;  %v16225_v4 = vld [vmem:[%s18762_s11 + $0xb40] sm:$0xff] }
 0x58d   : > { %13134 = vmatpush.bf16.msra.mxu3 %v16215_v28  ;;  %v12837_v57 = vadd.f32 %v12836_v56, %v12823_v52  ;;  %v16230_v27 = vld [vmem:[%s18762_s11 + $0xb68] sm:$0xff]  ;;  %v16235_v51 = vld [vmem:[%s18762_s11 + $0xb90] sm:$0xff]  ;;  %v16241_v5 = vld [vmem:[%s18762_s11 + $0xbc0] sm:$0xff] }
 0x58e   : > { %13093 = vmatpush.bf16.msra.mxu0 %v16190_v29  ;;  %v16246_v28 = vld [vmem:[%s18762_s11 + $0xbe8] sm:$0xff] }
 0x58f   : > { %13121 = vmatpush.bf16.msra.mxu2 %v16206_v30  ;;  %v16218_v56 = vld [vmem:[%s18762_s11 + $0xb08] sm:$0xff] }
 0x590   : > { %13107 = vmatpush.bf16.msra.mxu1 %v16198_v31  ;;  %v16221_v31 = vld [vmem:[%s18762_s11 + $0xb20] sm:$0xff] }
 0x591   : > { %13135 = vmatpush.bf16.msra.mxu3 %v16214_v33  ;;  %v12850_v60 = vpop.f32.mrf.mxu2  ;;  %v16237_v33 = vld [vmem:[%s18762_s11 + $0xba0] sm:$0xff] }
 0x592   : > { %13094 = vmatpush.bf16.msra.mxu0 %v16189_v37  ;;  %v12851_v61 = vadd.f32 %v12850_v60, %v12837_v57  ;;  %v16229_v37 = vld [vmem:[%s18762_s11 + $0xb60] sm:$0xff]  ;;  %v16234_v57 = vld [vmem:[%s18762_s11 + $0xb88] sm:$0xff] }
 0x593   : > { %13122 = vmatpush.bf16.msra.mxu2 %v16205_v36  ;;  %v12864_v63 = vpop.f32.mrf.mxu3  ;;  %v16245_v36 = vld [vmem:[%s18762_s11 + $0xbe0] sm:$0xff] }
 0x594   : > { %13108 = vmatpush.bf16.msra.mxu1 %v16197_v41  ;;  %v19248_v2 = vadd.f32 %v12864_v63, %v12851_v61  ;;  %v16217_v61 = vld [vmem:[%s18762_s11 + $0xb00] sm:$0xff]  ;;  %v16256_v63 = vld [vmem:[%s18762_s11 + $0xc38] sm:$0xff] }
 0x595   : > { %13136 = vmatpush.bf16.msra.mxu3 %v16213_v43 }
 0x596   : > { %13095 = vmatpush.bf16.msra.mxu0 %v16188_v44  ;;  %v16228_v44 = vld [vmem:[%s18762_s11 + $0xb58] sm:$0xff] }
 0x597   : > { %13123 = vmatpush.bf16.msra.mxu2 %v16204_v45  ;;  %v16244_v45 = vld [vmem:[%s18762_s11 + $0xbd8] sm:$0xff] }
 0x598   : > { %13109 = vmatpush.bf16.msra.mxu1 %v16196_v48 }
 0x599   : > { %13137 = vmatpush.bf16.msra.mxu3 %v16212_v49 }
 0x59a   : > { %13096 = vmatpush.bf16.msra.mxu0 %v16187_v54  ;;  %v16227_v54 = vld [vmem:[%s18762_s11 + $0xb50] sm:$0xff] }
 0x59b   : > { %13124 = vmatpush.bf16.msra.mxu2 %v16203_v55  ;;  %v16243_v55 = vld [vmem:[%s18762_s11 + $0xbd0] sm:$0xff] }
 0x59c   : > { %13110 = vmatpush.bf16.msra.mxu1 %v16195_v24 }
 0x59d   : > { %13138 = vmatpush.bf16.msra.mxu3 %v16211_v32 }
 0x59e   : > { %13097 = vmatpush.bf16.msra.mxu0 %v16186_v58  ;;  %v16226_v58 = vld [vmem:[%s18762_s11 + $0xb48] sm:$0xff] }
 0x59f   : > { %13125 = vmatpush.bf16.msra.mxu2 %v16202_v59  ;;  %v16242_v59 = vld [vmem:[%s18762_s11 + $0xbc8] sm:$0xff] }
 0x5a0   : > { %13111 = vmatpush.bf16.msra.mxu1 %v16194_v39  ;;  %v16233_v39 = vld [vmem:[%s18762_s11 + $0xb80] sm:$0xff] }
 0x5a1   : > { %13139 = vmatpush.bf16.msra.mxu3 %v16210_v62 }
 0x5a2   : > { %13098 = vmatpush.bf16.msra.mxu0 %v16185_v0  ;;  %v12876_v29 = vpop.f32.mrf.mxu0  ;;  %v16272_v0 = vld [vmem:[%s18762_s11 + $0xcb8] sm:$0xff] }
 0x5a3   : > { %13126 = vmatpush.bf16.msra.mxu2 %v16201_v1  ;;  %v12877_v30 = vadd.f32 %v12876_v29, %v19236_v53  ;;  %v13778_v1 = vld [vmem:[%s18803_s16 + $0xb0] sm:$0xf] }
 0x5a4   : > { %13112 = vmatpush.bf16.msra.mxu1 %v16193_v8  ;;  %v12890_v34 = vpop.f32.mrf.mxu1  ;;  %v15827_v8 = vld [vmem:[%s18803_s16 + $0xbc] sm:$0xf] }
 0x5a5   : > { %13140 = vmatpush.bf16.msra.mxu3 %v16209_v9  ;;  %13099 = vmatmul.bf16.vlgmr.msra.gmra.mxu0 %v13763_v14  ;;  %v12891_v35 = vadd.f32 %v12890_v34, %v12877_v30  ;;  %v13788_v9 = vld [vmem:[%s18803_s16 + $0x1ac] sm:$0xf0]  ;;  %v13783_v14 = vor.u32 %v15826_v6, %v13780_v7  ;;  %v16252_v34 = vld [vmem:[%s18762_s11 + $0xc18] sm:$0xff]  ;;  %v16287_v6 = vld [vmem:[%s18762_s11 + $0xd30] sm:$0xff] }
 0x5a6   : > { %13147 = vmatpush.bf16.msrb.mxu0 %v16224_v3  ;;  %13127 = vmatmul.bf16.vlgmr.msra.gmra.mxu2 %v13771_v15  ;;  %v13786_v3 = vld [vmem:[%s18803_s16 + $0xb8] sm:$0xf]  ;;  %v13791_v15 = vor.u32 %v15827_v8, %v13788_v9 }
 0x5a7   : > { %13175 = vmatpush.bf16.msrb.mxu2 %v16240_v42  ;;  %13113 = vmatmul.bf16.vlgmr.msra.gmra.mxu1 %v13767_v18  ;;  %v15857_v42 = vld [vmem:[%s18803_s16 + $0x1a8] sm:$0xf0]  ;;  %v16263_v18 = vld [vmem:[%s18762_s11 + $0xc70] sm:$0xff] }
 0x5a8   : > { %13161 = vmatpush.bf16.msrb.mxu1 %v16232_v16  ;;  %13141 = vmatmul.bf16.vlgmr.msra.gmra.mxu3 %v13775_v19  ;;  %v13787_v11 = vor.u32 %v15857_v42, %v13786_v3  ;;  %v16255_v16 = vld [vmem:[%s18762_s11 + $0xc30] sm:$0xff]  ;;  %v16296_v3 = vld [vmem:[%s18762_s11 + $0xd78] sm:$0xff] }
 0x5a9   : > { %13189 = vmatpush.bf16.msrb.mxu3 %v16248_v17  ;;  %v12904_v41 = vpop.f32.mrf.mxu2  ;;  %v16271_v17 = vld [vmem:[%s18762_s11 + $0xcb0] sm:$0xff]  ;;  %v16312_v42 = vld [vmem:[%s18762_s11 + $0xdf8] sm:$0xff] }
 0x5aa   : > { %13148 = vmatpush.bf16.msrb.mxu0 %v16223_v20  ;;  %v12905_v43 = vadd.f32 %v12904_v41, %v12891_v35  ;;  %v12878_v46 = vpop.f32.mrf.mxu0  ;;  %v16279_v19 = vld [vmem:[%s18762_s11 + $0xcf0] sm:$0xff]  ;;  %v16254_v20 = vld [vmem:[%s18762_s11 + $0xc28] sm:$0xff]  ;;  %v16268_v35 = vld [vmem:[%s18762_s11 + $0xc98] sm:$0xff] }
 0x5ab   : > { %13176 = vmatpush.bf16.msrb.mxu2 %v16239_v21  ;;  %v12918_v47 = vpop.f32.mrf.mxu3  ;;  %v12879_v48 = vadd.f32 %v12878_v46, %v19248_v2  ;;  %v15856_v2 = vld [vmem:[%s18803_s16 + $0x1a0] sm:$0xf0]  ;;  %v16270_v21 = vld [vmem:[%s18762_s11 + $0xca8] sm:$0xff] }
 0x5ac   : > { %13162 = vmatpush.bf16.msrb.mxu1 %v16231_v22  ;;  %v19282_v49 = vadd.f32 %v12918_v47, %v12905_v43  ;;  %v12892_v52 = vpop.f32.mrf.mxu1  ;;  %v13779_v10 = vor.u32 %v15856_v2, %v13778_v1  ;;  %v16262_v22 = vld [vmem:[%s18762_s11 + $0xc68] sm:$0xff]  ;;  %v16251_v46 = vld [vmem:[%s18762_s11 + $0xc10] sm:$0xff] }
 0x5ad   : > { %13190 = vmatpush.bf16.msrb.mxu3 %v16247_v23  ;;  %v12893_v53 = vadd.f32 %v12892_v52, %v12879_v48  ;;  %v16278_v23 = vld [vmem:[%s18762_s11 + $0xce8] sm:$0xff]  ;;  %v16267_v47 = vld [vmem:[%s18762_s11 + $0xc90] sm:$0xff] }
 0x5ae   : > { %13149 = vmatpush.bf16.msrb.mxu0 %v16222_v25  ;;  %v16259_v48 = vld [vmem:[%s18762_s11 + $0xc50] sm:$0xff]  ;;  %v16258_v52 = vld [vmem:[%s18762_s11 + $0xc48] sm:$0xff] }
 0x5af   : > { %13177 = vmatpush.bf16.msrb.mxu2 %v16238_v26  ;;  %v16303_v7 = vld [vmem:[%s18762_s11 + $0xdb0] sm:$0xff] }
 0x5b0   : > { %13163 = vmatpush.bf16.msrb.mxu1 %v16230_v27  ;;  %v16253_v27 = vld [vmem:[%s18762_s11 + $0xc20] sm:$0xff]  ;;  %v16295_v8 = vld [vmem:[%s18762_s11 + $0xd70] sm:$0xff] }
 0x5b1   : > { %13191 = vmatpush.bf16.msrb.mxu3 %v16246_v28  ;;  %v12906_v24 = vpop.f32.mrf.mxu2  ;;  %v16269_v28 = vld [vmem:[%s18762_s11 + $0xca0] sm:$0xff]  ;;  %v16311_v9 = vld [vmem:[%s18762_s11 + $0xdf0] sm:$0xff] }
 0x5b2   : > { %13150 = vmatpush.bf16.msrb.mxu0 %v16221_v31  ;;  %v12907_v32 = vadd.f32 %v12906_v24, %v12893_v53  ;;  %v16261_v31 = vld [vmem:[%s18762_s11 + $0xc60] sm:$0xff]  ;;  %v16274_v53 = vld [vmem:[%s18762_s11 + $0xcc8] sm:$0xff]  ;;  %v13794_v24 = vld [vmem:[%s18803_s16 + $0xc0] sm:$0xf] }
 0x5b3   : > { %13178 = vmatpush.bf16.msrb.mxu2 %v16237_v33  ;;  %v12920_v60 = vpop.f32.mrf.mxu3  ;;  %v16277_v33 = vld [vmem:[%s18762_s11 + $0xce0] sm:$0xff] }
 0x5b4   : > { %13164 = vmatpush.bf16.msrb.mxu1 %v16229_v37  ;;  %v19294_v62 = vadd.f32 %v12920_v60, %v12907_v32  ;;  %v15858_v32 = vld [vmem:[%s18803_s16 + $0x1b0] sm:$0xf0] }
 0x5b5   : > { %13192 = vmatpush.bf16.msrb.mxu3 %v16245_v36  ;;  %v16257_v60 = vld [vmem:[%s18762_s11 + $0xc40] sm:$0xff]  ;;  %v13795_v1 = vor.u32 %v15858_v32, %v13794_v24  ;;  %v16335_v24 = vld [vmem:[%s18762_s11 + $0xeb0] sm:$0xff] }
 0x5b6   : > { %13151 = vmatpush.bf16.msrb.mxu0 %v16220_v38  ;;  %v16260_v38 = vld [vmem:[%s18762_s11 + $0xc58] sm:$0xff]  ;;  %v16327_v32 = vld [vmem:[%s18762_s11 + $0xe70] sm:$0xff] }
 0x5b7   : > { %13179 = vmatpush.bf16.msrb.mxu2 %v16236_v40  ;;  %v16276_v40 = vld [vmem:[%s18762_s11 + $0xcd8] sm:$0xff] }
 0x5b8   : > { %13165 = vmatpush.bf16.msrb.mxu1 %v16228_v44 }
 0x5b9   : > { %13193 = vmatpush.bf16.msrb.mxu3 %v16244_v45 }
 0x5ba   : > { %13152 = vmatpush.bf16.msrb.mxu0 %v16219_v50  ;;  %v16250_v50 = vld [vmem:[%s18762_s11 + $0xc08] sm:$0xff] }
 0x5bb   : > { %13180 = vmatpush.bf16.msrb.mxu2 %v16235_v51  ;;  %v16266_v51 = vld [vmem:[%s18762_s11 + $0xc88] sm:$0xff] }
 0x5bc   : > { %13166 = vmatpush.bf16.msrb.mxu1 %v16227_v54  ;;  %v16249_v54 = vld [vmem:[%s18762_s11 + $0xc00] sm:$0xff] }
 0x5bd   : > { %13194 = vmatpush.bf16.msrb.mxu3 %v16243_v55  ;;  %v16265_v55 = vld [vmem:[%s18762_s11 + $0xc80] sm:$0xff] }
 0x5be   : > { %13153 = vmatpush.bf16.msrb.mxu0 %v16218_v56  ;;  %v16288_v56 = vld [vmem:[%s18762_s11 + $0xd38] sm:$0xff] }
 0x5bf   : > { %13181 = vmatpush.bf16.msrb.mxu2 %v16234_v57  ;;  %v16304_v57 = vld [vmem:[%s18762_s11 + $0xdb8] sm:$0xff] }
 0x5c0   : > { %13167 = vmatpush.bf16.msrb.mxu1 %v16226_v58  ;;  %v13802_v58 = vld [vmem:[%s18803_s16 + $0xc8] sm:$0xf] }
 0x5c1   : > { %13195 = vmatpush.bf16.msrb.mxu3 %v16242_v59  ;;  %v15859_v59 = vld [vmem:[%s18803_s16 + $0x1b8] sm:$0xf0] }
 0x5c2   : > { %13154 = vmatpush.bf16.msrb.mxu0 %v16217_v61  ;;  %v12932_v25 = vpop.f32.mrf.mxu0  ;;  %v16273_v61 = vld [vmem:[%s18762_s11 + $0xcc0] sm:$0xff]  ;;  %v13803_v2 = vor.u32 %v15859_v59, %v13802_v58  ;;  %v16343_v58 = vld [vmem:[%s18762_s11 + $0xef0] sm:$0xff]  ;;  %v16318_v59 = vld [vmem:[%s18762_s11 + $0xe28] sm:$0xff] }
 0x5c3   : > { %13182 = vmatpush.bf16.msrb.mxu2 %v16233_v39  ;;  %v12933_v26 = vadd.f32 %v12932_v25, %v19282_v49  ;;  %v16275_v49 = vld [vmem:[%s18762_s11 + $0xcd0] sm:$0xff] }
 0x5c4   : > { %13168 = vmatpush.bf16.msrb.mxu1 %v16225_v4  ;;  %v12946_v29 = vpop.f32.mrf.mxu1  ;;  %v15828_v39 = vld [vmem:[%s18803_s16 + $0xc4] sm:$0xf] }
 0x5c5   : > { %13196 = vmatpush.bf16.msrb.mxu3 %v16241_v5  ;;  %13155 = vmatmul.bf16.vlgmr.msrb.gmra.mxu0 %v13779_v10  ;;  %v12947_v30 = vadd.f32 %v12946_v29, %v12933_v26  ;;  %v16286_v10 = vld [vmem:[%s18762_s11 + $0xd28] sm:$0xff]  ;;  %v16283_v25 = vld [vmem:[%s18762_s11 + $0xd10] sm:$0xff] }
 0x5c6   : > { %13203 = vmatpush.bf16.msra.mxu0 %v16256_v63  ;;  %13183 = vmatmul.bf16.vlgmr.msrb.gmra.mxu2 %v13787_v11  ;;  %v15829_v63 = vld [vmem:[%s18803_s16 + $0xcc] sm:$0xf]  ;;  %v16302_v11 = vld [vmem:[%s18762_s11 + $0xda8] sm:$0xff]  ;;  %v16299_v26 = vld [vmem:[%s18762_s11 + $0xd90] sm:$0xff] }
 0x5c7   : > { %13231 = vmatpush.bf16.msra.mxu2 %v16272_v0  ;;  %13169 = vmatmul.bf16.vlgmr.msrb.gmra.mxu1 %v13783_v14  ;;  %v13804_v0 = vld [vmem:[%s18803_s16 + $0x1bc] sm:$0xf0]  ;;  %v16282_v29 = vld [vmem:[%s18762_s11 + $0xd08] sm:$0xff] }
 0x5c8   : > { %13217 = vmatpush.bf16.msra.mxu1 %v16264_v12  ;;  %13197 = vmatmul.bf16.vlgmr.msrb.gmra.mxu3 %v13791_v15  ;;  %v13807_v5 = vor.u32 %v15829_v63, %v13804_v0  ;;  %v16294_v12 = vld [vmem:[%s18762_s11 + $0xd68] sm:$0xff]  ;;  %v16333_v63 = vld [vmem:[%s18762_s11 + $0xea0] sm:$0xff] }
 0x5c9   : > { %13245 = vmatpush.bf16.msra.mxu3 %v16280_v13  ;;  %v12960_v37 = vpop.f32.mrf.mxu2  ;;  %v16310_v13 = vld [vmem:[%s18762_s11 + $0xde8] sm:$0xff]  ;;  %v16325_v0 = vld [vmem:[%s18762_s11 + $0xe60] sm:$0xff] }
 0x5ca   : > { %13204 = vmatpush.bf16.msra.mxu0 %v16255_v16  ;;  %v12961_v36 = vadd.f32 %v12960_v37, %v12947_v30  ;;  %v12934_v41 = vpop.f32.mrf.mxu0  ;;  %v16285_v16 = vld [vmem:[%s18762_s11 + $0xd20] sm:$0xff]  ;;  %v16298_v30 = vld [vmem:[%s18762_s11 + $0xd88] sm:$0xff]  ;;  %v16320_v37 = vld [vmem:[%s18762_s11 + $0xe38] sm:$0xff] }
 0x5cb   : > { %13232 = vmatpush.bf16.msra.mxu2 %v16271_v17  ;;  %v12974_v43 = vpop.f32.mrf.mxu3  ;;  %v19328_v44 = vadd.f32 %v12934_v41, %v19294_v62  ;;  %v13796_v62 = vld [vmem:[%s18803_s16 + $0x1b4] sm:$0xf0]  ;;  %v16301_v17 = vld [vmem:[%s18762_s11 + $0xda0] sm:$0xff] }
 0x5cc   : > { %13218 = vmatpush.bf16.msra.mxu1 %v16263_v18  ;;  %v19330_v45 = vadd.f32 %v12974_v43, %v12961_v36  ;;  %v13799_v4 = vor.u32 %v15828_v39, %v13796_v62  ;;  %v16293_v18 = vld [vmem:[%s18762_s11 + $0xd60] sm:$0xff]  ;;  %v16336_v36 = vld [vmem:[%s18762_s11 + $0xeb8] sm:$0xff]  ;;  %v13818_v41 = vld [vmem:[%s18803_s16 + $0xd8] sm:$0xf] }
 0x5cd   : > { %13246 = vmatpush.bf16.msra.mxu3 %v16279_v19  ;;  %v16309_v19 = vld [vmem:[%s18762_s11 + $0xde0] sm:$0xff]  ;;  %v16342_v39 = vld [vmem:[%s18762_s11 + $0xee8] sm:$0xff] }
 0x5ce   : > { %13205 = vmatpush.bf16.msra.mxu0 %v16254_v20  ;;  %v16284_v20 = vld [vmem:[%s18762_s11 + $0xd18] sm:$0xff]  ;;  %v16317_v62 = vld [vmem:[%s18762_s11 + $0xe20] sm:$0xff] }
 0x5cf   : > { %13233 = vmatpush.bf16.msra.mxu2 %v16270_v21  ;;  %v16300_v21 = vld [vmem:[%s18762_s11 + $0xd98] sm:$0xff] }
 0x5d0   : > { %13219 = vmatpush.bf16.msra.mxu1 %v16262_v22  ;;  %v16292_v22 = vld [vmem:[%s18762_s11 + $0xd58] sm:$0xff] }
 0x5d1   : > { %13247 = vmatpush.bf16.msra.mxu3 %v16278_v23  ;;  %v16308_v23 = vld [vmem:[%s18762_s11 + $0xdd8] sm:$0xff] }
 0x5d2   : > { %13206 = vmatpush.bf16.msra.mxu0 %v16253_v27  ;;  %v16291_v27 = vld [vmem:[%s18762_s11 + $0xd50] sm:$0xff]  ;;  %v15861_v43 = vld [vmem:[%s18803_s16 + $0x1c8] sm:$0xf0] }
 0x5d3   : > { %13234 = vmatpush.bf16.msra.mxu2 %v16269_v28  ;;  %v16307_v28 = vld [vmem:[%s18762_s11 + $0xdd0] sm:$0xff] }
 0x5d4   : > { %13220 = vmatpush.bf16.msra.mxu1 %v16261_v31  ;;  %v16290_v31 = vld [vmem:[%s18762_s11 + $0xd48] sm:$0xff] }
 0x5d5   : > { %13248 = vmatpush.bf16.msra.mxu3 %v16277_v33  ;;  %v16306_v33 = vld [vmem:[%s18762_s11 + $0xdc8] sm:$0xff] }
 0x5d6   : > { %13207 = vmatpush.bf16.msra.mxu0 %v16252_v34  ;;  %v16281_v34 = vld [vmem:[%s18762_s11 + $0xd00] sm:$0xff] }
 0x5d7   : > { %13235 = vmatpush.bf16.msra.mxu2 %v16268_v35  ;;  %v16297_v35 = vld [vmem:[%s18762_s11 + $0xd80] sm:$0xff] }
 0x5d8   : > { %13221 = vmatpush.bf16.msra.mxu1 %v16260_v38  ;;  %v13810_v38 = vld [vmem:[%s18803_s16 + $0xd0] sm:$0xf] }
 0x5d9   : > { %13249 = vmatpush.bf16.msra.mxu3 %v16276_v40  ;;  %v15860_v40 = vld [vmem:[%s18803_s16 + $0x1c0] sm:$0xf0] }
 0x5da   : > { %13208 = vmatpush.bf16.msra.mxu0 %v16251_v46  ;;  %v16305_v46 = vld [vmem:[%s18762_s11 + $0xdc0] sm:$0xff] }
 0x5db   : > { %13236 = vmatpush.bf16.msra.mxu2 %v16267_v47  ;;  %v15830_v47 = vld [vmem:[%s18803_s16 + $0xd4] sm:$0xf] }
 0x5dc   : > { %13222 = vmatpush.bf16.msra.mxu1 %v16259_v48  ;;  %v13812_v48 = vld [vmem:[%s18803_s16 + $0x1c4] sm:$0xf0] }
 0x5dd   : > { %13250 = vmatpush.bf16.msra.mxu3 %v16275_v49  ;;  %v15831_v49 = vld [vmem:[%s18803_s16 + $0xdc] sm:$0xf] }
 0x5de   : > { %13209 = vmatpush.bf16.msra.mxu0 %v16250_v50  ;;  %v13820_v50 = vld [vmem:[%s18803_s16 + $0x1cc] sm:$0xf0] }
 0x5df   : > { %13237 = vmatpush.bf16.msra.mxu2 %v16266_v51  ;;  %v13811_v51 = vor.u32 %v15860_v40, %v13810_v38  ;;  %v16346_v38 = vld [vmem:[%s18762_s11 + $0xf08] sm:$0xff]  ;;  %v16345_v40 = vld [vmem:[%s18762_s11 + $0xf00] sm:$0xff] }
 0x5e0   : > { %13223 = vmatpush.bf16.msra.mxu1 %v16258_v52  ;;  %v13819_v52 = vor.u32 %v15861_v43, %v13818_v41  ;;  %v13842_v41 = vld [vmem:[%s18803_s16 + $0xf0] sm:$0xf]  ;;  %v15864_v43 = vld [vmem:[%s18803_s16 + $0x1e0] sm:$0xf0] }
 0x5e1   : > { %13251 = vmatpush.bf16.msra.mxu3 %v16274_v53  ;;  %v16328_v53 = vld [vmem:[%s18762_s11 + $0xe78] sm:$0xff] }
 0x5e2   : > { %13210 = vmatpush.bf16.msra.mxu0 %v16249_v54  ;;  %v12988_v14 = vpop.f32.mrf.mxu0  ;;  %v16344_v54 = vld [vmem:[%s18762_s11 + $0xef8] sm:$0xff] }
 0x5e3   : > { %13238 = vmatpush.bf16.msra.mxu2 %v16265_v55  ;;  %v19365_v15 = vadd.f32 %v12988_v14, %v19330_v45  ;;  %v16289_v45 = vld [vmem:[%s18762_s11 + $0xd40] sm:$0xff]  ;;  %v13815_v55 = vor.u32 %v15830_v47, %v13812_v48  ;;  %v12962_v47 = vpop.f32.mrf.mxu2  ;;  %v12976_v48 = vpop.f32.mrf.mxu3 }
 0x5e4   : > { %13224 = vmatpush.bf16.msra.mxu1 %v16257_v60  ;;  %v16334_v60 = vld [vmem:[%s18762_s11 + $0xea8] sm:$0xff]  ;;  %v16329_v14 = vld [vmem:[%s18762_s11 + $0xe80] sm:$0xff] }
 0x5e5   : > { %13252 = vmatpush.bf16.msra.mxu3 %v16273_v61  ;;  %13211 = vmatmul.bf16.vlgmr.msra.gmra.mxu0 %v13795_v1  ;;  %v16326_v61 = vld [vmem:[%s18762_s11 + $0xe68] sm:$0xff]  ;;  %v16341_v1 = vld [vmem:[%s18762_s11 + $0xee0] sm:$0xff] }
 0x5e6   : > { %13259 = vmatpush.bf16.msrb.mxu0 %v16288_v56  ;;  %13239 = vmatmul.bf16.vlgmr.msra.gmra.mxu2 %v13803_v2  ;;  %v13823_v56 = vor.u32 %v15831_v49, %v13820_v50  ;;  %v16316_v2 = vld [vmem:[%s18762_s11 + $0xe18] sm:$0xff] }
 0x5e7   : > { %13287 = vmatpush.bf16.msrb.mxu2 %v16304_v57  ;;  %13225 = vmatmul.bf16.vlgmr.msra.gmra.mxu1 %v13799_v4  ;;  %v16319_v57 = vld [vmem:[%s18762_s11 + $0xe30] sm:$0xff]  ;;  %v16340_v4 = vld [vmem:[%s18762_s11 + $0xed8] sm:$0xff] }
 0x5e8   : > { %13273 = vmatpush.bf16.msrb.mxu1 %v16296_v3  ;;  %13253 = vmatmul.bf16.vlgmr.msra.gmra.mxu3 %v13807_v5  ;;  %v16332_v3 = vld [vmem:[%s18762_s11 + $0xe98] sm:$0xff]  ;;  %v16315_v5 = vld [vmem:[%s18762_s11 + $0xe10] sm:$0xff] }
 0x5e9   : > { %13301 = vmatpush.bf16.msrb.mxu3 %v16312_v42  ;;  %v16324_v42 = vld [vmem:[%s18762_s11 + $0xe58] sm:$0xff] }
 0x5ea   : > { %13260 = vmatpush.bf16.msrb.mxu0 %v16287_v6  ;;  %v16331_v6 = vld [vmem:[%s18762_s11 + $0xe90] sm:$0xff] }
 0x5eb   : > { %13288 = vmatpush.bf16.msrb.mxu2 %v16303_v7  ;;  %v16323_v7 = vld [vmem:[%s18762_s11 + $0xe50] sm:$0xff]  ;;  %v13016_v50 = vpop.f32.mrf.mxu2 }
 0x5ec   : > { %13274 = vmatpush.bf16.msrb.mxu1 %v16295_v8  ;;  %v16339_v8 = vld [vmem:[%s18762_s11 + $0xed0] sm:$0xff] }
 0x5ed   : > { %13302 = vmatpush.bf16.msrb.mxu3 %v16311_v9  ;;  %v16314_v9 = vld [vmem:[%s18762_s11 + $0xe08] sm:$0xff] }
 0x5ee   : > { %13261 = vmatpush.bf16.msrb.mxu0 %v16286_v10  ;;  %v16330_v10 = vld [vmem:[%s18762_s11 + $0xe88] sm:$0xff] }
 0x5ef   : > { %13289 = vmatpush.bf16.msrb.mxu2 %v16302_v11  ;;  %v16322_v11 = vld [vmem:[%s18762_s11 + $0xe48] sm:$0xff] }
 0x5f0   : > { %13275 = vmatpush.bf16.msrb.mxu1 %v16294_v12  ;;  %v16338_v12 = vld [vmem:[%s18762_s11 + $0xec8] sm:$0xff] }
 0x5f1   : > { %13303 = vmatpush.bf16.msrb.mxu3 %v16310_v13  ;;  %v16313_v13 = vld [vmem:[%s18762_s11 + $0xe00] sm:$0xff] }
 0x5f2   : > { %13262 = vmatpush.bf16.msrb.mxu0 %v16285_v16  ;;  %v16352_v16 = vld [vmem:[%s18762_s11 + $0xf38] sm:$0xff] }
 0x5f3   : > { %13290 = vmatpush.bf16.msrb.mxu2 %v16301_v17  ;;  %v13826_v17 = vld [vmem:[%s18803_s16 + $0xe0] sm:$0xf] }
 0x5f4   : > { %13276 = vmatpush.bf16.msrb.mxu1 %v16293_v18  ;;  %v15862_v18 = vld [vmem:[%s18803_s16 + $0x1d0] sm:$0xf0] }
 0x5f5   : > { %13304 = vmatpush.bf16.msrb.mxu3 %v16309_v19  ;;  %v13834_v19 = vld [vmem:[%s18803_s16 + $0xe8] sm:$0xf] }
 0x5f6   : > { %13263 = vmatpush.bf16.msrb.mxu0 %v16284_v20  ;;  %v15863_v20 = vld [vmem:[%s18803_s16 + $0x1d8] sm:$0xf0] }
 0x5f7   : > { %13291 = vmatpush.bf16.msrb.mxu2 %v16300_v21  ;;  %v16321_v21 = vld [vmem:[%s18762_s11 + $0xe40] sm:$0xff] }
 0x5f8   : > { %13277 = vmatpush.bf16.msrb.mxu1 %v16292_v22  ;;  %v16337_v22 = vld [vmem:[%s18762_s11 + $0xec0] sm:$0xff] }
 0x5f9   : > { %13305 = vmatpush.bf16.msrb.mxu3 %v16308_v23  ;;  %v15832_v23 = vld [vmem:[%s18803_s16 + $0xe4] sm:$0xf] }
 0x5fa   : > { %13264 = vmatpush.bf16.msrb.mxu0 %v16283_v25  ;;  %v13828_v25 = vld [vmem:[%s18803_s16 + $0x1d4] sm:$0xf0] }
 0x5fb   : > { %13292 = vmatpush.bf16.msrb.mxu2 %v16299_v26  ;;  %v15833_v26 = vld [vmem:[%s18803_s16 + $0xec] sm:$0xf] }
 0x5fc   : > { %13278 = vmatpush.bf16.msrb.mxu1 %v16291_v27  ;;  %v13836_v27 = vld [vmem:[%s18803_s16 + $0x1dc] sm:$0xf0] }
 0x5fd   : > { %13306 = vmatpush.bf16.msrb.mxu3 %v16307_v28  ;;  %v13827_v28 = vor.u32 %v15862_v18, %v13826_v17 }
 0x5fe   : > { %13265 = vmatpush.bf16.msrb.mxu0 %v16282_v29  ;;  %v13835_v29 = vor.u32 %v15863_v20, %v13834_v19 }
 0x5ff   : > { %13293 = vmatpush.bf16.msrb.mxu2 %v16298_v30  ;;  %v13831_v30 = vor.u32 %v15832_v23, %v13828_v25 }
 0x600   : > { %13279 = vmatpush.bf16.msrb.mxu1 %v16290_v31  ;;  %v13839_v31 = vor.u32 %v15833_v26, %v13836_v27 }
 0x601   : > { %13307 = vmatpush.bf16.msrb.mxu3 %v16306_v33  ;;  %v16351_v33 = vld [vmem:[%s18762_s11 + $0xf30] sm:$0xff] }
 0x602   : > { %13266 = vmatpush.bf16.msrb.mxu0 %v16281_v34  ;;  %v16350_v34 = vld [vmem:[%s18762_s11 + $0xf28] sm:$0xff] }
 0x603   : > { %13294 = vmatpush.bf16.msrb.mxu2 %v16297_v35  ;;  %v16349_v35 = vld [vmem:[%s18762_s11 + $0xf20] sm:$0xff] }
 0x604   : > { %13280 = vmatpush.bf16.msrb.mxu1 %v16289_v45  ;;  %v13843_v45 = vor.u32 %v15864_v43, %v13842_v41 }
 0x605   : > { %13308 = vmatpush.bf16.msrb.mxu3 %v16305_v46  ;;  %13267 = vmatmul.bf16.vlgmr.msrb.gmra.mxu0 %v13811_v51  ;;  %v12948_v46 = vpop.f32.mrf.mxu1  ;;  %v12990_v51 = vpop.f32.mrf.mxu0 }
 0x606   : > { %13315 = vmatpush.bf16.msra.mxu0 %v16320_v37  ;;  %13295 = vmatmul.bf16.vlgmr.msrb.gmra.mxu2 %v13819_v52  ;;  %v16348_v37 = vld [vmem:[%s18762_s11 + $0xf18] sm:$0xff]  ;;  %v13030_v52 = vpop.f32.mrf.mxu3 }
 0x607   : > { %13343 = vmatpush.bf16.msra.mxu2 %v16336_v36  ;;  %13281 = vmatmul.bf16.vlgmr.msrb.gmra.mxu1 %v13815_v55  ;;  %v16347_v36 = vld [vmem:[%s18762_s11 + $0xf10] sm:$0xff] }
 0x608   : > { %13329 = vmatpush.bf16.msra.mxu1 %v16328_v53  ;;  %13309 = vmatmul.bf16.vlgmr.msrb.gmra.mxu3 %v13823_v56 }
 0x609   : > { %13357 = vmatpush.bf16.msra.mxu3 %v16344_v54  ;;  %v13018_v54 = vpop.f32.mrf.mxu2 }
 0x60a   : > { %13316 = vmatpush.bf16.msra.mxu0 %v16319_v57 }
 0x60b   : > { %13344 = vmatpush.bf16.msra.mxu2 %v16335_v24 }
 0x60c   : > { %13330 = vmatpush.bf16.msra.mxu1 %v16327_v32 }
 0x60d   : > { %13358 = vmatpush.bf16.msra.mxu3 %v16343_v58  ;;  %v13002_v49 = vpop.f32.mrf.mxu1  ;;  %v13044_v55 = vpop.f32.mrf.mxu0 }
 0x60e   : > { %13317 = vmatpush.bf16.msra.mxu0 %v16318_v59  ;;  %v13032_v56 = vpop.f32.mrf.mxu3 }
 0x60f   : > { %13345 = vmatpush.bf16.msra.mxu2 %v16334_v60 }
 0x610   : > { %13331 = vmatpush.bf16.msra.mxu1 %v16326_v61 }
 0x611   : > { %13359 = vmatpush.bf16.msra.mxu3 %v16342_v39  ;;  %v13072_v24 = vpop.f32.mrf.mxu2 }
 0x612   : > { %13318 = vmatpush.bf16.msra.mxu0 %v16317_v62 }
 0x613   : > { %13346 = vmatpush.bf16.msra.mxu2 %v16333_v63  ;;  %v12949_v63 = vadd.f32 %v12948_v46, %v19328_v44 }
 0x614   : > { %13332 = vmatpush.bf16.msra.mxu1 %v16325_v0 }
 0x615   : > { %13360 = vmatpush.bf16.msra.mxu3 %v16341_v1  ;;  %v13004_v53 = vpop.f32.mrf.mxu1  ;;  %v13046_v32 = vpop.f32.mrf.mxu0  ;;  %v12963_v1 = vadd.f32 %v12962_v47, %v12949_v63 }
 0x616   : > { %13319 = vmatpush.bf16.msra.mxu0 %v16316_v2  ;;  %v13086_v58 = vpop.f32.mrf.mxu3 }
 0x617   : > { %13347 = vmatpush.bf16.msra.mxu2 %v16332_v3  ;;  %v13003_v3 = vadd.f32 %v13002_v49, %v19365_v15 }
 0x618   : > { %13333 = vmatpush.bf16.msra.mxu1 %v16324_v42 }
 0x619   : > { %13361 = vmatpush.bf16.msra.mxu3 %v16340_v4  ;;  %v13074_v60 = vpop.f32.mrf.mxu2  ;;  %v12977_v4 = vadd.f32 %v12976_v48, %v12963_v1 }
 0x61a   : > { %13320 = vmatpush.bf16.msra.mxu0 %v16315_v5  ;;  %v13017_v5 = vadd.f32 %v13016_v50, %v13003_v3 }
 0x61b   : > { %13348 = vmatpush.bf16.msra.mxu2 %v16331_v6  ;;  %v12991_v6 = vadd.f32 %v12990_v51, %v12977_v4 }
 0x61c   : > { %13334 = vmatpush.bf16.msra.mxu1 %v16323_v7 }
 0x61d   : > { %13362 = vmatpush.bf16.msra.mxu3 %v16339_v8  ;;  %v13058_v57 = vpop.f32.mrf.mxu1  ;;  %v13031_v8 = vadd.f32 %v13030_v52, %v13017_v5 }
 0x61e   : > { %13321 = vmatpush.bf16.msra.mxu0 %v16314_v9  ;;  %v13088_v39 = vpop.f32.mrf.mxu3 }
 0x61f   : > { %13349 = vmatpush.bf16.msra.mxu2 %v16330_v10 }
 0x620   : > { %13335 = vmatpush.bf16.msra.mxu1 %v16322_v11  ;;  %v13005_v11 = vadd.f32 %v13004_v53, %v12991_v6 }
 0x621   : > { %13363 = vmatpush.bf16.msra.mxu3 %v16338_v12  ;;  %v13045_v12 = vadd.f32 %v13044_v55, %v13031_v8 }
 0x622   : > { %13322 = vmatpush.bf16.msra.mxu0 %v16313_v13  ;;  %v13100_v61 = vpop.f32.mrf.mxu0  ;;  %v13019_v13 = vadd.f32 %v13018_v54, %v13005_v11 }
 0x623   : > { %13350 = vmatpush.bf16.msra.mxu2 %v16329_v14 }
 0x624   : > { %13336 = vmatpush.bf16.msra.mxu1 %v16321_v21  ;;  %v13033_v44 = vadd.f32 %v13032_v56, %v13019_v13 }
 0x625   : > { %13364 = vmatpush.bf16.msra.mxu3 %v16337_v22  ;;  %13323 = vmatmul.bf16.vlgmr.msra.gmra.mxu0 %v13827_v28  ;;  %v13060_v59 = vpop.f32.mrf.mxu1 }
 0x626   : > { %13371 = vmatpush.bf16.msrb.mxu0 %v16352_v16  ;;  %13351 = vmatmul.bf16.vlgmr.msra.gmra.mxu2 %v13835_v29  ;;  %v13059_v16 = vadd.f32 %v13058_v57, %v13045_v12  ;;  %v13047_v20 = vadd.f32 %v13046_v32, %v13033_v44 }
 0x627   : > { %13337 = vmatmul.bf16.vlgmr.msra.gmra.mxu1 %v13831_v30 }
 0x628   : > { %13365 = vmatmul.bf16.vlgmr.msra.gmra.mxu3 %v13839_v31  ;;  %v13073_v18 = vadd.f32 %v13072_v24, %v13059_v16  ;;  %v13061_v23 = vadd.f32 %v13060_v59, %v13047_v20 }
 0x629   : > { %v13128_v0 = vpop.f32.mrf.mxu2 }
 0x62a   : > { %13372 = vmatpush.bf16.msrb.mxu0 %v16351_v33  ;;  %v13102_v2 = vpop.f32.mrf.mxu0  ;;  %v13087_v15 = vadd.f32 %v13086_v58, %v13073_v18  ;;  %v13075_v26 = vadd.f32 %v13074_v60, %v13061_v23 }
 0x62b   : > { %v13142_v42 = vpop.f32.mrf.mxu3 }
 0x62c   : > { %v13101_v25 = vadd.f32 %v13100_v61, %v13087_v15  ;;  %v13089_v31 = vadd.f32 %v13088_v39, %v13075_v26 }
 0x62d   : > { %v13114_v62 = vpop.f32.mrf.mxu1 }
 0x62e   : > { %13373 = vmatpush.bf16.msrb.mxu0 %v16350_v34  ;;  %v13115_v28 = vadd.f32 %v13114_v62, %v13101_v25  ;;  %v13103_v34 = vadd.f32 %v13102_v2, %v13089_v31 }
 0x630   : > { %v13129_v33 = vadd.f32 %v13128_v0, %v13115_v28 }
 0x631   : > { %v13130_v9 = vpop.f32.mrf.mxu2 }
 0x632   : > { %13374 = vmatpush.bf16.msrb.mxu0 %v16349_v35 }
 0x633   : > { %v13144_v14 = vpop.f32.mrf.mxu3 }
 0x635   : > { %v13116_v7 = vpop.f32.mrf.mxu1 }
 0x636   : > { %13375 = vmatpush.bf16.msrb.mxu0 %v16348_v37  ;;  %v13143_v37 = vadd.f32 %v13142_v42, %v13129_v33 }
 0x63a   : > { %13376 = vmatpush.bf16.msrb.mxu0 %v16347_v36 }
 0x63e   : > { %13377 = vmatpush.bf16.msrb.mxu0 %v16346_v38  ;;  %v13117_v38 = vadd.f32 %v13116_v7, %v13103_v34 }
 0x640   : > { %v13131_v43 = vadd.f32 %v13130_v9, %v13117_v38 }
 0x642   : > { %13378 = vmatpush.bf16.msrb.mxu0 %v16345_v40  ;;  %v13156_v10 = vpop.f32.mrf.mxu0  ;;  %v13145_v48 = vadd.f32 %v13144_v14, %v13131_v43 }
 0x643   : > { %v13157_v40 = vadd.f32 %v13156_v10, %v13143_v37 }
 0x644   : > { %v13170_v17 = vpop.f32.mrf.mxu1 }
 0x645   : > { %13379 = vmatmul.bf16.vlgmr.msrb.gmra.mxu0 %v13843_v45  ;;  %v13171_v46 = vadd.f32 %v13170_v17, %v13157_v40 }
 0x649   : > { %v13184_v19 = vpop.f32.mrf.mxu2 }
 0x64a   : > { %v13158_v21 = vpop.f32.mrf.mxu0  ;;  %v13185_v49 = vadd.f32 %v13184_v19, %v13171_v46 }
 0x64b   : > { %v13198_v22 = vpop.f32.mrf.mxu3  ;;  %v13159_v50 = vadd.f32 %v13158_v21, %v13145_v48 }
 0x64c   : > { %v13172_v27 = vpop.f32.mrf.mxu1  ;;  %v13199_v52 = vadd.f32 %v13198_v22, %v13185_v49 }
 0x64d   : > { %v13173_v55 = vadd.f32 %v13172_v27, %v13159_v50 }
 0x651   : > { %v13186_v29 = vpop.f32.mrf.mxu2 }
 0x652   : > { %v13187_v57 = vadd.f32 %v13186_v29, %v13173_v55 }
 0x653   : > { %v13200_v35 = vpop.f32.mrf.mxu3 }
 0x654   : > { %v13201_v59 = vadd.f32 %v13200_v35, %v13187_v57 }
 0x662   : > { %v13212_v30 = vpop.f32.mrf.mxu0 }
 0x663   : > { %v13213_v56 = vadd.f32 %v13212_v30, %v13199_v52 }
 0x664   : > { %v13226_v36 = vpop.f32.mrf.mxu1 }
 0x665   : > { %v13227_v32 = vadd.f32 %v13226_v36, %v13213_v56 }
 0x669   : > { %v13240_v41 = vpop.f32.mrf.mxu2 }
 0x66a   : > { %v13214_v45 = vpop.f32.mrf.mxu0  ;;  %v13241_v60 = vadd.f32 %v13240_v41, %v13227_v32 }
 0x66b   : > { %v13254_v47 = vpop.f32.mrf.mxu3  ;;  %v13215_v39 = vadd.f32 %v13214_v45, %v13201_v59 }
 0x66c   : > { %v13228_v51 = vpop.f32.mrf.mxu1  ;;  %v13255_v63 = vadd.f32 %v13254_v47, %v13241_v60 }
 0x66d   : > { %v13229_v1 = vadd.f32 %v13228_v51, %v13215_v39 }
 0x671   : > { %v13242_v53 = vpop.f32.mrf.mxu2 }
 0x672   : > { %v13243_v3 = vadd.f32 %v13242_v53, %v13229_v1 }
 0x673   : > { %v13256_v24 = vpop.f32.mrf.mxu3 }
 0x674   : > { %v13257_v7 = vadd.f32 %v13256_v24, %v13243_v3 }
 0x682   : > { %v13268_v54 = vpop.f32.mrf.mxu0 }
 0x683   : > { %v13269_v2 = vadd.f32 %v13268_v54, %v13255_v63 }
 0x684   : > { %v13282_v58 = vpop.f32.mrf.mxu1 }
 0x685   : > { %v13283_v4 = vadd.f32 %v13282_v58, %v13269_v2 }
 0x689   : > { %v13296_v61 = vpop.f32.mrf.mxu2 }
 0x68a   : > { %v13270_v62 = vpop.f32.mrf.mxu0  ;;  %v13297_v8 = vadd.f32 %v13296_v61, %v13283_v4 }
 0x68b   : > { %v13310_v0 = vpop.f32.mrf.mxu3  ;;  %v13271_v9 = vadd.f32 %v13270_v62, %v13257_v7 }
 0x68c   : > { %v13284_v42 = vpop.f32.mrf.mxu1  ;;  %v13311_v11 = vadd.f32 %v13310_v0, %v13297_v8 }
 0x68d   : > { %v13285_v13 = vadd.f32 %v13284_v42, %v13271_v9 }
 0x691   : > { %v13298_v5 = vpop.f32.mrf.mxu2 }
 0x692   : > { %v13299_v17 = vadd.f32 %v13298_v5, %v13285_v13 }
 0x693   : > { %v13312_v10 = vpop.f32.mrf.mxu3 }
 0x694   : > { %v13313_v20 = vadd.f32 %v13312_v10, %v13299_v17 }
 0x6a2   : > { %v13324_v6 = vpop.f32.mrf.mxu0 }
 0x6a3   : > { %v13325_v14 = vadd.f32 %v13324_v6, %v13311_v11 }
 0x6a4   : > { %v13338_v12 = vpop.f32.mrf.mxu1 }
 0x6a5   : > { %v13339_v18 = vadd.f32 %v13338_v12, %v13325_v14 }
 0x6a9   : > { %v13352_v16 = vpop.f32.mrf.mxu2 }
 0x6aa   : > { %v13326_v44 = vpop.f32.mrf.mxu0  ;;  %v13353_v21 = vadd.f32 %v13352_v16, %v13339_v18 }
 0x6ab   : > { %v13366_v19 = vpop.f32.mrf.mxu3  ;;  %v13327_v15 = vadd.f32 %v13326_v44, %v13313_v20 }
 0x6ac   : > { %v13340_v22 = vpop.f32.mrf.mxu1  ;;  %v13367_v23 = vadd.f32 %v13366_v19, %v13353_v21 }
 0x6ad   : > { %v13341_v27 = vadd.f32 %v13340_v22, %v13327_v15 }
 0x6b1   : > { %v13354_v25 = vpop.f32.mrf.mxu2 }
 0x6b2   : > { %v13355_v29 = vadd.f32 %v13354_v25, %v13341_v27 }
 0x6b3   : > { %v13368_v30 = vpop.f32.mrf.mxu3 }
 0x6b4   : > { %v13369_v31 = vadd.f32 %v13368_v30, %v13355_v29 }
 0x6c2   : > { %v13380_v26 = vpop.f32.mrf.mxu0 }
 0x6c3   : > { %v13381_v28 = vadd.f32 %v13380_v26, %v13367_v23 }
 0x6c7   : > { %13388 = sbr.rel (%p15796_p4) target bundleno = 1745 (0x6d1), region = 114 }
 0x6ca   : > { %v13382_v33 = vpop.f32.mrf.mxu0 }
 0x6cb   : > { %v13383_v34 = vadd.f32 %v13382_v33, %v13369_v31 }
 0x6cc   : > { %v16445_v35 = vld [vmem:[%s8257_s26] ss:$0 sm:$0xff] }
 0x6cd   : > { %v13393_v37 = vadd.f32 %v16445_v35, %v13381_v28  ;;  %v13394_v36 = vadd.f32 %v16445_v35, %v13383_v34 }
 0x6cf   : > { %13395 = vst [vmem:[%s19448_s4] sm:$0xff] %v13393_v37 }
 0x6d0   : > { %13396 = vst [vmem:[%s19448_s4 + $0x8] sm:$0xff] %v13394_v36 }
 0x6d1 PF: > { %p13397_p5 = scmp.gt.s32.totalorder %s16516_s18, 0  ;;  %p13398_p6 = scmp.lt.s32.totalorder %s16516_s18, 2 }
 0x6d3   : > { %p13399_p7 = pnand %p13398_p6, %p13397_p5 }
 0x6d5   : > { %13402 = sbr.rel (%p13399_p7) target bundleno = 1759 (0x6df), region = 118 }
 0x6da   : > { %v13403_v38 = vld [vmem:[%s19448_s4] sm:$0xff]  ;;  %v13404_v40 = vld [vmem:[%s19448_s4 + $0x8] sm:$0xff] }
 0x6db   : > { %v13405_v41 = vadd.f32 %v13403_v38, %v13381_v28  ;;  %v13406_v43 = vadd.f32 %v13404_v40, %v13383_v34 }
 0x6dd   : > { %13407 = vst [vmem:[%s19448_s4] sm:$0xff] %v13405_v41 }
 0x6de   : > { %13408 = vst [vmem:[%s19448_s4 + $0x8] sm:$0xff] %v13406_v43 }
 0x6df PF: > { %p15797_p8 = scmp.ne.s32.totalorder %s16516_s18, 2 }
 0x6e1   : > { %13412 = sbr.rel (%p15797_p8) target bundleno = 1773 (0x6ed), region = 122 }
 0x6e6   : > { %v13413_v45 = vld [vmem:[%s19448_s4] sm:$0xff]  ;;  %v13414_v46 = vld [vmem:[%s19448_s4 + $0x8] sm:$0xff] }
 0x6e7   : > { %v13415_v47 = vadd.f32 %v13413_v45, %v13381_v28  ;;  %v13416_v48 = vadd.f32 %v13414_v46, %v13383_v34 }
 0x6e9   : > { %v13417_v49 = vmax.f32 %v13415_v47, 0.0  ;;  %v13418_v50 = vmax.f32 %v13416_v48, 0.0 }
 0x6eb   : > { %13419 = vst [vmem:[%s19448_s4] sm:$0xff] %v13417_v49 }
 0x6ec   : > { %13420 = vst [vmem:[%s19448_s4 + $0x8] sm:$0xff] %v13418_v50 }
 0x6ed PF: > { %13427 = sbr.rel (!%p16648_p12) target bundleno = 1781 (0x6f5), region = 126  ;;  %s15799_s18 = sshll.u32 (%p16648_p12), %s16520_s19, 3 }
 0x6ee   : > { %s13432_s7 = scalar_lea.vmem (%p16648_p12), %s19513_s3, %s15799_s18 }
 0x6f2   : > { %v13463_v51 = vld [vmem:[%s19448_s4] sm:$0xff] }
 0x6f3   : > { %v13465_v52 = vld [vmem:[%s19448_s4 + $0x8] sm:$0xff]  ;;  %13464 = vst [vmem:[%s13432_s7] sm:$0xff] %v13463_v51 }
 0x6f4   : > { %13466 = vst [vmem:[%s13432_s7 + $0x10] sm:$0xff] %v13465_v52 }
 0x6f5 PF: > { %s13_s22 = sadd.s32 1, %s16532_s22   ;;  %s19519_s12 = smov %s16496_s13 }
 0x6f6   : > { %p10_p9 = scmp.ge.s32.totalorder %s13_s22, 8   ;;  %s19520_s13 = smov %s16646_s9 }
 0x6f7   : > { %s19521_s14 = smov %s16504_s15  ;;  %s19522_s15 = smov %s16643_s8 }
 0x6f8   : > { %s19523_s16 = smov %s16512_s17  ;;  %s19524_s17 = smov %s16629_s30 }
 0x6f9   : > { %s19525_s18 = smov %s16524_s20  ;;  %s19526_s19 = smov %s16528_s21 }
 0x6fa   : > { %s19527_s20 = smov %s19530_s24  ;;  %s19528_s21 = smov %s19534_s25 }
 0x6fb   :  { %12 = sbr.rel (!%p10_p9) target bundleno = 8 (0x8), region = 216 }

</bundles_post_ra>
